<compile_context>
chip_gen: v6e
topology: v6e:2x2x1
jax: 0.10.0
libtpu: 0.0.40
codegen_flags: <defaults>
</compile_context>

<pallas_src>
import functools

import jax
import jax.numpy as jnp
from jax import lax
from jax.experimental import pallas as pl
from jax.experimental.pallas import tpu as pltpu


@functools.lru_cache(maxsize=None)
def _vmem_limit_bytes():
    """~3/4 of physical VMEM: ~96 MiB on v5e/v6e (128 MiB parts), ~48 MiB on v7x (64 MiB)."""
    cap = 64 * 1024 * 1024
    try:
        cap = int(pltpu.get_tpu_info().vmem_capacity_bytes)
    except Exception:
        pass
    return max(32 * 1024 * 1024, (3 * cap) // 4)


# ------------------------------ parameters (raw + one-time prep) ------------------------------

def init_params(key):
    """Raw parameters in the PyTorch module's layout."""
    ks = jax.random.split(key, 18)

    def dense(k, fin, fout):
        return jax.random.normal(k, (fin, fout), jnp.float32) / jnp.sqrt(jnp.float32(fin))

    p = {}
    p["gcn1_w"] = dense(ks[0], 78, 78);     p["gcn1_b"] = jnp.zeros((78,), jnp.float32)
    p["gcn2_w"] = dense(ks[1], 78, 156);    p["gcn2_b"] = jnp.zeros((156,), jnp.float32)
    p["gcn3_w"] = dense(ks[2], 156, 312);   p["gcn3_b"] = jnp.zeros((312,), jnp.float32)
    p["fc_g1_w"] = dense(ks[3], 312, 1024); p["fc_g1_b"] = jax.random.normal(ks[4], (1024,)) * 0.01
    p["fc_g2_w"] = dense(ks[5], 1024, 128); p["fc_g2_b"] = jax.random.normal(ks[6], (128,)) * 0.01
    p["emb"] = jax.random.normal(ks[7], (26, 128), jnp.float32) * 0.1      # Embedding(25+1, 128)
    p["conv_xt_w"] = jax.random.normal(ks[8], (32, 1000, 8), jnp.float32) / jnp.sqrt(8000.0)
    p["conv_xt_b"] = jax.random.normal(ks[9], (32,)) * 0.01
    p["fc1_xt_w"] = dense(ks[10], 32 * 121, 128)
    p["fc1_xt_b"] = jax.random.normal(ks[11], (128,)) * 0.01
    p["fc1_w"] = dense(ks[12], 256, 1024);  p["fc1_b"] = jax.random.normal(ks[13], (1024,)) * 0.01
    p["fc2_w"] = dense(ks[14], 1024, 512);  p["fc2_b"] = jax.random.normal(ks[15], (512,)) * 0.01
    p["out_w"] = dense(ks[16], 512, 1);     p["out_b"] = jax.random.normal(ks[17], (1,)) * 0.01
    return p


def prepare_params(p):
    """One-time re-layout, hoisted out of the jitted forward:
      * GCN feature dims padded to lane multiples (78->128, 156->256, 312->384),
      * 8 conv taps fused into one (256, 1000) weight,
      * fc1_xt rows re-laid onto the zero-padded (oc, 128) conv layout,
      * fc1 split for the concat-free head, biases reshaped to (1, n),
      * every MXU operand cast to bf16 (biases / elementwise stay f32)."""
    f32, bf16 = jnp.float32, jnp.bfloat16

    def pad2(a, rows, cols):
        return jnp.pad(a, ((0, rows - a.shape[0]), (0, cols - a.shape[1])))

    def row(v):
        return v.reshape(1, -1).astype(f32)

    def pad_row(v, n):
        return row(jnp.pad(v, (0, n - v.shape[0])))

    d0, d1, d2, d3 = 128, 128, 256, 384
    pp = {}
    pp["gcn1_w"] = pad2(p["gcn1_w"], d0, d1).astype(bf16)
    pp["gcn1_b"] = pad_row(p["gcn1_b"], d1)
    pp["gcn2_w"] = pad2(p["gcn2_w"], d1, d2).astype(bf16)
    pp["gcn2_b"] = pad_row(p["gcn2_b"], d2)
    pp["gcn3_w"] = pad2(p["gcn3_w"], d2, d3).astype(bf16)
    pp["gcn3_b"] = pad_row(p["gcn3_b"], d3)
    pp["fc_g1_w"] = jnp.pad(p["fc_g1_w"],
                            ((0, d3 - p["fc_g1_w"].shape[0]), (0, 0))).astype(bf16)
    pp["fc_g1_b"] = row(p["fc_g1_b"])
    pp["fc_g2_w"] = p["fc_g2_w"].astype(bf16)
    pp["fc_g2_b"] = row(p["fc_g2_b"])

    # protein branch: embedding table + fused conv weight  wcat[k*32+oc, p] = conv_w[oc, p, k]
    n_filt, seq, ksize = p["conv_xt_w"].shape            # 32, 1000, 8
    emb_dim = p["emb"].shape[1]                          # 128
    lout = emb_dim - ksize + 1                           # 121
    pp["emb"] = p["emb"].astype(bf16)                    # (26, 128)
    pp["conv_wcat"] = (jnp.transpose(p["conv_xt_w"], (2, 0, 1))
                       .reshape(ksize * n_filt, seq).astype(bf16))        # (256, 1000)
    pp["conv_b"] = p["conv_xt_b"].reshape(n_filt, 1).astype(f32)          # (32, 1)

    # fc1_xt rows re-laid from (oc*121 + t) to the padded (oc*128 + t) conv layout
    wxt = p["fc1_xt_w"].reshape(n_filt, lout, -1)
    wxt = jnp.pad(wxt, ((0, 0), (0, emb_dim - lout), (0, 0)))
    pp["fc1_xt_w"] = wxt.reshape(n_filt * emb_dim, -1).astype(bf16)       # (4096, 128)
    pp["fc1_xt_b"] = row(p["fc1_xt_b"])

    out_dim = p["fc_g2_w"].shape[1]                      # 128
    pp["fc1_wa"] = p["fc1_w"][:out_dim].astype(bf16)     # multiplies xg
    pp["fc1_wb"] = p["fc1_w"][out_dim:].astype(bf16)     # multiplies xt
    pp["fc1_b"] = row(p["fc1_b"])
    pp["fc2_w"] = p["fc2_w"].astype(bf16)
    pp["fc2_b"] = row(p["fc2_b"])
    pp["out_w"] = p["out_w"].astype(bf16)
    pp["out_b"] = row(p["out_b"])
    return pp


# ------------------- Kernel B: protein embedding + Conv1d(in=1000, out=32, k=8) ----------------

def _protein_conv_kernel(ids_ref, table_ref, wcat_ref, bconv_ref, o_ref, emb_ref, h_ref):
    seq, emb_dim = emb_ref.shape                         # 1000, 128
    n_vocab = table_ref.shape[0]                         # 26
    n_filt = bconv_ref.shape[0]                          # 32
    ksize = h_ref.shape[0] // n_filt                     # 8
    lout = emb_dim - ksize + 1                           # 121

    # Embedding lookup in VMEM (no HBM one-hot).  ids are a (seq, 1) sublane column, so the
    # one-hot is (seq, vocab) and both matmuls below are canonical (no RHS-lane contraction).
    ids = ids_ref[0]                                                        # (seq, 1) int32
    vocab = lax.broadcasted_iota(jnp.int32, (seq, n_vocab), 1)              # (seq, 26)
    onehot = (ids == vocab).astype(jnp.bfloat16)                            # (seq, 26)
    emb_ref[...] = jnp.dot(onehot, table_ref[...],
                           preferred_element_type=jnp.float32).astype(jnp.bfloat16)

    # All 8 conv taps fused in ONE MXU matmul:  H[k*32+oc, e] = sum_p w[oc, p, k] * emb[p, e]
    h_ref[...] = jnp.dot(wcat_ref[...], emb_ref[...],
                         preferred_element_type=jnp.float32)                # (256, 128) f32

    # out[oc, t] = bias[oc] + sum_k H[k*32+oc, t+k]   (t = 0..120)
    acc = h_ref[0:n_filt, 0:lout] + bconv_ref[...]                          # (32, 121) f32
    for k in range(1, ksize):
        acc = acc + h_ref[k * n_filt:(k + 1) * n_filt, k:k + lout]

    # Single lane-dense unmasked store of the padded (32, 128) tile; cols lout..127 are zero
    # (they pair with zero-padded fc1_xt weight rows in the head kernel).
    tail = jnp.zeros((n_filt, emb_dim - lout), jnp.float32)
    o_ref[0, :, :] = jnp.concatenate([acc, tail], axis=-1).astype(o_ref.dtype)


def protein_conv(pp, target):
    """target: (B, seq) int32  ->  (B, 32, 128) bf16 padded conv output."""
    bsz, seq = target.shape
    n_vocab, emb_dim = pp["emb"].shape
    n_filt = pp["conv_b"].shape[0]
    ksize = pp["conv_wcat"].shape[0] // n_filt

    ids3d = target.astype(jnp.int32)[:, :, None]          # (B, seq, 1): ids land on sublanes
    return pl.pallas_call(
        _protein_conv_kernel,
        out_shape=jax.ShapeDtypeStruct((bsz, n_filt, emb_dim), jnp.bfloat16),
        grid=(bsz,),
        in_specs=[
            pl.BlockSpec((1, seq, 1), lambda b: (b, 0, 0)),            # only this row's ids
            pl.BlockSpec((n_vocab, emb_dim), lambda b: (0, 0)),        # embedding table
            pl.BlockSpec((ksize * n_filt, seq), lambda b: (0, 0)),     # fused conv weight
            pl.BlockSpec((n_filt, 1), lambda b: (0, 0)),               # conv bias
        ],
        out_specs=pl.BlockSpec((1, n_filt, emb_dim), lambda b: (b, 0, 0)),
        scratch_shapes=[pltpu.VMEM((seq, emb_dim), jnp.bfloat16),      # emb, resident in VMEM
                        pltpu.VMEM((ksize * n_filt, emb_dim), jnp.float32)],
        compiler_params=pltpu.CompilerParams(
            dimension_semantics=("parallel",),                          # v7x: 2 TensorCores
            vmem_limit_bytes=_vmem_limit_bytes()),
    )(ids3d, pp["emb"], pp["conv_wcat"], pp["conv_b"])


# ---------------------- Kernel A+C: fused graph branch + prediction head ----------------------

def _graph_head_kernel(a_ref, x_ref, m_ref, cf_ref,
                       w1_ref, b1_ref, w2_ref, b2_ref, w3_ref, b3_ref,
                       g1w_ref, g1b_ref, g2w_ref, g2b_ref,
                       wxt_ref, bxt_ref, w1a_ref, w1b_ref, bc1_ref,
                       w2h_ref, bc2_ref, wo_ref, bo_ref, o_ref):
    bf16 = jnp.bfloat16
    a = a_ref[...]                                                     # (N, N) bf16

    def gcn_relu(h_bf, w_ref, b_ref):
        hw = jnp.dot(h_bf, w_ref[...], preferred_element_type=jnp.float32)
        z = jnp.dot(a, hw.astype(bf16), preferred_element_type=jnp.float32) + b_ref[...]
        return jnp.maximum(z, 0.0)                                     # f32

    h = gcn_relu(x_ref[...], w1_ref, b1_ref)                           # (N, 128)
    h = gcn_relu(h.astype(bf16), w2_ref, b2_ref)                       # (N, 256)
    h = gcn_relu(h.astype(bf16), w3_ref, b3_ref)                       # (N, 384)

    # global max pool (vectorized): m_ref is (B, N, 1), 0 for own nodes else -inf (f32)
    pooled = jnp.max(h[None, :, :] + m_ref[...], axis=1)               # (B, 384) f32

    xg = jnp.maximum(
        jnp.dot(pooled.astype(bf16), g1w_ref[...],
                preferred_element_type=jnp.float32) + g1b_ref[...], 0.0)      # (B, 1024)
    # TODO(synk): nn.Dropout(p=0.2) layers are identity (inference mode).
    xg = jnp.dot(xg.astype(bf16), g2w_ref[...],
                 preferred_element_type=jnp.float32) + g2b_ref[...]           # (B, 128)

    xt = jnp.dot(cf_ref[...], wxt_ref[...],
                 preferred_element_type=jnp.float32) + bxt_ref[...]           # (B, 128)

    # concat-free fc1:  concat(xg, xt) @ W1 == xg @ W1[:128] + xt @ W1[128:]
    xc = (jnp.dot(xg.astype(bf16), w1a_ref[...], preferred_element_type=jnp.float32)
          + jnp.dot(xt.astype(bf16), w1b_ref[...], preferred_element_type=jnp.float32)
          + bc1_ref[...])
    xc = jnp.maximum(xc, 0.0)                                                  # (B, 1024)
    xc = jnp.maximum(
        jnp.dot(xc.astype(bf16), w2h_ref[...],
                preferred_element_type=jnp.float32) + bc2_ref[...], 0.0)       # (B, 512)
    o_ref[...] = jnp.dot(xc.astype(bf16), wo_ref[...],
                         preferred_element_type=jnp.float32) + bo_ref[...]     # (B, 1)


def graph_and_head(pp, a_hat, x_pad, mask_add, conv_flat):
    n_graphs = mask_add.shape[0]
    return pl.pallas_call(
        _graph_head_kernel,
        out_shape=jax.ShapeDtypeStruct((n_graphs, pp["out_w"].shape[1]), jnp.float32),
        compiler_params=pltpu.CompilerParams(vmem_limit_bytes=_vmem_limit_bytes()),
    )(a_hat, x_pad, mask_add, conv_flat,
      pp["gcn1_w"], pp["gcn1_b"], pp["gcn2_w"], pp["gcn2_b"], pp["gcn3_w"], pp["gcn3_b"],
      pp["fc_g1_w"], pp["fc_g1_b"], pp["fc_g2_w"], pp["fc_g2_b"],
      pp["fc1_xt_w"], pp["fc1_xt_b"], pp["fc1_wa"], pp["fc1_wb"], pp["fc1_b"],
      pp["fc2_w"], pp["fc2_b"], pp["out_w"], pp["out_b"])


# -------------------------------------------- forward -----------------------------------------

@functools.partial(jax.jit, static_argnames=("n_graphs",))
def gcnnet_forward(pp, x, edge_index, batch, target, *, n_graphs):
    n_nodes = x.shape[0]

    # glue (plain JAX): GCN normalization, pool mask, feature padding / casts
    src, dst = edge_index[0], edge_index[1]
    a = jnp.zeros((n_nodes, n_nodes), jnp.float32).at[dst, src].set(1.0)
    a = a + jnp.eye(n_nodes, dtype=jnp.float32)
    dinv = lax.rsqrt(jnp.sum(a, axis=1))
    a_hat = (dinv[:, None] * a * dinv[None, :]).astype(jnp.bfloat16)
    # TODO(synk): for very large batched graphs, tile the dense a_hat path over node rows
    # before it outgrows v7x's 64 MiB VMEM (fine at current sizes on all generations).

    mask_add = jnp.where(batch[None, :] == jnp.arange(n_graphs)[:, None],
                         jnp.float32(0.0), jnp.float32(-jnp.inf))[:, :, None]   # (B, N, 1)

    d_in = pp["gcn1_w"].shape[0]                                        # 128 (padded)
    x_pad = jnp.pad(x, ((0, 0), (0, d_in - x.shape[1]))).astype(jnp.bfloat16)

    conv = protein_conv(pp, target)                                     # (B, 32, 128) bf16
    conv_flat = conv.reshape(n_graphs, -1)                              # (B, 4096), free reshape
    return graph_and_head(pp, a_hat, x_pad, mask_add, conv_flat)        # (B, 1) f32


# ---------------------------------------------- main ------------------------------------------

if __name__ == "__main__":
    key = jax.random.PRNGKey(0)
    k_param, k_x, k_t = jax.random.split(key, 3)

    params = init_params(k_param)
    prepped = prepare_params(params)          # one-time re-layout, outside the jitted forward

    # two small graphs of 8 nodes each (chain, symmetric edges)
    n_per, n_graphs = 8, 2
    n_nodes = n_per * n_graphs
    srcs, dsts = [], []
    for g in range(n_graphs):
        base = g * n_per
        s = jnp.arange(base, base + n_per - 1)
        d = s + 1
        srcs += [s, d]
        dsts += [d, s]
    edge_index = jnp.stack([jnp.concatenate(srcs), jnp.concatenate(dsts)]).astype(jnp.int32)
    batch = jnp.concatenate(
        [jnp.full((n_per,), g, dtype=jnp.int32) for g in range(n_graphs)])

    x = jax.random.normal(k_x, (n_nodes, 78), jnp.float32)
    target = jax.random.randint(k_t, (n_graphs, 1000), 0, 26, dtype=jnp.int32)

    out = gcnnet_forward(prepped, x, edge_index, batch, target, n_graphs=n_graphs)
    out = jax.block_until_ready(out)
    assert out.shape == (n_graphs, 1), out.shape
    print("KERNEL_OK")
</pallas_src>

<mosaic_0001>
module attributes {stable_mosaic.version = 11 : i64} {
  func.func @_protein_conv_kernel(%arg0: i32, %arg1: memref<1x1000x1xi32, #tpu.memory_space<vmem>>, %arg2: memref<26x128xbf16, #tpu.memory_space<vmem>>, %arg3: memref<256x1000xbf16, #tpu.memory_space<vmem>>, %arg4: memref<32x1xf32, #tpu.memory_space<vmem>>, %arg5: memref<1x32x128xbf16, #tpu.memory_space<vmem>>, %arg6: memref<1000x128xbf16, #tpu.memory_space<vmem>>, %arg7: memref<256x128xf32, #tpu.memory_space<vmem>>) attributes {dimension_semantics = [#tpu.dimension_semantics<parallel>], iteration_bounds = array<i64: 2>, scalar_prefetch = 0 : i64, scratch_operands = 2 : i64, tpu.core_type = #tpu.core_type<tc>, window_params = [{transform_indices = @transform_0, window_bounds = array<i64: 1, 1000, 1>}, {pipeline_mode = #tpu.pipeline_mode<synchronous>, transform_indices = @transform_1, window_bounds = array<i64: 26, 128>}, {pipeline_mode = #tpu.pipeline_mode<synchronous>, transform_indices = @transform_2, window_bounds = array<i64: 256, 1000>}, {pipeline_mode = #tpu.pipeline_mode<synchronous>, transform_indices = @transform_3, window_bounds = array<i64: 32, 1>}, {transform_indices = @transform_4, window_bounds = array<i64: 1, 32, 128>}]} {
    %c0 = arith.constant 0 : index
    %c0_0 = arith.constant 0 : index
    %c0_1 = arith.constant 0 : index
    %0 = vector.load %arg1[%c0, %c0_0, %c0_1] : memref<1x1000x1xi32, #tpu.memory_space<vmem>>, vector<1x1000x1xi32>
    %1 = vector.shape_cast %0 : vector<1x1000x1xi32> to vector<1000x1xi32>
    %2 = tpu.iota {dimensions = array<i32: 1>} : vector<1000x26xi32>
    %3 = vector.broadcast %1 : vector<1000x1xi32> to vector<1000x26xi32>
    %4 = arith.cmpi eq, %3, %2 : vector<1000x26xi32>
    %5 = arith.extui %4 : vector<1000x26xi1> to vector<1000x26xi32>
    %6 = arith.sitofp %5 : vector<1000x26xi32> to vector<1000x26xf32>
    %7 = arith.truncf %6 : vector<1000x26xf32> to vector<1000x26xbf16>
    %c0_2 = arith.constant 0 : index
    %c0_3 = arith.constant 0 : index
    %8 = vector.load %arg2[%c0_2, %c0_3] : memref<26x128xbf16, #tpu.memory_space<vmem>>, vector<26x128xbf16>
    %cst = arith.constant dense<0.000000e+00> : vector<1000x128xf32>
    %9 = tpu.matmul %7, %8, %cst {dimension_numbers = #tpu.dot_dimension_numbers<[1], [0], [0], [1], [0, 0, 1, 1], [], []>} : vector<1000x26xbf16>, vector<26x128xbf16>, vector<1000x128xf32> -> vector<1000x128xf32>
    %10 = arith.truncf %9 : vector<1000x128xf32> to vector<1000x128xbf16>
    %c0_4 = arith.constant 0 : index
    %c0_5 = arith.constant 0 : index
    %11 = vector.load %arg6[%c0_4, %c0_5] : memref<1000x128xbf16, #tpu.memory_space<vmem>>, vector<1000x128xbf16>
    tpu.vector_store %arg6[%c0_4, %c0_5], %10 {strides = array<i32>} : memref<1000x128xbf16, #tpu.memory_space<vmem>>, vector<1000x128xbf16>,
    %c0_6 = arith.constant 0 : index
    %c0_7 = arith.constant 0 : index
    %12 = vector.load %arg3[%c0_6, %c0_7] : memref<256x1000xbf16, #tpu.memory_space<vmem>>, vector<256x1000xbf16>
    %c0_8 = arith.constant 0 : index
    %c0_9 = arith.constant 0 : index
    %13 = vector.load %arg6[%c0_8, %c0_9] : memref<1000x128xbf16, #tpu.memory_space<vmem>>, vector<1000x128xbf16>
    %cst_10 = arith.constant dense<0.000000e+00> : vector<256x128xf32>
    %14 = tpu.matmul %12, %13, %cst_10 {dimension_numbers = #tpu.dot_dimension_numbers<[1], [0], [0], [1], [0, 0, 1, 1], [], []>} : vector<256x1000xbf16>, vector<1000x128xbf16>, vector<256x128xf32> -> vector<256x128xf32>
    %c0_11 = arith.constant 0 : index
    %c0_12 = arith.constant 0 : index
    %15 = vector.load %arg7[%c0_11, %c0_12] : memref<256x128xf32, #tpu.memory_space<vmem>>, vector<256x128xf32>
    tpu.vector_store %arg7[%c0_11, %c0_12], %14 {strides = array<i32>} : memref<256x128xf32, #tpu.memory_space<vmem>>, vector<256x128xf32>,
    %c0_13 = arith.constant 0 : index
    %c0_14 = arith.constant 0 : index
    %16 = vector.load %arg7[%c0_13, %c0_14] : memref<256x128xf32, #tpu.memory_space<vmem>>, vector<32x121xf32>
    %c0_15 = arith.constant 0 : index
    %c0_16 = arith.constant 0 : index
    %17 = vector.load %arg4[%c0_15, %c0_16] : memref<32x1xf32, #tpu.memory_space<vmem>>, vector<32x1xf32>
    %18 = vector.broadcast %17 : vector<32x1xf32> to vector<32x121xf32>
    %19 = arith.addf %16, %18 : vector<32x121xf32>
    %c32 = arith.constant 32 : index
    %c1 = arith.constant 1 : index
    %20 = vector.load %arg7[%c32, %c1] : memref<256x128xf32, #tpu.memory_space<vmem>>, vector<32x121xf32>
    %21 = arith.addf %19, %20 : vector<32x121xf32>
    %c64 = arith.constant 64 : index
    %c2 = arith.constant 2 : index
    %22 = vector.load %arg7[%c64, %c2] : memref<256x128xf32, #tpu.memory_space<vmem>>, vector<32x121xf32>
    %23 = arith.addf %21, %22 : vector<32x121xf32>
    %c96 = arith.constant 96 : index
    %c3 = arith.constant 3 : index
    %24 = vector.load %arg7[%c96, %c3] : memref<256x128xf32, #tpu.memory_space<vmem>>, vector<32x121xf32>
    %25 = arith.addf %23, %24 : vector<32x121xf32>
    %c128 = arith.constant 128 : index
    %c4 = arith.constant 4 : index
    %26 = vector.load %arg7[%c128, %c4] : memref<256x128xf32, #tpu.memory_space<vmem>>, vector<32x121xf32>
    %27 = arith.addf %25, %26 : vector<32x121xf32>
    %c160 = arith.constant 160 : index
    %c5 = arith.constant 5 : index
    %28 = vector.load %arg7[%c160, %c5] : memref<256x128xf32, #tpu.memory_space<vmem>>, vector<32x121xf32>
    %29 = arith.addf %27, %28 : vector<32x121xf32>
    %c192 = arith.constant 192 : index
    %c6 = arith.constant 6 : index
    %30 = vector.load %arg7[%c192, %c6] : memref<256x128xf32, #tpu.memory_space<vmem>>, vector<32x121xf32>
    %31 = arith.addf %29, %30 : vector<32x121xf32>
    %c224 = arith.constant 224 : index
    %c7 = arith.constant 7 : index
    %32 = vector.load %arg7[%c224, %c7] : memref<256x128xf32, #tpu.memory_space<vmem>>, vector<32x121xf32>
    %33 = arith.addf %31, %32 : vector<32x121xf32>
    %cst_17 = arith.constant 0.000000e+00 : f32
    %34 = vector.broadcast %cst_17 : f32 to vector<32x7xf32>
    %35 = tpu.concatenate %33, %34 in 1 : vector<32x121xf32>, vector<32x7xf32> -> vector<32x128xf32>
    %36 = arith.truncf %35 : vector<32x128xf32> to vector<32x128xbf16>
    %c0_18 = arith.constant 0 : index
    %c0_19 = arith.constant 0 : index
    %c0_20 = arith.constant 0 : index
    %37 = vector.load %arg5[%c0_18, %c0_19, %c0_20] : memref<1x32x128xbf16, #tpu.memory_space<vmem>>, vector<1x32x128xbf16>
    %38 = vector.shape_cast %37 : vector<1x32x128xbf16> to vector<32x128xbf16>
    %39 = vector.shape_cast %36 : vector<32x128xbf16> to vector<1x32x128xbf16>
    tpu.vector_store %arg5[%c0_18, %c0_19, %c0_20], %39 {strides = array<i32>} : memref<1x32x128xbf16, #tpu.memory_space<vmem>>, vector<1x32x128xbf16>,
    return
  }
  func.func @transform_0(%arg0: i32) -> (i32, i32, i32) {
    %c0_i32 = arith.constant 0 : i32
    %c0_i32_0 = arith.constant 0 : i32
    %c0_i32_1 = arith.constant 0 : i32
    return %arg0, %c0_i32, %c0_i32_0 : i32, i32, i32
  }
  func.func @transform_1(%arg0: i32) -> (i32, i32) {
    %c0_i32 = arith.constant 0 : i32
    %c0_i32_0 = arith.constant 0 : i32
    %c0_i32_1 = arith.constant 0 : i32
    return %c0_i32, %c0_i32_0 : i32, i32
  }
  func.func @transform_2(%arg0: i32) -> (i32, i32) {
    %c0_i32 = arith.constant 0 : i32
    %c0_i32_0 = arith.constant 0 : i32
    %c0_i32_1 = arith.constant 0 : i32
    return %c0_i32, %c0_i32_0 : i32, i32
  }
  func.func @transform_3(%arg0: i32) -> (i32, i32) {
    %c0_i32 = arith.constant 0 : i32
    %c0_i32_0 = arith.constant 0 : i32
    %c0_i32_1 = arith.constant 0 : i32
    return %c0_i32, %c0_i32_0 : i32, i32
  }
  func.func @transform_4(%arg0: i32) -> (i32, i32, i32) {
    %c0_i32 = arith.constant 0 : i32
    %c0_i32_0 = arith.constant 0 : i32
    %c0_i32_1 = arith.constant 0 : i32
    return %arg0, %c0_i32, %c0_i32_0 : i32, i32, i32
  }
}

module attributes {stable_mosaic.version = 11 : i64} {
  func.func @_graph_head_kernel(%arg0: memref<16x16xbf16, #tpu.memory_space<vmem>>, %arg1: memref<16x128xbf16, #tpu.memory_space<vmem>>, %arg2: memref<2x16x1xf32, #tpu.memory_space<vmem>>, %arg3: memref<2x4096xbf16, #tpu.memory_space<vmem>>, %arg4: memref<128x128xbf16, #tpu.memory_space<vmem>>, %arg5: memref<1x128xf32, #tpu.memory_space<vmem>>, %arg6: memref<128x256xbf16, #tpu.memory_space<vmem>>, %arg7: memref<1x256xf32, #tpu.memory_space<vmem>>, %arg8: memref<256x384xbf16, #tpu.memory_space<vmem>>, %arg9: memref<1x384xf32, #tpu.memory_space<vmem>>, %arg10: memref<384x1024xbf16, #tpu.memory_space<vmem>>, %arg11: memref<1x1024xf32, #tpu.memory_space<vmem>>, %arg12: memref<1024x128xbf16, #tpu.memory_space<vmem>>, %arg13: memref<1x128xf32, #tpu.memory_space<vmem>>, %arg14: memref<4096x128xbf16, #tpu.memory_space<vmem>>, %arg15: memref<1x128xf32, #tpu.memory_space<vmem>>, %arg16: memref<128x1024xbf16, #tpu.memory_space<vmem>>, %arg17: memref<128x1024xbf16, #tpu.memory_space<vmem>>, %arg18: memref<1x1024xf32, #tpu.memory_space<vmem>>, %arg19: memref<1024x512xbf16, #tpu.memory_space<vmem>>, %arg20: memref<1x512xf32, #tpu.memory_space<vmem>>, %arg21: memref<512x1xbf16, #tpu.memory_space<vmem>>, %arg22: memref<1x1xf32, #tpu.memory_space<vmem>>, %arg23: memref<2x1xf32, #tpu.memory_space<vmem>>) attributes {dimension_semantics = [], scalar_prefetch = 0 : i64, scratch_operands = 0 : i64, tpu.core_type = #tpu.core_type<tc>} {
    %c0 = arith.constant 0 : index
    %c0_0 = arith.constant 0 : index
    %0 = vector.load %arg0[%c0, %c0_0] : memref<16x16xbf16, #tpu.memory_space<vmem>>, vector<16x16xbf16>
    %c0_1 = arith.constant 0 : index
    %c0_2 = arith.constant 0 : index
    %1 = vector.load %arg1[%c0_1, %c0_2] : memref<16x128xbf16, #tpu.memory_space<vmem>>, vector<16x128xbf16>
    %c0_3 = arith.constant 0 : index
    %c0_4 = arith.constant 0 : index
    %2 = vector.load %arg4[%c0_3, %c0_4] : memref<128x128xbf16, #tpu.memory_space<vmem>>, vector<128x128xbf16>
    %cst = arith.constant dense<0.000000e+00> : vector<16x128xf32>
    %3 = tpu.matmul %1, %2, %cst {dimension_numbers = #tpu.dot_dimension_numbers<[1], [0], [0], [1], [0, 0, 1, 1], [], []>} : vector<16x128xbf16>, vector<128x128xbf16>, vector<16x128xf32> -> vector<16x128xf32>
    %4 = arith.truncf %3 : vector<16x128xf32> to vector<16x128xbf16>
    %cst_5 = arith.constant dense<0.000000e+00> : vector<16x128xf32>
    %5 = tpu.matmul %0, %4, %cst_5 {dimension_numbers = #tpu.dot_dimension_numbers<[1], [0], [0], [1], [0, 0, 1, 1], [], []>} : vector<16x16xbf16>, vector<16x128xbf16>, vector<16x128xf32> -> vector<16x128xf32>
    %c0_6 = arith.constant 0 : index
    %c0_7 = arith.constant 0 : index
    %6 = vector.load %arg5[%c0_6, %c0_7] : memref<1x128xf32, #tpu.memory_space<vmem>>, vector<1x128xf32>
    %7 = vector.broadcast %6 : vector<1x128xf32> to vector<16x128xf32>
    %8 = arith.addf %5, %7 : vector<16x128xf32>
    %cst_8 = arith.constant 0.000000e+00 : f32
    %9 = vector.broadcast %cst_8 : f32 to vector<16x128xf32>
    %10 = arith.maximumf %8, %9 : vector<16x128xf32>
    %11 = arith.truncf %10 : vector<16x128xf32> to vector<16x128xbf16>
    %c0_9 = arith.constant 0 : index
    %c0_10 = arith.constant 0 : index
    %12 = vector.load %arg6[%c0_9, %c0_10] : memref<128x256xbf16, #tpu.memory_space<vmem>>, vector<128x256xbf16>
    %cst_11 = arith.constant dense<0.000000e+00> : vector<16x256xf32>
    %13 = tpu.matmul %11, %12, %cst_11 {dimension_numbers = #tpu.dot_dimension_numbers<[1], [0], [0], [1], [0, 0, 1, 1], [], []>} : vector<16x128xbf16>, vector<128x256xbf16>, vector<16x256xf32> -> vector<16x256xf32>
    %14 = arith.truncf %13 : vector<16x256xf32> to vector<16x256xbf16>
    %cst_12 = arith.constant dense<0.000000e+00> : vector<16x256xf32>
    %15 = tpu.matmul %0, %14, %cst_12 {dimension_numbers = #tpu.dot_dimension_numbers<[1], [0], [0], [1], [0, 0, 1, 1], [], []>} : vector<16x16xbf16>, vector<16x256xbf16>, vector<16x256xf32> -> vector<16x256xf32>
    %c0_13 = arith.constant 0 : index
    %c0_14 = arith.constant 0 : index
    %16 = vector.load %arg7[%c0_13, %c0_14] : memref<1x256xf32, #tpu.memory_space<vmem>>, vector<1x256xf32>
    %17 = vector.broadcast %16 : vector<1x256xf32> to vector<16x256xf32>
    %18 = arith.addf %15, %17 : vector<16x256xf32>
    %cst_15 = arith.constant 0.000000e+00 : f32
    %19 = vector.broadcast %cst_15 : f32 to vector<16x256xf32>
    %20 = arith.maximumf %18, %19 : vector<16x256xf32>
    %21 = arith.truncf %20 : vector<16x256xf32> to vector<16x256xbf16>
    %c0_16 = arith.constant 0 : index
    %c0_17 = arith.constant 0 : index
    %22 = vector.load %arg8[%c0_16, %c0_17] : memref<256x384xbf16, #tpu.memory_space<vmem>>, vector<256x384xbf16>
    %cst_18 = arith.constant dense<0.000000e+00> : vector<16x384xf32>
    %23 = tpu.matmul %21, %22, %cst_18 {dimension_numbers = #tpu.dot_dimension_numbers<[1], [0], [0], [1], [0, 0, 1, 1], [], []>} : vector<16x256xbf16>, vector<256x384xbf16>, vector<16x384xf32> -> vector<16x384xf32>
    %24 = arith.truncf %23 : vector<16x384xf32> to vector<16x384xbf16>
    %cst_19 = arith.constant dense<0.000000e+00> : vector<16x384xf32>
    %25 = tpu.matmul %0, %24, %cst_19 {dimension_numbers = #tpu.dot_dimension_numbers<[1], [0], [0], [1], [0, 0, 1, 1], [], []>} : vector<16x16xbf16>, vector<16x384xbf16>, vector<16x384xf32> -> vector<16x384xf32>
    %c0_20 = arith.constant 0 : index
    %c0_21 = arith.constant 0 : index
    %26 = vector.load %arg9[%c0_20, %c0_21] : memref<1x384xf32, #tpu.memory_space<vmem>>, vector<1x384xf32>
    %27 = vector.broadcast %26 : vector<1x384xf32> to vector<16x384xf32>
    %28 = arith.addf %25, %27 : vector<16x384xf32>
    %cst_22 = arith.constant 0.000000e+00 : f32
    %29 = vector.broadcast %cst_22 : f32 to vector<16x384xf32>
    %30 = arith.maximumf %28, %29 : vector<16x384xf32>
    %31 = vector.shape_cast %30 : vector<16x384xf32> to vector<1x16x384xf32>
    %c0_23 = arith.constant 0 : index
    %c0_24 = arith.constant 0 : index
    %c0_25 = arith.constant 0 : index
    %32 = vector.load %arg2[%c0_23, %c0_24, %c0_25] : memref<2x16x1xf32, #tpu.memory_space<vmem>>, vector<2x16x1xf32>
    %33 = vector.broadcast %31 : vector<1x16x384xf32> to vector<2x16x384xf32>
    %34 = vector.broadcast %32 : vector<2x16x1xf32> to vector<2x16x384xf32>
    %35 = arith.addf %33, %34 : vector<2x16x384xf32>
    %cst_26 = arith.constant dense<0xFF800000> : vector<2x384xf32>
    %36 = vector.multi_reduction <maximumf>, %35, %cst_26 [1] : vector<2x16x384xf32> to vector<2x384xf32>
    %37 = arith.truncf %36 : vector<2x384xf32> to vector<2x384xbf16>
    %c0_27 = arith.constant 0 : index
    %c0_28 = arith.constant 0 : index
    %38 = vector.load %arg10[%c0_27, %c0_28] : memref<384x1024xbf16, #tpu.memory_space<vmem>>, vector<384x1024xbf16>
    %cst_29 = arith.constant dense<0.000000e+00> : vector<2x1024xf32>
    %39 = tpu.matmul %37, %38, %cst_29 {dimension_numbers = #tpu.dot_dimension_numbers<[1], [0], [0], [1], [0, 0, 1, 1], [], []>} : vector<2x384xbf16>, vector<384x1024xbf16>, vector<2x1024xf32> -> vector<2x1024xf32>
    %c0_30 = arith.constant 0 : index
    %c0_31 = arith.constant 0 : index
    %40 = vector.load %arg11[%c0_30, %c0_31] : memref<1x1024xf32, #tpu.memory_space<vmem>>, vector<1x1024xf32>
    %41 = vector.broadcast %40 : vector<1x1024xf32> to vector<2x1024xf32>
    %42 = arith.addf %39, %41 : vector<2x1024xf32>
    %cst_32 = arith.constant 0.000000e+00 : f32
    %43 = vector.broadcast %cst_32 : f32 to vector<2x1024xf32>
    %44 = arith.maximumf %42, %43 : vector<2x1024xf32>
    %45 = arith.truncf %44 : vector<2x1024xf32> to vector<2x1024xbf16>
    %c0_33 = arith.constant 0 : index
    %c0_34 = arith.constant 0 : index
    %46 = vector.load %arg12[%c0_33, %c0_34] : memref<1024x128xbf16, #tpu.memory_space<vmem>>, vector<1024x128xbf16>
    %cst_35 = arith.constant dense<0.000000e+00> : vector<2x128xf32>
    %47 = tpu.matmul %45, %46, %cst_35 {dimension_numbers = #tpu.dot_dimension_numbers<[1], [0], [0], [1], [0, 0, 1, 1], [], []>} : vector<2x1024xbf16>, vector<1024x128xbf16>, vector<2x128xf32> -> vector<2x128xf32>
    %c0_36 = arith.constant 0 : index
    %c0_37 = arith.constant 0 : index
    %48 = vector.load %arg13[%c0_36, %c0_37] : memref<1x128xf32, #tpu.memory_space<vmem>>, vector<1x128xf32>
    %49 = vector.broadcast %48 : vector<1x128xf32> to vector<2x128xf32>
    %50 = arith.addf %47, %49 : vector<2x128xf32>
    %c0_38 = arith.constant 0 : index
    %c0_39 = arith.constant 0 : index
    %51 = vector.load %arg3[%c0_38, %c0_39] : memref<2x4096xbf16, #tpu.memory_space<vmem>>, vector<2x4096xbf16>
    %c0_40 = arith.constant 0 : index
    %c0_41 = arith.constant 0 : index
    %52 = vector.load %arg14[%c0_40, %c0_41] : memref<4096x128xbf16, #tpu.memory_space<vmem>>, vector<4096x128xbf16>
    %cst_42 = arith.constant dense<0.000000e+00> : vector<2x128xf32>
    %53 = tpu.matmul %51, %52, %cst_42 {dimension_numbers = #tpu.dot_dimension_numbers<[1], [0], [0], [1], [0, 0, 1, 1], [], []>} : vector<2x4096xbf16>, vector<4096x128xbf16>, vector<2x128xf32> -> vector<2x128xf32>
    %c0_43 = arith.constant 0 : index
    %c0_44 = arith.constant 0 : index
    %54 = vector.load %arg15[%c0_43, %c0_44] : memref<1x128xf32, #tpu.memory_space<vmem>>, vector<1x128xf32>
    %55 = vector.broadcast %54 : vector<1x128xf32> to vector<2x128xf32>
    %56 = arith.addf %53, %55 : vector<2x128xf32>
    %57 = arith.truncf %50 : vector<2x128xf32> to vector<2x128xbf16>
    %c0_45 = arith.constant 0 : index
    %c0_46 = arith.constant 0 : index
    %58 = vector.load %arg16[%c0_45, %c0_46] : memref<128x1024xbf16, #tpu.memory_space<vmem>>, vector<128x1024xbf16>
    %cst_47 = arith.constant dense<0.000000e+00> : vector<2x1024xf32>
    %59 = tpu.matmul %57, %58, %cst_47 {dimension_numbers = #tpu.dot_dimension_numbers<[1], [0], [0], [1], [0, 0, 1, 1], [], []>} : vector<2x128xbf16>, vector<128x1024xbf16>, vector<2x1024xf32> -> vector<2x1024xf32>
    %60 = arith.truncf %56 : vector<2x128xf32> to vector<2x128xbf16>
    %c0_48 = arith.constant 0 : index
    %c0_49 = arith.constant 0 : index
    %61 = vector.load %arg17[%c0_48, %c0_49] : memref<128x1024xbf16, #tpu.memory_space<vmem>>, vector<128x1024xbf16>
    %cst_50 = arith.constant dense<0.000000e+00> : vector<2x1024xf32>
    %62 = tpu.matmul %60, %61, %cst_50 {dimension_numbers = #tpu.dot_dimension_numbers<[1], [0], [0], [1], [0, 0, 1, 1], [], []>} : vector<2x128xbf16>, vector<128x1024xbf16>, vector<2x1024xf32> -> vector<2x1024xf32>
    %63 = arith.addf %59, %62 : vector<2x1024xf32>
    %c0_51 = arith.constant 0 : index
    %c0_52 = arith.constant 0 : index
    %64 = vector.load %arg18[%c0_51, %c0_52] : memref<1x1024xf32, #tpu.memory_space<vmem>>, vector<1x1024xf32>
    %65 = vector.broadcast %64 : vector<1x1024xf32> to vector<2x1024xf32>
    %66 = arith.addf %63, %65 : vector<2x1024xf32>
    %cst_53 = arith.constant 0.000000e+00 : f32
    %67 = vector.broadcast %cst_53 : f32 to vector<2x1024xf32>
    %68 = arith.maximumf %66, %67 : vector<2x1024xf32>
    %69 = arith.truncf %68 : vector<2x1024xf32> to vector<2x1024xbf16>
    %c0_54 = arith.constant 0 : index
    %c0_55 = arith.constant 0 : index
    %70 = vector.load %arg19[%c0_54, %c0_55] : memref<1024x512xbf16, #tpu.memory_space<vmem>>, vector<1024x512xbf16>
    %cst_56 = arith.constant dense<0.000000e+00> : vector<2x512xf32>
    %71 = tpu.matmul %69, %70, %cst_56 {dimension_numbers = #tpu.dot_dimension_numbers<[1], [0], [0], [1], [0, 0, 1, 1], [], []>} : vector<2x1024xbf16>, vector<1024x512xbf16>, vector<2x512xf32> -> vector<2x512xf32>
    %c0_57 = arith.constant 0 : index
    %c0_58 = arith.constant 0 : index
    %72 = vector.load %arg20[%c0_57, %c0_58] : memref<1x512xf32, #tpu.memory_space<vmem>>, vector<1x512xf32>
    %73 = vector.broadcast %72 : vector<1x512xf32> to vector<2x512xf32>
    %74 = arith.addf %71, %73 : vector<2x512xf32>
    %cst_59 = arith.constant 0.000000e+00 : f32
    %75 = vector.broadcast %cst_59 : f32 to vector<2x512xf32>
    %76 = arith.maximumf %74, %75 : vector<2x512xf32>
    %77 = arith.truncf %76 : vector<2x512xf32> to vector<2x512xbf16>
    %c0_60 = arith.constant 0 : index
    %c0_61 = arith.constant 0 : index
    %78 = vector.load %arg21[%c0_60, %c0_61] : memref<512x1xbf16, #tpu.memory_space<vmem>>, vector<512x1xbf16>
    %cst_62 = arith.constant dense<0.000000e+00> : vector<2x1xf32>
    %79 = tpu.matmul %77, %78, %cst_62 {dimension_numbers = #tpu.dot_dimension_numbers<[1], [0], [0], [1], [0, 0, 1, 1], [], []>} : vector<2x512xbf16>, vector<512x1xbf16>, vector<2x1xf32> -> vector<2x1xf32>
    %c0_63 = arith.constant 0 : index
    %c0_64 = arith.constant 0 : index
    %80 = vector.load %arg22[%c0_63, %c0_64] : memref<1x1xf32, #tpu.memory_space<vmem>>, vector<1x1xf32>
    %81 = vector.broadcast %80 : vector<1x1xf32> to vector<2x1xf32>
    %82 = arith.addf %79, %81 : vector<2x1xf32>
    %c0_65 = arith.constant 0 : index
    %c0_66 = arith.constant 0 : index
    %83 = vector.load %arg23[%c0_65, %c0_66] : memref<2x1xf32, #tpu.memory_space<vmem>>, vector<2x1xf32>
    tpu.vector_store %arg23[%c0_65, %c0_66], %82 {strides = array<i32>} : memref<2x1xf32, #tpu.memory_space<vmem>>, vector<2x1xf32>,
    return
  }
}

</mosaic_0001>

<bundles_post_ra>
// kernel: gcnnet_forward.2
= control target key start
LH: loop header
LB: loop body
LE: loop exit
PB: predicated region body
PF: predicated region fallthrough
CT: control target
= control target key end

     0   :  { %s6621_s15 = smov 0   ;;  %s7958_s0 = inlined_call_operand.vmem [shape: s32[2,1000,1], index: 0, kind: input, shape index: {}]   ;;  %s7959_s1 = inlined_call_operand.vmem [shape: bf16[26,128], index: 1, kind: input, shape index: {}]   ;;  %s7960_s2 = inlined_call_operand.vmem [shape: bf16[256,1000], index: 2, kind: input, shape index: {}]   ;;  %s7961_s3 = inlined_call_operand.vmem [shape: f32[32,1], index: 3, kind: input, shape index: {}]   ;;  %s7962_s4 = inlined_call_operand.vmem [shape: bf16[2,32,128], index: 4, kind: output, shape index: {}]  }
   0x1 LB: > { %s4771_s16 = sadd.s32 4294967295, %s6584_s15   ;;  %p4775_p0 = scmp.ge.s32.totalorder %s6584_s15, 1  ;;  %s6584_s15 = sphi %s6621_s15, %s14_s15  }
   0x2   : > { %p162_p1 = scmp.lt.s32.totalorder %s6584_s15, 3 }
   0x4   : > { %p163_p2 = pnand %p4775_p0, %p162_p1 }
   0x5   : > { %p188_p3 = scmp.lt.s32.totalorder (!%p163_p2), %s4771_s16, 1  ;;  %s6589_s25 = smov (!%p163_p2), 127  }
   0x6   : > { %166 = sbr.rel (%p163_p2) target bundleno = 1332 (0x534), region = 36  ;;  %s6590_s26 = smov (!%p163_p2), 126  }
   0x7   : > { %s6591_s27 = smov (!%p163_p2), 125   ;;  %s6592_s28 = smov (!%p163_p2), 124  }
   0x8   : > { %s6593_s29 = smov (!%p163_p2), 123   ;;  %s6594_s30 = smov (!%p163_p2), 122  }
   0x9   : > { %s6595_s5 = smov (!%p163_p2), 121  }
   0xb   : > { %v6586_v0 = vmov 0   ;;  %s7964_s16 = smov (!%p188_p3, %s4771_s16), 1  ;;  %v6587_v1 = vmov 0.0   ;;  %v6513_v2 = vld [vmem:[%s7959_s1 + $0x8] sm:$0x1f]   ;;  %vm1344_vm0 = vcmask 1044480  }
   0xc   : > { %6512 = vset.pattern.permute.xlu1 %v6586_v0  ;;  %6511 = vset.pattern.permute.xlu0 %v6586_v0  ;;  %s6492_s19 = smul.u32 1000, %s7964_s16  ;;  %v1346_v3 = vsel %vm1344_vm0, %v6513_v2, 0  ;;  %vm6588_vm1 = vmmov 0   ;;  %v6514_v18 = vld [vmem:[%s7959_s1] sm:$0xff]   ;;  %vm1154_vm4 = vcmask 211968   ;;  %s5307_s6 = sshll.u32 %s7964_s16, 4 }
   0xd   : > { %6220 = vmatprep.subr.bf16.mxu0 %v6587_v1  ;;  %6224 = vmatprep.mubr.msk.bf16.mxu0 %vm6588_vm1, %v6587_v1  ;;  %s197_s9 = scalar_lea.vmem %s7962_s4, %s5307_s6 }
   0xe   : > { %6221 = vmatpush3.bf16.msra.mxu0 %v1346_v3  ;;  %s6641_s22 = scalar_lea.vmem %s7958_s0, %s6492_s19 }
   0xf   : > { %6222 = vmatprep.subr.bf16.mxu0 %v6587_v1  ;;  %v201_v4 = vld [vmem:[%s6641_s22 + $0x10] sm:$0xff]  ;;  %v199_v5 = vld [vmem:[%s6641_s22] sm:$0xff]  ;;  %v202_v6 = vld [vmem:[%s6641_s22 + $0x18] sm:$0xff] }
  0x10   : > { %333 = vperm.xlu1 %6512, %v201_v4   ;;  %327 = vperm.xlu0 %6511, %v199_v5   ;;  %v200_v7 = vld [vmem:[%s6641_s22 + $0x8] sm:$0xff]  ;;  %v203_v9 = vld [vmem:[%s6641_s22 + $0x20] sm:$0xff]  ;;  %v206_v10 = vld [vmem:[%s6641_s22 + $0x38] sm:$0xff]  ;;  %v324_v5 = vlaneseq }
  0x11   : > { %v204_v8 = vld [vmem:[%s6641_s22 + $0x28] sm:$0xff]  ;;  %v205_v11 = vld [vmem:[%s6641_s22 + $0x30] sm:$0xff]  ;;  %v207_v13 = vld [vmem:[%s6641_s22 + $0x40] sm:$0xff] }
  0x12   : > { %v208_v12 = vld [vmem:[%s6641_s22 + $0x48] sm:$0xff]  ;;  %v210_v14 = vld [vmem:[%s6641_s22 + $0x58] sm:$0xff]  ;;  %v209_v15 = vld [vmem:[%s6641_s22 + $0x50] sm:$0xff]  ;;  %6223 = vmatpush3.bf16.msra.mxu0 %v6514_v18 }
  0x13   : > { %v212_v16 = vld [vmem:[%s6641_s22 + $0x68] sm:$0xff]  ;;  %v211_v17 = vld [vmem:[%s6641_s22 + $0x60] sm:$0xff]  ;;  %v214_v19 = vld [vmem:[%s6641_s22 + $0x78] sm:$0xff] }
  0x14   : > { %336 = vperm.xlu1 %6512, %v202_v6   ;;  %330 = vperm.xlu0 %6511, %v200_v7   ;;  %v213_v20 = vld [vmem:[%s6641_s22 + $0x70] sm:$0xff]  ;;  %v216_v21 = vld [vmem:[%s6641_s22 + $0x88] sm:$0xff]  ;;  %v215_v22 = vld [vmem:[%s6641_s22 + $0x80] sm:$0xff] }
  0x15   : > { %v218_v23 = vld [vmem:[%s6641_s22 + $0x98] sm:$0xff]  ;;  %v217_v24 = vld [vmem:[%s6641_s22 + $0x90] sm:$0xff]  ;;  %v220_v25 = vld [vmem:[%s6641_s22 + $0xa8] sm:$0xff] }
  0x16   : > { %v219_v26 = vld [vmem:[%s6641_s22 + $0xa0] sm:$0xff]  ;;  %v222_v27 = vld [vmem:[%s6641_s22 + $0xb8] sm:$0xff]  ;;  %v221_v28 = vld [vmem:[%s6641_s22 + $0xb0] sm:$0xff] }
  0x17   : > { %v224_v29 = vld [vmem:[%s6641_s22 + $0xc8] sm:$0xff]  ;;  %v223_v30 = vld [vmem:[%s6641_s22 + $0xc0] sm:$0xff]  ;;  %v226_v31 = vld [vmem:[%s6641_s22 + $0xd8] sm:$0xff] }
  0x18   : > { %342 = vperm.xlu1 %6512, %v204_v8   ;;  %339 = vperm.xlu0 %6511, %v203_v9   ;;  %v225_v32 = vld [vmem:[%s6641_s22 + $0xd0] sm:$0xff]  ;;  %v228_v33 = vld [vmem:[%s6641_s22 + $0xe8] sm:$0xff]  ;;  %v227_v34 = vld [vmem:[%s6641_s22 + $0xe0] sm:$0xff]  ;;  %v6713_v8 = vand.u32 127, %v324_v5 }
  0x19   : > { %v230_v35 = vld [vmem:[%s6641_s22 + $0xf8] sm:$0xff]  ;;  %v229_v36 = vld [vmem:[%s6641_s22 + $0xf0] sm:$0xff]  ;;  %v232_v37 = vld [vmem:[%s6641_s22 + $0x108] sm:$0xff] }
  0x1a   : > { %v231_v38 = vld [vmem:[%s6641_s22 + $0x100] sm:$0xff]  ;;  %v234_v39 = vld [vmem:[%s6641_s22 + $0x118] sm:$0xff]  ;;  %v233_v40 = vld [vmem:[%s6641_s22 + $0x110] sm:$0xff] }
  0x1b   : > { %v236_v41 = vld [vmem:[%s6641_s22 + $0x128] sm:$0xff]  ;;  %v235_v42 = vld [vmem:[%s6641_s22 + $0x120] sm:$0xff]  ;;  %v238_v43 = vld [vmem:[%s6641_s22 + $0x138] sm:$0xff] }
  0x1c   : > { %348 = vperm.xlu1 %6512, %v206_v10   ;;  %345 = vperm.xlu0 %6511, %v205_v11   ;;  %v237_v44 = vld [vmem:[%s6641_s22 + $0x130] sm:$0xff]  ;;  %v240_v45 = vld [vmem:[%s6641_s22 + $0x148] sm:$0xff]  ;;  %v239_v46 = vld [vmem:[%s6641_s22 + $0x140] sm:$0xff] }
  0x1d   : > { %v242_v47 = vld [vmem:[%s6641_s22 + $0x158] sm:$0xff]  ;;  %v241_v48 = vld [vmem:[%s6641_s22 + $0x150] sm:$0xff]  ;;  %v244_v49 = vld [vmem:[%s6641_s22 + $0x168] sm:$0xff] }
  0x1e   : > { %v243_v50 = vld [vmem:[%s6641_s22 + $0x160] sm:$0xff]  ;;  %v246_v51 = vld [vmem:[%s6641_s22 + $0x178] sm:$0xff]  ;;  %v245_v52 = vld [vmem:[%s6641_s22 + $0x170] sm:$0xff] }
  0x1f   : > { %v248_v53 = vld [vmem:[%s6641_s22 + $0x188] sm:$0xff]  ;;  %v247_v54 = vld [vmem:[%s6641_s22 + $0x180] sm:$0xff]  ;;  %v250_v55 = vld [vmem:[%s6641_s22 + $0x198] sm:$0xff] }
  0x20   : > { %354 = vperm.xlu1 %6512, %v208_v12   ;;  %351 = vperm.xlu0 %6511, %v207_v13   ;;  %v249_v56 = vld [vmem:[%s6641_s22 + $0x190] sm:$0xff]  ;;  %v252_v57 = vld [vmem:[%s6641_s22 + $0x1a8] sm:$0xff]  ;;  %v251_v58 = vld [vmem:[%s6641_s22 + $0x1a0] sm:$0xff] }
  0x21   : > { %v254_v59 = vld [vmem:[%s6641_s22 + $0x1b8] sm:$0xff]  ;;  %v253_v60 = vld [vmem:[%s6641_s22 + $0x1b0] sm:$0xff]  ;;  %v256_v61 = vld [vmem:[%s6641_s22 + $0x1c8] sm:$0xff] }
  0x22   : > { %v255_v62 = vld [vmem:[%s6641_s22 + $0x1c0] sm:$0xff]  ;;  %v258_v63 = vld [vmem:[%s6641_s22 + $0x1d8] sm:$0xff]  ;;  %v257_v2 = vld [vmem:[%s6641_s22 + $0x1d0] sm:$0xff] }
  0x23   : > { %v260_v3 = vld [vmem:[%s6641_s22 + $0x1e8] sm:$0xff]  ;;  %v259_v4 = vld [vmem:[%s6641_s22 + $0x1e0] sm:$0xff]  ;;  %v262_v6 = vld [vmem:[%s6641_s22 + $0x1f8] sm:$0xff] }
  0x24   : > { %360 = vperm.xlu1 %6512, %v210_v14   ;;  %357 = vperm.xlu0 %6511, %v209_v15   ;;  %v261_v7 = vld [vmem:[%s6641_s22 + $0x1f0] sm:$0xff]  ;;  %v264_v10 = vld [vmem:[%s6641_s22 + $0x208] sm:$0xff]  ;;  %v263_v11 = vld [vmem:[%s6641_s22 + $0x200] sm:$0xff] }
  0x28   : > { %366 = vperm.xlu1 %6512, %v212_v16   ;;  %363 = vperm.xlu0 %6511, %v211_v17   ;;  %v266_v16 = vld [vmem:[%s6641_s22 + $0x218] sm:$0xff]  ;;  %v265_v17 = vld [vmem:[%s6641_s22 + $0x210] sm:$0xff] }
  0x2c   : > { %372 = vperm.xlu1 %6512, %v214_v19   ;;  %369 = vperm.xlu0 %6511, %v213_v20   ;;  %v268_v20 = vld [vmem:[%s6641_s22 + $0x228] sm:$0xff] }
  0x30   : > { %378 = vperm.xlu1 %6512, %v216_v21   ;;  %375 = vperm.xlu0 %6511, %v215_v22   ;;  %v267_v21 = vld [vmem:[%s6641_s22 + $0x220] sm:$0xff] }
  0x34   : > { %384 = vperm.xlu1 %6512, %v218_v23   ;;  %381 = vperm.xlu0 %6511, %v217_v24   ;;  %v270_v24 = vld [vmem:[%s6641_s22 + $0x238] sm:$0xff] }
  0x38   : > { %390 = vperm.xlu1 %6512, %v220_v25   ;;  %387 = vperm.xlu0 %6511, %v219_v26   ;;  %v269_v25 = vld [vmem:[%s6641_s22 + $0x230] sm:$0xff] }
  0x3c   : > { %396 = vperm.xlu1 %6512, %v222_v27   ;;  %393 = vperm.xlu0 %6511, %v221_v28  }
  0x40   : > { %402 = vperm.xlu1 %6512, %v224_v29   ;;  %399 = vperm.xlu0 %6511, %v223_v30   ;;  %v272_v29 = vld [vmem:[%s6641_s22 + $0x248] sm:$0xff]  ;;  %v271_v30 = vld [vmem:[%s6641_s22 + $0x240] sm:$0xff] }
  0x44   : > { %408 = vperm.xlu1 %6512, %v226_v31   ;;  %405 = vperm.xlu0 %6511, %v225_v32  }
  0x48   : > { %414 = vperm.xlu1 %6512, %v228_v33   ;;  %411 = vperm.xlu0 %6511, %v227_v34   ;;  %v274_v33 = vld [vmem:[%s6641_s22 + $0x258] sm:$0xff]  ;;  %v273_v34 = vld [vmem:[%s6641_s22 + $0x250] sm:$0xff] }
  0x4c   : > { %420 = vperm.xlu1 %6512, %v230_v35   ;;  %417 = vperm.xlu0 %6511, %v229_v36  }
  0x50   : > { %426 = vperm.xlu1 %6512, %v232_v37   ;;  %423 = vperm.xlu0 %6511, %v231_v38   ;;  %v276_v38 = vld [vmem:[%s6641_s22 + $0x268] sm:$0xff] }
  0x54   : > { %432 = vperm.xlu1 %6512, %v234_v39   ;;  %429 = vperm.xlu0 %6511, %v233_v40   ;;  %v275_v39 = vld [vmem:[%s6641_s22 + $0x260] sm:$0xff] }
  0x58   : > { %438 = vperm.xlu1 %6512, %v236_v41   ;;  %435 = vperm.xlu0 %6511, %v235_v42   ;;  %v278_v42 = vld [vmem:[%s6641_s22 + $0x278] sm:$0xff] }
  0x5c   : > { %444 = vperm.xlu1 %6512, %v238_v43   ;;  %441 = vperm.xlu0 %6511, %v237_v44   ;;  %v277_v43 = vld [vmem:[%s6641_s22 + $0x270] sm:$0xff] }
  0x60   : > { %450 = vperm.xlu1 %6512, %v240_v45   ;;  %447 = vperm.xlu0 %6511, %v239_v46  }
  0x64   : > { %456 = vperm.xlu1 %6512, %v242_v47   ;;  %453 = vperm.xlu0 %6511, %v241_v48   ;;  %v280_v47 = vld [vmem:[%s6641_s22 + $0x288] sm:$0xff]  ;;  %v279_v48 = vld [vmem:[%s6641_s22 + $0x280] sm:$0xff] }
  0x68   : > { %462 = vperm.xlu1 %6512, %v244_v49   ;;  %459 = vperm.xlu0 %6511, %v243_v50  }
  0x6c   : > { %468 = vperm.xlu1 %6512, %v246_v51   ;;  %465 = vperm.xlu0 %6511, %v245_v52   ;;  %v282_v51 = vld [vmem:[%s6641_s22 + $0x298] sm:$0xff]  ;;  %v281_v52 = vld [vmem:[%s6641_s22 + $0x290] sm:$0xff] }
  0x70   : > { %474 = vperm.xlu1 %6512, %v248_v53   ;;  %471 = vperm.xlu0 %6511, %v247_v54  }
  0x74   : > { %480 = vperm.xlu1 %6512, %v250_v55   ;;  %477 = vperm.xlu0 %6511, %v249_v56   ;;  %v284_v56 = vld [vmem:[%s6641_s22 + $0x2a8] sm:$0xff] }
  0x78   : > { %486 = vperm.xlu1 %6512, %v252_v57   ;;  %483 = vperm.xlu0 %6511, %v251_v58   ;;  %v283_v57 = vld [vmem:[%s6641_s22 + $0x2a0] sm:$0xff] }
  0x7c   : > { %492 = vperm.xlu1 %6512, %v254_v59   ;;  %489 = vperm.xlu0 %6511, %v253_v60   ;;  %v286_v60 = vld [vmem:[%s6641_s22 + $0x2b8] sm:$0xff] }
  0x80   : > { %498 = vperm.xlu1 %6512, %v256_v61   ;;  %495 = vperm.xlu0 %6511, %v255_v62   ;;  %v285_v61 = vld [vmem:[%s6641_s22 + $0x2b0] sm:$0xff] }
  0x84   : > { %504 = vperm.xlu1 %6512, %v258_v63   ;;  %501 = vperm.xlu0 %6511, %v257_v2  }
  0x88   : > { %510 = vperm.xlu1 %6512, %v260_v3   ;;  %507 = vperm.xlu0 %6511, %v259_v4   ;;  %v288_v3 = vld [vmem:[%s6641_s22 + $0x2c8] sm:$0xff]  ;;  %v287_v4 = vld [vmem:[%s6641_s22 + $0x2c0] sm:$0xff] }
  0x8b   : > { %v328_v9 = vpop.permute.xlu0 %327  ;;  %v334_v12 = vpop.permute.xlu1 %333 }
  0x8c   : > { %516 = vperm.xlu1 %6512, %v262_v6   ;;  %513 = vperm.xlu0 %6511, %v261_v7   ;;  %vm701_vm2 = vcmp.eq.s32.totalorder %v328_v9, %v6713_v8  ;;  %vm703_vm5 = vcmp.eq.s32.totalorder %v334_v12, %v6713_v8  ;;  %v290_v7 = vld [vmem:[%s6641_s22 + $0x2d8] sm:$0xff]  ;;  %v289_v9 = vld [vmem:[%s6641_s22 + $0x2d0] sm:$0xff] }
  0x8d   : > { %v4779_v14 = vsel %vm701_vm2, 1.0, %v6587_v1  ;;  %v4781_v22 = vsel %vm703_vm5, 1.0, %v6587_v1 }
  0x8f   : > { %v331_v13 = vpop.permute.xlu0 %330  ;;  %v337_v19 = vpop.permute.xlu1 %336 }
  0x90   : > { %vm702_vm3 = vcmp.eq.s32.totalorder %v331_v13, %v6713_v8  ;;  %522 = vperm.xlu1 %6512, %v264_v10   ;;  %519 = vperm.xlu0 %6511, %v263_v11   ;;  %vm704_vm6 = vcmp.eq.s32.totalorder %v337_v19, %v6713_v8  ;;  %v292_v13 = vld [vmem:[%s6641_s22 + $0x2e8] sm:$0xff] }
  0x91   : > { %v4780_v15 = vsel %vm702_vm3, 1.0, %v6587_v1  ;;  %v4782_v23 = vsel %vm704_vm6, 1.0, %v6587_v1 }
  0x92   : > { %v1076_v18 = vpack.c.bf16 %v4780_v15, %v4779_v14  ;;  %v1077_v28 = vpack.c.bf16 %v4782_v23, %v4781_v22  ;;  %v291_v14 = vld [vmem:[%s6641_s22 + $0x2e0] sm:$0xff]  ;;  %v296_v22 = vld [vmem:[%s6641_s22 + $0x308] sm:$0xff] }
  0x93   : > { %v343_v26 = vpop.permute.xlu1 %342  ;;  %v340_v27 = vpop.permute.xlu0 %339  ;;  %v295_v23 = vld [vmem:[%s6641_s22 + $0x300] sm:$0xff] }
  0x94   : > { %528 = vperm.xlu1 %6512, %v266_v16   ;;  %525 = vperm.xlu0 %6511, %v265_v17   ;;  %vm706_vm7 = vcmp.eq.s32.totalorder %v343_v26, %v6713_v8  ;;  %vm705_vm8 = vcmp.eq.s32.totalorder %v340_v27, %v6713_v8  ;;  %v294_v17 = vld [vmem:[%s6641_s22 + $0x2f8] sm:$0xff]  ;;  %v297_v27 = vld [vmem:[%s6641_s22 + $0x310] sm:$0xff] }
  0x95   : > { %6225 = vmatmul.mubr.msk.bf16.vlgmr.msra.gmra.mxu0 %vm1154_vm4, %v1076_v18  ;;  %v4784_v31 = vsel %vm706_vm7, 1.0, %v6587_v1  ;;  %v4783_v32 = vsel %vm705_vm8, 1.0, %v6587_v1  ;;  %v293_v18 = vld [vmem:[%s6641_s22 + $0x2f0] sm:$0xff]  ;;  %v298_v26 = vld [vmem:[%s6641_s22 + $0x318] sm:$0xff] }
  0x96   : > { %6228 = vmatprep.mubr.msk.bf16.mxu0 %vm6588_vm1, %v6587_v1  ;;  %v1078_v37 = vpack.c.bf16 %v4784_v31, %v4783_v32  ;;  %v300_v31 = vld [vmem:[%s6641_s22 + $0x328] sm:$0xff]  ;;  %v299_v32 = vld [vmem:[%s6641_s22 + $0x320] sm:$0xff] }
  0x97   : > { %v349_v35 = vpop.permute.xlu1 %348  ;;  %v346_v36 = vpop.permute.xlu0 %345 }
  0x98   : > { %534 = vperm.xlu1 %6512, %v268_v20   ;;  %531 = vperm.xlu0 %6511, %v267_v21   ;;  %vm708_vm9 = vcmp.eq.s32.totalorder %v349_v35, %v6713_v8  ;;  %vm707_vm10 = vcmp.eq.s32.totalorder %v346_v36, %v6713_v8  ;;  %v302_v35 = vld [vmem:[%s6641_s22 + $0x338] sm:$0xff]  ;;  %v301_v36 = vld [vmem:[%s6641_s22 + $0x330] sm:$0xff] }
  0x99   : > { %v4786_v40 = vsel %vm708_vm9, 1.0, %v6587_v1  ;;  %v4785_v41 = vsel %vm707_vm10, 1.0, %v6587_v1 }
  0x9a   : > { %v1079_v46 = vpack.c.bf16 %v4786_v40, %v4785_v41  ;;  %v304_v40 = vld [vmem:[%s6641_s22 + $0x348] sm:$0xff]  ;;  %v303_v41 = vld [vmem:[%s6641_s22 + $0x340] sm:$0xff] }
  0x9b   : > { %v355_v44 = vpop.permute.xlu1 %354  ;;  %v352_v45 = vpop.permute.xlu0 %351 }
  0x9c   : > { %540 = vperm.xlu1 %6512, %v270_v24   ;;  %537 = vperm.xlu0 %6511, %v269_v25   ;;  %vm710_vm11 = vcmp.eq.s32.totalorder %v355_v44, %v6713_v8  ;;  %vm709_vm12 = vcmp.eq.s32.totalorder %v352_v45, %v6713_v8  ;;  %v306_v44 = vld [vmem:[%s6641_s22 + $0x358] sm:$0xff]  ;;  %v305_v45 = vld [vmem:[%s6641_s22 + $0x350] sm:$0xff] }
  0x9d   : > { %6229 = vmatmul.mubr.msk.bf16.gmra.mxu0 %vm1154_vm4, %v1077_v28  ;;  %v4788_v49 = vsel %vm710_vm11, 1.0, %v6587_v1  ;;  %v4787_v50 = vsel %vm709_vm12, 1.0, %v6587_v1 }
  0x9e   : > { %6232 = vmatprep.mubr.msk.bf16.mxu0 %vm6588_vm1, %v6587_v1  ;;  %v1080_v55 = vpack.c.bf16 %v4788_v49, %v4787_v50  ;;  %v308_v49 = vld [vmem:[%s6641_s22 + $0x368] sm:$0xff]  ;;  %v307_v50 = vld [vmem:[%s6641_s22 + $0x360] sm:$0xff] }
  0x9f   : > { %v361_v53 = vpop.permute.xlu1 %360  ;;  %v358_v54 = vpop.permute.xlu0 %357 }
  0xa0   : > { %546 = vperm.xlu1 %6512, %v272_v29   ;;  %543 = vperm.xlu0 %6511, %v271_v30   ;;  %vm712_vm13 = vcmp.eq.s32.totalorder %v361_v53, %v6713_v8  ;;  %vm711_vm14 = vcmp.eq.s32.totalorder %v358_v54, %v6713_v8  ;;  %v310_v53 = vld [vmem:[%s6641_s22 + $0x378] sm:$0xff]  ;;  %v309_v54 = vld [vmem:[%s6641_s22 + $0x370] sm:$0xff] }
  0xa1   : > { %v4790_v58 = vsel %vm712_vm13, 1.0, %v6587_v1  ;;  %v4789_v59 = vsel %vm711_vm14, 1.0, %v6587_v1 }
  0xa2   : > { %v1081_v2 = vpack.c.bf16 %v4790_v58, %v4789_v59  ;;  %v312_v58 = vld [vmem:[%s6641_s22 + $0x388] sm:$0xff]  ;;  %v311_v59 = vld [vmem:[%s6641_s22 + $0x380] sm:$0xff] }
  0xa3   : > { %v367_v62 = vpop.permute.xlu1 %366  ;;  %v364_v63 = vpop.permute.xlu0 %363 }
  0xa4   : > { %552 = vperm.xlu1 %6512, %v274_v33   ;;  %549 = vperm.xlu0 %6511, %v273_v34   ;;  %vm714_vm15 = vcmp.eq.s32.totalorder %v367_v62, %v6713_v8  ;;  %vm713_vm0 = vcmp.eq.s32.totalorder %v364_v63, %v6713_v8  ;;  %v314_v62 = vld [vmem:[%s6641_s22 + $0x398] sm:$0xff]  ;;  %v313_v63 = vld [vmem:[%s6641_s22 + $0x390] sm:$0xff] }
  0xa5   : > { %6233 = vmatmul.mubr.msk.bf16.gmra.mxu0 %vm1154_vm4, %v1078_v37  ;;  %v4792_v5 = vsel %vm714_vm15, 1.0, %v6587_v1  ;;  %v4791_v6 = vsel %vm713_vm0, 1.0, %v6587_v1 }
  0xa6   : > { %6236 = vmatprep.mubr.msk.bf16.mxu0 %vm6588_vm1, %v6587_v1  ;;  %v1082_v12 = vpack.c.bf16 %v4792_v5, %v4791_v6  ;;  %v316_v5 = vld [vmem:[%s6641_s22 + $0x3a8] sm:$0xff]  ;;  %v315_v6 = vld [vmem:[%s6641_s22 + $0x3a0] sm:$0xff] }
  0xa7   : > { %v373_v10 = vpop.permute.xlu1 %372  ;;  %v370_v11 = vpop.permute.xlu0 %369 }
  0xa8   : > { %558 = vperm.xlu1 %6512, %v276_v38   ;;  %555 = vperm.xlu0 %6511, %v275_v39   ;;  %vm716_vm2 = vcmp.eq.s32.totalorder %v373_v10, %v6713_v8  ;;  %vm715_vm3 = vcmp.eq.s32.totalorder %v370_v11, %v6713_v8  ;;  %v318_v10 = vld [vmem:[%s6641_s22 + $0x3b8] sm:$0xff]  ;;  %v317_v11 = vld [vmem:[%s6641_s22 + $0x3b0] sm:$0xff] }
  0xa9   : > { %v4794_v15 = vsel %vm716_vm2, 1.0, %v6587_v1  ;;  %v4793_v16 = vsel %vm715_vm3, 1.0, %v6587_v1 }
  0xaa   : > { %v1083_v21 = vpack.c.bf16 %v4794_v15, %v4793_v16  ;;  %v320_v15 = vld [vmem:[%s6641_s22 + $0x3c8] sm:$0xff]  ;;  %v319_v16 = vld [vmem:[%s6641_s22 + $0x3c0] sm:$0xff] }
  0xab   : > { %v379_v19 = vpop.permute.xlu1 %378  ;;  %v376_v20 = vpop.permute.xlu0 %375 }
  0xac   : > { %564 = vperm.xlu1 %6512, %v278_v42   ;;  %561 = vperm.xlu0 %6511, %v277_v43   ;;  %vm718_vm5 = vcmp.eq.s32.totalorder %v379_v19, %v6713_v8  ;;  %vm717_vm6 = vcmp.eq.s32.totalorder %v376_v20, %v6713_v8  ;;  %v322_v19 = vld [vmem:[%s6641_s22 + $0x3d8] sm:$0xff]  ;;  %v321_v20 = vld [vmem:[%s6641_s22 + $0x3d0] sm:$0xff] }
  0xad   : > { %6237 = vmatmul.mubr.msk.bf16.gmra.mxu0 %vm1154_vm4, %v1079_v46  ;;  %v4796_v24 = vsel %vm718_vm5, 1.0, %v6587_v1  ;;  %v4795_v25 = vsel %vm717_vm6, 1.0, %v6587_v1 }
  0xae   : > { %6240 = vmatprep.mubr.msk.bf16.mxu0 %vm6588_vm1, %v6587_v1  ;;  %v1084_v30 = vpack.c.bf16 %v4796_v24, %v4795_v25  ;;  %v4495_v24 = vld [vmem:[%s7961_s3] sm:$0xff] }
  0xaf   : > { %v385_v28 = vpop.permute.xlu1 %384  ;;  %v382_v29 = vpop.permute.xlu0 %381  ;;  %v323_v25 = vld [vmem:[%s6641_s22 + $0x3e0] sm:$0xff] }
  0xb0   : > { %570 = vperm.xlu1 %6512, %v280_v47   ;;  %567 = vperm.xlu0 %6511, %v279_v48   ;;  %vm720_vm7 = vcmp.eq.s32.totalorder %v385_v28, %v6713_v8  ;;  %vm719_vm8 = vcmp.eq.s32.totalorder %v382_v29, %v6713_v8  ;;  %v4497_v28 = vld [vmem:[%s7961_s3 + $0x10] sm:$0xff]  ;;  %v4496_v29 = vld [vmem:[%s7961_s3 + $0x8] sm:$0xff] }
  0xb1   : > { %v4798_v33 = vsel %vm720_vm7, 1.0, %v6587_v1  ;;  %v4797_v34 = vsel %vm719_vm8, 1.0, %v6587_v1 }
  0xb2   : > { %v1085_v39 = vpack.c.bf16 %v4798_v33, %v4797_v34  ;;  %v4498_v33 = vld [vmem:[%s7961_s3 + $0x18] sm:$0xff] }
  0xb3   : > { %v391_v37 = vpop.permute.xlu1 %390  ;;  %v388_v38 = vpop.permute.xlu0 %387 }
  0xb4   : > { %576 = vperm.xlu1 %6512, %v282_v51   ;;  %573 = vperm.xlu0 %6511, %v281_v52   ;;  %vm722_vm9 = vcmp.eq.s32.totalorder %v391_v37, %v6713_v8  ;;  %vm721_vm10 = vcmp.eq.s32.totalorder %v388_v38, %v6713_v8 }
  0xb5   : > { %6241 = vmatmul.mubr.msk.bf16.gmra.mxu0 %vm1154_vm4, %v1080_v55  ;;  %v4800_v42 = vsel %vm722_vm9, 1.0, %v6587_v1  ;;  %v4799_v43 = vsel %vm721_vm10, 1.0, %v6587_v1 }
  0xb6   : > { %6244 = vmatprep.mubr.msk.bf16.mxu0 %vm6588_vm1, %v6587_v1  ;;  %v1086_v48 = vpack.c.bf16 %v4800_v42, %v4799_v43 }
  0xb7   : > { %v397_v46 = vpop.permute.xlu1 %396  ;;  %v394_v47 = vpop.permute.xlu0 %393 }
  0xb8   : > { %582 = vperm.xlu1 %6512, %v284_v56   ;;  %579 = vperm.xlu0 %6511, %v283_v57   ;;  %vm724_vm11 = vcmp.eq.s32.totalorder %v397_v46, %v6713_v8  ;;  %vm723_vm12 = vcmp.eq.s32.totalorder %v394_v47, %v6713_v8 }
  0xb9   : > { %v4802_v51 = vsel %vm724_vm11, 1.0, %v6587_v1  ;;  %v4801_v52 = vsel %vm723_vm12, 1.0, %v6587_v1 }
  0xba   : > { %v1087_v57 = vpack.c.bf16 %v4802_v51, %v4801_v52 }
  0xbb   : > { %v403_v55 = vpop.permute.xlu1 %402  ;;  %v400_v56 = vpop.permute.xlu0 %399 }
  0xbc   : > { %588 = vperm.xlu1 %6512, %v286_v60   ;;  %585 = vperm.xlu0 %6511, %v285_v61   ;;  %vm726_vm13 = vcmp.eq.s32.totalorder %v403_v55, %v6713_v8  ;;  %vm725_vm14 = vcmp.eq.s32.totalorder %v400_v56, %v6713_v8 }
  0xbd   : > { %6245 = vmatmul.mubr.msk.bf16.gmra.mxu0 %vm1154_vm4, %v1081_v2  ;;  %v4804_v60 = vsel %vm726_vm13, 1.0, %v6587_v1  ;;  %v4803_v61 = vsel %vm725_vm14, 1.0, %v6587_v1 }
  0xbe   : > { %6248 = vmatprep.mubr.msk.bf16.mxu0 %vm6588_vm1, %v6587_v1 }
  0xbf   : > { %v409_v2 = vpop.permute.xlu1 %408 }
  0xc0   : > { %594 = vperm.xlu1 %6512, %v288_v3   ;;  %591 = vperm.xlu0 %6511, %v287_v4   ;;  %v406_v3 = vpop.permute.xlu0 %405  ;;  %v1088_v4 = vpack.c.bf16 %v4804_v60, %v4803_v61  ;;  %vm728_vm15 = vcmp.eq.s32.totalorder %v409_v2, %v6713_v8 }
  0xc1   : > { %vm727_vm0 = vcmp.eq.s32.totalorder %v406_v3, %v6713_v8 }
  0xc4   : > { %600 = vperm.xlu1 %6512, %v290_v7   ;;  %597 = vperm.xlu0 %6511, %v289_v9   ;;  %v4806_v7 = vsel %vm728_vm15, 1.0, %v6587_v1  ;;  %v4805_v9 = vsel %vm727_vm0, 1.0, %v6587_v1 }
  0xc5   : > { %6249 = vmatmul.mubr.msk.bf16.gmra.mxu0 %vm1154_vm4, %v1082_v12  ;;  %v415_v12 = vpop.permute.xlu1 %414 }
  0xc6   : > { %6252 = vmatprep.mubr.msk.bf16.mxu0 %vm6588_vm1, %v6587_v1  ;;  %vm730_vm2 = vcmp.eq.s32.totalorder %v415_v12, %v6713_v8 }
  0xc8   : > { %606 = vperm.xlu1 %6512, %v292_v13   ;;  %603 = vperm.xlu0 %6511, %v291_v14   ;;  %v412_v13 = vpop.permute.xlu0 %411  ;;  %v1089_v14 = vpack.c.bf16 %v4806_v7, %v4805_v9 }
  0xc9   : > { %vm729_vm3 = vcmp.eq.s32.totalorder %v412_v13, %v6713_v8 }
  0xcc   : > { %612 = vperm.xlu1 %6512, %v294_v17   ;;  %609 = vperm.xlu0 %6511, %v293_v18   ;;  %v4808_v17 = vsel %vm730_vm2, 1.0, %v6587_v1  ;;  %v4807_v18 = vsel %vm729_vm3, 1.0, %v6587_v1 }
  0xcd   : > { %6253 = vmatmul.mubr.msk.bf16.gmra.mxu0 %vm1154_vm4, %v1083_v21  ;;  %v421_v21 = vpop.permute.xlu1 %420 }
  0xce   : > { %6256 = vmatprep.mubr.msk.bf16.mxu0 %vm6588_vm1, %v6587_v1  ;;  %vm732_vm5 = vcmp.eq.s32.totalorder %v421_v21, %v6713_v8 }
  0xd0   : > { %618 = vperm.xlu1 %6512, %v296_v22   ;;  %615 = vperm.xlu0 %6511, %v295_v23   ;;  %v418_v22 = vpop.permute.xlu0 %417  ;;  %v1090_v23 = vpack.c.bf16 %v4808_v17, %v4807_v18 }
  0xd1   : > { %vm731_vm6 = vcmp.eq.s32.totalorder %v418_v22, %v6713_v8 }
  0xd4   : > { %624 = vperm.xlu1 %6512, %v298_v26   ;;  %621 = vperm.xlu0 %6511, %v297_v27   ;;  %v4810_v26 = vsel %vm732_vm5, 1.0, %v6587_v1  ;;  %v4809_v27 = vsel %vm731_vm6, 1.0, %v6587_v1 }
  0xd5   : > { %6257 = vmatmul.mubr.msk.bf16.gmra.mxu0 %vm1154_vm4, %v1084_v30  ;;  %v427_v30 = vpop.permute.xlu1 %426 }
  0xd6   : > { %6260 = vmatprep.mubr.msk.bf16.mxu0 %vm6588_vm1, %v6587_v1  ;;  %vm734_vm7 = vcmp.eq.s32.totalorder %v427_v30, %v6713_v8 }
  0xd7   : > { %v4812_v34 = vsel %vm734_vm7, 1.0, %v6587_v1 }
  0xd8   : > { %630 = vperm.xlu1 %6512, %v300_v31   ;;  %627 = vperm.xlu0 %6511, %v299_v32   ;;  %v424_v31 = vpop.permute.xlu0 %423  ;;  %v1091_v32 = vpack.c.bf16 %v4810_v26, %v4809_v27 }
  0xd9   : > { %vm733_vm8 = vcmp.eq.s32.totalorder %v424_v31, %v6713_v8 }
  0xdc   : > { %636 = vperm.xlu1 %6512, %v302_v35   ;;  %633 = vperm.xlu0 %6511, %v301_v36   ;;  %v4811_v35 = vsel %vm733_vm8, 1.0, %v6587_v1  ;;  %v433_v36 = vpop.permute.xlu1 %432  ;;  %v430_v37 = vpop.permute.xlu0 %429 }
  0xdd   : > { %6261 = vmatmul.mubr.msk.bf16.gmra.mxu0 %vm1154_vm4, %v1085_v39  ;;  %v1092_v38 = vpack.c.bf16 %v4812_v34, %v4811_v35  ;;  %vm736_vm9 = vcmp.eq.s32.totalorder %v433_v36, %v6713_v8  ;;  %vm735_vm10 = vcmp.eq.s32.totalorder %v430_v37, %v6713_v8 }
  0xde   : > { %6264 = vmatprep.mubr.msk.bf16.mxu0 %vm6588_vm1, %v6587_v1  ;;  %v4814_v39 = vsel %vm736_vm9, 1.0, %v6587_v1 }
  0xe0   : > { %642 = vperm.xlu1 %6512, %v304_v40   ;;  %639 = vperm.xlu0 %6511, %v303_v41   ;;  %v4813_v40 = vsel %vm735_vm10, 1.0, %v6587_v1  ;;  %v439_v41 = vpop.permute.xlu1 %438  ;;  %v436_v42 = vpop.permute.xlu0 %435 }
  0xe1   : > { %v1093_v43 = vpack.c.bf16 %v4814_v39, %v4813_v40  ;;  %vm738_vm11 = vcmp.eq.s32.totalorder %v439_v41, %v6713_v8  ;;  %vm737_vm12 = vcmp.eq.s32.totalorder %v436_v42, %v6713_v8 }
  0xe4   : > { %648 = vperm.xlu1 %6512, %v306_v44   ;;  %645 = vperm.xlu0 %6511, %v305_v45   ;;  %v4816_v44 = vsel %vm738_vm11, 1.0, %v6587_v1  ;;  %v4815_v45 = vsel %vm737_vm12, 1.0, %v6587_v1  ;;  %v445_v46 = vpop.permute.xlu1 %444  ;;  %v442_v47 = vpop.permute.xlu0 %441 }
  0xe5   : > { %6265 = vmatmul.mubr.msk.bf16.gmra.mxu0 %vm1154_vm4, %v1086_v48  ;;  %v1094_v48 = vpack.c.bf16 %v4816_v44, %v4815_v45  ;;  %vm740_vm13 = vcmp.eq.s32.totalorder %v445_v46, %v6713_v8  ;;  %vm739_vm14 = vcmp.eq.s32.totalorder %v442_v47, %v6713_v8 }
  0xe6   : > { %6268 = vmatprep.mubr.msk.bf16.mxu0 %vm6588_vm1, %v6587_v1 }
  0xe8   : > { %654 = vperm.xlu1 %6512, %v308_v49   ;;  %651 = vperm.xlu0 %6511, %v307_v50   ;;  %v4818_v49 = vsel %vm740_vm13, 1.0, %v6587_v1  ;;  %v4817_v50 = vsel %vm739_vm14, 1.0, %v6587_v1  ;;  %v451_v51 = vpop.permute.xlu1 %450  ;;  %v448_v52 = vpop.permute.xlu0 %447 }
  0xe9   : > { %vm742_vm15 = vcmp.eq.s32.totalorder %v451_v51, %v6713_v8  ;;  %vm741_vm0 = vcmp.eq.s32.totalorder %v448_v52, %v6713_v8 }
  0xea   : > { %v4819_v55 = vsel %vm741_vm0, 1.0, %v6587_v1 }
  0xec   : > { %660 = vperm.xlu1 %6512, %v310_v53   ;;  %657 = vperm.xlu0 %6511, %v309_v54   ;;  %v1095_v53 = vpack.c.bf16 %v4818_v49, %v4817_v50  ;;  %v4820_v54 = vsel %vm742_vm15, 1.0, %v6587_v1  ;;  %v457_v56 = vpop.permute.xlu1 %456 }
  0xed   : > { %6269 = vmatmul.mubr.msk.bf16.gmra.mxu0 %vm1154_vm4, %v1087_v57  ;;  %v454_v57 = vpop.permute.xlu0 %453  ;;  %vm744_vm2 = vcmp.eq.s32.totalorder %v457_v56, %v6713_v8 }
  0xee   : > { %6272 = vmatprep.mubr.msk.bf16.mxu0 %vm6588_vm1, %v6587_v1  ;;  %vm743_vm3 = vcmp.eq.s32.totalorder %v454_v57, %v6713_v8 }
  0xef   : > { %v4821_v60 = vsel %vm743_vm3, 1.0, %v6587_v1 }
  0xf0   : > { %666 = vperm.xlu1 %6512, %v312_v58   ;;  %663 = vperm.xlu0 %6511, %v311_v59   ;;  %v1096_v58 = vpack.c.bf16 %v4820_v54, %v4819_v55  ;;  %v4822_v59 = vsel %vm744_vm2, 1.0, %v6587_v1  ;;  %v463_v61 = vpop.permute.xlu1 %462 }
  0xf1   : > { %vm746_vm5 = vcmp.eq.s32.totalorder %v463_v61, %v6713_v8 }
  0xf2   : > { %v4824_v2 = vsel %vm746_vm5, 1.0, %v6587_v1 }
  0xf4   : > { %672 = vperm.xlu1 %6512, %v314_v62   ;;  %669 = vperm.xlu0 %6511, %v313_v63   ;;  %v460_v62 = vpop.permute.xlu0 %459  ;;  %v1097_v63 = vpack.c.bf16 %v4822_v59, %v4821_v60 }
  0xf5   : > { %6273 = vmatmul.mubr.msk.bf16.gmra.mxu0 %vm1154_vm4, %v1088_v4  ;;  %vm745_vm6 = vcmp.eq.s32.totalorder %v460_v62, %v6713_v8  ;;  %v469_v4 = vpop.permute.xlu1 %468 }
  0xf6   : > { %6276 = vmatprep.mubr.msk.bf16.mxu0 %vm6588_vm1, %v6587_v1  ;;  %v4823_v3 = vsel %vm745_vm6, 1.0, %v6587_v1  ;;  %vm748_vm7 = vcmp.eq.s32.totalorder %v469_v4, %v6713_v8 }
  0xf7   : > { %v4826_v7 = vsel %vm748_vm7, 1.0, %v6587_v1 }
  0xf8   : > { %678 = vperm.xlu1 %6512, %v316_v5   ;;  %675 = vperm.xlu0 %6511, %v315_v6   ;;  %v466_v5 = vpop.permute.xlu0 %465  ;;  %v1098_v6 = vpack.c.bf16 %v4824_v2, %v4823_v3 }
  0xf9   : > { %vm747_vm8 = vcmp.eq.s32.totalorder %v466_v5, %v6713_v8 }
  0xfa   : > { %v4825_v9 = vsel %vm747_vm8, 1.0, %v6587_v1 }
  0xfb   : > { %v1099_v12 = vpack.c.bf16 %v4826_v7, %v4825_v9 }
  0xfc   : > { %684 = vperm.xlu1 %6512, %v318_v10   ;;  %681 = vperm.xlu0 %6511, %v317_v11   ;;  %v475_v10 = vpop.permute.xlu1 %474  ;;  %v472_v11 = vpop.permute.xlu0 %471 }
  0xfd   : > { %6277 = vmatmul.mubr.msk.bf16.gmra.mxu0 %vm1154_vm4, %v1089_v14  ;;  %vm750_vm9 = vcmp.eq.s32.totalorder %v475_v10, %v6713_v8  ;;  %vm749_vm10 = vcmp.eq.s32.totalorder %v472_v11, %v6713_v8 }
  0xfe   : > { %6280 = vmatprep.mubr.msk.bf16.mxu0 %vm6588_vm1, %v6587_v1  ;;  %v4828_v13 = vsel %vm750_vm9, 1.0, %v6587_v1  ;;  %v4827_v14 = vsel %vm749_vm10, 1.0, %v6587_v1 }
  0xff   : > { %v1100_v17 = vpack.c.bf16 %v4828_v13, %v4827_v14 }
 0x100   : > { %690 = vperm.xlu1 %6512, %v320_v15   ;;  %687 = vperm.xlu0 %6511, %v319_v16   ;;  %v481_v15 = vpop.permute.xlu1 %480  ;;  %v478_v16 = vpop.permute.xlu0 %477 }
 0x101   : > { %vm752_vm11 = vcmp.eq.s32.totalorder %v481_v15, %v6713_v8  ;;  %vm751_vm12 = vcmp.eq.s32.totalorder %v478_v16, %v6713_v8 }
 0x102   : > { %v4829_v21 = vsel %vm751_vm12, 1.0, %v6587_v1 }
 0x104   : > { %696 = vperm.xlu1 %6512, %v322_v19   ;;  %693 = vperm.xlu0 %6511, %v321_v20   ;;  %v4830_v20 = vsel %vm752_vm11, 1.0, %v6587_v1 }
 0x105   : > { %6281 = vmatmul.mubr.msk.bf16.gmra.mxu0 %vm1154_vm4, %v1090_v23  ;;  %v487_v23 = vpop.permute.xlu1 %486  ;;  %v1101_v26 = vpack.c.bf16 %v4830_v20, %v4829_v21 }
 0x106   : > { %6284 = vmatprep.mubr.msk.bf16.mxu0 %vm6588_vm1, %v6587_v1  ;;  %vm754_vm13 = vcmp.eq.s32.totalorder %v487_v23, %v6713_v8 }
 0x107   : > { %v4832_v30 = vsel %vm754_vm13, 1.0, %v6587_v1 }
 0x108   : > { %4501 = vperm.xlu1 %6512, %v4495_v24   ;;  %699 = vperm.xlu0 %6511, %v323_v25   ;;  %v484_v24 = vpop.permute.xlu0 %483 }
 0x109   : > { %vm753_vm14 = vcmp.eq.s32.totalorder %v484_v24, %v6713_v8 }
 0x10a   : > { %v4831_v31 = vsel %vm753_vm14, 1.0, %v6587_v1 }
 0x10b   : > { %v1102_v36 = vpack.c.bf16 %v4832_v30, %v4831_v31 }
 0x10c   : > { %4511 = vperm.xlu1 %6512, %v4497_v28   ;;  %4506 = vperm.xlu0 %6511, %v4496_v29   ;;  %v490_v34 = vpop.permute.xlu0 %489 }
 0x10d   : > { %6285 = vmatmul.mubr.msk.bf16.gmra.mxu0 %vm1154_vm4, %v1091_v32  ;;  %vm755_vm0 = vcmp.eq.s32.totalorder %v490_v34, %v6713_v8 }
 0x10e   : > { %6288 = vmatprep.mubr.msk.bf16.mxu0 %vm6588_vm1, %v6587_v1  ;;  %v4833_v41 = vsel %vm755_vm0, 1.0, %v6587_v1 }
 0x110   : > { %4516 = vperm.xlu0 %6511, %v4498_v33   ;;  %v493_v33 = vpop.permute.xlu1 %492  ;;  %v496_v44 = vpop.permute.xlu0 %495 }
 0x111   : > { %vm756_vm15 = vcmp.eq.s32.totalorder %v493_v33, %v6713_v8  ;;  %vm757_vm3 = vcmp.eq.s32.totalorder %v496_v44, %v6713_v8 }
 0x112   : > { %v4834_v40 = vsel %vm756_vm15, 1.0, %v6587_v1  ;;  %v4835_v51 = vsel %vm757_vm3, 1.0, %v6587_v1 }
 0x113   : > { %v1103_v46 = vpack.c.bf16 %v4834_v40, %v4833_v41 }
 0x114   : > { %v502_v54 = vpop.permute.xlu0 %501 }
 0x115   : > { %6289 = vmatmul.mubr.msk.bf16.gmra.mxu0 %vm1154_vm4, %v1092_v38  ;;  %vm759_vm6 = vcmp.eq.s32.totalorder %v502_v54, %v6713_v8 }
 0x116   : > { %6292 = vmatprep.mubr.msk.bf16.mxu0 %vm6588_vm1, %v6587_v1  ;;  %v4837_v61 = vsel %vm759_vm6, 1.0, %v6587_v1 }
 0x118   : > { %v508_v2 = vpop.permute.xlu0 %507 }
 0x119   : > { %vm761_vm8 = vcmp.eq.s32.totalorder %v508_v2, %v6713_v8 }
 0x11a   : > { %v4839_v10 = vsel %vm761_vm8, 1.0, %v6587_v1 }
 0x11c   : > { %v514_v13 = vpop.permute.xlu0 %513 }
 0x11d   : > { %6293 = vmatmul.mubr.msk.bf16.gmra.mxu0 %vm1154_vm4, %v1093_v43  ;;  %v499_v43 = vpop.permute.xlu1 %498  ;;  %vm763_vm10 = vcmp.eq.s32.totalorder %v514_v13, %v6713_v8 }
 0x11e   : > { %6296 = vmatprep.mubr.msk.bf16.mxu0 %vm6588_vm1, %v6587_v1  ;;  %vm758_vm2 = vcmp.eq.s32.totalorder %v499_v43, %v6713_v8  ;;  %v4841_v24 = vsel %vm763_vm10, 1.0, %v6587_v1 }
 0x11f   : > { %v4836_v50 = vsel %vm758_vm2, 1.0, %v6587_v1 }
 0x120   : > { %v1104_v56 = vpack.c.bf16 %v4836_v50, %v4835_v51 }
 0x125   : > { %6297 = vmatmul.mubr.msk.bf16.gmra.mxu0 %vm1154_vm4, %v1094_v48 }
 0x126   : > { %6300 = vmatprep.mubr.msk.bf16.mxu0 %vm6588_vm1, %v6587_v1 }
 0x12d   : > { %6301 = vmatmul.mubr.msk.bf16.gmra.mxu0 %vm1154_vm4, %v1095_v53  ;;  %v505_v53 = vpop.permute.xlu1 %504 }
 0x12e   : > { %6304 = vmatprep.mubr.msk.bf16.mxu0 %vm6588_vm1, %v6587_v1  ;;  %vm760_vm5 = vcmp.eq.s32.totalorder %v505_v53, %v6713_v8 }
 0x12f   : > { %v4838_v60 = vsel %vm760_vm5, 1.0, %v6587_v1 }
 0x130   : > { %v1105_v4 = vpack.c.bf16 %v4838_v60, %v4837_v61 }
 0x135   : > { %6305 = vmatmul.mubr.msk.bf16.gmra.mxu0 %vm1154_vm4, %v1096_v58 }
 0x136   : > { %6308 = vmatprep.mubr.msk.bf16.mxu0 %vm6588_vm1, %v6587_v1 }
 0x13d   : > { %6309 = vmatmul.mubr.msk.bf16.gmra.mxu0 %vm1154_vm4, %v1097_v63  ;;  %v511_v63 = vpop.permute.xlu1 %510 }
 0x13e   : > { %6312 = vmatprep.mubr.msk.bf16.mxu0 %vm6588_vm1, %v6587_v1  ;;  %vm762_vm7 = vcmp.eq.s32.totalorder %v511_v63, %v6713_v8 }
 0x13f   : > { %v4840_v9 = vsel %vm762_vm7, 1.0, %v6587_v1 }
 0x140   : > { %v1106_v15 = vpack.c.bf16 %v4840_v9, %v4839_v10 }
 0x145   : > { %6313 = vmatmul.mubr.msk.bf16.gmra.mxu0 %vm1154_vm4, %v1098_v6 }
 0x146   : > { %6316 = vmatprep.mubr.msk.bf16.mxu0 %vm6588_vm1, %v6587_v1 }
 0x14d   : > { %6317 = vmatmul.mubr.msk.bf16.gmra.mxu0 %vm1154_vm4, %v1099_v12  ;;  %v517_v12 = vpop.permute.xlu1 %516 }
 0x14e   : > { %6320 = vmatprep.mubr.msk.bf16.mxu0 %vm6588_vm1, %v6587_v1  ;;  %vm764_vm9 = vcmp.eq.s32.totalorder %v517_v12, %v6713_v8 }
 0x14f   : > { %v4842_v23 = vsel %vm764_vm9, 1.0, %v6587_v1 }
 0x155   : > { %v1382_v18 = vpop.f32.mrf.mxu0  ;;  %6321 = vmatmul.mubr.msk.bf16.gmra.mxu0 %vm1154_vm4, %v1100_v17  ;;  %v7005_v17 = vld [vmem:[%s7960_s2 + $0x80] sm:$0xff] }
 0x156   : > { %6324 = vmatprep.mubr.msk.bf16.mxu0 %vm6588_vm1, %v6587_v1 }
 0x157   : > { %v6226_v19 = vpop.f32.mrf.mxu0 }
 0x159   : > { %v1385_v22 = vpop.f32.mrf.mxu0 }
 0x15a   : > { %v5440_v25 = vpack.c.bf16 %v1385_v22, %v1382_v18  ;;  %v7010_v18 = vld [vmem:[%s7960_s2 + $0xa0] sm:$0xff] }
 0x15b   : > { %v6227_v27 = vpop.f32.mrf.mxu0  ;;  %v5111_v20 = vcombine.high %v7005_v17, %v7010_v18  ;;  %v5110_v21 = vcombine.low %v7005_v17, %v7010_v18 }
 0x15c   : > { %5441 = vst [vmem:[#allocation2] sm:$0xff] %v5440_v25   ;;  %v520_v27 = vpop.permute.xlu0 %519 }
 0x15d   : > { %v1390_v28 = vpop.f32.mrf.mxu0  ;;  %6325 = vmatmul.mubr.msk.bf16.gmra.mxu0 %vm1154_vm4, %v1101_v26  ;;  %3863 = vmatprep.mubr.bf16.mxu1 %v5111_v20  ;;  %v523_v26 = vpop.permute.xlu1 %522  ;;  %vm765_vm12 = vcmp.eq.s32.totalorder %v520_v27, %v6713_v8 }
 0x15e   : > { %6328 = vmatprep.mubr.msk.bf16.mxu0 %vm6588_vm1, %v6587_v1  ;;  %vm766_vm11 = vcmp.eq.s32.totalorder %v523_v26, %v6713_v8  ;;  %v4843_v34 = vsel %vm765_vm12, 1.0, %v6587_v1 }
 0x15f   : > { %v6230_v29 = vpop.f32.mrf.mxu0  ;;  %v4844_v33 = vsel %vm766_vm11, 1.0, %v6587_v1 }
 0x160   : > { %v1107_v29 = vpack.c.bf16 %v4842_v23, %v4841_v24 }
 0x161   : > { %v1393_v32 = vpop.f32.mrf.mxu0 }
 0x162   : > { %v5445_v35 = vpack.c.bf16 %v1393_v32, %v1390_v28 }
 0x163   : > { %v6231_v37 = vpop.f32.mrf.mxu0 }
 0x164   : > { %5757 = vst [vmem:[#allocation2 + $0x8] sm:$0xff] %v5445_v35   ;;  %v526_v37 = vpop.permute.xlu0 %525 }
 0x165   : > { %v1398_v38 = vpop.f32.mrf.mxu0  ;;  %6329 = vmatmul.mubr.msk.bf16.gmra.mxu0 %vm1154_vm4, %v1102_v36  ;;  %v529_v36 = vpop.permute.xlu1 %528  ;;  %vm767_vm14 = vcmp.eq.s32.totalorder %v526_v37, %v6713_v8 }
 0x166   : > { %6332 = vmatprep.mubr.msk.bf16.mxu0 %vm6588_vm1, %v6587_v1  ;;  %vm768_vm13 = vcmp.eq.s32.totalorder %v529_v36, %v6713_v8  ;;  %v4845_v44 = vsel %vm767_vm14, 1.0, %v6587_v1 }
 0x167   : > { %v6234_v39 = vpop.f32.mrf.mxu0  ;;  %v4846_v43 = vsel %vm768_vm13, 1.0, %v6587_v1 }
 0x168   : > { %v1108_v39 = vpack.c.bf16 %v4844_v33, %v4843_v34 }
 0x169   : > { %v1401_v42 = vpop.f32.mrf.mxu0 }
 0x16a   : > { %v5450_v45 = vpack.c.bf16 %v1401_v42, %v1398_v38 }
 0x16b   : > { %v6235_v47 = vpop.f32.mrf.mxu0 }
 0x16c   : > { %5758 = vst [vmem:[#allocation2 + $0x10] sm:$0xff] %v5450_v45   ;;  %v532_v47 = vpop.permute.xlu0 %531 }
 0x16d   : > { %v1406_v48 = vpop.f32.mrf.mxu0  ;;  %6333 = vmatmul.mubr.msk.bf16.gmra.mxu0 %vm1154_vm4, %v1103_v46  ;;  %v535_v46 = vpop.permute.xlu1 %534  ;;  %vm769_vm0 = vcmp.eq.s32.totalorder %v532_v47, %v6713_v8 }
 0x16e   : > { %6336 = vmatprep.mubr.msk.bf16.mxu0 %vm6588_vm1, %v6587_v1  ;;  %vm770_vm15 = vcmp.eq.s32.totalorder %v535_v46, %v6713_v8  ;;  %v4847_v54 = vsel %vm769_vm0, 1.0, %v6587_v1 }
 0x16f   : > { %v6238_v49 = vpop.f32.mrf.mxu0  ;;  %v4848_v53 = vsel %vm770_vm15, 1.0, %v6587_v1 }
 0x170   : > { %v1109_v49 = vpack.c.bf16 %v4846_v43, %v4845_v44 }
 0x171   : > { %v1409_v52 = vpop.f32.mrf.mxu0 }
 0x172   : > { %v5455_v55 = vpack.c.bf16 %v1409_v52, %v1406_v48 }
 0x173   : > { %v6239_v57 = vpop.f32.mrf.mxu0 }
 0x174   : > { %5759 = vst [vmem:[#allocation2 + $0x18] sm:$0xff] %v5455_v55   ;;  %v538_v57 = vpop.permute.xlu0 %537 }
 0x175   : > { %v1414_v58 = vpop.f32.mrf.mxu0  ;;  %6337 = vmatmul.mubr.msk.bf16.gmra.mxu0 %vm1154_vm4, %v1104_v56  ;;  %v541_v56 = vpop.permute.xlu1 %540  ;;  %vm771_vm3 = vcmp.eq.s32.totalorder %v538_v57, %v6713_v8 }
 0x176   : > { %6340 = vmatprep.mubr.msk.bf16.mxu0 %vm6588_vm1, %v6587_v1  ;;  %vm772_vm2 = vcmp.eq.s32.totalorder %v541_v56, %v6713_v8  ;;  %v4849_v2 = vsel %vm771_vm3, 1.0, %v6587_v1 }
 0x177   : > { %v6242_v59 = vpop.f32.mrf.mxu0  ;;  %v4850_v63 = vsel %vm772_vm2, 1.0, %v6587_v1 }
 0x178   : > { %v1110_v59 = vpack.c.bf16 %v4848_v53, %v4847_v54 }
 0x179   : > { %v1417_v62 = vpop.f32.mrf.mxu0 }
 0x17a   : > { %v5460_v3 = vpack.c.bf16 %v1417_v62, %v1414_v58 }
 0x17b   : > { %v6243_v5 = vpop.f32.mrf.mxu0 }
 0x17c   : > { %5760 = vst [vmem:[#allocation2 + $0x20] sm:$0xff] %v5460_v3   ;;  %v544_v5 = vpop.permute.xlu0 %543 }
 0x17d   : > { %v1422_v6 = vpop.f32.mrf.mxu0  ;;  %6341 = vmatmul.mubr.msk.bf16.gmra.mxu0 %vm1154_vm4, %v1105_v4  ;;  %v547_v4 = vpop.permute.xlu1 %546  ;;  %vm773_vm6 = vcmp.eq.s32.totalorder %v544_v5, %v6713_v8 }
 0x17e   : > { %6344 = vmatprep.mubr.msk.bf16.mxu0 %vm6588_vm1, %v6587_v1  ;;  %vm774_vm5 = vcmp.eq.s32.totalorder %v547_v4, %v6713_v8  ;;  %v4851_v13 = vsel %vm773_vm6, 1.0, %v6587_v1 }
 0x17f   : > { %v6246_v7 = vpop.f32.mrf.mxu0  ;;  %v4852_v12 = vsel %vm774_vm5, 1.0, %v6587_v1 }
 0x180   : > { %v1111_v7 = vpack.c.bf16 %v4850_v63, %v4849_v2  ;;  %v1112_v20 = vpack.c.bf16 %v4852_v12, %v4851_v13 }
 0x181   : > { %v1425_v11 = vpop.f32.mrf.mxu0 }
 0x182   : > { %v5465_v14 = vpack.c.bf16 %v1425_v11, %v1422_v6 }
 0x183   : > { %v6247_v16 = vpop.f32.mrf.mxu0 }
 0x184   : > { %5761 = vst [vmem:[#allocation2 + $0x28] sm:$0xff] %v5465_v14   ;;  %v550_v16 = vpop.permute.xlu0 %549 }
 0x185   : > { %v1430_v19 = vpop.f32.mrf.mxu0  ;;  %6345 = vmatmul.mubr.msk.bf16.gmra.mxu0 %vm1154_vm4, %v1106_v15  ;;  %v553_v15 = vpop.permute.xlu1 %552  ;;  %vm775_vm8 = vcmp.eq.s32.totalorder %v550_v16, %v6713_v8 }
 0x186   : > { %6348 = vmatprep.mubr.msk.bf16.mxu0 %vm6588_vm1, %v6587_v1  ;;  %vm776_vm7 = vcmp.eq.s32.totalorder %v553_v15, %v6713_v8  ;;  %v4853_v26 = vsel %vm775_vm8, 1.0, %v6587_v1 }
 0x187   : > { %v6250_v22 = vpop.f32.mrf.mxu0 }
 0x189   : > { %v1433_v25 = vpop.f32.mrf.mxu0 }
 0x18a   : > { %v5470_v28 = vpack.c.bf16 %v1433_v25, %v1430_v19  ;;  %v4854_v25 = vsel %vm776_vm7, 1.0, %v6587_v1 }
 0x18b   : > { %v6251_v30 = vpop.f32.mrf.mxu0 }
 0x18c   : > { %5762 = vst [vmem:[#allocation2 + $0x30] sm:$0xff] %v5470_v28   ;;  %v559_v28 = vpop.permute.xlu1 %558 }
 0x18d   : > { %v1438_v31 = vpop.f32.mrf.mxu0  ;;  %6349 = vmatmul.mubr.msk.bf16.gmra.mxu0 %vm1154_vm4, %v1107_v29  ;;  %v556_v29 = vpop.permute.xlu0 %555  ;;  %vm778_vm9 = vcmp.eq.s32.totalorder %v559_v28, %v6713_v8 }
 0x18e   : > { %6352 = vmatprep.mubr.msk.bf16.mxu0 %vm6588_vm1, %v6587_v1  ;;  %vm777_vm10 = vcmp.eq.s32.totalorder %v556_v29, %v6713_v8 }
 0x18f   : > { %v6254_v32 = vpop.f32.mrf.mxu0  ;;  %v4855_v36 = vsel %vm777_vm10, 1.0, %v6587_v1 }
 0x191   : > { %v1441_v35 = vpop.f32.mrf.mxu0 }
 0x192   : > { %v5475_v38 = vpack.c.bf16 %v1441_v35, %v1438_v31  ;;  %v1113_v31 = vpack.c.bf16 %v4854_v25, %v4853_v26  ;;  %v4856_v35 = vsel %vm778_vm9, 1.0, %v6587_v1 }
 0x193   : > { %v6255_v40 = vpop.f32.mrf.mxu0 }
 0x194   : > { %5763 = vst [vmem:[#allocation2 + $0x38] sm:$0xff] %v5475_v38   ;;  %v565_v38 = vpop.permute.xlu1 %564 }
 0x195   : > { %v1446_v41 = vpop.f32.mrf.mxu0  ;;  %6353 = vmatmul.mubr.msk.bf16.gmra.mxu0 %vm1154_vm4, %v1108_v39  ;;  %v562_v39 = vpop.permute.xlu0 %561  ;;  %vm780_vm11 = vcmp.eq.s32.totalorder %v565_v38, %v6713_v8 }
 0x196   : > { %6356 = vmatprep.mubr.msk.bf16.mxu0 %vm6588_vm1, %v6587_v1  ;;  %vm779_vm12 = vcmp.eq.s32.totalorder %v562_v39, %v6713_v8 }
 0x197   : > { %v6258_v42 = vpop.f32.mrf.mxu0  ;;  %v4857_v46 = vsel %vm779_vm12, 1.0, %v6587_v1 }
 0x199   : > { %v1449_v45 = vpop.f32.mrf.mxu0 }
 0x19a   : > { %v5480_v48 = vpack.c.bf16 %v1449_v45, %v1446_v41  ;;  %v1114_v41 = vpack.c.bf16 %v4856_v35, %v4855_v36  ;;  %v4858_v45 = vsel %vm780_vm11, 1.0, %v6587_v1  ;;  %v6522_v36 = vld [vmem:[#allocation2 + $0x20] sm:$0xff]  }
 0x19b   : > { %v6259_v50 = vpop.f32.mrf.mxu0  ;;  %v6516_v13 = vld [vmem:[#allocation2 + $0x38] sm:$0xff]  }
 0x19c   : > { %5764 = vst [vmem:[#allocation2 + $0x40] sm:$0xff] %v5480_v48   ;;  %v571_v48 = vpop.permute.xlu1 %570 }
 0x19d   : > { %v1454_v51 = vpop.f32.mrf.mxu0  ;;  %6357 = vmatmul.mubr.msk.bf16.gmra.mxu0 %vm1154_vm4, %v1109_v49  ;;  %v568_v49 = vpop.permute.xlu0 %567  ;;  %vm782_vm13 = vcmp.eq.s32.totalorder %v571_v48, %v6713_v8 }
 0x19e   : > { %6360 = vmatprep.mubr.msk.bf16.mxu0 %vm6588_vm1, %v6587_v1  ;;  %vm781_vm14 = vcmp.eq.s32.totalorder %v568_v49, %v6713_v8 }
 0x19f   : > { %v6262_v52 = vpop.f32.mrf.mxu0  ;;  %v4859_v56 = vsel %vm781_vm14, 1.0, %v6587_v1 }
 0x1a1   : > { %v1457_v55 = vpop.f32.mrf.mxu0 }
 0x1a2   : > { %v5485_v58 = vpack.c.bf16 %v1457_v55, %v1454_v51  ;;  %v1115_v51 = vpack.c.bf16 %v4858_v45, %v4857_v46  ;;  %v4860_v55 = vsel %vm782_vm13, 1.0, %v6587_v1 }
 0x1a3   : > { %v6263_v60 = vpop.f32.mrf.mxu0 }
 0x1a4   : > { %5765 = vst [vmem:[#allocation2 + $0x48] sm:$0xff] %v5485_v58   ;;  %v577_v58 = vpop.permute.xlu1 %576 }
 0x1a5   : > { %v1462_v61 = vpop.f32.mrf.mxu0  ;;  %6361 = vmatmul.mubr.msk.bf16.gmra.mxu0 %vm1154_vm4, %v1110_v59  ;;  %v574_v59 = vpop.permute.xlu0 %573  ;;  %vm784_vm15 = vcmp.eq.s32.totalorder %v577_v58, %v6713_v8  ;;  %v6528_v58 = vld [vmem:[#allocation2 + $0x8] sm:$0xff]  }
 0x1a6   : > { %6364 = vmatprep.mubr.msk.bf16.mxu0 %vm6588_vm1, %v6587_v1  ;;  %vm783_vm0 = vcmp.eq.s32.totalorder %v574_v59, %v6713_v8 }
 0x1a7   : > { %v6266_v62 = vpop.f32.mrf.mxu0  ;;  %v4861_v4 = vsel %vm783_vm0, 1.0, %v6587_v1 }
 0x1a9   : > { %v1465_v3 = vpop.f32.mrf.mxu0 }
 0x1aa   : > { %v5490_v6 = vpack.c.bf16 %v1465_v3, %v1462_v61  ;;  %v1116_v61 = vpack.c.bf16 %v4860_v55, %v4859_v56  ;;  %v4862_v3 = vsel %vm784_vm15, 1.0, %v6587_v1 }
 0x1ab   : > { %v6267_v9 = vpop.f32.mrf.mxu0 }
 0x1ac   : > { %5766 = vst [vmem:[#allocation2 + $0x50] sm:$0xff] %v5490_v6   ;;  %v583_v6 = vpop.permute.xlu1 %582 }
 0x1ad   : > { %v1470_v10 = vpop.f32.mrf.mxu0  ;;  %6365 = vmatmul.mubr.msk.bf16.gmra.mxu0 %vm1154_vm4, %v1111_v7  ;;  %v580_v7 = vpop.permute.xlu0 %579  ;;  %vm786_vm2 = vcmp.eq.s32.totalorder %v583_v6, %v6713_v8 }
 0x1ae   : > { %6368 = vmatprep.mubr.msk.bf16.mxu0 %vm6588_vm1, %v6587_v1  ;;  %vm785_vm3 = vcmp.eq.s32.totalorder %v580_v7, %v6713_v8 }
 0x1af   : > { %v6270_v11 = vpop.f32.mrf.mxu0 }
 0x1b0   : > { %v589_v25 = vpop.permute.xlu1 %588 }
 0x1b1   : > { %v1473_v14 = vpop.f32.mrf.mxu0  ;;  %v586_v26 = vpop.permute.xlu0 %585  ;;  %vm788_vm5 = vcmp.eq.s32.totalorder %v589_v25, %v6713_v8 }
 0x1b2   : > { %v5495_v19 = vpack.c.bf16 %v1473_v14, %v1470_v10  ;;  %v1117_v10 = vpack.c.bf16 %v4862_v3, %v4861_v4  ;;  %vm787_vm6 = vcmp.eq.s32.totalorder %v586_v26, %v6713_v8  ;;  %v2534_v3 = vld [vmem:[%s7960_s2 + $0xc0] sm:$0xff] }
 0x1b3   : > { %v6271_v22 = vpop.f32.mrf.mxu0  ;;  %v4865_v35 = vsel %vm787_vm6, 1.0, %v6587_v1  ;;  %v6525_v46 = vld [vmem:[#allocation2 + $0x50] sm:$0xff]   ;;  %v2538_v4 = vld [vmem:[%s7960_s2 + $0xe0] sm:$0xff] }
 0x1b4   : > { %5767 = vst [vmem:[#allocation2 + $0x58] sm:$0xff] %v5495_v19   ;;  %v4864_v19 = vsel %vm786_vm2, 1.0, %v6587_v1  ;;  %v6518_v22 = vld [vmem:[#allocation2 + $0x30] sm:$0xff]   ;;  %v595_v39 = vpop.permute.xlu1 %594  ;;  %v5118_v17 = vcombine.low %v2534_v3, %v2538_v4 }
 0x1b5   : > { %v1478_v23 = vpop.f32.mrf.mxu0  ;;  %6369 = vmatmul.mubr.msk.bf16.gmra.mxu0 %vm1154_vm4, %v1112_v20  ;;  %v4863_v20 = vsel %vm785_vm3, 1.0, %v6587_v1  ;;  %vm790_vm7 = vcmp.eq.s32.totalorder %v595_v39, %v6713_v8 }
 0x1b6   : > { %6372 = vmatprep.mubr.msk.bf16.mxu0 %vm6588_vm1, %v6587_v1  ;;  %v1118_v28 = vpack.c.bf16 %v4864_v19, %v4863_v20  ;;  %v4868_v48 = vsel %vm790_vm7, 1.0, %v6587_v1  ;;  %v2542_v19 = vld [vmem:[%s7960_s2 + $0x100] sm:$0xff] }
 0x1b7   : > { %v6274_v24 = vpop.f32.mrf.mxu0  ;;  %v2546_v20 = vld [vmem:[%s7960_s2 + $0x120] sm:$0xff] }
 0x1b8   : > { %v5127_v26 = vcombine.high %v2542_v19, %v2546_v20 }
 0x1b9   : > { %v1481_v27 = vpop.f32.mrf.mxu0 }
 0x1ba   : > { %v5500_v30 = vpack.c.bf16 %v1481_v27, %v1478_v23 }
 0x1bb   : > { %v6275_v32 = vpop.f32.mrf.mxu0  ;;  %v6523_v38 = vld [vmem:[#allocation2 + $0x58] sm:$0xff]  }
 0x1bc   : > { %5768 = vst [vmem:[#allocation2 + $0x60] sm:$0xff] %v5500_v30   ;;  %v6520_v30 = vld [vmem:[#allocation2 + $0x28] sm:$0xff]  }
 0x1bd   : > { %v1486_v33 = vpop.f32.mrf.mxu0  ;;  %6373 = vmatmul.mubr.msk.bf16.gmra.mxu0 %vm1154_vm4, %v1113_v31 }
 0x1be   : > { %6376 = vmatprep.mubr.msk.bf16.mxu0 %vm6588_vm1, %v6587_v1 }
 0x1bf   : > { %v6278_v34 = vpop.f32.mrf.mxu0 }
 0x1c0   : > { %v4866_v34 = vsel %vm788_vm5, 1.0, %v6587_v1 }
 0x1c1   : > { %v1489_v37 = vpop.f32.mrf.mxu0 }
 0x1c2   : > { %v5505_v40 = vpack.c.bf16 %v1489_v37, %v1486_v33 }
 0x1c3   : > { %v6279_v42 = vpop.f32.mrf.mxu0  ;;  %v6521_v32 = vld [vmem:[#allocation2 + $0x60] sm:$0xff]  }
 0x1c4   : > { %5769 = vst [vmem:[#allocation2 + $0x68] sm:$0xff] %v5505_v40   ;;  %v592_v40 = vpop.permute.xlu0 %591  ;;  %v1119_v42 = vpack.c.bf16 %v4866_v34, %v4865_v35 }
 0x1c5   : > { %v1494_v43 = vpop.f32.mrf.mxu0  ;;  %6377 = vmatmul.mubr.msk.bf16.gmra.mxu0 %vm1154_vm4, %v1114_v41  ;;  %vm789_vm8 = vcmp.eq.s32.totalorder %v592_v40, %v6713_v8 }
 0x1c6   : > { %6380 = vmatprep.mubr.msk.bf16.mxu0 %vm6588_vm1, %v6587_v1  ;;  %v4867_v49 = vsel %vm789_vm8, 1.0, %v6587_v1 }
 0x1c7   : > { %v6282_v44 = vpop.f32.mrf.mxu0  ;;  %v1120_v56 = vpack.c.bf16 %v4868_v48, %v4867_v49 }
 0x1c8   : > { %v6524_v44 = vld [vmem:[#allocation2 + $0x18] sm:$0xff]  }
 0x1c9   : > { %v1497_v47 = vpop.f32.mrf.mxu0 }
 0x1ca   : > { %v5510_v50 = vpack.c.bf16 %v1497_v47, %v1494_v43 }
 0x1cb   : > { %v6283_v52 = vpop.f32.mrf.mxu0  ;;  %v6519_v24 = vld [vmem:[#allocation2 + $0x68] sm:$0xff]  }
 0x1cc   : > { %5770 = vst [vmem:[#allocation2 + $0x70] sm:$0xff] %v5510_v50   ;;  %v6526_v50 = vld [vmem:[#allocation2 + $0x10] sm:$0xff]   ;;  %v6527_v52 = vld [vmem:[#allocation2 + $0x48] sm:$0xff]  }
 0x1cd   : > { %v1502_v53 = vpop.f32.mrf.mxu0  ;;  %6381 = vmatmul.mubr.msk.bf16.gmra.mxu0 %vm1154_vm4, %v1115_v51 }
 0x1ce   : > { %6384 = vmatprep.mubr.msk.bf16.mxu0 %vm6588_vm1, %v6587_v1 }
 0x1cf   : > { %v6286_v54 = vpop.f32.mrf.mxu0 }
 0x1d0   : > { %v598_v54 = vpop.permute.xlu0 %597 }
 0x1d1   : > { %v1505_v57 = vpop.f32.mrf.mxu0  ;;  %vm791_vm10 = vcmp.eq.s32.totalorder %v598_v54, %v6713_v8 }
 0x1d2   : > { %v5515_v60 = vpack.c.bf16 %v1505_v57, %v1502_v53  ;;  %v601_v53 = vpop.permute.xlu1 %600 }
 0x1d3   : > { %v6287_v62 = vpop.f32.mrf.mxu0  ;;  %v6517_v15 = vld [vmem:[#allocation2 + $0x70] sm:$0xff]   ;;  %vm792_vm9 = vcmp.eq.s32.totalorder %v601_v53, %v6713_v8 }
 0x1d4   : > { %5771 = vst [vmem:[#allocation2 + $0x78] sm:$0xff] %v5515_v60   ;;  %v6529_v60 = vld [vmem:[#allocation2 + $0x40] sm:$0xff]   ;;  %v4870_v62 = vsel %vm792_vm9, 1.0, %v6587_v1  ;;  %v604_v7 = vpop.permute.xlu0 %603 }
 0x1d5   : > { %v1510_v63 = vpop.f32.mrf.mxu0  ;;  %6385 = vmatmul.mubr.msk.bf16.gmra.mxu0 %vm1154_vm4, %v1116_v61  ;;  %vm793_vm12 = vcmp.eq.s32.totalorder %v604_v7, %v6713_v8 }
 0x1d6   : > { %6388 = vmatprep.mubr.msk.bf16.mxu0 %vm6588_vm1, %v6587_v1  ;;  %v607_v6 = vpop.permute.xlu1 %606 }
 0x1d7   : > { %v6290_v2 = vpop.f32.mrf.mxu0  ;;  %vm794_vm11 = vcmp.eq.s32.totalorder %v607_v6, %v6713_v8 }
 0x1d8   : > { %v6530_v2 = vld [vmem:[#allocation2] sm:$0xff]  }
 0x1d9   : > { %v1513_v5 = vpop.f32.mrf.mxu0 }
 0x1da   : > { %v5520_v9 = vpack.c.bf16 %v1513_v5, %v1510_v63  ;;  %v4869_v63 = vsel %vm791_vm10, 1.0, %v6587_v1 }
 0x1db   : > { %v6291_v11 = vpop.f32.mrf.mxu0  ;;  %v6515_v12 = vld [vmem:[#allocation2 + $0x78] sm:$0xff]  }
 0x1dc   : > { %5772 = vst [vmem:[#allocation2 + $0x80] sm:$0xff] %v5520_v9   ;;  %5884 = vmatprep.subr.bf16.mxu0 %v6515_v12  ;;  %6476 = vmatprep.subr.bf16.mxu1 %v6515_v12  ;;  %v5119_v12 = vcombine.high %v2534_v3, %v2538_v4 }
 0x1dd   : > { %v1518_v14 = vpop.f32.mrf.mxu0  ;;  %6389 = vmatmul.mubr.msk.bf16.gmra.mxu0 %vm1154_vm4, %v1117_v10  ;;  %6484 = vmatpush3.bf16.msra.mxu1 %v6516_v13  ;;  %v1121_v10 = vpack.c.bf16 %v4870_v62, %v4869_v63 }
 0x1de   : > { %5885 = vmatpush3.bf16.msra.mxu0 %v6516_v13  ;;  %6477 = vmatprep.subr.bf16.mxu1 %v6517_v15 }
 0x1df   : > { %v6294_v16 = vpop.f32.mrf.mxu0  ;;  %5886 = vmatprep.subr.bf16.mxu0 %v6517_v15  ;;  %6392 = vmatprep.mubr.msk.bf16.mxu0 %vm6588_vm1, %v6587_v1  ;;  %v4872_v15 = vsel %vm794_vm11, 1.0, %v6587_v1 }
 0x1e0   : > { %v4871_v16 = vsel %vm793_vm12, 1.0, %v6587_v1 }
 0x1e1   : > { %v1521_v23 = vpop.f32.mrf.mxu0  ;;  %6485 = vmatpush3.bf16.msra.mxu1 %v6518_v22  ;;  %v1122_v18 = vpack.c.bf16 %v4872_v15, %v4871_v16 }
 0x1e2   : > { %v5525_v27 = vpack.c.bf16 %v1521_v23, %v1518_v14  ;;  %5887 = vmatpush3.bf16.msra.mxu0 %v6518_v22  ;;  %6478 = vmatprep.subr.bf16.mxu1 %v6519_v24  ;;  %v613_v23 = vpop.permute.xlu1 %612 }
 0x1e3   : > { %v6295_v29 = vpop.f32.mrf.mxu0  ;;  %5888 = vmatprep.subr.bf16.mxu0 %v6519_v24  ;;  %v610_v24 = vpop.permute.xlu0 %609  ;;  %vm796_vm13 = vcmp.eq.s32.totalorder %v613_v23, %v6713_v8 }
 0x1e4   : > { %5773 = vst [vmem:[#allocation2 + $0x88] sm:$0xff] %v5525_v27   ;;  %vm795_vm14 = vcmp.eq.s32.totalorder %v610_v24, %v6713_v8  ;;  %v4874_v29 = vsel %vm796_vm13, 1.0, %v6587_v1 }
 0x1e5   : > { %v1526_v31 = vpop.f32.mrf.mxu0  ;;  %6393 = vmatmul.mubr.msk.bf16.gmra.mxu0 %vm1154_vm4, %v1118_v28  ;;  %6486 = vmatpush3.bf16.msra.mxu1 %v6520_v30 }
 0x1e6   : > { %5889 = vmatpush3.bf16.msra.mxu0 %v6520_v30  ;;  %6396 = vmatprep.mubr.msk.bf16.mxu0 %vm6588_vm1, %v6587_v1  ;;  %v4873_v30 = vsel %vm795_vm14, 1.0, %v6587_v1  ;;  %v619_v34 = vpop.permute.xlu1 %618 }
 0x1e7   : > { %v6298_v33 = vpop.f32.mrf.mxu0  ;;  %5890 = vmatprep.subr.bf16.mxu0 %v6521_v32  ;;  %6479 = vmatprep.subr.bf16.mxu1 %v6521_v32  ;;  %v2554_v32 = vld [vmem:[%s7960_s2 + $0x160] sm:$0xff]  ;;  %v616_v35 = vpop.permute.xlu0 %615  ;;  %vm798_vm15 = vcmp.eq.s32.totalorder %v619_v34, %v6713_v8 }
 0x1e8   : > { %vm797_vm0 = vcmp.eq.s32.totalorder %v616_v35, %v6713_v8 }
 0x1e9   : > { %v1529_v37 = vpop.f32.mrf.mxu0  ;;  %6487 = vmatpush3.bf16.msra.mxu1 %v6522_v36 }
 0x1ea   : > { %v5530_v41 = vpack.c.bf16 %v1529_v37, %v1526_v31  ;;  %5891 = vmatpush3.bf16.msra.mxu0 %v6522_v36  ;;  %6480 = vmatprep.subr.bf16.mxu1 %v6523_v38  ;;  %v2550_v31 = vld [vmem:[%s7960_s2 + $0x140] sm:$0xff]  ;;  %v5126_v37 = vcombine.low %v2542_v19, %v2546_v20  ;;  %v625_v48 = vpop.permute.xlu1 %624 }
 0x1eb   : > { %v6299_v43 = vpop.f32.mrf.mxu0  ;;  %5892 = vmatprep.subr.bf16.mxu0 %v6523_v38  ;;  %v1123_v38 = vpack.c.bf16 %v4874_v29, %v4873_v30  ;;  %v5135_v40 = vcombine.high %v2550_v31, %v2554_v32  ;;  %v622_v49 = vpop.permute.xlu0 %621  ;;  %vm800_vm2 = vcmp.eq.s32.totalorder %v625_v48, %v6713_v8 }
 0x1ec   : > { %5774 = vst [vmem:[#allocation2 + $0x90] sm:$0xff] %v5530_v41   ;;  %v4876_v43 = vsel %vm798_vm15, 1.0, %v6587_v1  ;;  %vm799_vm3 = vcmp.eq.s32.totalorder %v622_v49, %v6713_v8 }
 0x1ed   : > { %v1534_v45 = vpop.f32.mrf.mxu0  ;;  %6397 = vmatmul.mubr.msk.bf16.gmra.mxu0 %vm1154_vm4, %v1119_v42  ;;  %6488 = vmatpush3.bf16.msra.mxu1 %v6524_v44 }
 0x1ee   : > { %5893 = vmatpush3.bf16.msra.mxu0 %v6524_v44  ;;  %6400 = vmatprep.mubr.msk.bf16.mxu0 %vm6588_vm1, %v6587_v1  ;;  %v4875_v44 = vsel %vm797_vm0, 1.0, %v6587_v1  ;;  %v631_v62 = vpop.permute.xlu1 %630 }
 0x1ef   : > { %v6302_v47 = vpop.f32.mrf.mxu0  ;;  %5894 = vmatprep.subr.bf16.mxu0 %v6525_v46  ;;  %6481 = vmatprep.subr.bf16.mxu1 %v6525_v46  ;;  %v2562_v46 = vld [vmem:[%s7960_s2 + $0x1a0] sm:$0xff]  ;;  %v628_v63 = vpop.permute.xlu0 %627  ;;  %vm802_vm5 = vcmp.eq.s32.totalorder %v631_v62, %v6713_v8 }
 0x1f0   : > { %vm801_vm6 = vcmp.eq.s32.totalorder %v628_v63, %v6713_v8 }
 0x1f1   : > { %v1537_v51 = vpop.f32.mrf.mxu0  ;;  %6489 = vmatpush3.bf16.msra.mxu1 %v6526_v50 }
 0x1f2   : > { %v5535_v55 = vpack.c.bf16 %v1537_v51, %v1534_v45  ;;  %5895 = vmatpush3.bf16.msra.mxu0 %v6526_v50  ;;  %6482 = vmatprep.subr.bf16.mxu1 %v6527_v52  ;;  %v2558_v45 = vld [vmem:[%s7960_s2 + $0x180] sm:$0xff]  ;;  %v5134_v51 = vcombine.low %v2550_v31, %v2554_v32  ;;  %v637_v15 = vpop.permute.xlu1 %636 }
 0x1f3   : > { %v6303_v57 = vpop.f32.mrf.mxu0  ;;  %5896 = vmatprep.subr.bf16.mxu0 %v6527_v52  ;;  %v1124_v52 = vpack.c.bf16 %v4876_v43, %v4875_v44  ;;  %v5143_v54 = vcombine.high %v2558_v45, %v2562_v46  ;;  %v5142_v3 = vcombine.low %v2558_v45, %v2562_v46  ;;  %v634_v16 = vpop.permute.xlu0 %633  ;;  %vm804_vm7 = vcmp.eq.s32.totalorder %v637_v15, %v6713_v8 }
 0x1f4   : > { %5775 = vst [vmem:[#allocation2 + $0x98] sm:$0xff] %v5535_v55   ;;  %v4878_v57 = vsel %vm800_vm2, 1.0, %v6587_v1  ;;  %vm803_vm8 = vcmp.eq.s32.totalorder %v634_v16, %v6713_v8 }
 0x1f5   : > { %v1542_v59 = vpop.f32.mrf.mxu0  ;;  %6401 = vmatmul.mubr.msk.bf16.gmra.mxu0 %vm1154_vm4, %v1120_v56  ;;  %6490 = vmatpush3.bf16.msra.mxu1 %v6528_v58 }
 0x1f6   : > { %5897 = vmatpush3.bf16.msra.mxu0 %v6528_v58  ;;  %6404 = vmatprep.mubr.msk.bf16.mxu0 %vm6588_vm1, %v6587_v1  ;;  %v4877_v58 = vsel %vm799_vm3, 1.0, %v6587_v1  ;;  %v643_v29 = vpop.permute.xlu1 %642 }
 0x1f7   : > { %v6306_v61 = vpop.f32.mrf.mxu0  ;;  %5898 = vmatprep.subr.bf16.mxu0 %v6529_v60  ;;  %6483 = vmatprep.subr.bf16.mxu1 %v6529_v60  ;;  %v2570_v60 = vld [vmem:[%s7960_s2 + $0x1e0] sm:$0xff]  ;;  %v1125_v4 = vpack.c.bf16 %v4878_v57, %v4877_v58  ;;  %v640_v30 = vpop.permute.xlu0 %639  ;;  %vm806_vm9 = vcmp.eq.s32.totalorder %v643_v29, %v6713_v8 }
 0x1f8   : > { %vm805_vm10 = vcmp.eq.s32.totalorder %v640_v30, %v6713_v8 }
 0x1f9   : > { %v1545_v5 = vpop.f32.mrf.mxu0  ;;  %6491 = vmatpush3.bf16.msra.mxu1 %v6530_v2 }
 0x1fa   : > { %v5540_v9 = vpack.c.bf16 %v1545_v5, %v1542_v59  ;;  %5899 = vmatpush3.bf16.msra.mxu0 %v6530_v2  ;;  %v2566_v59 = vld [vmem:[%s7960_s2 + $0x1c0] sm:$0xff]  ;;  %v649_v43 = vpop.permute.xlu1 %648 }
 0x1fb   : > { %v6307_v11 = vpop.f32.mrf.mxu0  ;;  %v5151_v6 = vcombine.high %v2566_v59, %v2570_v60  ;;  %v5150_v20 = vcombine.low %v2566_v59, %v2570_v60  ;;  %v646_v44 = vpop.permute.xlu0 %645  ;;  %vm808_vm11 = vcmp.eq.s32.totalorder %v649_v43, %v6713_v8 }
 0x1fc   : > { %5776 = vst [vmem:[#allocation2 + $0xa0] sm:$0xff] %v5540_v9   ;;  %3864 = vmatmul.mubr.bf16.vlgmr.msra.gmra.mxu1 %v5110_v21  ;;  %v4879_v11 = vsel %vm801_vm6, 1.0, %v6587_v1  ;;  %vm807_vm12 = vcmp.eq.s32.totalorder %v646_v44, %v6713_v8 }
 0x1fd   : > { %v1550_v13 = vpop.f32.mrf.mxu0  ;;  %6405 = vmatmul.mubr.msk.bf16.gmra.mxu0 %vm1154_vm4, %v1121_v10  ;;  %3871 = vmatprep.mubr.bf16.mxu1 %v5119_v12  ;;  %v4880_v10 = vsel %vm802_vm5, 1.0, %v6587_v1  ;;  %v2574_v12 = vld [vmem:[%s7960_s2 + $0x200] sm:$0xff] }
 0x1fe   : > { %6408 = vmatprep.mubr.msk.bf16.mxu0 %vm6588_vm1, %v6587_v1  ;;  %v655_v57 = vpop.permute.xlu1 %654 }
 0x1ff   : > { %v6310_v14 = vpop.f32.mrf.mxu0  ;;  %v652_v58 = vpop.permute.xlu0 %651  ;;  %vm810_vm13 = vcmp.eq.s32.totalorder %v655_v57, %v6713_v8 }
 0x200   : > { %vm809_vm14 = vcmp.eq.s32.totalorder %v652_v58, %v6713_v8 }
 0x201   : > { %v1553_v22 = vpop.f32.mrf.mxu0 }
 0x202   : > { %v5545_v25 = vpack.c.bf16 %v1553_v22, %v1550_v13  ;;  %v2578_v13 = vld [vmem:[%s7960_s2 + $0x220] sm:$0xff]  ;;  %v1126_v22 = vpack.c.bf16 %v4880_v10, %v4879_v11  ;;  %v661_v10 = vpop.permute.xlu1 %660 }
 0x203   : > { %v6311_v21 = vpop.f32.mrf.mxu0  ;;  %v5159_v24 = vcombine.high %v2574_v12, %v2578_v13  ;;  %v5158_v32 = vcombine.low %v2574_v12, %v2578_v13  ;;  %v658_v11 = vpop.permute.xlu0 %657  ;;  %vm812_vm15 = vcmp.eq.s32.totalorder %v661_v10, %v6713_v8 }
 0x204   : > { %5777 = vst [vmem:[#allocation2 + $0xa8] sm:$0xff] %v5545_v25   ;;  %3872 = vmatmul.mubr.bf16.gmra.mxu1 %v5118_v17  ;;  %v4881_v21 = vsel %vm803_vm8, 1.0, %v6587_v1  ;;  %vm811_vm0 = vcmp.eq.s32.totalorder %v658_v11, %v6713_v8 }
 0x205   : > { %v1558_v27 = vpop.f32.mrf.mxu0  ;;  %6409 = vmatmul.mubr.msk.bf16.gmra.mxu0 %vm1154_vm4, %v1122_v18  ;;  %3879 = vmatprep.mubr.bf16.mxu1 %v5127_v26  ;;  %v4882_v18 = vsel %vm804_vm7, 1.0, %v6587_v1  ;;  %v2582_v26 = vld [vmem:[%s7960_s2 + $0x240] sm:$0xff] }
 0x206   : > { %6412 = vmatprep.mubr.msk.bf16.mxu0 %vm6588_vm1, %v6587_v1 }
 0x207   : > { %v6314_v28 = vpop.f32.mrf.mxu0 }
 0x209   : > { %v1561_v33 = vpop.f32.mrf.mxu0 }
 0x20a   : > { %v5550_v36 = vpack.c.bf16 %v1561_v33, %v1558_v27  ;;  %v2586_v27 = vld [vmem:[%s7960_s2 + $0x260] sm:$0xff]  ;;  %v1127_v33 = vpack.c.bf16 %v4882_v18, %v4881_v21  ;;  %v667_v18 = vpop.permute.xlu1 %666  ;;  %v664_v21 = vpop.permute.xlu0 %663 }
 0x20b   : > { %v6315_v39 = vpop.f32.mrf.mxu0  ;;  %v5167_v35 = vcombine.high %v2582_v26, %v2586_v27  ;;  %v5166_v46 = vcombine.low %v2582_v26, %v2586_v27  ;;  %vm814_vm2 = vcmp.eq.s32.totalorder %v667_v18, %v6713_v8  ;;  %vm813_vm3 = vcmp.eq.s32.totalorder %v664_v21, %v6713_v8 }
 0x20c   : > { %5778 = vst [vmem:[#allocation2 + $0xb0] sm:$0xff] %v5550_v36   ;;  %3880 = vmatmul.mubr.bf16.gmra.mxu1 %v5126_v37  ;;  %v4883_v39 = vsel %vm805_vm10, 1.0, %v6587_v1 }
 0x20d   : > { %v1566_v41 = vpop.f32.mrf.mxu0  ;;  %6413 = vmatmul.mubr.msk.bf16.gmra.mxu0 %vm1154_vm4, %v1123_v38  ;;  %3887 = vmatprep.mubr.bf16.mxu1 %v5135_v40  ;;  %v4884_v38 = vsel %vm806_vm9, 1.0, %v6587_v1  ;;  %v2590_v40 = vld [vmem:[%s7960_s2 + $0x280] sm:$0xff] }
 0x20e   : > { %6416 = vmatprep.mubr.msk.bf16.mxu0 %vm6588_vm1, %v6587_v1 }
 0x20f   : > { %v6318_v42 = vpop.f32.mrf.mxu0 }
 0x211   : > { %v1569_v47 = vpop.f32.mrf.mxu0 }
 0x212   : > { %v5555_v50 = vpack.c.bf16 %v1569_v47, %v1566_v41  ;;  %v2594_v41 = vld [vmem:[%s7960_s2 + $0x2a0] sm:$0xff]  ;;  %v1128_v47 = vpack.c.bf16 %v4884_v38, %v4883_v39  ;;  %v673_v38 = vpop.permute.xlu1 %672  ;;  %v670_v39 = vpop.permute.xlu0 %669 }
 0x213   : > { %v6319_v53 = vpop.f32.mrf.mxu0  ;;  %v5175_v49 = vcombine.high %v2590_v40, %v2594_v41  ;;  %v5174_v60 = vcombine.low %v2590_v40, %v2594_v41  ;;  %vm816_vm5 = vcmp.eq.s32.totalorder %v673_v38, %v6713_v8  ;;  %vm815_vm6 = vcmp.eq.s32.totalorder %v670_v39, %v6713_v8 }
 0x214   : > { %5779 = vst [vmem:[#allocation2 + $0xb8] sm:$0xff] %v5555_v50   ;;  %3888 = vmatmul.mubr.bf16.gmra.mxu1 %v5134_v51  ;;  %v4885_v53 = vsel %vm807_vm12, 1.0, %v6587_v1 }
 0x215   : > { %v1574_v55 = vpop.f32.mrf.mxu0  ;;  %6417 = vmatmul.mubr.msk.bf16.gmra.mxu0 %vm1154_vm4, %v1124_v52  ;;  %3895 = vmatprep.mubr.bf16.mxu1 %v5143_v54  ;;  %v4886_v52 = vsel %vm808_vm11, 1.0, %v6587_v1  ;;  %v2598_v54 = vld [vmem:[%s7960_s2 + $0x2c0] sm:$0xff] }
 0x216   : > { %6420 = vmatprep.mubr.msk.bf16.mxu0 %vm6588_vm1, %v6587_v1 }
 0x217   : > { %v6322_v56 = vpop.f32.mrf.mxu0 }
 0x219   : > { %v1577_v61 = vpop.f32.mrf.mxu0 }
 0x21a   : > { %v5560_v2 = vpack.c.bf16 %v1577_v61, %v1574_v55  ;;  %v2602_v55 = vld [vmem:[%s7960_s2 + $0x2e0] sm:$0xff]  ;;  %v1129_v61 = vpack.c.bf16 %v4886_v52, %v4885_v53  ;;  %v679_v52 = vpop.permute.xlu1 %678  ;;  %v676_v53 = vpop.permute.xlu0 %675 }
 0x21b   : > { %v6323_v5 = vpop.f32.mrf.mxu0  ;;  %v5183_v63 = vcombine.high %v2598_v54, %v2602_v55  ;;  %v5182_v13 = vcombine.low %v2598_v54, %v2602_v55  ;;  %vm818_vm7 = vcmp.eq.s32.totalorder %v679_v52, %v6713_v8  ;;  %vm817_vm8 = vcmp.eq.s32.totalorder %v676_v53, %v6713_v8  ;;  %v6546_v53 = vld [vmem:[#allocation2 + $0x80] sm:$0xff]  }
 0x21c   : > { %5780 = vst [vmem:[#allocation2 + $0xc0] sm:$0xff] %v5560_v2   ;;  %3896 = vmatmul.mubr.bf16.gmra.mxu1 %v5142_v3  ;;  %v4887_v5 = vsel %vm809_vm14, 1.0, %v6587_v1 }
 0x21d   : > { %v1582_v7 = vpop.f32.mrf.mxu0  ;;  %6421 = vmatmul.mubr.msk.bf16.gmra.mxu0 %vm1154_vm4, %v1125_v4  ;;  %3903 = vmatprep.mubr.bf16.mxu1 %v5151_v6  ;;  %v4888_v4 = vsel %vm810_vm13, 1.0, %v6587_v1  ;;  %v2606_v6 = vld [vmem:[%s7960_s2 + $0x300] sm:$0xff] }
 0x21e   : > { %6424 = vmatprep.mubr.msk.bf16.mxu0 %vm6588_vm1, %v6587_v1  ;;  %v685_v10 = vpop.permute.xlu1 %684  ;;  %v682_v11 = vpop.permute.xlu0 %681 }
 0x21f   : > { %v6326_v9 = vpop.f32.mrf.mxu0  ;;  %vm820_vm9 = vcmp.eq.s32.totalorder %v685_v10, %v6713_v8  ;;  %vm819_vm10 = vcmp.eq.s32.totalorder %v682_v11, %v6713_v8 }
 0x221   : > { %v1585_v14 = vpop.f32.mrf.mxu0 }
 0x222   : > { %v5565_v19 = vpack.c.bf16 %v1585_v14, %v1582_v7  ;;  %v2610_v7 = vld [vmem:[%s7960_s2 + $0x320] sm:$0xff]  ;;  %v1130_v14 = vpack.c.bf16 %v4888_v4, %v4887_v5  ;;  %v6534_v4 = vld [vmem:[#allocation2 + $0xb0] sm:$0xff]  }
 0x223   : > { %v6327_v23 = vpop.f32.mrf.mxu0  ;;  %v5191_v16 = vcombine.high %v2606_v6, %v2610_v7  ;;  %v5190_v27 = vcombine.low %v2606_v6, %v2610_v7  ;;  %v7296_v7 = vld [vmem:[%s7960_s2 + $0x8] sm:$0xff] }
 0x224   : > { %5781 = vst [vmem:[#allocation2 + $0xc8] sm:$0xff] %v5565_v19   ;;  %3904 = vmatmul.mubr.bf16.gmra.mxu1 %v5150_v20  ;;  %v4889_v23 = vsel %vm811_vm0, 1.0, %v6587_v1  ;;  %vm4691_vm0 = vcmask 990208  }
 0x225   : > { %v1590_v25 = vpop.f32.mrf.mxu0  ;;  %6425 = vmatmul.mubr.msk.bf16.gmra.mxu0 %vm1154_vm4, %v1126_v22  ;;  %3911 = vmatprep.mubr.bf16.mxu1 %v5159_v24  ;;  %v4890_v22 = vsel %vm812_vm15, 1.0, %v6587_v1  ;;  %v2614_v24 = vld [vmem:[%s7960_s2 + $0x340] sm:$0xff] }
 0x226   : > { %6428 = vmatprep.mubr.msk.bf16.mxu0 %vm6588_vm1, %v6587_v1 }
 0x227   : > { %v6330_v17 = vpop.f32.mrf.mxu0 }
 0x229   : > { %v1593_v28 = vpop.f32.mrf.mxu0 }
 0x22a   : > { %v5570_v31 = vpack.c.bf16 %v1593_v28, %v1590_v25  ;;  %v2618_v25 = vld [vmem:[%s7960_s2 + $0x360] sm:$0xff]  ;;  %v1131_v28 = vpack.c.bf16 %v4890_v22, %v4889_v23 }
 0x22b   : > { %v6331_v34 = vpop.f32.mrf.mxu0  ;;  %v5199_v30 = vcombine.high %v2614_v24, %v2618_v25  ;;  %v5198_v41 = vcombine.low %v2614_v24, %v2618_v25  ;;  %v4898_v24 = vsel %vm820_vm9, 1.0, %v6587_v1  ;;  %v4897_v25 = vsel %vm819_vm10, 1.0, %v6587_v1  ;;  %v6543_v39 = vld [vmem:[#allocation2 + $0xc8] sm:$0xff]  }
 0x22c   : > { %5782 = vst [vmem:[#allocation2 + $0xd0] sm:$0xff] %v5570_v31   ;;  %3912 = vmatmul.mubr.bf16.gmra.mxu1 %v5158_v32  ;;  %v4891_v34 = vsel %vm813_vm3, 1.0, %v6587_v1 }
 0x22d   : > { %v1598_v36 = vpop.f32.mrf.mxu0  ;;  %6429 = vmatmul.mubr.msk.bf16.gmra.mxu0 %vm1154_vm4, %v1127_v33  ;;  %3919 = vmatprep.mubr.bf16.mxu1 %v5167_v35  ;;  %v4892_v33 = vsel %vm814_vm2, 1.0, %v6587_v1  ;;  %v2622_v35 = vld [vmem:[%s7960_s2 + $0x380] sm:$0xff] }
 0x22e   : > { %6432 = vmatprep.mubr.msk.bf16.mxu0 %vm6588_vm1, %v6587_v1 }
 0x22f   : > { %v6334_v37 = vpop.f32.mrf.mxu0 }
 0x231   : > { %v1601_v42 = vpop.f32.mrf.mxu0 }
 0x232   : > { %v5575_v45 = vpack.c.bf16 %v1601_v42, %v1598_v36  ;;  %v2626_v36 = vld [vmem:[%s7960_s2 + $0x3a0] sm:$0xff]  ;;  %v1132_v42 = vpack.c.bf16 %v4892_v33, %v4891_v34 }
 0x233   : > { %v6335_v48 = vpop.f32.mrf.mxu0  ;;  %v5207_v44 = vcombine.high %v2622_v35, %v2626_v36  ;;  %v5206_v58 = vcombine.low %v2622_v35, %v2626_v36  ;;  %v6541_v33 = vld [vmem:[#allocation2 + $0xd0] sm:$0xff]  }
 0x234   : > { %5783 = vst [vmem:[#allocation2 + $0xd8] sm:$0xff] %v5575_v45   ;;  %3920 = vmatmul.mubr.bf16.gmra.mxu1 %v5166_v46  ;;  %v4893_v48 = vsel %vm815_vm6, 1.0, %v6587_v1 }
 0x235   : > { %v1606_v50 = vpop.f32.mrf.mxu0  ;;  %6433 = vmatmul.mubr.msk.bf16.gmra.mxu0 %vm1154_vm4, %v1128_v47  ;;  %3927 = vmatprep.mubr.bf16.mxu1 %v5175_v49  ;;  %v4894_v47 = vsel %vm816_vm5, 1.0, %v6587_v1 }
 0x236   : > { %6436 = vmatprep.mubr.msk.bf16.mxu0 %vm6588_vm1, %v6587_v1  ;;  %v1133_v55 = vpack.c.bf16 %v4894_v47, %v4893_v48  ;;  %v6545_v47 = vld [vmem:[#allocation2 + $0xc0] sm:$0xff]  }
 0x237   : > { %v6338_v51 = vpop.f32.mrf.mxu0 }
 0x238   : > { %v2634_v51 = vld [vmem:[%s7960_s2 + $0x3e0] sm:$0xff] }
 0x239   : > { %v1609_v56 = vpop.f32.mrf.mxu0 }
 0x23a   : > { %v5580_v59 = vpack.c.bf16 %v1609_v56, %v1606_v50  ;;  %v2630_v50 = vld [vmem:[%s7960_s2 + $0x3c0] sm:$0xff] }
 0x23b   : > { %v6339_v62 = vpop.f32.mrf.mxu0  ;;  %v6539_v21 = vld [vmem:[#allocation2 + $0xd8] sm:$0xff]  }
 0x23c   : > { %5784 = vst [vmem:[#allocation2 + $0xe0] sm:$0xff] %v5580_v59   ;;  %3928 = vmatmul.mubr.bf16.gmra.mxu1 %v5174_v60  ;;  %v6532_v59 = vld [vmem:[#allocation2 + $0xb8] sm:$0xff]   ;;  %v5215_v60 = vcombine.high %v2630_v50, %v2634_v51 }
 0x23d   : > { %v1614_v2 = vpop.f32.mrf.mxu0  ;;  %6437 = vmatmul.mubr.msk.bf16.gmra.mxu0 %vm1154_vm4, %v1129_v61  ;;  %3935 = vmatprep.mubr.bf16.mxu1 %v5183_v63 }
 0x23e   : > { %6440 = vmatprep.mubr.msk.bf16.mxu0 %vm6588_vm1, %v6587_v1 }
 0x23f   : > { %v6342_v3 = vpop.f32.mrf.mxu0 }
 0x240   : > { %v4895_v3 = vsel %vm817_vm8, 1.0, %v6587_v1 }
 0x241   : > { %v1617_v9 = vpop.f32.mrf.mxu0 }
 0x242   : > { %v5585_v12 = vpack.c.bf16 %v1617_v9, %v1614_v2  ;;  %v4896_v2 = vsel %vm818_vm7, 1.0, %v6587_v1  ;;  %v7301_v9 = vld [vmem:[%s7960_s2 + $0x28] sm:$0xff] }
 0x243   : > { %v6343_v15 = vpop.f32.mrf.mxu0  ;;  %v6537_v22 = vld [vmem:[#allocation2 + $0xe0] sm:$0xff]  }
 0x244   : > { %5785 = vst [vmem:[#allocation2 + $0xe8] sm:$0xff] %v5585_v12   ;;  %3936 = vmatmul.mubr.bf16.gmra.mxu1 %v5182_v13  ;;  %v1134_v13 = vpack.c.bf16 %v4896_v2, %v4895_v3  ;;  %v5214_v15 = vcombine.low %v2630_v50, %v2634_v51  ;;  %v2523_v50 = vld [vmem:[%s7960_s2 + $0x68] sm:$0xff]  ;;  %v2514_v3 = vld [vmem:[%s7960_s2 + $0x20] sm:$0xff] }
 0x245   : > { %v1622_v19 = vpop.f32.mrf.mxu0  ;;  %6441 = vmatmul.mubr.msk.bf16.gmra.mxu0 %vm1154_vm4, %v1130_v14  ;;  %3943 = vmatprep.mubr.bf16.mxu1 %v5191_v16  ;;  %v6536_v16 = vld [vmem:[#allocation2 + $0xa8] sm:$0xff]  }
 0x246   : > { %6444 = vmatprep.mubr.msk.bf16.mxu0 %vm6588_vm1, %v6587_v1  ;;  %v2531_v2 = vld [vmem:[%s7960_s2 + $0xa8] sm:$0xff] }
 0x247   : > { %v6346_v20 = vpop.f32.mrf.mxu0 }
 0x249   : > { %v1625_v17 = vpop.f32.mrf.mxu0 }
 0x24a   : > { %v5590_v26 = vpack.c.bf16 %v1625_v17, %v1622_v19  ;;  %v5097_v19 = vcombine.high %v7296_v7, %v7301_v9  ;;  %v6538_v17 = vld [vmem:[#allocation2 + $0xa0] sm:$0xff]  }
 0x24b   : > { %v6347_v29 = vpop.f32.mrf.mxu0  ;;  %v6535_v6 = vld [vmem:[#allocation2 + $0xe8] sm:$0xff]  }
 0x24c   : > { %5786 = vst [vmem:[#allocation2 + $0xf0] sm:$0xff] %v5590_v26   ;;  %3944 = vmatmul.mubr.bf16.gmra.mxu1 %v5190_v27  ;;  %v691_v26 = vpop.permute.xlu1 %690  ;;  %v688_v27 = vpop.permute.xlu0 %687  ;;  %v1135_v29 = vpack.c.bf16 %v4898_v24, %v4897_v25 }
 0x24d   : > { %v1630_v31 = vpop.f32.mrf.mxu0  ;;  %6445 = vmatmul.mubr.msk.bf16.gmra.mxu0 %vm1154_vm4, %v1131_v28  ;;  %3951 = vmatprep.mubr.bf16.mxu1 %v5199_v30  ;;  %vm822_vm11 = vcmp.eq.s32.totalorder %v691_v26, %v6713_v8  ;;  %vm821_vm12 = vcmp.eq.s32.totalorder %v688_v27, %v6713_v8  ;;  %v2543_v27 = vld [vmem:[%s7960_s2 + $0x108] sm:$0xff] }
 0x24e   : > { %6448 = vmatprep.mubr.msk.bf16.mxu0 %vm6588_vm1, %v6587_v1  ;;  %v4900_v35 = vsel %vm822_vm11, 1.0, %v6587_v1  ;;  %v4899_v36 = vsel %vm821_vm12, 1.0, %v6587_v1 }
 0x24f   : > { %v6350_v32 = vpop.f32.mrf.mxu0 }
 0x251   : > { %v1633_v37 = vpop.f32.mrf.mxu0 }
 0x252   : > { %v5595_v40 = vpack.c.bf16 %v1633_v37, %v1630_v31  ;;  %v6540_v31 = vld [vmem:[#allocation2 + $0x98] sm:$0xff]   ;;  %v6542_v37 = vld [vmem:[#allocation2 + $0x90] sm:$0xff]  }
 0x253   : > { %v6351_v43 = vpop.f32.mrf.mxu0  ;;  %v6533_v62 = vld [vmem:[#allocation2 + $0xf0] sm:$0xff]  }
 0x254   : > { %5787 = vst [vmem:[#allocation2 + $0xf8] sm:$0xff] %v5595_v40   ;;  %3952 = vmatmul.mubr.bf16.gmra.mxu1 %v5198_v41  ;;  %v697_v40 = vpop.permute.xlu1 %696  ;;  %v694_v41 = vpop.permute.xlu0 %693  ;;  %v1136_v43 = vpack.c.bf16 %v4900_v35, %v4899_v36 }
 0x255   : > { %v1638_v45 = vpop.f32.mrf.mxu0  ;;  %6449 = vmatmul.mubr.msk.bf16.gmra.mxu0 %vm1154_vm4, %v1132_v42  ;;  %3959 = vmatprep.mubr.bf16.mxu1 %v5207_v44  ;;  %vm824_vm13 = vcmp.eq.s32.totalorder %v697_v40, %v6713_v8  ;;  %vm823_vm14 = vcmp.eq.s32.totalorder %v694_v41, %v6713_v8 }
 0x256   : > { %6452 = vmatprep.mubr.msk.bf16.mxu0 %vm6588_vm1, %v6587_v1  ;;  %v4902_v51 = vsel %vm824_vm13, 1.0, %v6587_v1  ;;  %v4901_v52 = vsel %vm823_vm14, 1.0, %v6587_v1 }
 0x257   : > { %v6354_v46 = vpop.f32.mrf.mxu0 }
 0x259   : > { %v1641_v49 = vpop.f32.mrf.mxu0 }
 0x25a   : > { %v5600_v54 = vpack.c.bf16 %v1641_v49, %v1638_v45  ;;  %v6544_v45 = vld [vmem:[#allocation2 + $0x88] sm:$0xff]  }
 0x25b   : > { %v6355_v56 = vpop.f32.mrf.mxu0  ;;  %v6531_v57 = vld [vmem:[#allocation2 + $0xf8] sm:$0xff]   ;;  %v2519_v49 = vld [vmem:[%s7960_s2 + $0x48] sm:$0xff] }
 0x25c   : > { %5788 = vst [vmem:[#allocation2 + $0x100] sm:$0xff] %v5600_v54   ;;  %5996 = vmatprep.subr.bf16.mxu1 %v6531_v57  ;;  %3960 = vmatmul.mubr.bf16.gmra.mxu1 %v5206_v58  ;;  %v700_v56 = vpop.permute.xlu0 %699  ;;  %v5105_v58 = vcombine.high %v2519_v49, %v2523_v50 }
 0x25d   : > { %v1646_v61 = vpop.f32.mrf.mxu0  ;;  %6453 = vmatmul.mubr.msk.bf16.gmra.mxu0 %vm1154_vm4, %v1133_v55  ;;  %5997 = vmatpush3.bf16.msra.mxu1 %v6532_v59  ;;  %v5096_v55 = vcombine.low %v7296_v7, %v7301_v9  ;;  %v1137_v59 = vpack.c.bf16 %v4902_v51, %v4901_v52  ;;  %vm825_vm15 = vcmp.eq.s32.totalorder %v700_v56, %v6713_v8  ;;  %v2510_v8 = vld [vmem:[%s7960_s2] sm:$0xff]  ;;  %v2571_v56 = vld [vmem:[%s7960_s2 + $0x1e8] sm:$0xff] }
 0x25e   : > { %6456 = vmatprep.mubr.msk.bf16.mxu0 %vm6588_vm1, %v6587_v1  ;;  %5998 = vmatprep.subr.bf16.mxu1 %v6533_v62  ;;  %v2527_v62 = vld [vmem:[%s7960_s2 + $0x88] sm:$0xff]  ;;  %v5095_v10 = vcombine.high %v2510_v8, %v2514_v3 }
 0x25f   : > { %v6358_v63 = vpop.f32.mrf.mxu0  ;;  %3967 = vmatprep.mubr.bf16.mxu1 %v5215_v60  ;;  %v5113_v9 = vcombine.high %v2527_v62, %v2531_v2 }
 0x261   : > { %v1649_v5 = vpop.f32.mrf.mxu0  ;;  %5999 = vmatpush3.bf16.msra.mxu1 %v6534_v4  ;;  %v4903_v4 = vsel %vm825_vm15, 1.0, %v6587_v1 }
 0x262   : > { %v5605_v12 = vpack.c.bf16 %v1649_v5, %v1646_v61  ;;  %6000 = vmatprep.subr.bf16.mxu1 %v6535_v6  ;;  %v5104_v6 = vcombine.low %v2519_v49, %v2523_v50  ;;  %v1138_v11 = vpack.c.bf16 %v4903_v4, %v4903_v4 }
 0x263   : > { %v6359_v14 = vpop.f32.mrf.mxu0 }
 0x264   : > { %5789 = vst [vmem:[#allocation2 + $0x108] sm:$0xff] %v5605_v12   ;;  %3968 = vmatmul.mubr.bf16.gmra.mxu1 %v5214_v15  ;;  %v2535_v14 = vld [vmem:[%s7960_s2 + $0xc8] sm:$0xff] }
 0x265   : > { %v1654_v20 = vpop.f32.mrf.mxu0  ;;  %6457 = vmatmul.mubr.msk.bf16.gmra.mxu0 %vm1154_vm4, %v1134_v13  ;;  %6001 = vmatpush3.bf16.msra.mxu1 %v6536_v16  ;;  %v2518_v16 = vld [vmem:[%s7960_s2 + $0x40] sm:$0xff] }
 0x266   : > { %6460 = vmatprep.mubr.msk.bf16.mxu0 %vm6588_vm1, %v6587_v1  ;;  %6002 = vmatprep.subr.bf16.mxu1 %v6537_v22  ;;  %v5112_v22 = vcombine.low %v2527_v62, %v2531_v2  ;;  %v2575_v2 = vld [vmem:[%s7960_s2 + $0x208] sm:$0xff] }
 0x267   : > { %v6362_v23 = vpop.f32.mrf.mxu0  ;;  %4008 = vmatprep.mubr.bf16.mxu1 %v5097_v19  ;;  %v2522_v19 = vld [vmem:[%s7960_s2 + $0x60] sm:$0xff] }
 0x268   : > { %v5094_v23 = vcombine.low %v2510_v8, %v2514_v3  ;;  %v2579_v8 = vld [vmem:[%s7960_s2 + $0x228] sm:$0xff] }
 0x269   : > { %v1657_v18 = vpop.f32.mrf.mxu0  ;;  %6003 = vmatpush3.bf16.msra.mxu1 %v6538_v17  ;;  %v5103_v17 = vcombine.high %v2518_v16, %v2522_v19 }
 0x26a   : > { %v5610_v28 = vpack.c.bf16 %v1657_v18, %v1654_v20  ;;  %6004 = vmatprep.subr.bf16.mxu1 %v6539_v21 }
 0x26b   : > { %v6363_v30 = vpop.f32.mrf.mxu0 }
 0x26c   : > { %5790 = vst [vmem:[#allocation2 + $0x110] sm:$0xff] %v5610_v28   ;;  %v2547_v28 = vld [vmem:[%s7960_s2 + $0x128] sm:$0xff] }
 0x26d   : > { %v1662_v32 = vpop.f32.mrf.mxu0  ;;  %6461 = vmatmul.mubr.msk.bf16.gmra.mxu0 %vm1154_vm4, %v1135_v29  ;;  %6005 = vmatpush3.bf16.msra.mxu1 %v6540_v31  ;;  %v5102_v31 = vcombine.low %v2518_v16, %v2522_v19  ;;  %v5128_v40 = vcombine.low %v2543_v27, %v2547_v28 }
 0x26e   : > { %6464 = vmatprep.mubr.msk.bf16.mxu0 %vm6588_vm1, %v6587_v1  ;;  %6006 = vmatprep.subr.bf16.mxu1 %v6541_v33  ;;  %v5129_v33 = vcombine.high %v2543_v27, %v2547_v28 }
 0x26f   : > { %v6366_v34 = vpop.f32.mrf.mxu0 }
 0x271   : > { %v1665_v38 = vpop.f32.mrf.mxu0  ;;  %6007 = vmatpush3.bf16.msra.mxu1 %v6542_v37  ;;  %v2551_v37 = vld [vmem:[%s7960_s2 + $0x148] sm:$0xff] }
 0x272   : > { %v5615_v42 = vpack.c.bf16 %v1665_v38, %v1662_v32  ;;  %6008 = vmatprep.subr.bf16.mxu1 %v6543_v39  ;;  %v2555_v38 = vld [vmem:[%s7960_s2 + $0x168] sm:$0xff] }
 0x273   : > { %v6367_v44 = vpop.f32.mrf.mxu0  ;;  %v5136_v49 = vcombine.low %v2551_v37, %v2555_v38 }
 0x274   : > { %5791 = vst [vmem:[#allocation2 + $0x118] sm:$0xff] %v5615_v42   ;;  %v5137_v42 = vcombine.high %v2551_v37, %v2555_v38 }
 0x275   : > { %v1670_v46 = vpop.f32.mrf.mxu0  ;;  %6465 = vmatmul.mubr.msk.bf16.gmra.mxu0 %vm1154_vm4, %v1136_v43  ;;  %6009 = vmatpush3.bf16.msra.mxu1 %v6544_v45 }
 0x276   : > { %6468 = vmatprep.mubr.msk.bf16.mxu0 %vm6588_vm1, %v6587_v1  ;;  %6010 = vmatprep.subr.bf16.mxu1 %v6545_v47  ;;  %v2563_v47 = vld [vmem:[%s7960_s2 + $0x1a8] sm:$0xff] }
 0x277   : > { %v6370_v48 = vpop.f32.mrf.mxu0 }
 0x279   : > { %v1673_v54 = vpop.f32.mrf.mxu0  ;;  %6011 = vmatpush3.bf16.msra.mxu1 %v6546_v53 }
 0x27a   : > { %v5620_v57 = vpack.c.bf16 %v1673_v54, %v1670_v46  ;;  %v2559_v46 = vld [vmem:[%s7960_s2 + $0x188] sm:$0xff] }
 0x27b   : > { %v6371_v60 = vpop.f32.mrf.mxu0  ;;  %v5145_v51 = vcombine.high %v2559_v46, %v2563_v47 }
 0x27c   : > { %5792 = vst [vmem:[#allocation2 + $0x120] sm:$0xff] %v5620_v57   ;;  %4009 = vmatmul.mubr.bf16.vlgmr.msra.gmra.mxu1 %v5096_v55  ;;  %v2567_v55 = vld [vmem:[%s7960_s2 + $0x1c8] sm:$0xff] }
 0x27d   : > { %v1678_v61 = vpop.f32.mrf.mxu0  ;;  %6469 = vmatmul.mubr.msk.bf16.gmra.mxu0 %vm1154_vm4, %v1137_v59  ;;  %4016 = vmatprep.mubr.bf16.mxu1 %v5105_v58  ;;  %v5144_v58 = vcombine.low %v2559_v46, %v2563_v47  ;;  %v5153_v60 = vcombine.high %v2567_v55, %v2571_v56  ;;  %v5152_v4 = vcombine.low %v2567_v55, %v2571_v56 }
 0x27e   : > { %6472 = vmatprep.mubr.msk.bf16.mxu0 %vm6588_vm1, %v6587_v1  ;;  %v2539_v1 = vld [vmem:[%s7960_s2 + $0xe8] sm:$0xff]  ;;  %vm3811_vm1 = vcmask 1043456  }
 0x27f   : > { %v6374_v63 = vpop.f32.mrf.mxu0  ;;  %v5121_v25 = vcombine.high %v2535_v14, %v2539_v1  ;;  %v5120_v30 = vcombine.low %v2535_v14, %v2539_v1  ;;  %v5160_v14 = vcombine.low %v2575_v2, %v2579_v8 }
 0x281   : > { %v1681_v5 = vpop.f32.mrf.mxu0 }
 0x282   : > { %v5625_v7 = vpack.c.bf16 %v1681_v5, %v1678_v61 }
 0x283   : > { %v6375_v12 = vpop.f32.mrf.mxu0 }
 0x284   : > { %5793 = vst [vmem:[#allocation2 + $0x128] sm:$0xff] %v5625_v7   ;;  %4017 = vmatmul.mubr.bf16.gmra.mxu1 %v5104_v6  ;;  %v5161_v6 = vcombine.high %v2575_v2, %v2579_v8  ;;  %v2587_v12 = vld [vmem:[%s7960_s2 + $0x268] sm:$0xff] }
 0x285   : > { %v1686_v13 = vpop.f32.mrf.mxu0  ;;  %6473 = vmatmul.mubr.msk.bf16.gmra.mxu0 %vm1154_vm4, %v1138_v11  ;;  %4024 = vmatprep.mubr.bf16.mxu1 %v5113_v9  ;;  %v2583_v11 = vld [vmem:[%s7960_s2 + $0x248] sm:$0xff]  ;;  %vm3762_vm4 = vcmask 850944  }
 0x286   : > { %3847 = vmatprep.mubr.bf16.mxu0 %v5095_v10  ;;  %v5169_v1 = vcombine.high %v2583_v11, %v2587_v12  ;;  %v2615_v8 = vld [vmem:[%s7960_s2 + $0x348] sm:$0xff] }
 0x287   : > { %v6378_v15 = vpop.f32.mrf.mxu0 }
 0x289   : > { %v1689_v20 = vpop.f32.mrf.mxu0 }
 0x28a   : > { %v5630_v24 = vpack.c.bf16 %v1689_v20, %v1686_v13 }
 0x28b   : > { %v6379_v18 = vpop.f32.mrf.mxu0 }
 0x28c   : > { %5794 = vst [vmem:[#allocation2 + $0x130] sm:$0xff] %v5630_v24   ;;  %4025 = vmatmul.mubr.bf16.gmra.mxu1 %v5112_v22  ;;  %v2595_v24 = vld [vmem:[%s7960_s2 + $0x2a8] sm:$0xff]  ;;  %v5168_v18 = vcombine.low %v2583_v11, %v2587_v12 }
 0x28d   : > { %v1694_v21 = vpop.f32.mrf.mxu0  ;;  %3848 = vmatmul.mubr.bf16.vlgmr.msra.gmra.mxu0 %v5094_v23  ;;  %4032 = vmatprep.mubr.bf16.mxu1 %v5121_v25  ;;  %v2591_v23 = vld [vmem:[%s7960_s2 + $0x288] sm:$0xff] }
 0x28e   : > { %3855 = vmatprep.mubr.bf16.mxu0 %v5103_v17  ;;  %v5177_v27 = vcombine.high %v2591_v23, %v2595_v24 }
 0x28f   : > { %v6382_v26 = vpop.f32.mrf.mxu0 }
 0x291   : > { %v1697_v29 = vpop.f32.mrf.mxu0 }
 0x292   : > { %v5635_v32 = vpack.c.bf16 %v1697_v29, %v1694_v21 }
 0x293   : > { %v6383_v34 = vpop.f32.mrf.mxu0 }
 0x294   : > { %5795 = vst [vmem:[#allocation2 + $0x138] sm:$0xff] %v5635_v32   ;;  %4033 = vmatmul.mubr.bf16.gmra.mxu1 %v5120_v30 }
 0x295   : > { %v1702_v35 = vpop.f32.mrf.mxu0  ;;  %3856 = vmatmul.mubr.bf16.gmra.mxu0 %v5102_v31  ;;  %4040 = vmatprep.mubr.bf16.mxu1 %v5129_v33 }
 0x297   : > { %v6386_v36 = vpop.f32.mrf.mxu0 }
 0x298   : > { %v2603_v36 = vld [vmem:[%s7960_s2 + $0x2e8] sm:$0xff] }
 0x299   : > { %v1705_v39 = vpop.f32.mrf.mxu0 }
 0x29a   : > { %v5640_v41 = vpack.c.bf16 %v1705_v39, %v1702_v35  ;;  %v2599_v35 = vld [vmem:[%s7960_s2 + $0x2c8] sm:$0xff]  ;;  %v5176_v39 = vcombine.low %v2591_v23, %v2595_v24 }
 0x29b   : > { %v6387_v43 = vpop.f32.mrf.mxu0  ;;  %v2623_v23 = vld [vmem:[%s7960_s2 + $0x388] sm:$0xff] }
 0x29c   : > { %5796 = vst [vmem:[#allocation2 + $0x140] sm:$0xff] %v5640_v41   ;;  %4041 = vmatmul.mubr.bf16.gmra.mxu1 %v5128_v40  ;;  %v2627_v24 = vld [vmem:[%s7960_s2 + $0x3a8] sm:$0xff] }
 0x29d   : > { %v1710_v44 = vpop.f32.mrf.mxu0  ;;  %4048 = vmatprep.mubr.bf16.mxu1 %v5137_v42  ;;  %v5185_v42 = vcombine.high %v2599_v35, %v2603_v36 }
 0x29f   : > { %v6390_v45 = vpop.f32.mrf.mxu0 }
 0x2a1   : > { %v1713_v48 = vpop.f32.mrf.mxu0 }
 0x2a2   : > { %v5645_v50 = vpack.c.bf16 %v1713_v48, %v1710_v44 }
 0x2a3   : > { %v6391_v52 = vpop.f32.mrf.mxu0 }
 0x2a4   : > { %5797 = vst [vmem:[#allocation2 + $0x148] sm:$0xff] %v5645_v50   ;;  %4049 = vmatmul.mubr.bf16.gmra.mxu1 %v5136_v49  ;;  %v2607_v50 = vld [vmem:[%s7960_s2 + $0x308] sm:$0xff] }
 0x2a5   : > { %v1718_v53 = vpop.f32.mrf.mxu0  ;;  %4056 = vmatprep.mubr.bf16.mxu1 %v5145_v51  ;;  %v2611_v51 = vld [vmem:[%s7960_s2 + $0x328] sm:$0xff] }
 0x2a7   : > { %v6394_v54 = vpop.f32.mrf.mxu0 }
 0x2a8   : > { %v5184_v54 = vcombine.low %v2599_v35, %v2603_v36 }
 0x2a9   : > { %v1721_v57 = vpop.f32.mrf.mxu0 }
 0x2aa   : > { %v5650_v59 = vpack.c.bf16 %v1721_v57, %v1718_v53  ;;  %v5193_v57 = vcombine.high %v2607_v50, %v2611_v51 }
 0x2ab   : > { %v6395_v61 = vpop.f32.mrf.mxu0 }
 0x2ac   : > { %5798 = vst [vmem:[#allocation2 + $0x150] sm:$0xff] %v5650_v59   ;;  %4057 = vmatmul.mubr.bf16.gmra.mxu1 %v5144_v58 }
 0x2ad   : > { %v1726_v62 = vpop.f32.mrf.mxu0  ;;  %4064 = vmatprep.mubr.bf16.mxu1 %v5153_v60 }
 0x2af   : > { %v6398_v63 = vpop.f32.mrf.mxu0 }
 0x2b1   : > { %v1729_v3 = vpop.f32.mrf.mxu0 }
 0x2b2   : > { %v5655_v5 = vpack.c.bf16 %v1729_v3, %v1726_v62  ;;  %v2619_v3 = vld [vmem:[%s7960_s2 + $0x368] sm:$0xff] }
 0x2b3   : > { %v6399_v7 = vpop.f32.mrf.mxu0 }
 0x2b4   : > { %5799 = vst [vmem:[#allocation2 + $0x158] sm:$0xff] %v5655_v5   ;;  %4065 = vmatmul.mubr.bf16.gmra.mxu1 %v5152_v4 }
 0x2b5   : > { %v1734_v9 = vpop.f32.mrf.mxu0  ;;  %4072 = vmatprep.mubr.bf16.mxu1 %v5161_v6  ;;  %v5192_v6 = vcombine.low %v2607_v50, %v2611_v51 }
 0x2b7   : > { %v6402_v10 = vpop.f32.mrf.mxu0 }
 0x2b8   : > { %v5201_v10 = vcombine.high %v2615_v8, %v2619_v3 }
 0x2b9   : > { %v1737_v13 = vpop.f32.mrf.mxu0 }
 0x2ba   : > { %v5660_v15 = vpack.c.bf16 %v1737_v13, %v1734_v9 }
 0x2bb   : > { %v6403_v16 = vpop.f32.mrf.mxu0 }
 0x2bc   : > { %5800 = vst [vmem:[#allocation2 + $0x160] sm:$0xff] %v5660_v15   ;;  %4073 = vmatmul.mubr.bf16.gmra.mxu1 %v5160_v14  ;;  %v5912_v20 = vpop.f32.mrf.mxu1  ;;  %v6548_v14 = vld [vmem:[#allocation2 + $0x138] sm:$0xff]  }
 0x2bd   : > { %v1742_v19 = vpop.f32.mrf.mxu0  ;;  %4080 = vmatprep.mubr.bf16.mxu1 %v5169_v1 }
 0x2be   : > { %v5913_v25 = vpop.f32.mrf.mxu1 }
 0x2bf   : > { %v6406_v22 = vpop.f32.mrf.mxu0  ;;  %v7406_v21 = vadd.f32 %v5913_v25, %v5912_v20  ;;  %v6550_v25 = vld [vmem:[#allocation2 + $0x130] sm:$0xff]  }
 0x2c0   : > { %v5915_v28 = vpop.f32.mrf.mxu1 }
 0x2c1   : > { %v1745_v17 = vpop.f32.mrf.mxu0 }
 0x2c2   : > { %v5665_v26 = vpack.c.bf16 %v1745_v17, %v1742_v19  ;;  %v5916_v30 = vpop.f32.mrf.mxu1 }
 0x2c3   : > { %v6407_v29 = vpop.f32.mrf.mxu0  ;;  %v7408_v32 = vadd.f32 %v5916_v30, %v5915_v28  ;;  %v5209_v30 = vcombine.high %v2623_v23, %v2627_v24 }
 0x2c4   : > { %5801 = vst [vmem:[#allocation2 + $0x168] sm:$0xff] %v5665_v26   ;;  %4081 = vmatmul.mubr.bf16.gmra.mxu1 %v5168_v18  ;;  %v5918_v33 = vpop.f32.mrf.mxu1 }
 0x2c5   : > { %v1750_v31 = vpop.f32.mrf.mxu0  ;;  %4088 = vmatprep.mubr.bf16.mxu1 %v5177_v27  ;;  %v5200_v27 = vcombine.low %v2615_v8, %v2619_v3  ;;  %v2516_v8 = vld [vmem:[%s7960_s2 + $0x30] sm:$0xff] }
 0x2c6   : > { %v5919_v37 = vpop.f32.mrf.mxu1  ;;  %v6558_v3 = vld [vmem:[#allocation2 + $0x110] sm:$0xff]  }
 0x2c7   : > { %v6410_v34 = vpop.f32.mrf.mxu0  ;;  %v7416_v40 = vadd.f32 %v5919_v37, %v5918_v33  ;;  %v6553_v37 = vld [vmem:[#allocation2 + $0x160] sm:$0xff]  }
 0x2c8   : > { %v5921_v43 = vpop.f32.mrf.mxu1  ;;  %v6552_v34 = vld [vmem:[#allocation2 + $0x128] sm:$0xff]  }
 0x2c9   : > { %v1753_v38 = vpop.f32.mrf.mxu0 }
 0x2ca   : > { %v5670_v41 = vpack.c.bf16 %v1753_v38, %v1750_v31  ;;  %v5922_v45 = vpop.f32.mrf.mxu1 }
 0x2cb   : > { %v6411_v44 = vpop.f32.mrf.mxu0  ;;  %v7418_v47 = vadd.f32 %v5922_v45, %v5921_v43  ;;  %v6551_v26 = vld [vmem:[#allocation2 + $0x168] sm:$0xff]  }
 0x2cc   : > { %5802 = vst [vmem:[#allocation2 + $0x170] sm:$0xff] %v5670_v41   ;;  %4089 = vmatmul.mubr.bf16.gmra.mxu1 %v5176_v39  ;;  %v5924_v48 = vpop.f32.mrf.mxu1  ;;  %v2635_v43 = vld [vmem:[%s7960_s2 + $0x3e8] sm:$0xff]  ;;  %v6554_v44 = vld [vmem:[#allocation2 + $0x120] sm:$0xff]  }
 0x2cd   : > { %v1758_v46 = vpop.f32.mrf.mxu0  ;;  %4096 = vmatprep.mubr.bf16.mxu1 %v5185_v42  ;;  %v2631_v42 = vld [vmem:[%s7960_s2 + $0x3c8] sm:$0xff] }
 0x2ce   : > { %v5925_v52 = vpop.f32.mrf.mxu1 }
 0x2cf   : > { %v6414_v49 = vpop.f32.mrf.mxu0  ;;  %v7426_v55 = vadd.f32 %v5925_v52, %v5924_v48  ;;  %v6555_v48 = vld [vmem:[#allocation2 + $0x158] sm:$0xff]   ;;  %v5217_v52 = vcombine.high %v2631_v42, %v2635_v43 }
 0x2d0   : > { %v5927_v58 = vpop.f32.mrf.mxu1  ;;  %v5208_v49 = vcombine.low %v2623_v23, %v2627_v24 }
 0x2d1   : > { %v1761_v53 = vpop.f32.mrf.mxu0 }
 0x2d2   : > { %v5675_v56 = vpack.c.bf16 %v1761_v53, %v1758_v46  ;;  %v5928_v60 = vpop.f32.mrf.mxu1 }
 0x2d3   : > { %v6415_v59 = vpop.f32.mrf.mxu0  ;;  %v7428_v62 = vadd.f32 %v5928_v60, %v5927_v58  ;;  %v6549_v16 = vld [vmem:[#allocation2 + $0x170] sm:$0xff]  }
 0x2d4   : > { %5803 = vst [vmem:[#allocation2 + $0x178] sm:$0xff] %v5675_v56   ;;  %4097 = vmatmul.mubr.bf16.gmra.mxu1 %v5184_v54  ;;  %v5930_v63 = vpop.f32.mrf.mxu1  ;;  %v6556_v56 = vld [vmem:[#allocation2 + $0x118] sm:$0xff]   ;;  %v6557_v59 = vld [vmem:[#allocation2 + $0x150] sm:$0xff]  }
 0x2d5   : > { %v1766_v61 = vpop.f32.mrf.mxu0  ;;  %4104 = vmatprep.mubr.bf16.mxu1 %v5193_v57 }
 0x2d6   : > { %v5931_v4 = vpop.f32.mrf.mxu1 }
 0x2d7   : > { %v6418_v2 = vpop.f32.mrf.mxu0  ;;  %v7436_v7 = vadd.f32 %v5931_v4, %v5930_v63 }
 0x2d8   : > { %v5933_v11 = vpop.f32.mrf.mxu1  ;;  %v2512_v2 = vld [vmem:[%s7960_s2 + $0x10] sm:$0xff] }
 0x2d9   : > { %v1769_v5 = vpop.f32.mrf.mxu0 }
 0x2da   : > { %v5680_v9 = vpack.c.bf16 %v1769_v5, %v1766_v61  ;;  %v5934_v15 = vpop.f32.mrf.mxu1 }
 0x2db   : > { %v6419_v12 = vpop.f32.mrf.mxu0  ;;  %v6547_v13 = vld [vmem:[#allocation2 + $0x178] sm:$0xff]   ;;  %v7438_v19 = vadd.f32 %v5934_v15, %v5933_v11  ;;  %v6560_v15 = vld [vmem:[#allocation2 + $0x108] sm:$0xff]  }
 0x2dc   : > { %5804 = vst [vmem:[#allocation2 + $0x180] sm:$0xff] %v5680_v9   ;;  %4105 = vmatmul.mubr.bf16.gmra.mxu1 %v5192_v6  ;;  %6108 = vmatprep.subr.bf16.mxu1 %v6547_v13  ;;  %v5936_v20 = vpop.f32.mrf.mxu1  ;;  %v6559_v6 = vld [vmem:[#allocation2 + $0x148] sm:$0xff]   ;;  %v5216_v9 = vcombine.low %v2631_v42, %v2635_v43  ;;  %v5099_v12 = vcombine.high %v2512_v2, %v2516_v8  ;;  %v2528_v43 = vld [vmem:[%s7960_s2 + $0x90] sm:$0xff] }
 0x2dd   : > { %v1774_v1 = vpop.f32.mrf.mxu0  ;;  %6109 = vmatpush3.bf16.msra.mxu1 %v6548_v14  ;;  %4112 = vmatprep.mubr.bf16.mxu1 %v5201_v10 }
 0x2de   : > { %6110 = vmatprep.subr.bf16.mxu1 %v6549_v16  ;;  %v5937_v17 = vpop.f32.mrf.mxu1 }
 0x2df   : > { %v6422_v22 = vpop.f32.mrf.mxu0  ;;  %v7446_v28 = vadd.f32 %v5937_v17, %v5936_v20  ;;  %v6561_v20 = vld [vmem:[#allocation2 + $0x140] sm:$0xff]   ;;  %v2524_v17 = vld [vmem:[%s7960_s2 + $0x70] sm:$0xff] }
 0x2e0   : > { %v5939_v31 = vpop.f32.mrf.mxu1 }
 0x2e1   : > { %v1777_v18 = vpop.f32.mrf.mxu0  ;;  %6111 = vmatpush3.bf16.msra.mxu1 %v6550_v25  ;;  %v2520_v25 = vld [vmem:[%s7960_s2 + $0x50] sm:$0xff] }
 0x2e2   : > { %v5685_v29 = vpack.c.bf16 %v1777_v18, %v1774_v1  ;;  %6112 = vmatprep.subr.bf16.mxu1 %v6551_v26  ;;  %v5940_v35 = vpop.f32.mrf.mxu1  ;;  %v6562_v18 = vld [vmem:[#allocation2 + $0x100] sm:$0xff]  }
 0x2e3   : > { %v6423_v33 = vpop.f32.mrf.mxu0  ;;  %v7448_v38 = vadd.f32 %v5940_v35, %v5939_v31 }
 0x2e4   : > { %5805 = vst [vmem:[#allocation2 + $0x188] sm:$0xff] %v5685_v29   ;;  %4113 = vmatmul.mubr.bf16.gmra.mxu1 %v5200_v27  ;;  %v5942_v39 = vpop.f32.mrf.mxu1  ;;  %v5098_v29 = vcombine.low %v2512_v2, %v2516_v8  ;;  %v5107_v33 = vcombine.high %v2520_v25, %v2524_v17  ;;  %v2540_v2 = vld [vmem:[%s7960_s2 + $0xf0] sm:$0xff] }
 0x2e5   : > { %v1782_v36 = vpop.f32.mrf.mxu0  ;;  %6113 = vmatpush3.bf16.msra.mxu1 %v6552_v34  ;;  %4120 = vmatprep.mubr.bf16.mxu1 %v5209_v30 }
 0x2e6   : > { %6114 = vmatprep.subr.bf16.mxu1 %v6553_v37  ;;  %v5943_v45 = vpop.f32.mrf.mxu1 }
 0x2e7   : > { %v6426_v41 = vpop.f32.mrf.mxu0  ;;  %v7456_v50 = vadd.f32 %v5943_v45, %v5942_v39 }
 0x2e8   : > { %v5945_v53 = vpop.f32.mrf.mxu1 }
 0x2e9   : > { %v1785_v46 = vpop.f32.mrf.mxu0  ;;  %6115 = vmatpush3.bf16.msra.mxu1 %v6554_v44  ;;  %v2532_v44 = vld [vmem:[%s7960_s2 + $0xb0] sm:$0xff] }
 0x2ea   : > { %v5690_v51 = vpack.c.bf16 %v1785_v46, %v1782_v36  ;;  %6116 = vmatprep.subr.bf16.mxu1 %v6555_v48  ;;  %v5946_v57 = vpop.f32.mrf.mxu1  ;;  %v5106_v48 = vcombine.low %v2520_v25, %v2524_v17 }
 0x2eb   : > { %v6427_v54 = vpop.f32.mrf.mxu0  ;;  %v7458_v60 = vadd.f32 %v5946_v57, %v5945_v53 }
 0x2ec   : > { %5806 = vst [vmem:[#allocation2 + $0x190] sm:$0xff] %v5690_v51   ;;  %4121 = vmatmul.mubr.bf16.gmra.mxu1 %v5208_v49  ;;  %v5948_v61 = vpop.f32.mrf.mxu1 }
 0x2ed   : > { %v1790_v58 = vpop.f32.mrf.mxu0  ;;  %6117 = vmatpush3.bf16.msra.mxu1 %v6556_v56  ;;  %4128 = vmatprep.mubr.bf16.mxu1 %v5217_v52  ;;  %v5115_v52 = vcombine.high %v2528_v43, %v2532_v44 }
 0x2ee   : > { %6118 = vmatprep.subr.bf16.mxu1 %v6557_v59  ;;  %v5949_v4 = vpop.f32.mrf.mxu1 }
 0x2ef   : > { %v6430_v63 = vpop.f32.mrf.mxu0  ;;  %v7466_v10 = vadd.f32 %v5949_v4, %v5948_v61  ;;  %v5114_v4 = vcombine.low %v2528_v43, %v2532_v44 }
 0x2f0   : > { %v5951_v13 = vpop.f32.mrf.mxu1  ;;  %v2536_v63 = vld [vmem:[%s7960_s2 + $0xd0] sm:$0xff] }
 0x2f1   : > { %v1793_v5 = vpop.f32.mrf.mxu0  ;;  %6119 = vmatpush3.bf16.msra.mxu1 %v6558_v3  ;;  %v5122_v17 = vcombine.low %v2536_v63, %v2540_v2 }
 0x2f2   : > { %v5695_v11 = vpack.c.bf16 %v1793_v5, %v1790_v58  ;;  %6120 = vmatprep.subr.bf16.mxu1 %v6559_v6  ;;  %v5952_v1 = vpop.f32.mrf.mxu1 }
 0x2f3   : > { %v6431_v14 = vpop.f32.mrf.mxu0  ;;  %v7468_v22 = vadd.f32 %v5952_v1, %v5951_v13 }
 0x2f4   : > { %5807 = vst [vmem:[#allocation2 + $0x198] sm:$0xff] %v5695_v11   ;;  %4129 = vmatmul.mubr.bf16.gmra.mxu1 %v5216_v9  ;;  %v5954_v23 = vpop.f32.mrf.mxu1  ;;  %v5123_v9 = vcombine.high %v2536_v63, %v2540_v2  ;;  %v2560_v63 = vld [vmem:[%s7960_s2 + $0x190] sm:$0xff] }
 0x2f5   : > { %v1798_v16 = vpop.f32.mrf.mxu0  ;;  %6121 = vmatpush3.bf16.msra.mxu1 %v6560_v15  ;;  %4169 = vmatprep.mubr.bf16.mxu1 %v5099_v12  ;;  %v2564_v2 = vld [vmem:[%s7960_s2 + $0x1b0] sm:$0xff] }
 0x2f6   : > { %6122 = vmatprep.subr.bf16.mxu1 %v6561_v20  ;;  %v5955_v26 = vpop.f32.mrf.mxu1  ;;  %v2544_v20 = vld [vmem:[%s7960_s2 + $0x110] sm:$0xff] }
 0x2f7   : > { %v6434_v24 = vpop.f32.mrf.mxu0  ;;  %v7476_v30 = vadd.f32 %v5955_v26, %v5954_v23  ;;  %v2548_v23 = vld [vmem:[%s7960_s2 + $0x130] sm:$0xff] }
 0x2f8   : > { %v5957_v34 = vpop.f32.mrf.mxu1 }
 0x2f9   : > { %v1801_v27 = vpop.f32.mrf.mxu0  ;;  %6123 = vmatpush3.bf16.msra.mxu1 %v6562_v18 }
 0x2fa   : > { %v5700_v31 = vpack.c.bf16 %v1801_v27, %v1798_v16  ;;  %4298 = vmatprep.subr.bf16.mxu1 %v6586_v0  ;;  %v5958_v36 = vpop.f32.mrf.mxu1  ;;  %v5131_v27 = vcombine.high %v2544_v20, %v2548_v23 }
 0x2fb   : > { %v6435_v35 = vpop.f32.mrf.mxu0  ;;  %v7479_v39 = vadd.f32 %v5958_v36, %v5957_v34 }
 0x2fc   : > { %5808 = vst [vmem:[#allocation2 + $0x1a0] sm:$0xff] %v5700_v31   ;;  %4170 = vmatmul.mubr.bf16.vlgmr.msra.gmra.mxu1 %v5098_v29  ;;  %v5960_v41 = vpop.f32.mrf.mxu1 }
 0x2fd   : > { %v1806_v37 = vpop.f32.mrf.mxu0  ;;  %4177 = vmatprep.mubr.bf16.mxu1 %v5107_v33 }
 0x2fe   : > { %v5961_v45 = vpop.f32.mrf.mxu1 }
 0x2ff   : > { %v6438_v42 = vpop.f32.mrf.mxu0  ;;  %v7487_v49 = vadd.f32 %v5961_v45, %v5960_v41  ;;  %v2552_v41 = vld [vmem:[%s7960_s2 + $0x150] sm:$0xff]  ;;  %v5130_v45 = vcombine.low %v2544_v20, %v2548_v23 }
 0x300   : > { %v5963_v53 = vpop.f32.mrf.mxu1  ;;  %v2556_v42 = vld [vmem:[%s7960_s2 + $0x170] sm:$0xff] }
 0x301   : > { %v1809_v46 = vpop.f32.mrf.mxu0 }
 0x302   : > { %v5705_v51 = vpack.c.bf16 %v1809_v46, %v1806_v37  ;;  %v5964_v56 = vpop.f32.mrf.mxu1 }
 0x303   : > { %v6439_v54 = vpop.f32.mrf.mxu0  ;;  %v7489_v58 = vadd.f32 %v5964_v56, %v5963_v53 }
 0x304   : > { %5809 = vst [vmem:[#allocation2 + $0x1a8] sm:$0xff] %v5705_v51   ;;  %4178 = vmatmul.mubr.bf16.gmra.mxu1 %v5106_v48  ;;  %v5966_v59 = vpop.f32.mrf.mxu1  ;;  %v5139_v51 = vcombine.high %v2552_v41, %v2556_v42 }
 0x305   : > { %v1814_v57 = vpop.f32.mrf.mxu0  ;;  %4185 = vmatprep.mubr.bf16.mxu1 %v5115_v52 }
 0x306   : > { %v5967_v8 = vpop.f32.mrf.mxu1 }
 0x307   : > { %v6442_v61 = vpop.f32.mrf.mxu0  ;;  %v7497_v5 = vadd.f32 %v5967_v8, %v5966_v59 }
 0x308   : > { %v5969_v11 = vpop.f32.mrf.mxu1 }
 0x309   : > { %v1817_v3 = vpop.f32.mrf.mxu0 }
 0x30a   : > { %v5710_v6 = vpack.c.bf16 %v1817_v3, %v1814_v57  ;;  %v5970_v13 = vpop.f32.mrf.mxu1 }
 0x30b   : > { %v6443_v12 = vpop.f32.mrf.mxu0  ;;  %v7499_v15 = vadd.f32 %v5970_v13, %v5969_v11 }
 0x30c   : > { %5810 = vst [vmem:[#allocation2 + $0x1b0] sm:$0xff] %v5710_v6   ;;  %4186 = vmatmul.mubr.bf16.gmra.mxu1 %v5114_v4  ;;  %v5972_v1 = vpop.f32.mrf.mxu1  ;;  %v5138_v6 = vcombine.low %v2552_v41, %v2556_v42  ;;  %v5147_v12 = vcombine.high %v2560_v63, %v2564_v2 }
 0x30d   : > { %v1822_v14 = vpop.f32.mrf.mxu0  ;;  %4193 = vmatprep.mubr.bf16.mxu1 %v5123_v9 }
 0x30e   : > { %v5973_v24 = vpop.f32.mrf.mxu1 }
 0x30f   : > { %v6446_v16 = vpop.f32.mrf.mxu0  ;;  %v7507_v18 = vadd.f32 %v5973_v24, %v5972_v1 }
 0x310   : > { %v5975_v29 = vpop.f32.mrf.mxu1  ;;  %v6565_v16 = vld [vmem:[#allocation2 + $0x1a8] sm:$0xff]  }
 0x311   : > { %v1825_v25 = vpop.f32.mrf.mxu0 }
 0x312   : > { %v5715_v26 = vpack.c.bf16 %v1825_v25, %v1822_v14  ;;  %v5976_v33 = vpop.f32.mrf.mxu1 }
 0x313   : > { %v6447_v31 = vpop.f32.mrf.mxu0  ;;  %v7509_v35 = vadd.f32 %v5976_v33, %v5975_v29  ;;  %v6564_v3 = vld [vmem:[#allocation2 + $0x1b0] sm:$0xff]   ;;  %v6566_v29 = vld [vmem:[#allocation2 + $0x1a0] sm:$0xff]   ;;  %v5146_v33 = vcombine.low %v2560_v63, %v2564_v2 }
 0x314   : > { %5811 = vst [vmem:[#allocation2 + $0x1b8] sm:$0xff] %v5715_v26   ;;  %4194 = vmatmul.mubr.bf16.gmra.mxu1 %v5122_v17  ;;  %v5978_v36 = vpop.f32.mrf.mxu1  ;;  %v2568_v17 = vld [vmem:[%s7960_s2 + $0x1d0] sm:$0xff] }
 0x315   : > { %v1830_v34 = vpop.f32.mrf.mxu0  ;;  %4201 = vmatprep.mubr.bf16.mxu1 %v5131_v27  ;;  %v2572_v26 = vld [vmem:[%s7960_s2 + $0x1f0] sm:$0xff] }
 0x316   : > { %v5979_v43 = vpop.f32.mrf.mxu1 }
 0x317   : > { %v6450_v37 = vpop.f32.mrf.mxu0  ;;  %v7517_v46 = vadd.f32 %v5979_v43, %v5978_v36 }
 0x318   : > { %v5981_v52 = vpop.f32.mrf.mxu1  ;;  %v5155_v37 = vcombine.high %v2568_v17, %v2572_v26 }
 0x319   : > { %v1833_v44 = vpop.f32.mrf.mxu0 }
 0x31a   : > { %v5720_v48 = vpack.c.bf16 %v1833_v44, %v1830_v34  ;;  %v5982_v56 = vpop.f32.mrf.mxu1  ;;  %v6567_v44 = vld [vmem:[#allocation2 + $0x198] sm:$0xff]  }
 0x31b   : > { %v6451_v53 = vpop.f32.mrf.mxu0  ;;  %v6563_v54 = vld [vmem:[#allocation2 + $0x1b8] sm:$0xff]   ;;  %v7519_v59 = vadd.f32 %v5982_v56, %v5981_v52  ;;  %v6568_v56 = vld [vmem:[#allocation2 + $0x190] sm:$0xff]  }
 0x31c   : > { %5812 = vst [vmem:[#allocation2 + $0x1c0] sm:$0xff] %v5720_v48   ;;  %4202 = vmatmul.mubr.bf16.gmra.mxu1 %v5130_v45  ;;  %v5984_v8 = vpop.f32.mrf.mxu1  ;;  %v2576_v53 = vld [vmem:[%s7960_s2 + $0x210] sm:$0xff] }
 0x31d   : > { %v1838_v57 = vpop.f32.mrf.mxu0  ;;  %4299 = vmatpush1.bf16.msra.mxu1 %v6563_v54  ;;  %4209 = vmatprep.mubr.bf16.mxu1 %v5139_v51  ;;  %v2580_v54 = vld [vmem:[%s7960_s2 + $0x230] sm:$0xff] }
 0x31e   : > { %4300 = vmatprep.subr.bf16.mxu1 %v6586_v0  ;;  %v5985_v9 = vpop.f32.mrf.mxu1  ;;  %v5163_v2 = vcombine.high %v2576_v53, %v2580_v54 }
 0x31f   : > { %v6454_v61 = vpop.f32.mrf.mxu0  ;;  %v7528_v13 = vadd.f32 %v5985_v9, %v5984_v8  ;;  %v2584_v9 = vld [vmem:[%s7960_s2 + $0x250] sm:$0xff] }
 0x320   : > { %v5987_v1 = vpop.f32.mrf.mxu1  ;;  %v5154_v61 = vcombine.low %v2568_v17, %v2572_v26 }
 0x321   : > { %v1841_v4 = vpop.f32.mrf.mxu0  ;;  %4301 = vmatpush1.bf16.msra.mxu1 %v6564_v3  ;;  %v6569_v3 = vld [vmem:[#allocation2 + $0x188] sm:$0xff]  }
 0x322   : > { %v5725_v11 = vpack.c.bf16 %v1841_v4, %v1838_v57  ;;  %4302 = vmatprep.subr.bf16.mxu1 %v6586_v0  ;;  %v5988_v23 = vpop.f32.mrf.mxu1 }
 0x323   : > { %v6455_v14 = vpop.f32.mrf.mxu0  ;;  %v7531_v24 = vadd.f32 %v5988_v23, %v5987_v1  ;;  %v5162_v1 = vcombine.low %v2576_v53, %v2580_v54 }
 0x324   : > { %5813 = vst [vmem:[#allocation2 + $0x1c8] sm:$0xff] %v5725_v11   ;;  %4210 = vmatmul.mubr.bf16.gmra.mxu1 %v5138_v6  ;;  %v5990_v27 = vpop.f32.mrf.mxu1  ;;  %v2588_v11 = vld [vmem:[%s7960_s2 + $0x270] sm:$0xff] }
 0x325   : > { %v1846_v20 = vpop.f32.mrf.mxu0  ;;  %4303 = vmatpush1.bf16.msra.mxu1 %v6565_v16  ;;  %4217 = vmatprep.mubr.bf16.mxu1 %v5147_v12  ;;  %v6570_v12 = vld [vmem:[#allocation2 + $0x180] sm:$0xff]  }
 0x326   : > { %4304 = vmatprep.subr.bf16.mxu1 %v6586_v0  ;;  %v5991_v34 = vpop.f32.mrf.mxu1 }
 0x327   : > { %v6458_v25 = vpop.f32.mrf.mxu0  ;;  %v7540_v41 = vadd.f32 %v5991_v34, %v5990_v27 }
 0x328   : > { %v5993_v43 = vpop.f32.mrf.mxu1 }
 0x329   : > { %v1849_v31 = vpop.f32.mrf.mxu0  ;;  %4305 = vmatpush1.bf16.msra.mxu1 %v6566_v29  ;;  %v2592_v29 = vld [vmem:[%s7960_s2 + $0x290] sm:$0xff] }
 0x32a   : > { %v5730_v36 = vpack.c.bf16 %v1849_v31, %v1846_v20  ;;  %4306 = vmatprep.subr.bf16.mxu1 %v6586_v0  ;;  %v5994_v48 = vpop.f32.mrf.mxu1  ;;  %v5171_v20 = vcombine.high %v2584_v9, %v2588_v11  ;;  %v2596_v31 = vld [vmem:[%s7960_s2 + $0x2b0] sm:$0xff] }
 0x32b   : > { %v6459_v42 = vpop.f32.mrf.mxu0  ;;  %v7543_v51 = vadd.f32 %v5994_v48, %v5993_v43  ;;  %v5179_v43 = vcombine.high %v2592_v29, %v2596_v31 }
 0x32c   : > { %5814 = vst [vmem:[#allocation2 + $0x1d0] sm:$0xff] %v5730_v36   ;;  %4218 = vmatmul.mubr.bf16.gmra.mxu1 %v5146_v33 }
 0x32d   : > { %v1854_v45 = vpop.f32.mrf.mxu0  ;;  %4307 = vmatpush1.bf16.msra.mxu1 %v6567_v44  ;;  %4225 = vmatprep.mubr.bf16.mxu1 %v5155_v37  ;;  %v5170_v37 = vcombine.low %v2584_v9, %v2588_v11 }
 0x32e   : > { %4308 = vmatprep.subr.bf16.mxu1 %v6586_v0 }
 0x32f   : > { %v6462_v52 = vpop.f32.mrf.mxu0 }
 0x331   : > { %v1857_v57 = vpop.f32.mrf.mxu0  ;;  %4309 = vmatpush1.bf16.msra.mxu1 %v6568_v56 }
 0x332   : > { %v5735_v63 = vpack.c.bf16 %v1857_v57, %v1854_v45  ;;  %4310 = vmatprep.subr.bf16.mxu1 %v6586_v0 }
 0x333   : > { %v6463_v8 = vpop.f32.mrf.mxu0 }
 0x334   : > { %5815 = vst [vmem:[#allocation2 + $0x1d8] sm:$0xff] %v5735_v63   ;;  %4226 = vmatmul.mubr.bf16.gmra.mxu1 %v5154_v61  ;;  %v2600_v61 = vld [vmem:[%s7960_s2 + $0x2d0] sm:$0xff] }
 0x335   : > { %v1862_v4 = vpop.f32.mrf.mxu0  ;;  %4311 = vmatpush1.bf16.msra.mxu1 %v6569_v3  ;;  %4233 = vmatprep.mubr.bf16.mxu1 %v5163_v2  ;;  %v2604_v63 = vld [vmem:[%s7960_s2 + $0x2f0] sm:$0xff] }
 0x336   : > { %4312 = vmatprep.subr.bf16.mxu1 %v6586_v0 }
 0x337   : > { %v6466_v6 = vpop.f32.mrf.mxu0 }
 0x338   : > { %v5187_v6 = vcombine.high %v2600_v61, %v2604_v63 }
 0x339   : > { %v1865_v14 = vpop.f32.mrf.mxu0  ;;  %4313 = vmatpush1.bf16.msra.mxu1 %v6570_v12 }
 0x33a   : > { %v5740_v16 = vpack.c.bf16 %v1865_v14, %v1862_v4  ;;  %4316 = vmatprep.subr.bf16.mxu1 %v6586_v0  ;;  %v5178_v4 = vcombine.low %v2592_v29, %v2596_v31 }
 0x33b   : > { %v6467_v23 = vpop.f32.mrf.mxu0 }
 0x33c   : > { %5816 = vst [vmem:[#allocation2 + $0x1e0] sm:$0xff] %v5740_v16   ;;  %v6012_v17 = vpop.f32.mrf.mxu1  ;;  %4234 = vmatmul.mubr.bf16.gmra.mxu1 %v5162_v1  ;;  %v2608_v1 = vld [vmem:[%s7960_s2 + $0x310] sm:$0xff] }
 0x33d   : > { %v1870_v25 = vpop.f32.mrf.mxu0  ;;  %4241 = vmatprep.mubr.bf16.mxu1 %v5171_v20  ;;  %v2612_v23 = vld [vmem:[%s7960_s2 + $0x330] sm:$0xff] }
 0x33e   : > { %v6013_v27 = vpop.f32.mrf.mxu1  ;;  %v5195_v31 = vcombine.high %v2608_v1, %v2612_v23 }
 0x33f   : > { %v6470_v26 = vpop.f32.mrf.mxu0  ;;  %v7567_v33 = vadd.f32 %v6013_v27, %v6012_v17  ;;  %v5186_v27 = vcombine.low %v2600_v61, %v2604_v63 }
 0x340   : > { %v6015_v36 = vpop.f32.mrf.mxu1 }
 0x341   : > { %v1873_v34 = vpop.f32.mrf.mxu0 }
 0x342   : > { %v5745_v42 = vpack.c.bf16 %v1873_v34, %v1870_v25  ;;  %v6016_v45 = vpop.f32.mrf.mxu1 }
 0x343   : > { %v6471_v44 = vpop.f32.mrf.mxu0  ;;  %v7569_v48 = vadd.f32 %v6016_v45, %v6015_v36  ;;  %v2620_v45 = vld [vmem:[%s7960_s2 + $0x370] sm:$0xff] }
 0x344   : > { %5817 = vst [vmem:[#allocation2 + $0x1e8] sm:$0xff] %v5745_v42   ;;  %v6018_v53 = vpop.f32.mrf.mxu1  ;;  %4242 = vmatmul.mubr.bf16.gmra.mxu1 %v5170_v37 }
 0x345   : > { %v1878_v52 = vpop.f32.mrf.mxu0  ;;  %4249 = vmatprep.mubr.bf16.mxu1 %v5179_v43 }
 0x346   : > { %v5432_v54 = vpack.c.bf16 %v1878_v52, %v1878_v52  ;;  %v6019_v57 = vpop.f32.mrf.mxu1 }
 0x347   : > { %v6474_v56 = vpop.f32.mrf.mxu0  ;;  %v7577_v2 = vadd.f32 %v6019_v57, %v6018_v53  ;;  %v6573_v53 = vld [vmem:[#allocation2 + $0x1e0] sm:$0xff]  }
 0x348   : > { %2509 = vst [vmem:[#allocation2 + $0x1f0] sm:$0xf] %v5432_v54  ;;  %v6021_v3 = vpop.f32.mrf.mxu1  ;;  %v5194_v56 = vcombine.low %v2608_v1, %v2612_v23 }
 0x349   : > { %v1881_v8 = vpop.f32.mrf.mxu0 }
 0x34a   : > { %v6022_v11 = vpop.f32.mrf.mxu1  ;;  %v6574_v8 = vld [vmem:[#allocation2 + $0x1d8] sm:$0xff]  }
 0x34b   : > { %v6475_v9 = vpop.f32.mrf.mxu0  ;;  %v7579_v12 = vadd.f32 %v6022_v11, %v6021_v3  ;;  %v6572_v37 = vld [vmem:[#allocation2 + $0x1e8] sm:$0xff]  }
 0x34c   : > { %v6024_v14 = vpop.f32.mrf.mxu1  ;;  %4250 = vmatmul.mubr.bf16.gmra.mxu1 %v5178_v4  ;;  %v2628_v9 = vld [vmem:[%s7960_s2 + $0x3b0] sm:$0xff] }
 0x34d   : > { %4257 = vmatprep.mubr.bf16.mxu1 %v5187_v6 }
 0x34e   : > { %v6025_v16 = vpop.f32.mrf.mxu1 }
 0x34f   : > { %v6571_v20 = vld [vmem:[#allocation2 + $0x1f0] ss:$0 sps:$4 sm:$0xff]   ;;  %v6026_v25 = vadd.f32 %v6025_v16, %v6024_v14 }
 0x350   : > { %v6027_v17 = vpop.f32.mrf.mxu1  ;;  %v3813_v26 = vsel %vm3811_vm1, %v6571_v20, 0  ;;  %v6575_v14 = vld [vmem:[#allocation2 + $0x1d0] sm:$0xff]  }
 0x351   : > { %v7588_v29 = vadd.f32 %v6026_v25, %v7406_v21  ;;  %4317 = vmatpush2.bf16.msra.mxu1 %v3813_v26  ;;  %v2616_v21 = vld [vmem:[%s7960_s2 + $0x350] sm:$0xff] }
 0x352   : > { %v6028_v34 = vpop.f32.mrf.mxu1  ;;  %4318 = vmatprep.subr.bf16.mxu1 %v6586_v0  ;;  %v5203_v57 = vcombine.high %v2616_v21, %v2620_v45  ;;  %v5202_v16 = vcombine.low %v2616_v21, %v2620_v45 }
 0x353   : > { %v6029_v36 = vadd.f32 %v6028_v34, %v6027_v17  ;;  %v6576_v17 = vld [vmem:[#allocation2 + $0x1c8] sm:$0xff]   ;;  %v2636_v34 = vld [vmem:[%s7960_s2 + $0x3f0] sm:$0xff] }
 0x354   : > { %v6030_v42 = vpop.f32.mrf.mxu1  ;;  %4258 = vmatmul.mubr.bf16.gmra.mxu1 %v5186_v27 }
 0x355   : > { %v7592_v43 = vadd.f32 %v6029_v36, %v7408_v32  ;;  %4319 = vmatpush2.bf16.msra.mxu1 %v6572_v37  ;;  %4265 = vmatprep.mubr.bf16.mxu1 %v5195_v31  ;;  %v6577_v37 = vld [vmem:[#allocation2 + $0x1c0] sm:$0xff]  }
 0x356   : > { %v6031_v44 = vpop.f32.mrf.mxu1  ;;  %4320 = vmatprep.subr.bf16.mxu1 %v6586_v0 }
 0x357   : > { %v6032_v52 = vadd.f32 %v6031_v44, %v6030_v42 }
 0x358   : > { %v6033_v54 = vpop.f32.mrf.mxu1 }
 0x359   : > { %v7602_v32 = vadd.f32 %v6032_v52, %v7416_v40  ;;  %4321 = vmatpush2.bf16.msra.mxu1 %v6573_v53  ;;  %v2624_v40 = vld [vmem:[%s7960_s2 + $0x390] sm:$0xff] }
 0x35a   : > { %v6034_v61 = vpop.f32.mrf.mxu1  ;;  %4322 = vmatprep.subr.bf16.mxu1 %v6586_v0  ;;  %v5211_v20 = vcombine.high %v2624_v40, %v2628_v9  ;;  %v5210_v44 = vcombine.low %v2624_v40, %v2628_v9 }
 0x35b   : > { %v6035_v63 = vadd.f32 %v6034_v61, %v6033_v54 }
 0x35c   : > { %v6036_v3 = vpop.f32.mrf.mxu1  ;;  %4266 = vmatmul.mubr.bf16.gmra.mxu1 %v5194_v56  ;;  %v2513_v56 = vld [vmem:[%s7960_s2 + $0x18] sm:$0xff] }
 0x35d   : > { %v7606_v4 = vadd.f32 %v6035_v63, %v7418_v47  ;;  %4323 = vmatpush2.bf16.msra.mxu1 %v6574_v8  ;;  %4273 = vmatprep.mubr.bf16.mxu1 %v5203_v57 }
 0x35e   : > { %v6037_v6 = vpop.f32.mrf.mxu1  ;;  %4324 = vmatprep.subr.bf16.mxu1 %v6586_v0 }
 0x35f   : > { %v6038_v11 = vadd.f32 %v6037_v6, %v6036_v3 }
 0x360   : > { %v6039_v1 = vpop.f32.mrf.mxu1 }
 0x361   : > { %v7616_v47 = vadd.f32 %v6038_v11, %v7426_v55  ;;  %4325 = vmatpush2.bf16.msra.mxu1 %v6575_v14  ;;  %v2632_v55 = vld [vmem:[%s7960_s2 + $0x3d0] sm:$0xff]  ;;  %v2521_v14 = vld [vmem:[%s7960_s2 + $0x58] sm:$0xff] }
 0x362   : > { %v6040_v23 = vpop.f32.mrf.mxu1  ;;  %4326 = vmatprep.subr.bf16.mxu1 %v6586_v0  ;;  %v5219_v21 = vcombine.high %v2632_v55, %v2636_v34  ;;  %v5218_v63 = vcombine.low %v2632_v55, %v2636_v34  ;;  %v2529_v34 = vld [vmem:[%s7960_s2 + $0x98] sm:$0xff] }
 0x363   : > { %v6041_v25 = vadd.f32 %v6040_v23, %v6039_v1 }
 0x364   : > { %v6042_v26 = vpop.f32.mrf.mxu1  ;;  %4274 = vmatmul.mubr.bf16.gmra.mxu1 %v5202_v16 }
 0x365   : > { %v7620_v27 = vadd.f32 %v6041_v25, %v7428_v62  ;;  %4327 = vmatpush2.bf16.msra.mxu1 %v6576_v17  ;;  %4281 = vmatprep.mubr.bf16.mxu1 %v5211_v20 }
 0x366   : > { %v6043_v31 = vpop.f32.mrf.mxu1  ;;  %4328 = vmatprep.subr.bf16.mxu1 %v6586_v0 }
 0x367   : > { %v6044_v36 = vadd.f32 %v6043_v31, %v6042_v26 }
 0x368   : > { %v6045_v42 = vpop.f32.mrf.mxu1 }
 0x369   : > { %v7630_v62 = vadd.f32 %v6044_v36, %v7436_v7  ;;  %4329 = vmatpush2.bf16.msra.mxu1 %v6577_v37  ;;  %v2517_v7 = vld [vmem:[%s7960_s2 + $0x38] sm:$0xff] }
 0x36a   : > { %v6046_v45 = vpop.f32.mrf.mxu1  ;;  %v5101_v3 = vcombine.high %v2513_v56, %v2517_v7  ;;  %v5100_v20 = vcombine.low %v2513_v56, %v2517_v7  ;;  %v2537_v56 = vld [vmem:[%s7960_s2 + $0xd8] sm:$0xff] }
 0x36b   : > { %v6047_v52 = vadd.f32 %v6046_v45, %v6045_v42 }
 0x36c   : > { %v6048_v0 = vpop.f32.mrf.mxu1  ;;  %4282 = vmatmul.mubr.bf16.gmra.mxu1 %v5210_v44 }
 0x36d   : > { %v7633_v53 = vadd.f32 %v6047_v52, %v7438_v19  ;;  %4289 = vmatprep.mubr.bf16.mxu1 %v5219_v21 }
 0x36e   : > { %v6049_v54 = vpop.f32.mrf.mxu1 }
 0x36f   : > { %v6050_v57 = vadd.f32 %v6049_v54, %v6048_v0 }
 0x370   : > { %v6051_v61 = vpop.f32.mrf.mxu1 }
 0x371   : > { %v7642_v8 = vadd.f32 %v6050_v57, %v7446_v28  ;;  %v2525_v28 = vld [vmem:[%s7960_s2 + $0x78] sm:$0xff] }
 0x372   : > { %v6052_v6 = vpop.f32.mrf.mxu1  ;;  %v5109_v25 = vcombine.high %v2521_v14, %v2525_v28  ;;  %v5108_v42 = vcombine.low %v2521_v14, %v2525_v28  ;;  %v2545_v14 = vld [vmem:[%s7960_s2 + $0x118] sm:$0xff] }
 0x373   : > { %v6053_v19 = vadd.f32 %v6052_v6, %v6051_v61 }
 0x374   : > { %v6054_v40 = vpop.f32.mrf.mxu1  ;;  %4290 = vmatmul.mubr.bf16.gmra.mxu1 %v5218_v63 }
 0x375   : > { %v7645_v9 = vadd.f32 %v6053_v19, %v7448_v38  ;;  %5285 = vmatprep.mubr.msk.bf16.mxu1 %vm3762_vm4, %v5101_v3 }
 0x376   : > { %v6055_v11 = vpop.f32.mrf.mxu1 }
 0x377   : > { %v6056_v1 = vadd.f32 %v6055_v11, %v6054_v40 }
 0x378   : > { %v6057_v16 = vpop.f32.mrf.mxu1 }
 0x379   : > { %v7655_v23 = vadd.f32 %v6056_v1, %v7456_v50  ;;  %v2533_v50 = vld [vmem:[%s7960_s2 + $0xb8] sm:$0xff] }
 0x37a   : > { %v6058_v38 = vpop.f32.mrf.mxu1  ;;  %v5117_v21 = vcombine.high %v2529_v34, %v2533_v50  ;;  %v5116_v61 = vcombine.low %v2529_v34, %v2533_v50  ;;  %v2553_v34 = vld [vmem:[%s7960_s2 + $0x158] sm:$0xff] }
 0x37b   : > { %v6059_v17 = vadd.f32 %v6058_v38, %v6057_v16 }
 0x37c   : > { %v6060_v26 = vpop.f32.mrf.mxu1  ;;  %4331 = vmatmul.mubr.bf16.vlgmr.msra.gmra.mxu1 %v5100_v20 }
 0x37d   : > { %v7658_v31 = vadd.f32 %v6059_v17, %v7458_v60  ;;  %5286 = vmatprep.mubr.msk.bf16.mxu1 %vm3762_vm4, %v5109_v25 }
 0x37e   : > { %v6061_v55 = vpop.f32.mrf.mxu1 }
 0x37f   : > { %v6062_v36 = vadd.f32 %v6061_v55, %v6060_v26 }
 0x380   : > { %v6063_v37 = vpop.f32.mrf.mxu1 }
 0x381   : > { %v7668_v44 = vadd.f32 %v6062_v36, %v7466_v10  ;;  %v2541_v10 = vld [vmem:[%s7960_s2 + $0xf8] sm:$0xff] }
 0x382   : > { %v6064_v60 = vpop.f32.mrf.mxu1  ;;  %v5125_v3 = vcombine.high %v2537_v56, %v2541_v10  ;;  %v5124_v16 = vcombine.low %v2537_v56, %v2541_v10  ;;  %v2561_v56 = vld [vmem:[%s7960_s2 + $0x198] sm:$0xff] }
 0x383   : > { %v6065_v45 = vadd.f32 %v6064_v60, %v6063_v37 }
 0x384   : > { %v6066_v52 = vpop.f32.mrf.mxu1  ;;  %4339 = vmatmul.mubr.bf16.gmra.mxu1 %v5108_v42 }
 0x385   : > { %v7671_v0 = vadd.f32 %v6065_v45, %v7468_v22  ;;  %5287 = vmatprep.mubr.msk.bf16.mxu1 %vm3762_vm4, %v5117_v21 }
 0x386   : > { %v6067_v54 = vpop.f32.mrf.mxu1 }
 0x387   : > { %v6068_v7 = vadd.f32 %v6067_v54, %v6066_v52 }
 0x388   : > { %v6069_v57 = vpop.f32.mrf.mxu1 }
 0x389   : > { %v7681_v63 = vadd.f32 %v6068_v7, %v7476_v30  ;;  %v2549_v30 = vld [vmem:[%s7960_s2 + $0x138] sm:$0xff] }
 0x38a   : > { %v6070_v22 = vpop.f32.mrf.mxu1  ;;  %v5133_v25 = vcombine.high %v2545_v14, %v2549_v30  ;;  %v5132_v37 = vcombine.low %v2545_v14, %v2549_v30  ;;  %v2569_v14 = vld [vmem:[%s7960_s2 + $0x1d8] sm:$0xff] }
 0x38b   : > { %v6071_v6 = vadd.f32 %v6070_v22, %v6069_v57 }
 0x38c   : > { %v6072_v19 = vpop.f32.mrf.mxu1  ;;  %4347 = vmatmul.mubr.bf16.gmra.mxu1 %v5116_v61 }
 0x38d   : > { %v7684_v40 = vadd.f32 %v6071_v6, %v7479_v39  ;;  %5288 = vmatprep.mubr.msk.bf16.mxu1 %vm3762_vm4, %v5125_v3 }
 0x38e   : > { %v6073_v11 = vpop.f32.mrf.mxu1 }
 0x38f   : > { %v6074_v28 = vadd.f32 %v6073_v11, %v6072_v19 }
 0x390   : > { %v6075_v1 = vpop.f32.mrf.mxu1 }
 0x391   : > { %v7694_v20 = vadd.f32 %v6074_v28, %v7487_v49  ;;  %v2557_v49 = vld [vmem:[%s7960_s2 + $0x178] sm:$0xff]  ;;  %v5900_v28 = vpop.f32.mrf.mxu0 }
 0x392   : > { %v6076_v39 = vpop.f32.mrf.mxu1  ;;  %v5141_v21 = vcombine.high %v2553_v34, %v2557_v49  ;;  %v5140_v57 = vcombine.low %v2553_v34, %v2557_v49 }
 0x393   : > { %v6077_v38 = vadd.f32 %v6076_v39, %v6075_v1 }
 0x394   : > { %v6078_v17 = vpop.f32.mrf.mxu1  ;;  %4355 = vmatmul.mubr.bf16.gmra.mxu1 %v5124_v16 }
 0x395   : > { %v7697_v26 = vadd.f32 %v6077_v38, %v7489_v58  ;;  %5289 = vmatprep.mubr.msk.bf16.mxu1 %vm3762_vm4, %v5133_v25 }
 0x396   : > { %v6079_v55 = vpop.f32.mrf.mxu1 }
 0x397   : > { %v6080_v50 = vadd.f32 %v6079_v55, %v6078_v17  ;;  %v5901_v17 = vpop.f32.mrf.mxu0 }
 0x398   : > { %v6081_v36 = vpop.f32.mrf.mxu1 }
 0x399   : > { %v7707_v42 = vadd.f32 %v6080_v50, %v7497_v5  ;;  %v2565_v5 = vld [vmem:[%s7960_s2 + $0x1b8] sm:$0xff] }
 0x39a   : > { %v6082_v58 = vpop.f32.mrf.mxu1  ;;  %v5149_v3 = vcombine.high %v2561_v56, %v2565_v5  ;;  %v5148_v16 = vcombine.low %v2561_v56, %v2565_v5  ;;  %v2577_v50 = vld [vmem:[%s7960_s2 + $0x218] sm:$0xff] }
 0x39b   : > { %v6083_v60 = vadd.f32 %v6082_v58, %v6081_v36 }
 0x39c   : > { %v6084_v45 = vpop.f32.mrf.mxu1  ;;  %4363 = vmatmul.mubr.bf16.gmra.mxu1 %v5132_v37  ;;  %v5903_v37 = vpop.f32.mrf.mxu0 }
 0x39d   : > { %v7710_v52 = vadd.f32 %v6083_v60, %v7499_v15  ;;  %5290 = vmatprep.mubr.msk.bf16.mxu1 %vm3762_vm4, %v5141_v21 }
 0x39e   : > { %v6085_v54 = vpop.f32.mrf.mxu1  ;;  %v5904_v56 = vpop.f32.mrf.mxu0 }
 0x39f   : > { %v6086_v10 = vadd.f32 %v6085_v54, %v6084_v45 }
 0x3a0   : > { %v6087_v7 = vpop.f32.mrf.mxu1 }
 0x3a1   : > { %v7720_v61 = vadd.f32 %v6086_v10, %v7507_v18  ;;  %v2573_v18 = vld [vmem:[%s7960_s2 + $0x1f8] sm:$0xff] }
 0x3a2   : > { %v6088_v15 = vpop.f32.mrf.mxu1  ;;  %v5156_v58 = vcombine.low %v2569_v14, %v2573_v18 }
 0x3a3   : > { %v6089_v22 = vadd.f32 %v6088_v15, %v6087_v7  ;;  %v5906_v15 = vpop.f32.mrf.mxu0 }
 0x3a4   : > { %v6090_v6 = vpop.f32.mrf.mxu1  ;;  %4371 = vmatmul.mubr.bf16.gmra.mxu1 %v5140_v57  ;;  %v2585_v57 = vld [vmem:[%s7960_s2 + $0x258] sm:$0xff] }
 0x3a5   : > { %v7723_v19 = vadd.f32 %v6089_v22, %v7509_v35  ;;  %5291 = vmatprep.mubr.msk.bf16.mxu1 %vm3762_vm4, %v5149_v3  ;;  %v5157_v35 = vcombine.high %v2569_v14, %v2573_v18  ;;  %v5902_v18 = vadd.f32 %v5901_v17, %v5900_v28  ;;  %v5905_v17 = vadd.f32 %v5904_v56, %v5903_v37  ;;  %v2601_v37 = vld [vmem:[%s7960_s2 + $0x2d8] sm:$0xff] }
 0x3a6   : > { %v6091_v11 = vpop.f32.mrf.mxu1  ;;  %v2605_v56 = vld [vmem:[%s7960_s2 + $0x2f8] sm:$0xff] }
 0x3a7   : > { %v6092_v30 = vadd.f32 %v6091_v11, %v6090_v6  ;;  %v4011_v28 = vadd.f32 %v7567_v33, %v5902_v18 }
 0x3a8   : > { %v6093_v1 = vpop.f32.mrf.mxu1 }
 0x3a9   : > { %v7733_v25 = vadd.f32 %v6092_v30, %v7517_v46  ;;  %v2581_v46 = vld [vmem:[%s7960_s2 + $0x238] sm:$0xff] }
 0x3aa   : > { %v6094_v39 = vpop.f32.mrf.mxu1  ;;  %v5164_v6 = vcombine.low %v2577_v50, %v2581_v46 }
 0x3ab   : > { %v6095_v38 = vadd.f32 %v6094_v39, %v6093_v1  ;;  %v5907_v1 = vpop.f32.mrf.mxu0 }
 0x3ac   : > { %v6096_v55 = vpop.f32.mrf.mxu1  ;;  %4379 = vmatmul.mubr.bf16.gmra.mxu1 %v5148_v16 }
 0x3ad   : > { %v7736_v34 = vadd.f32 %v6095_v38, %v7519_v59  ;;  %5292 = vmatprep.mubr.msk.bf16.mxu1 %vm3762_vm4, %v5157_v35  ;;  %v5165_v59 = vcombine.high %v2577_v50, %v2581_v46  ;;  %v2593_v38 = vld [vmem:[%s7960_s2 + $0x298] sm:$0xff] }
 0x3ae   : > { %v6097_v49 = vpop.f32.mrf.mxu1 }
 0x3af   : > { %v6098_v36 = vadd.f32 %v6097_v49, %v6096_v55  ;;  %v5909_v49 = vpop.f32.mrf.mxu0 }
 0x3b0   : > { %v6099_v21 = vpop.f32.mrf.mxu1 }
 0x3b1   : > { %v7746_v60 = vadd.f32 %v6098_v36, %v7528_v13  ;;  %v2589_v13 = vld [vmem:[%s7960_s2 + $0x278] sm:$0xff] }
 0x3b2   : > { %v6100_v45 = vpop.f32.mrf.mxu1  ;;  %v5172_v46 = vcombine.low %v2585_v57, %v2589_v13 }
 0x3b3   : > { %v6101_v54 = vadd.f32 %v6100_v45, %v6099_v21 }
 0x3b4   : > { %v6102_v5 = vpop.f32.mrf.mxu1  ;;  %4387 = vmatmul.mubr.bf16.gmra.mxu1 %v5156_v58  ;;  %v4014_v58 = vadd.f32 %v7569_v48, %v5905_v17 }
 0x3b5   : > { %v7749_v10 = vadd.f32 %v6101_v54, %v7531_v24  ;;  %5293 = vmatprep.mubr.msk.bf16.mxu1 %vm3762_vm4, %v5165_v59  ;;  %v5173_v24 = vcombine.high %v2585_v57, %v2589_v13  ;;  %v5908_v59 = vadd.f32 %v5907_v1, %v5906_v15  ;;  %v5910_v54 = vpop.f32.mrf.mxu0 }
 0x3b6   : > { %v6103_v7 = vpop.f32.mrf.mxu1  ;;  %v5911_v57 = vadd.f32 %v5910_v54, %v5909_v49 }
 0x3b7   : > { %v6104_v3 = vadd.f32 %v6103_v7, %v6102_v5  ;;  %v4019_v48 = vadd.f32 %v7577_v2, %v5908_v59  ;;  %v2609_v2 = vld [vmem:[%s7960_s2 + $0x318] sm:$0xff] }
 0x3b8   : > { %v6105_v22 = vpop.f32.mrf.mxu1 }
 0x3b9   : > { %v7759_v11 = vadd.f32 %v6104_v3, %v7540_v41  ;;  %v2597_v41 = vld [vmem:[%s7960_s2 + $0x2b8] sm:$0xff] }
 0x3ba   : > { %v6106_v14 = vpop.f32.mrf.mxu1  ;;  %v5180_v15 = vcombine.low %v2593_v38, %v2597_v41 }
 0x3bb   : > { %v6107_v30 = vadd.f32 %v6106_v14, %v6105_v22  ;;  %v5189_v22 = vcombine.high %v2601_v37, %v2605_v56  ;;  %v4022_v14 = vadd.f32 %v7579_v12, %v5911_v57  ;;  %v2625_v57 = vld [vmem:[%s7960_s2 + $0x398] sm:$0xff] }
 0x3bc   : > { %v6124_v16 = vpop.f32.mrf.mxu1  ;;  %4395 = vmatmul.mubr.bf16.gmra.mxu1 %v5164_v6 }
 0x3bd   : > { %v7762_v35 = vadd.f32 %v6107_v30, %v7543_v51  ;;  %5294 = vmatprep.mubr.msk.bf16.mxu1 %vm3762_vm4, %v5173_v24  ;;  %v5181_v51 = vcombine.high %v2593_v38, %v2597_v41 }
 0x3be   : > { %v6125_v39 = vpop.f32.mrf.mxu1 }
 0x3bf   : > { %v6126_v55 = vadd.f32 %v6125_v39, %v6124_v16  ;;  %v2613_v39 = vld [vmem:[%s7960_s2 + $0x338] sm:$0xff] }
 0x3c0   : > { %v6127_v50 = vpop.f32.mrf.mxu1  ;;  %v5197_v12 = vcombine.high %v2609_v2, %v2613_v39 }
 0x3c1   : > { %v7772_v36 = vadd.f32 %v6126_v55, %v4011_v28  ;;  %v5188_v28 = vcombine.low %v2601_v37, %v2605_v56 }
 0x3c2   : > { %v6128_v21 = vpop.f32.mrf.mxu1 }
 0x3c3   : > { %v6129_v45 = vadd.f32 %v6128_v21, %v6127_v50  ;;  %v2617_v21 = vld [vmem:[%s7960_s2 + $0x358] sm:$0xff] }
 0x3c4   : > { %v6130_v5 = vpop.f32.mrf.mxu1  ;;  %4403 = vmatmul.mubr.bf16.gmra.mxu1 %v5172_v46 }
 0x3c5   : > { %5295 = vmatprep.mubr.msk.bf16.mxu1 %vm3762_vm4, %v5181_v51  ;;  %v7776_v7 = vadd.f32 %v6129_v45, %v4014_v58  ;;  %v2621_v58 = vld [vmem:[%s7960_s2 + $0x378] sm:$0xff]  ;;  %v5196_v45 = vcombine.low %v2609_v2, %v2613_v39 }
 0x3c6   : > { %v6131_v33 = vpop.f32.mrf.mxu1  ;;  %v5205_v54 = vcombine.high %v2617_v21, %v2621_v58  ;;  %v2633_v2 = vld [vmem:[%s7960_s2 + $0x3d8] sm:$0xff] }
 0x3c7   : > { %v6132_v13 = vadd.f32 %v6131_v33, %v6130_v5  ;;  %v2637_v39 = vld [vmem:[%s7960_s2 + $0x3f8] sm:$0xff] }
 0x3c8   : > { %v6133_v3 = vpop.f32.mrf.mxu1 }
 0x3c9   : > { %v7785_v6 = vadd.f32 %v6132_v13, %v4019_v48  ;;  %v2629_v13 = vld [vmem:[%s7960_s2 + $0x3b8] sm:$0xff] }
 0x3ca   : > { %v6134_v24 = vpop.f32.mrf.mxu1 }
 0x3cb   : > { %v6135_v18 = vadd.f32 %v6134_v24, %v6133_v3 }
 0x3cc   : > { %v6136_v30 = vpop.f32.mrf.mxu1  ;;  %4411 = vmatmul.mubr.bf16.gmra.mxu1 %v5180_v15  ;;  %v5204_v15 = vcombine.low %v2617_v21, %v2621_v58 }
 0x3cd   : > { %5296 = vmatprep.mubr.msk.bf16.mxu1 %vm3762_vm4, %v5189_v22  ;;  %v7789_v1 = vadd.f32 %v6135_v18, %v4022_v14  ;;  %v5213_v22 = vcombine.high %v2625_v57, %v2629_v13 }
 0x3ce   : > { %v6137_v16 = vpop.f32.mrf.mxu1 }
 0x3cf   : > { %v6138_v38 = vadd.f32 %v6137_v16, %v6136_v30 }
 0x3d0   : > { %v6139_v41 = vpop.f32.mrf.mxu1 }
 0x3d1   : > { %v7798_v17 = vadd.f32 %v6138_v38, %v7588_v29 }
 0x3d2   : > { %v6140_v55 = vpop.f32.mrf.mxu1 }
 0x3d3   : > { %v6141_v49 = vadd.f32 %v6140_v55, %v6139_v41  ;;  %v5212_v41 = vcombine.low %v2625_v57, %v2629_v13 }
 0x3d4   : > { %v6142_v50 = vpop.f32.mrf.mxu1  ;;  %4419 = vmatmul.mubr.bf16.gmra.mxu1 %v5188_v28  ;;  %v5221_v28 = vcombine.high %v2633_v2, %v2637_v39 }
 0x3d5   : > { %5297 = vmatprep.mubr.msk.bf16.mxu1 %vm3762_vm4, %v5197_v12  ;;  %v7802_v46 = vadd.f32 %v6141_v49, %v7592_v43 }
 0x3d6   : > { %v6143_v51 = vpop.f32.mrf.mxu1 }
 0x3d7   : > { %v6144_v29 = vadd.f32 %v6143_v51, %v6142_v50 }
 0x3d8   : > { %v6145_v59 = vpop.f32.mrf.mxu1 }
 0x3d9   : > { %v7811_v5 = vadd.f32 %v6144_v29, %v7602_v32  ;;  %v5220_v29 = vcombine.low %v2633_v2, %v2637_v39 }
 0x3da   : > { %v6146_v33 = vpop.f32.mrf.mxu1 }
 0x3db   : > { %v6147_v37 = vadd.f32 %v6146_v33, %v6145_v59 }
 0x3dc   : > { %v6148_v43 = vpop.f32.mrf.mxu1  ;;  %4427 = vmatmul.mubr.bf16.gmra.mxu1 %v5196_v45 }
 0x3dd   : > { %5298 = vmatprep.mubr.msk.bf16.mxu1 %vm3762_vm4, %v5205_v54  ;;  %v7815_v56 = vadd.f32 %v6147_v37, %v7606_v4 }
 0x3de   : > { %v6149_v48 = vpop.f32.mrf.mxu1 }
 0x3df   : > { %v6150_v32 = vadd.f32 %v6149_v48, %v6148_v43 }
 0x3e0   : > { %v6151_v3 = vpop.f32.mrf.mxu1 }
 0x3e1   : > { %v7824_v24 = vadd.f32 %v6150_v32, %v7616_v47 }
 0x3e2   : > { %v6152_v14 = vpop.f32.mrf.mxu1 }
 0x3e3   : > { %v6153_v18 = vadd.f32 %v6152_v14, %v6151_v3 }
 0x3e4   : > { %v6154_v4 = vpop.f32.mrf.mxu1  ;;  %4435 = vmatmul.mubr.bf16.gmra.mxu1 %v5204_v15 }
 0x3e5   : > { %5299 = vmatprep.mubr.msk.bf16.mxu1 %vm3762_vm4, %v5213_v22  ;;  %v7828_v30 = vadd.f32 %v6153_v18, %v7620_v27 }
 0x3e6   : > { %v6155_v16 = vpop.f32.mrf.mxu1 }
 0x3e7   : > { %v6156_v47 = vadd.f32 %v6155_v16, %v6154_v4 }
 0x3e8   : > { %v6157_v38 = vpop.f32.mrf.mxu1 }
 0x3e9   : > { %v7837_v12 = vadd.f32 %v6156_v47, %v7630_v62 }
 0x3ea   : > { %v6158_v55 = vpop.f32.mrf.mxu1 }
 0x3eb   : > { %v6159_v49 = vadd.f32 %v6158_v55, %v6157_v38 }
 0x3ec   : > { %v6160_v27 = vpop.f32.mrf.mxu1  ;;  %4443 = vmatmul.mubr.bf16.gmra.mxu1 %v5212_v41 }
 0x3ed   : > { %5300 = vmatprep.mubr.msk.bf16.mxu1 %vm3762_vm4, %v5221_v28  ;;  %v7841_v50 = vadd.f32 %v6159_v49, %v7633_v53 }
 0x3ee   : > { %v6161_v51 = vpop.f32.mrf.mxu1 }
 0x3ef   : > { %v6162_v21 = vadd.f32 %v6161_v51, %v6160_v27 }
 0x3f0   : > { %v6163_v58 = vpop.f32.mrf.mxu1 }
 0x3f1   : > { %v7844_v59 = vadd.f32 %v6162_v21, %v7642_v8 }
 0x3f2   : > { %v6164_v45 = vpop.f32.mrf.mxu1 }
 0x3f3   : > { %v6165_v54 = vadd.f32 %v6164_v45, %v6163_v58 }
 0x3f4   : > { %v6166_v62 = vpop.f32.mrf.mxu1  ;;  %4451 = vmatmul.mubr.bf16.gmra.mxu1 %v5220_v29 }
 0x3f5   : > { %v7847_v33 = vadd.f32 %v6165_v54, %v7645_v9 }
 0x3f6   : > { %v6167_v37 = vpop.f32.mrf.mxu1 }
 0x3f7   : > { %v6168_v43 = vadd.f32 %v6167_v37, %v6166_v62 }
 0x3f8   : > { %v6169_v48 = vpop.f32.mrf.mxu1 }
 0x3f9   : > { %v7850_v53 = vadd.f32 %v6168_v43, %v7655_v23 }
 0x3fa   : > { %v6170_v57 = vpop.f32.mrf.mxu1 }
 0x3fb   : > { %v6171_v13 = vadd.f32 %v6170_v57, %v6169_v48 }
 0x3fc   : > { %v6172_v32 = vpop.f32.mrf.mxu1 }
 0x3fd   : > { %v7853_v3 = vadd.f32 %v6171_v13, %v7658_v31 }
 0x3fe   : > { %v6173_v8 = vpop.f32.mrf.mxu1 }
 0x3ff   : > { %v6174_v15 = vadd.f32 %v6173_v8, %v6172_v32 }
 0x400   : > { %v6175_v22 = vpop.f32.mrf.mxu1 }
 0x401   : > { %v7856_v14 = vadd.f32 %v6174_v15, %v7668_v44 }
 0x402   : > { %v6176_v9 = vpop.f32.mrf.mxu1 }
 0x403   : > { %v6177_v18 = vadd.f32 %v6176_v9, %v6175_v22 }
 0x404   : > { %v6178_v4 = vpop.f32.mrf.mxu1 }
 0x405   : > { %v7859_v16 = vadd.f32 %v6177_v18, %v7671_v0 }
 0x406   : > { %v6179_v23 = vpop.f32.mrf.mxu1 }
 0x407   : > { %v6180_v2 = vadd.f32 %v6179_v23, %v6178_v4 }
 0x408   : > { %v6181_v39 = vpop.f32.mrf.mxu1 }
 0x409   : > { %v7862_v47 = vadd.f32 %v6180_v2, %v7681_v63 }
 0x40a   : > { %v6182_v31 = vpop.f32.mrf.mxu1 }
 0x40b   : > { %v6183_v38 = vadd.f32 %v6182_v31, %v6181_v39 }
 0x40c   : > { %v6184_v41 = vpop.f32.mrf.mxu1 }
 0x40d   : > { %v7865_v28 = vadd.f32 %v6183_v38, %v7684_v40 }
 0x40e   : > { %v6185_v44 = vpop.f32.mrf.mxu1 }
 0x40f   : > { %v6186_v55 = vadd.f32 %v6185_v44, %v6184_v41 }
 0x410   : > { %v6187_v49 = vpop.f32.mrf.mxu1 }
 0x411   : > { %v7868_v27 = vadd.f32 %v6186_v55, %v7694_v20 }
 0x412   : > { %v6188_v0 = vpop.f32.mrf.mxu1 }
 0x413   : > { %v6189_v51 = vadd.f32 %v6188_v0, %v6187_v49 }
 0x414   : > { %v6190_v21 = vpop.f32.mrf.mxu1 }
 0x415   : > { %v7871_v58 = vadd.f32 %v6189_v51, %v7697_v26 }
 0x416   : > { %v6191_v63 = vpop.f32.mrf.mxu1 }
 0x417   : > { %v6192_v29 = vadd.f32 %v6191_v63, %v6190_v21 }
 0x418   : > { %v6193_v45 = vpop.f32.mrf.mxu1 }
 0x419   : > { %v7874_v54 = vadd.f32 %v6192_v29, %v7707_v42 }
 0x41a   : > { %v6194_v40 = vpop.f32.mrf.mxu1 }
 0x41b   : > { %v6195_v62 = vadd.f32 %v6194_v40, %v6193_v45 }
 0x41c   : > { %v6196_v37 = vpop.f32.mrf.mxu1 }
 0x41d   : > { %v7877_v43 = vadd.f32 %v6195_v62, %v7710_v52 }
 0x41e   : > { %v6197_v20 = vpop.f32.mrf.mxu1 }
 0x41f   : > { %v6198_v48 = vadd.f32 %v6197_v20, %v6196_v37 }
 0x420   : > { %v6199_v57 = vpop.f32.mrf.mxu1 }
 0x421   : > { %v7880_v13 = vadd.f32 %v6198_v48, %v7720_v61 }
 0x422   : > { %v6200_v26 = vpop.f32.mrf.mxu1 }
 0x423   : > { %v6201_v32 = vadd.f32 %v6200_v26, %v6199_v57 }
 0x424   : > { %v6202_v8 = vpop.f32.mrf.mxu1 }
 0x425   : > { %v7883_v15 = vadd.f32 %v6201_v32, %v7723_v19 }
 0x426   : > { %v6203_v42 = vpop.f32.mrf.mxu1 }
 0x427   : > { %v6204_v22 = vadd.f32 %v6203_v42, %v6202_v8 }
 0x428   : > { %v6205_v9 = vpop.f32.mrf.mxu1 }
 0x429   : > { %v7886_v18 = vadd.f32 %v6204_v22, %v7733_v25 }
 0x42a   : > { %v6206_v52 = vpop.f32.mrf.mxu1 }
 0x42b   : > { %v6207_v4 = vadd.f32 %v6206_v52, %v6205_v9 }
 0x42c   : > { %v6208_v23 = vpop.f32.mrf.mxu1 }
 0x42d   : > { %v7889_v2 = vadd.f32 %v6207_v4, %v7736_v34 }
 0x42e   : > { %v6209_v61 = vpop.f32.mrf.mxu1 }
 0x42f   : > { %v6210_v39 = vadd.f32 %v6209_v61, %v6208_v23 }
 0x430   : > { %v6211_v31 = vpop.f32.mrf.mxu1 }
 0x431   : > { %v7892_v38 = vadd.f32 %v6210_v39, %v7746_v60 }
 0x432   : > { %v6212_v19 = vpop.f32.mrf.mxu1 }
 0x433   : > { %v6213_v41 = vadd.f32 %v6212_v19, %v6211_v31 }
 0x434   : > { %v6214_v44 = vpop.f32.mrf.mxu1 }
 0x435   : > { %v7895_v55 = vadd.f32 %v6213_v41, %v7749_v10 }
 0x436   : > { %v6215_v25 = vpop.f32.mrf.mxu1 }
 0x437   : > { %v6216_v49 = vadd.f32 %v6215_v25, %v6214_v44 }
 0x438   : > { %v6217_v0 = vpop.f32.mrf.mxu1 }
 0x439   : > { %v7898_v51 = vadd.f32 %v6216_v49, %v7759_v11 }
 0x43a   : > { %v6218_v34 = vpop.f32.mrf.mxu1 }
 0x43b   : > { %v6219_v21 = vadd.f32 %v6218_v34, %v6217_v0 }
 0x43c   : > { %v4332_v63 = vpop.f32.mrf.mxu1 }
 0x43d   : > { %v7901_v29 = vadd.f32 %v4332_v63, %v7772_v36  ;;  %v7904_v60 = vadd.f32 %v6219_v21, %v7762_v35 }
 0x43e   : > { %v4334_v45 = vpop.f32.mrf.mxu1 }
 0x440   : > { %v4335_v40 = vpop.f32.mrf.mxu1 }
 0x441   : > { %v7907_v10 = vadd.f32 %v4335_v40, %v7776_v7 }
 0x442   : > { %v4337_v62 = vpop.f32.mrf.mxu1 }
 0x444   : > { %v4340_v37 = vpop.f32.mrf.mxu1 }
 0x445   : > { %v7910_v20 = vadd.f32 %v4340_v37, %v7785_v6 }
 0x446   : > { %v4342_v11 = vpop.f32.mrf.mxu1 }
 0x448   : > { %v4343_v48 = vpop.f32.mrf.mxu1 }
 0x449   : > { %v7913_v57 = vadd.f32 %v4343_v48, %v7789_v1 }
 0x44a   : > { %v4345_v36 = vpop.f32.mrf.mxu1 }
 0x44c   : > { %v4348_v26 = vpop.f32.mrf.mxu1 }
 0x44d   : > { %v4349_v35 = vadd.f32 %v4348_v26, %v7798_v17 }
 0x44e   : > { %v4350_v32 = vpop.f32.mrf.mxu1 }
 0x44f   : > { %4531 = vrot.lane.b32.xlu1 %v4349_v35, %s6589_s25 }
 0x450   : > { %v4351_v8 = vpop.f32.mrf.mxu1 }
 0x451   : > { %v4352_v7 = vadd.f32 %v4351_v8, %v7802_v46 }
 0x452   : > { %v4353_v42 = vpop.f32.mrf.mxu1 }
 0x453   : > { %4533 = vrot.lane.b32.xlu0 %v4352_v7, %s6589_s25 }
 0x454   : > { %v4356_v22 = vpop.f32.mrf.mxu1 }
 0x455   : > { %v4357_v6 = vadd.f32 %v4356_v22, %v7811_v5 }
 0x456   : > { %v4358_v9 = vpop.f32.mrf.mxu1 }
 0x457   : > { %4535 = vrot.lane.b32.xlu1 %v4357_v6, %s6589_s25 }
 0x458   : > { %v4359_v52 = vpop.f32.mrf.mxu1 }
 0x459   : > { %v4360_v1 = vadd.f32 %v4359_v52, %v7815_v56 }
 0x45a   : > { %v4361_v4 = vpop.f32.mrf.mxu1 }
 0x45b   : > { %4537 = vrot.lane.b32.xlu0 %v4360_v1, %s6589_s25 }
 0x45c   : > { %v4364_v23 = vpop.f32.mrf.mxu1 }
 0x45d   : > { %v4365_v17 = vadd.f32 %v4364_v23, %v7824_v24 }
 0x45e   : > { %v4366_v61 = vpop.f32.mrf.mxu1 }
 0x45f   : > { %4555 = vrot.lane.b32.xlu1 %v4365_v17, %s6590_s26 }
 0x460   : > { %v4367_v39 = vpop.f32.mrf.mxu1 }
 0x461   : > { %v4368_v46 = vadd.f32 %v4367_v39, %v7828_v30 }
 0x462   : > { %v4369_v31 = vpop.f32.mrf.mxu1 }
 0x463   : > { %4557 = vrot.lane.b32.xlu0 %v4368_v46, %s6590_s26 }
 0x464   : > { %v4372_v19 = vpop.f32.mrf.mxu1 }
 0x465   : > { %v4373_v5 = vadd.f32 %v4372_v19, %v7837_v12 }
 0x466   : > { %v4374_v41 = vpop.f32.mrf.mxu1 }
 0x467   : > { %4559 = vrot.lane.b32.xlu1 %v4373_v5, %s6590_s26 }
 0x468   : > { %v4375_v44 = vpop.f32.mrf.mxu1 }
 0x469   : > { %v4376_v56 = vadd.f32 %v4375_v44, %v7841_v50 }
 0x46a   : > { %v4377_v25 = vpop.f32.mrf.mxu1 }
 0x46b   : > { %4561 = vrot.lane.b32.xlu0 %v4376_v56, %s6590_s26 }
 0x46c   : > { %v4380_v49 = vpop.f32.mrf.mxu1 }
 0x46d   : > { %v4381_v24 = vadd.f32 %v4380_v49, %v7844_v59 }
 0x46e   : > { %v4382_v0 = vpop.f32.mrf.mxu1 }
 0x46f   : > { %4579 = vrot.lane.b32.xlu1 %v4381_v24, %s6591_s27 }
 0x470   : > { %v4383_v34 = vpop.f32.mrf.mxu1 }
 0x471   : > { %v4384_v30 = vadd.f32 %v4383_v34, %v7847_v33 }
 0x472   : > { %v4385_v21 = vpop.f32.mrf.mxu1 }
 0x473   : > { %4581 = vrot.lane.b32.xlu0 %v4384_v30, %s6591_s27  ;;  %v4502_v30 = vpop.permute.xlu1 %4501 }
 0x474   : > { %v4388_v63 = vpop.f32.mrf.mxu1 }
 0x475   : > { %v4389_v12 = vadd.f32 %v4388_v63, %v7850_v53 }
 0x476   : > { %v4390_v45 = vpop.f32.mrf.mxu1 }
 0x477   : > { %4583 = vrot.lane.b32.xlu1 %v4389_v12, %s6591_s27  ;;  %v4512_v21 = vpop.permute.xlu1 %4511 }
 0x478   : > { %v4391_v40 = vpop.f32.mrf.mxu1 }
 0x479   : > { %v4392_v50 = vadd.f32 %v4391_v40, %v7853_v3 }
 0x47a   : > { %v4393_v62 = vpop.f32.mrf.mxu1 }
 0x47b   : > { %4585 = vrot.lane.b32.xlu0 %v4392_v50, %s6591_s27 }
 0x47c   : > { %v4396_v37 = vpop.f32.mrf.mxu1 }
 0x47d   : > { %v4397_v59 = vadd.f32 %v4396_v37, %v7856_v14 }
 0x47e   : > { %v4398_v11 = vpop.f32.mrf.mxu1 }
 0x47f   : > { %4603 = vrot.lane.b32.xlu1 %v4397_v59, %s6592_s28 }
 0x480   : > { %v4399_v48 = vpop.f32.mrf.mxu1 }
 0x481   : > { %v4400_v33 = vadd.f32 %v4399_v48, %v7859_v16 }
 0x482   : > { %v4401_v36 = vpop.f32.mrf.mxu1 }
 0x483   : > { %4605 = vrot.lane.b32.xlu0 %v4400_v33, %s6592_s28 }
 0x484   : > { %v4404_v26 = vpop.f32.mrf.mxu1 }
 0x485   : > { %v4405_v53 = vadd.f32 %v4404_v26, %v7862_v47 }
 0x486   : > { %v4406_v35 = vpop.f32.mrf.mxu1 }
 0x487   : > { %4607 = vrot.lane.b32.xlu1 %v4405_v53, %s6592_s28 }
 0x488   : > { %v4407_v32 = vpop.f32.mrf.mxu1 }
 0x489   : > { %v4408_v3 = vadd.f32 %v4407_v32, %v7865_v28 }
 0x48a   : > { %v4409_v8 = vpop.f32.mrf.mxu1 }
 0x48b   : > { %4609 = vrot.lane.b32.xlu0 %v4408_v3, %s6592_s28  ;;  %v4519_v8 = vadd.f32 %v4502_v30, %v7901_v29 }
 0x48c   : > { %v4412_v7 = vpop.f32.mrf.mxu1 }
 0x48d   : > { %v4413_v14 = vadd.f32 %v4412_v7, %v7868_v27 }
 0x48e   : > { %v4414_v42 = vpop.f32.mrf.mxu1 }
 0x48f   : > { %4627 = vrot.lane.b32.xlu1 %v4413_v14, %s6593_s29 }
 0x490   : > { %v4415_v22 = vpop.f32.mrf.mxu1 }
 0x491   : > { %v4416_v16 = vadd.f32 %v4415_v22, %v7871_v58 }
 0x492   : > { %v4417_v6 = vpop.f32.mrf.mxu1 }
 0x493   : > { %4629 = vrot.lane.b32.xlu0 %v4416_v16, %s6593_s29 }
 0x494   : > { %v4420_v9 = vpop.f32.mrf.mxu1 }
 0x495   : > { %v4421_v47 = vadd.f32 %v4420_v9, %v7874_v54 }
 0x496   : > { %v4422_v52 = vpop.f32.mrf.mxu1 }
 0x497   : > { %4631 = vrot.lane.b32.xlu1 %v4421_v47, %s6593_s29 }
 0x498   : > { %v4423_v1 = vpop.f32.mrf.mxu1 }
 0x499   : > { %v4424_v28 = vadd.f32 %v4423_v1, %v7877_v43 }
 0x49a   : > { %v4425_v4 = vpop.f32.mrf.mxu1 }
 0x49b   : > { %4633 = vrot.lane.b32.xlu0 %v4424_v28, %s6593_s29  ;;  %v4521_v28 = vadd.f32 %v4512_v21, %v7910_v20 }
 0x49c   : > { %v4428_v23 = vpop.f32.mrf.mxu1 }
 0x49d   : > { %v4429_v27 = vadd.f32 %v4428_v23, %v7880_v13 }
 0x49e   : > { %v4430_v17 = vpop.f32.mrf.mxu1 }
 0x49f   : > { %4651 = vrot.lane.b32.xlu1 %v4429_v27, %s6594_s30 }
 0x4a0   : > { %v4431_v61 = vpop.f32.mrf.mxu1 }
 0x4a1   : > { %v4432_v58 = vadd.f32 %v4431_v61, %v7883_v15 }
 0x4a2   : > { %v4433_v39 = vpop.f32.mrf.mxu1 }
 0x4a3   : > { %4653 = vrot.lane.b32.xlu0 %v4432_v58, %s6594_s30 }
 0x4a4   : > { %v4436_v46 = vpop.f32.mrf.mxu1 }
 0x4a5   : > { %v4437_v54 = vadd.f32 %v4436_v46, %v7886_v18 }
 0x4a6   : > { %v4438_v31 = vpop.f32.mrf.mxu1 }
 0x4a7   : > { %4655 = vrot.lane.b32.xlu1 %v4437_v54, %s6594_s30 }
 0x4a8   : > { %v4439_v19 = vpop.f32.mrf.mxu1 }
 0x4a9   : > { %v4440_v43 = vadd.f32 %v4439_v19, %v7889_v2 }
 0x4aa   : > { %v4441_v5 = vpop.f32.mrf.mxu1 }
 0x4ab   : > { %4657 = vrot.lane.b32.xlu0 %v4440_v43, %s6594_s30 }
 0x4ac   : > { %v4444_v41 = vpop.f32.mrf.mxu1 }
 0x4ad   : > { %v4445_v13 = vadd.f32 %v4444_v41, %v7892_v38  ;;  %v4507_v38 = vpop.permute.xlu0 %4506 }
 0x4ae   : > { %v4446_v44 = vpop.f32.mrf.mxu1  ;;  %v4520_v14 = vadd.f32 %v4507_v38, %v7907_v10 }
 0x4af   : > { %4675 = vrot.lane.b32.xlu1 %v4445_v13, %s6595_s5 }
 0x4b0   : > { %v4447_v56 = vpop.f32.mrf.mxu1 }
 0x4b1   : > { %v4448_v15 = vadd.f32 %v4447_v56, %v7895_v55  ;;  %v4517_v63 = vpop.permute.xlu0 %4516 }
 0x4b2   : > { %v4449_v25 = vpop.f32.mrf.mxu1  ;;  %v4522_v17 = vadd.f32 %v4517_v63, %v7913_v57 }
 0x4b3   : > { %4677 = vrot.lane.b32.xlu0 %v4448_v15, %s6595_s5 }
 0x4b4   : > { %v4452_v49 = vpop.f32.mrf.mxu1 }
 0x4b5   : > { %v4453_v18 = vadd.f32 %v4452_v49, %v7898_v51 }
 0x4b6   : > { %v4454_v24 = vpop.f32.mrf.mxu1 }
 0x4b7   : > { %4679 = vrot.lane.b32.xlu1 %v4453_v18, %s6595_s5 }
 0x4b8   : > { %v4455_v0 = vpop.f32.mrf.mxu1 }
 0x4b9   : > { %v4456_v2 = vadd.f32 %v4455_v0, %v7904_v60 }
 0x4ba   : > { %v4457_v34 = vpop.f32.mrf.mxu1 }
 0x4bb   : > { %4681 = vrot.lane.b32.xlu0 %v4456_v2, %s6595_s5 }
 0x4c1   : > { %v4532_v12 = vpop.permute.xlu1 %4531 }
 0x4c2   : > { %v4543_v7 = vadd.f32 %v4532_v12, %v4519_v8 }
 0x4c5   : > { %v4534_v45 = vpop.permute.xlu0 %4533 }
 0x4c6   : > { %v4544_v16 = vadd.f32 %v4534_v45, %v4520_v14 }
 0x4c9   : > { %v4536_v40 = vpop.permute.xlu1 %4535 }
 0x4ca   : > { %v4545_v27 = vadd.f32 %v4536_v40, %v4521_v28 }
 0x4cd   : > { %v4538_v55 = vpop.permute.xlu0 %4537 }
 0x4ce   : > { %v4546_v39 = vadd.f32 %v4538_v55, %v4522_v17 }
 0x4d1   : > { %v4556_v50 = vpop.permute.xlu1 %4555 }
 0x4d2   : > { %v4567_v6 = vadd.f32 %v4556_v50, %v4543_v7 }
 0x4d5   : > { %v4558_v62 = vpop.permute.xlu0 %4557 }
 0x4d6   : > { %v4568_v9 = vadd.f32 %v4558_v62, %v4544_v16 }
 0x4d9   : > { %v4560_v37 = vpop.permute.xlu1 %4559 }
 0x4da   : > { %v4569_v46 = vadd.f32 %v4560_v37, %v4545_v27 }
 0x4dd   : > { %v4562_v59 = vpop.permute.xlu0 %4561 }
 0x4de   : > { %v4570_v19 = vadd.f32 %v4562_v59, %v4546_v39 }
 0x4e1   : > { %v4580_v51 = vpop.permute.xlu1 %4579 }
 0x4e2   : > { %v4591_v47 = vadd.f32 %v4580_v51, %v4567_v6 }
 0x4e5   : > { %v4582_v11 = vpop.permute.xlu0 %4581 }
 0x4e6   : > { %v4592_v4 = vadd.f32 %v4582_v11, %v4568_v9 }
 0x4e9   : > { %v4584_v48 = vpop.permute.xlu1 %4583 }
 0x4ea   : > { %v4593_v43 = vadd.f32 %v4584_v48, %v4569_v46 }
 0x4ed   : > { %v4586_v33 = vpop.permute.xlu0 %4585 }
 0x4ee   : > { %v4594_v13 = vadd.f32 %v4586_v33, %v4570_v19 }
 0x4f1   : > { %v4604_v36 = vpop.permute.xlu1 %4603 }
 0x4f2   : > { %v4615_v23 = vadd.f32 %v4604_v36, %v4591_v47 }
 0x4f5   : > { %v4606_v60 = vpop.permute.xlu0 %4605 }
 0x4f6   : > { %v4616_v29 = vadd.f32 %v4606_v60, %v4592_v4 }
 0x4f9   : > { %v4608_v26 = vpop.permute.xlu1 %4607 }
 0x4fa   : > { %v4617_v44 = vadd.f32 %v4608_v26, %v4593_v43 }
 0x4fd   : > { %v4610_v53 = vpop.permute.xlu0 %4609 }
 0x4fe   : > { %v4618_v15 = vadd.f32 %v4610_v53, %v4594_v13 }
 0x501   : > { %v4628_v35 = vpop.permute.xlu1 %4627 }
 0x502   : > { %v4639_v61 = vadd.f32 %v4628_v35, %v4615_v23 }
 0x505   : > { %v4630_v32 = vpop.permute.xlu0 %4629 }
 0x506   : > { %v4640_v54 = vadd.f32 %v4630_v32, %v4616_v29 }
 0x509   : > { %v4632_v3 = vpop.permute.xlu1 %4631 }
 0x50a   : > { %v4641_v57 = vadd.f32 %v4632_v3, %v4617_v44 }
 0x50d   : > { %v4634_v42 = vpop.permute.xlu0 %4633 }
 0x50e   : > { %v4642_v0 = vadd.f32 %v4634_v42, %v4618_v15 }
 0x511   : > { %v4652_v22 = vpop.permute.xlu1 %4651 }
 0x512   : > { %v4663_v31 = vadd.f32 %v4652_v22, %v4639_v61 }
 0x515   : > { %v4654_v52 = vpop.permute.xlu0 %4653 }
 0x516   : > { %v4664_v5 = vadd.f32 %v4654_v52, %v4640_v54 }
 0x519   : > { %v4656_v1 = vpop.permute.xlu1 %4655 }
 0x51a   : > { %v4665_v2 = vadd.f32 %v4656_v1, %v4641_v57 }
 0x51d   : > { %v4658_v58 = vpop.permute.xlu0 %4657 }
 0x51e   : > { %v4666_v34 = vadd.f32 %v4658_v58, %v4642_v0 }
 0x521   : > { %v4676_v10 = vpop.permute.xlu1 %4675 }
 0x522   : > { %v4687_v41 = vadd.f32 %v4676_v10, %v4663_v31 }
 0x524   : > { %v4692_v25 = vsel %vm4691_vm0, %v4687_v41, 0.0 }
 0x525   : > { %v4678_v20 = vpop.permute.xlu0 %4677 }
 0x526   : > { %v4688_v56 = vadd.f32 %v4678_v20, %v4664_v5 }
 0x528   : > { %v4693_v49 = vsel %vm4691_vm0, %v4688_v56, 0.0 }
 0x529   : > { %v5750_v18 = vpack.c.bf16 %v4693_v49, %v4692_v25  ;;  %v4680_v24 = vpop.permute.xlu1 %4679 }
 0x52a   : > { %v4689_v30 = vadd.f32 %v4680_v24, %v4665_v2 }
 0x52b   : > { %5751 = vst [vmem:[%s197_s9] sm:$0xff] %v5750_v18  }
 0x52c   : > { %v4694_v63 = vsel %vm4691_vm0, %v4689_v30, 0.0 }
 0x52d   : > { %v4682_v38 = vpop.permute.xlu0 %4681 }
 0x52e   : > { %v4690_v21 = vadd.f32 %v4682_v38, %v4666_v34 }
 0x530   : > { %v4695_v12 = vsel %vm4691_vm0, %v4690_v21, 0.0 }
 0x531   : > { %v5755_v45 = vpack.c.bf16 %v4695_v12, %v4694_v63 }
 0x533   : > { %5818 = vst [vmem:[%s197_s9 + $0x8] sm:$0xff] %v5755_v45  }
 0x534 PF: > { %s14_s15 = sadd.s32 1, %s6584_s15  }
 0x535   : > { %p11_p4 = scmp.ge.s32.totalorder %s14_s15, 4  }
 0x537   :  { %13 = sbr.rel (!%p11_p4) target bundleno = 1 (0x1), region = 66 }

// kernel: gcnnet_forward.3
= control target key start
LH: loop header
LB: loop body
LE: loop exit
PB: predicated region body
PF: predicated region fallthrough
CT: control target
= control target key end

     0   :  { %v12036_v0 = vmov 0.0   ;;  %vm12037_vm0 = vmmov 0   ;;  %vm205_vm1 = vcmask 130048   ;;  %v12038_v32 = vmov 0   ;;  %s15634_s4 = inlined_call_operand.vmem [shape: bf16[128,128], index: 4, kind: input, shape index: {}]   ;;  %s15635_s1 = inlined_call_operand.vmem [shape: bf16[16,128], index: 1, kind: input, shape index: {}]   ;;  %s15636_s0 = inlined_call_operand.vmem [shape: bf16[16,16], index: 0, kind: input, shape index: {}]   ;;  %s15637_s6 = inlined_call_operand.vmem [shape: bf16[128,256], index: 6, kind: input, shape index: {}]   ;;  %s15638_s5 = inlined_call_operand.vmem [shape: f32[1,128], index: 5, kind: input, shape index: {}]   ;;  %s15639_s8 = inlined_call_operand.vmem [shape: bf16[256,384], index: 8, kind: input, shape index: {}]   ;;  %s15640_s7 = inlined_call_operand.vmem [shape: f32[1,256], index: 7, kind: input, shape index: {}]   ;;  %s15641_s2 = inlined_call_operand.vmem [shape: f32[2,16,1], index: 2, kind: input, shape index: {}]   ;;  %s15642_s10 = inlined_call_operand.vmem [shape: bf16[384,1024], index: 10, kind: input, shape index: {}]   ;;  %s15643_s9 = inlined_call_operand.vmem [shape: f32[1,384], index: 9, kind: input, shape index: {}]   ;;  %s15644_s12 = inlined_call_operand.vmem [shape: bf16[1024,128], index: 12, kind: input, shape index: {}]   ;;  %s15645_s11 = inlined_call_operand.vmem [shape: f32[1,1024], index: 11, kind: input, shape index: {}]   ;;  %s15646_s14 = inlined_call_operand.vmem [shape: bf16[4096,128], index: 14, kind: input, shape index: {}]   ;;  %s15647_s3 = inlined_call_operand.vmem [shape: bf16[2,4096], index: 3, kind: input, shape index: {}]   ;;  %s15648_s13 = inlined_call_operand.vmem [shape: f32[1,128], index: 13, kind: input, shape index: {}]   ;;  %s15649_s15 = inlined_call_operand.vmem [shape: f32[1,128], index: 15, kind: input, shape index: {}]   ;;  %s15650_s17 = inlined_call_operand.vmem [shape: bf16[128,1024], index: 17, kind: input, shape index: {}]   ;;  %s15651_s16 = inlined_call_operand.vmem [shape: bf16[128,1024], index: 16, kind: input, shape index: {}]   ;;  %s15652_s19 = inlined_call_operand.vmem [shape: bf16[1024,512], index: 19, kind: input, shape index: {}]   ;;  %s15653_s18 = inlined_call_operand.vmem [shape: f32[1,1024], index: 18, kind: input, shape index: {}]   ;;  %s15654_s21 = inlined_call_operand.vmem [shape: bf16[512,1], index: 21, kind: input, shape index: {}]   ;;  %s15655_s20 = inlined_call_operand.vmem [shape: f32[1,512], index: 20, kind: input, shape index: {}]   ;;  %s15656_s22 = inlined_call_operand.<no memory space> [shape: f32[1,1], index: 22, kind: input, shape index: {}]   ;;  %s15657_s23 = inlined_call_operand.vmem [shape: f32[2,1], index: 23, kind: output, shape index: {}]  }
   0x1   :  { %15662 = sst [smem:[#allocation3_spill]] %s15634_s4  ;;  %11159 = vmatprep.subr.bf16.mxu0 %v12036_v0  ;;  %11175 = vmatprep.mubr.msk.bf16.mxu0 %vm12037_vm0, %v12036_v0  ;;  %vm1299_vm2 = vcmask 1041409   ;;  %vm9624_vm3 = vcmask 1024  }
   0x2   :  { %15663 = sst [smem:[#allocation4_spill]] %s15635_s1  ;;  %381 = vmatprep.mubr.bf16.mxu1 %v12038_v32  ;;  %11196 = vset.pattern.permute.xlu1 %v12038_v32 }
   0x3   :  { %15664 = sst [smem:[#allocation5_spill]] %s15636_s0  ;;  %11195 = vset.pattern.permute.xlu0 %v12038_v32 }
   0x4   :  { %15665 = sst [smem:[#allocation6_spill]] %s15637_s6 }
   0x5   :  { %15666 = sst [smem:[#allocation7_spill]] %s15638_s5 }
   0x6   :  { %15667 = sst [smem:[#allocation8_spill]] %s15639_s8 }
   0x7   :  { %15668 = sst [smem:[#allocation9_spill]] %s15640_s7 }
   0x8   :  { %15669 = sst [smem:[#allocation10_spill]] %s15641_s2 }
   0x9   :  { %s15670_s24 = sld [smem:[#allocation3_spill]] }
   0xa   :  { %s15671_s1 = sld [smem:[#allocation4_spill]] }
   0xb   :  { %s15672_s7 = sld [smem:[#allocation6_spill]] }
   0xc   :  { %s15673_s30 = sld [smem:[#allocation5_spill]] }
   0xd   :  { %s15674_s5 = sld [smem:[#allocation7_spill]] }
   0xe   :  { %s15675_s25 = sld [smem:[#allocation8_spill]] }
   0xf   :  { %v11197_v1 = vld [vmem:[%s15670_s24 + $0x38] sm:$0xff]   ;;  %v11198_v2 = vld [vmem:[%s15670_s24 + $0x30] sm:$0xff]   ;;  %v11199_v3 = vld [vmem:[%s15670_s24 + $0x28] sm:$0xff]   ;;  %s15677_s8 = sld [smem:[#allocation10_spill]] }
  0x10   :  { %11160 = vmatpush3.bf16.msra.mxu0 %v11197_v1  ;;  %v11200_v4 = vld [vmem:[%s15670_s24 + $0x20] sm:$0xff]   ;;  %v11201_v5 = vld [vmem:[%s15670_s24 + $0x18] sm:$0xff]   ;;  %v11202_v6 = vld [vmem:[%s15670_s24 + $0x10] sm:$0xff]  }
  0x11   :  { %11161 = vmatprep.subr.bf16.mxu0 %v12036_v0  ;;  %v11203_v7 = vld [vmem:[%s15670_s24 + $0x8] sm:$0xff]   ;;  %v11204_v8 = vld [vmem:[%s15670_s24] sm:$0xff]   ;;  %v11207_v10 = vld [vmem:[%s15672_s7 + $0x74] ss:$8 sps:$4 sm:$0xff]  }
  0x12   :  { %v11205_v9 = vld [vmem:[%s15671_s1] sm:$0xff]   ;;  %v11209_v11 = vld [vmem:[%s15672_s7 + $0x70] ss:$8 sps:$4 sm:$0xff]   ;;  %349 = vmatprep.subr.bf16.mxu1 %v11207_v10  ;;  %v11213_v14 = vld [vmem:[%s15672_s7 + $0x54] ss:$8 sps:$4 sm:$0xff]  }
  0x13   :  { %v11210_v12 = vld [vmem:[%s15672_s7 + $0x64] ss:$8 sps:$4 sm:$0xff]   ;;  %350 = vmatpush1.bf16.msra.mxu1 %v11209_v11  ;;  %v11212_v13 = vld [vmem:[%s15672_s7 + $0x60] ss:$8 sps:$4 sm:$0xff]   ;;  %v11215_v15 = vld [vmem:[%s15672_s7 + $0x50] ss:$8 sps:$4 sm:$0xff]  }
  0x14   :  { %11162 = vmatpush3.bf16.msra.mxu0 %v11198_v2  ;;  %351 = vmatprep.subr.bf16.mxu1 %v11210_v12  ;;  %v11216_v16 = vld [vmem:[%s15672_s7 + $0x44] ss:$8 sps:$4 sm:$0xff]   ;;  %v11218_v17 = vld [vmem:[%s15672_s7 + $0x40] ss:$8 sps:$4 sm:$0xff]   ;;  %v11219_v18 = vld [vmem:[%s15672_s7 + $0x34] ss:$8 sps:$4 sm:$0xff]  }
  0x15   :  { %11163 = vmatprep.subr.bf16.mxu0 %v12036_v0  ;;  %v11221_v19 = vld [vmem:[%s15672_s7 + $0x30] ss:$8 sps:$4 sm:$0xff]   ;;  %v11222_v20 = vld [vmem:[%s15672_s7 + $0x24] ss:$8 sps:$4 sm:$0xff]   ;;  %v11224_v27 = vld [vmem:[%s15672_s7 + $0x20] ss:$8 sps:$4 sm:$0xff]  }
  0x16   :  { %v12236_v26 = vld [vmem:[%s15673_s30] sm:$0xff]   ;;  %v11225_v28 = vld [vmem:[%s15672_s7 + $0x14] ss:$8 sps:$4 sm:$0xff]   ;;  %v11227_v29 = vld [vmem:[%s15672_s7 + $0x10] ss:$8 sps:$4 sm:$0xff]  }
  0x17   :  { %352 = vmatpush1.bf16.msra.mxu1 %v11212_v13  ;;  %v11228_v30 = vld [vmem:[%s15672_s7 + $0x4] ss:$8 sps:$4 sm:$0xff]   ;;  %v11230_v31 = vld [vmem:[%s15672_s7] ss:$8 sps:$4 sm:$0xff]   ;;  %v11234_v46 = vld [vmem:[%s15675_s25 + $0x90] ss:$12 sps:$4 sm:$0xff]  }
  0x18   :  { %11164 = vmatpush3.bf16.msra.mxu0 %v11199_v3  ;;  %353 = vmatprep.subr.bf16.mxu1 %v11213_v14  ;;  %v9639_v33 = vld [vmem:[%s15674_s5] ss:$0 sm:$0xff]  ;;  %v11231_v43 = vld [vmem:[%s15675_s25 + $0xa8] ss:$12 sps:$4 sm:$0xff]   ;;  %v11233_v44 = vld [vmem:[%s15675_s25 + $0xac] ss:$12 sps:$4 sm:$0xff]  }
  0x19   :  { %11165 = vmatprep.subr.bf16.mxu0 %v12036_v0  ;;  %v11236_v45 = vld [vmem:[%s15675_s25 + $0x94] ss:$12 sps:$4 sm:$0xff]   ;;  %v11239_v47 = vld [vmem:[%s15675_s25 + $0x7c] ss:$12 sps:$4 sm:$0xff]   ;;  %v11237_v48 = vld [vmem:[%s15675_s25 + $0x78] ss:$12 sps:$4 sm:$0xff]  }
  0x1a   :  { %v11242_v49 = vld [vmem:[%s15675_s25 + $0x64] ss:$12 sps:$4 sm:$0xff]   ;;  %v11240_v50 = vld [vmem:[%s15675_s25 + $0x60] ss:$12 sps:$4 sm:$0xff]   ;;  %v11243_v52 = vld [vmem:[%s15675_s25 + $0x48] ss:$12 sps:$4 sm:$0xff]  }
  0x1b   :  { %354 = vmatpush1.bf16.msra.mxu1 %v11215_v15  ;;  %v11245_v51 = vld [vmem:[%s15675_s25 + $0x4c] ss:$12 sps:$4 sm:$0xff]   ;;  %v11248_v53 = vld [vmem:[%s15675_s25 + $0x34] ss:$12 sps:$4 sm:$0xff]   ;;  %v11246_v54 = vld [vmem:[%s15675_s25 + $0x30] ss:$12 sps:$4 sm:$0xff]  }
  0x1c   :  { %11166 = vmatpush3.bf16.msra.mxu0 %v11200_v4  ;;  %355 = vmatprep.subr.bf16.mxu1 %v11216_v16  ;;  %v11251_v55 = vld [vmem:[%s15675_s25 + $0x1c] ss:$12 sps:$4 sm:$0xff]   ;;  %v11249_v56 = vld [vmem:[%s15675_s25 + $0x18] ss:$12 sps:$4 sm:$0xff]   ;;  %v11252_v58 = vld [vmem:[%s15675_s25] ss:$12 sps:$4 sm:$0xff]  }
  0x1d   :  { %11167 = vmatprep.subr.bf16.mxu0 %v12036_v0  ;;  %v11254_v57 = vld [vmem:[%s15675_s25 + $0x4] ss:$12 sps:$4 sm:$0xff]   ;;  %v11257_v59 = vld [vmem:[%s15675_s25 + $0x16c] ss:$12 sps:$4 sm:$0xff]   ;;  %v11255_v60 = vld [vmem:[%s15675_s25 + $0x168] ss:$12 sps:$4 sm:$0xff]  }
  0x1e   :  { %v11262_v61 = vld [vmem:[%s15675_s25 + $0x154] ss:$12 sps:$4 sm:$0xff]   ;;  %v11260_v62 = vld [vmem:[%s15675_s25 + $0x150] ss:$12 sps:$4 sm:$0xff]   ;;  %v11265_v1 = vld [vmem:[%s15675_s25 + $0x138] ss:$12 sps:$4 sm:$0xff]  }
  0x1f   :  { %356 = vmatpush1.bf16.msra.mxu1 %v11218_v17  ;;  %v11267_v63 = vld [vmem:[%s15675_s25 + $0x13c] ss:$12 sps:$4 sm:$0xff]   ;;  %v11272_v2 = vld [vmem:[%s15675_s25 + $0x124] ss:$12 sps:$4 sm:$0xff]   ;;  %v11270_v3 = vld [vmem:[%s15675_s25 + $0x120] ss:$12 sps:$4 sm:$0xff]  }
  0x20   :  { %11168 = vmatpush3.bf16.msra.mxu0 %v11201_v5  ;;  %357 = vmatprep.subr.bf16.mxu1 %v11219_v18  ;;  %v11277_v4 = vld [vmem:[%s15675_s25 + $0x10c] ss:$12 sps:$4 sm:$0xff]   ;;  %v11275_v5 = vld [vmem:[%s15675_s25 + $0x108] ss:$12 sps:$4 sm:$0xff]   ;;  %v11258_v11 = vld [vmem:[%s15675_s25 + $0x170] ss:$12 sps:$4 sm:$0xff]  }
  0x21   :  { %11169 = vmatprep.subr.bf16.mxu0 %v12036_v0  ;;  %v11259_v13 = vld [vmem:[%s15675_s25 + $0xb0] ss:$12 sps:$4 sm:$0xff]   ;;  %v11263_v14 = vld [vmem:[%s15675_s25 + $0x158] ss:$12 sps:$4 sm:$0xff]   ;;  %v11268_v16 = vld [vmem:[%s15675_s25 + $0x140] ss:$12 sps:$4 sm:$0xff]  }
  0x22   :  { %v11264_v15 = vld [vmem:[%s15675_s25 + $0x98] ss:$12 sps:$4 sm:$0xff]   ;;  %v11269_v17 = vld [vmem:[%s15675_s25 + $0x80] ss:$12 sps:$4 sm:$0xff]   ;;  %v11273_v18 = vld [vmem:[%s15675_s25 + $0x128] ss:$12 sps:$4 sm:$0xff]  }
  0x23   :  { %358 = vmatpush1.bf16.msra.mxu1 %v11221_v19  ;;  %v11274_v19 = vld [vmem:[%s15675_s25 + $0x68] ss:$12 sps:$4 sm:$0xff]   ;;  %s15676_s7 = sld [smem:[#allocation9_spill]] }
  0x24   :  { %11170 = vmatpush3.bf16.msra.mxu0 %v11202_v6  ;;  %359 = vmatprep.subr.bf16.mxu1 %v11222_v20  ;;  %v11278_v20 = vld [vmem:[%s15675_s25 + $0x110] ss:$12 sps:$4 sm:$0xff]  }
  0x25   :  { %11171 = vmatprep.subr.bf16.mxu0 %v12036_v0 }
  0x27   :  { %360 = vmatpush1.bf16.msra.mxu1 %v11224_v27  ;;  %v11287_v27 = vld [vmem:[%s15675_s25 + $0xdc] ss:$12 sps:$4 sm:$0xff]  }
  0x28   :  { %11172 = vmatpush3.bf16.msra.mxu0 %v11203_v7  ;;  %361 = vmatprep.subr.bf16.mxu1 %v11225_v28  ;;  %v11288_v28 = vld [vmem:[%s15675_s25 + $0xe0] ss:$12 sps:$4 sm:$0xff]  }
  0x29   :  { %11173 = vmatprep.subr.bf16.mxu0 %v12036_v0 }
  0x2b   :  { %362 = vmatpush1.bf16.msra.mxu1 %v11227_v29  ;;  %v11285_v29 = vld [vmem:[%s15675_s25 + $0xd8] ss:$12 sps:$4 sm:$0xff]  }
  0x2c   :  { %11174 = vmatpush3.bf16.msra.mxu0 %v11204_v8  ;;  %363 = vmatprep.subr.bf16.mxu1 %v11228_v30  ;;  %v11289_v30 = vld [vmem:[%s15675_s25 + $0x20] ss:$12 sps:$4 sm:$0xff]  }
  0x2d   :  { %11179 = vmatprep.subr.bf16.mxu0 %v12036_v0 }
  0x2f   :  { %11176 = vmatmul.mubr.bf16.vlgmr.msra.gmra.mxu0 %v11205_v9  ;;  %364 = vmatpush1.bf16.msra.mxu1 %v11230_v31  ;;  %v11292_v31 = vld [vmem:[%s15675_s25 + $0xc4] ss:$12 sps:$4 sm:$0xff]  }
  0x30   :  { %11181 = vmatprep.mubr.msk.bf16.mxu0 %vm12037_vm0, %v12036_v0  ;;  %775 = vmatprep.subr.bf16.mxu1 %v11233_v44 }
  0xef   :  { %v185_v21 = vpop.f32.mrf.mxu0 }
  0xf1   :  { %v11177_v22 = vpop.f32.mrf.mxu0 }
  0xf2   :  { %v11282_v22 = vld [vmem:[%s15675_s25 + $0xf4] ss:$12 sps:$4 sm:$0xff]  }
  0xf3   :  { %v188_v23 = vpop.f32.mrf.mxu0 }
  0xf4   :  { %v192_v24 = vpack.c.bf16 %v188_v23, %v185_v21  ;;  %v11279_v21 = vld [vmem:[%s15675_s25 + $0x50] ss:$12 sps:$4 sm:$0xff]   ;;  %v11283_v23 = vld [vmem:[%s15675_s25 + $0xf8] ss:$12 sps:$4 sm:$0xff]  }
  0xf5   :  { %v11178_v25 = vpop.f32.mrf.mxu0 }
  0xf6   :  { %11180 = vmatpush3.bf16.msra.mxu0 %v192_v24  ;;  %v11280_v24 = vld [vmem:[%s15675_s25 + $0xf0] ss:$12 sps:$4 sm:$0xff]   ;;  %v11284_v25 = vld [vmem:[%s15675_s25 + $0x38] ss:$12 sps:$4 sm:$0xff]  }
  0xf9   :  { %11182 = vmatmul.mubr.msk.bf16.vlgmr.msra.gmra.mxu0 %vm205_vm1, %v12236_v26 }
  0xfa   :  { %438 = vmatprep.mubr.bf16.mxu0 %v12038_v32 }
 0x1b9   :  { %v243_v34 = vpop.f32.mrf.mxu0 }
 0x1ba   :  { %v244_v36 = vadd.f32 %v9639_v33, %v243_v34  ;;  %v11290_v34 = vld [vmem:[%s15675_s25 + $0xc0] ss:$12 sps:$4 sm:$0xff]  }
 0x1bb   :  { %v11183_v35 = vpop.f32.mrf.mxu0 }
 0x1bc   :  { %v250_v40 = vmax.f32 %v244_v36, 0.0  ;;  %v11294_v35 = vld [vmem:[%s15675_s25 + $0x8] ss:$12 sps:$4 sm:$0xff]   ;;  %v396_v36 = vlaneseq }
 0x1bd   :  { %v246_v37 = vpop.f32.mrf.mxu0 }
 0x1be   :  { %v247_v38 = vadd.f32 %v9639_v33, %v246_v37  ;;  %v11293_v33 = vld [vmem:[%s15675_s25 + $0xc8] ss:$12 sps:$4 sm:$0xff]   ;;  %v12408_v37 = vshrl.u32 %v396_v36, 7 }
 0x1bf   :  { %v11184_v39 = vpop.f32.mrf.mxu0 }
 0x1c0   :  { %v251_v41 = vmax.f32 %v247_v38, 0.0  ;;  %v12411_v38 = vsub.s32 1, %v12408_v37  ;;  %v12414_v39 = vsub.s32 0, %v12408_v37 }
 0x1c2   :  { %v252_v42 = vpack.c.bf16 %v251_v41, %v250_v40  ;;  %v394_v40 = vld [vmem:[%s15676_s7] sm:$0x3] }
 0x1c4   :  { %382 = vmatmul.mubr.bf16.vlgmr.msra.gmra.mxu1 %v252_v42  ;;  %v403_v42 = vrot.slane %v394_v40, %v12411_v38 }
 0x1c5   :  { %776 = vmatpush1.bf16.msra.mxu1 %v11231_v43  ;;  %v399_v43 = vrot.slane %v394_v40, %v12414_v39 }
 0x1c6   :  { %777 = vmatprep.subr.bf16.mxu1 %v11236_v45 }
 0x1c9   :  { %778 = vmatpush1.bf16.msra.mxu1 %v11234_v46 }
 0x1ca   :  { %779 = vmatprep.subr.bf16.mxu1 %v11239_v47 }
 0x1cd   :  { %780 = vmatpush1.bf16.msra.mxu1 %v11237_v48 }
 0x1ce   :  { %781 = vmatprep.subr.bf16.mxu1 %v11242_v49 }
 0x1d1   :  { %782 = vmatpush1.bf16.msra.mxu1 %v11240_v50 }
 0x1d2   :  { %783 = vmatprep.subr.bf16.mxu1 %v11245_v51 }
 0x1d5   :  { %784 = vmatpush1.bf16.msra.mxu1 %v11243_v52 }
 0x1d6   :  { %785 = vmatprep.subr.bf16.mxu1 %v11248_v53 }
 0x1d9   :  { %786 = vmatpush1.bf16.msra.mxu1 %v11246_v54 }
 0x1da   :  { %787 = vmatprep.subr.bf16.mxu1 %v11251_v55 }
 0x1dd   :  { %788 = vmatpush1.bf16.msra.mxu1 %v11249_v56 }
 0x1de   :  { %789 = vmatprep.subr.bf16.mxu1 %v11254_v57  ;;  %v971_v57 = vld [vmem:[%s15677_s8 + $0x10] sm:$0xff] }
 0x1df   :  { %985 = vperm.xlu1 %11196, %v971_v57  }
 0x1e1   :  { %790 = vmatpush1.bf16.msra.mxu1 %v11252_v58  ;;  %v969_v58 = vld [vmem:[%s15677_s8] sm:$0xff] }
 0x1e2   :  { %791 = vmatprep.subr.bf16.mxu1 %v11257_v59  ;;  %975 = vperm.xlu0 %11195, %v969_v58   ;;  %v972_v59 = vld [vmem:[%s15677_s8 + $0x18] sm:$0xff]  ;;  %v1157_v58 = vld [vmem:[%s15642_s10 + $0x340] sm:$0xff] }
 0x1e3   :  { %990 = vperm.xlu1 %11196, %v972_v59   ;;  %v1161_v59 = vld [vmem:[%s15642_s10 + $0x360] sm:$0xff] }
 0x1e5   :  { %792 = vmatpush2.bf16.msra.mxu1 %v11255_v60  ;;  %v970_v60 = vld [vmem:[%s15677_s8 + $0x8] sm:$0xff] }
 0x1e6   :  { %793 = vmatprep.subr.bf16.mxu1 %v11262_v61  ;;  %980 = vperm.xlu0 %11195, %v970_v60   ;;  %v9814_v60 = vcombine.high %v1157_v58, %v1161_v59 }
 0x1e9   :  { %794 = vmatpush2.bf16.msra.mxu1 %v11260_v62 }
 0x1ea   :  { %795 = vmatprep.subr.bf16.mxu1 %v11267_v63 }
 0x1ed   :  { %796 = vmatpush2.bf16.msra.mxu1 %v11265_v1 }
 0x1ee   :  { %797 = vmatprep.subr.bf16.mxu1 %v11272_v2 }
 0x1f1   :  { %798 = vmatpush2.bf16.msra.mxu1 %v11270_v3 }
 0x1f2   :  { %799 = vmatprep.subr.bf16.mxu1 %v11277_v4 }
 0x1f5   :  { %800 = vmatpush2.bf16.msra.mxu1 %v11275_v5 }
 0x1f6   :  { %801 = vmatprep.subr.bf16.mxu1 %v11282_v22  ;;  %v1089_v22 = vld [vmem:[%s15642_s10 + $0x120] sm:$0xff] }
 0x1f9   :  { %802 = vmatpush2.bf16.msra.mxu1 %v11280_v24 }
 0x1fa   :  { %803 = vmatprep.subr.bf16.mxu1 %v11287_v27 }
 0x1fd   :  { %804 = vmatpush2.bf16.msra.mxu1 %v11285_v29  ;;  %v1069_v29 = vld [vmem:[%s15642_s10 + $0x80] sm:$0xff] }
 0x1fe   :  { %805 = vmatprep.subr.bf16.mxu1 %v11292_v31 }
 0x201   :  { %806 = vmatpush2.bf16.msra.mxu1 %v11290_v34  ;;  %v1061_v34 = vld [vmem:[%s15642_s10 + $0x40] sm:$0xff] }
 0x284   :  { %v383_v6 = vpop.f32.mrf.mxu1 }
 0x286   :  { %v385_v7 = vpop.f32.mrf.mxu1 }
 0x288   :  { %v387_v8 = vpop.f32.mrf.mxu1 }
 0x289   :  { %v392_v12 = vpack.c.bf16 %v387_v8, %v383_v6 }
 0x28a   :  { %v389_v9 = vpop.f32.mrf.mxu1 }
 0x28b   :  { %v393_v10 = vpack.c.bf16 %v389_v9, %v385_v7  ;;  %v1109_v9 = vld [vmem:[%s15642_s10 + $0x1c0] sm:$0xff] }
 0x28d   :  { %420 = vmatprep.subr.bf16.mxu0 %v393_v10  ;;  %v1113_v10 = vld [vmem:[%s15642_s10 + $0x1e0] sm:$0xff] }
 0x28e   :  { %421 = vmatpush1.bf16.msra.mxu0 %v392_v12  ;;  %v9766_v12 = vcombine.high %v1109_v9, %v1113_v10 }
 0x28f   :  { %10651 = vmatprep.subr.bf16.mxu0 %v11258_v11 }
 0x291   :  { %9658 = vmatmul.mubr.msk.bf16.vlgmr.msra.gmra.mxu0 %vm205_vm1, %v12236_v26 }
 0x292   :  { %10652 = vmatpush3.bf16.msra.mxu0 %v11259_v13 }
 0x293   :  { %10653 = vmatprep.subr.bf16.mxu0 %v11263_v14  ;;  %v1101_v14 = vld [vmem:[%s15642_s10 + $0x180] sm:$0xff] }
 0x296   :  { %10654 = vmatpush3.bf16.msra.mxu0 %v11264_v15  ;;  %v1105_v15 = vld [vmem:[%s15642_s10 + $0x1a0] sm:$0xff] }
 0x297   :  { %10655 = vmatprep.subr.bf16.mxu0 %v11268_v16  ;;  %v9765_v16 = vcombine.low %v1109_v9, %v1113_v10 }
 0x29a   :  { %10656 = vmatpush3.bf16.msra.mxu0 %v11269_v17  ;;  %v9758_v17 = vcombine.high %v1101_v14, %v1105_v15 }
 0x29b   :  { %10657 = vmatprep.subr.bf16.mxu0 %v11273_v18  ;;  %v1093_v18 = vld [vmem:[%s15642_s10 + $0x140] sm:$0xff] }
 0x29e   :  { %10658 = vmatpush3.bf16.msra.mxu0 %v11274_v19  ;;  %v1097_v19 = vld [vmem:[%s15642_s10 + $0x160] sm:$0xff] }
 0x29f   :  { %10659 = vmatprep.subr.bf16.mxu0 %v11278_v20  ;;  %v9750_v20 = vcombine.high %v1093_v18, %v1097_v19 }
 0x2a2   :  { %10660 = vmatpush3.bf16.msra.mxu0 %v11279_v21  ;;  %v1085_v21 = vld [vmem:[%s15642_s10 + $0x100] sm:$0xff] }
 0x2a3   :  { %10661 = vmatprep.subr.bf16.mxu0 %v11283_v23  ;;  %v9749_v23 = vcombine.low %v1093_v18, %v1097_v19  ;;  %v9742_v24 = vcombine.high %v1085_v21, %v1089_v22  ;;  %v9741_v27 = vcombine.low %v1085_v21, %v1089_v22  ;;  %v1133_v19 = vld [vmem:[%s15642_s10 + $0x280] sm:$0xff] }
 0x2a4   :  { %v1205_v21 = vld [vmem:[%s15642_s10 + $0x4c0] sm:$0xff] }
 0x2a5   :  { %v1209_v22 = vld [vmem:[%s15642_s10 + $0x4e0] sm:$0xff] }
 0x2a6   :  { %10662 = vmatpush3.bf16.msra.mxu0 %v11284_v25  ;;  %v1081_v25 = vld [vmem:[%s15642_s10 + $0xe0] sm:$0xff] }
 0x2a7   :  { %10663 = vmatprep.subr.bf16.mxu0 %v11288_v28 }
 0x2aa   :  { %10664 = vmatpush3.bf16.msra.mxu0 %v11289_v30  ;;  %v1073_v30 = vld [vmem:[%s15642_s10 + $0xa0] sm:$0xff] }
 0x2ab   :  { %10665 = vmatprep.subr.bf16.mxu0 %v11293_v33  ;;  %v9726_v33 = vcombine.high %v1069_v29, %v1073_v30  ;;  %v9725_v36 = vcombine.low %v1069_v29, %v1073_v30  ;;  %v1197_v29 = vld [vmem:[%s15642_s10 + $0x480] sm:$0xff] }
 0x2ac   :  { %v1201_v30 = vld [vmem:[%s15642_s10 + $0x4a0] sm:$0xff] }
 0x2ae   :  { %10666 = vmatpush3.bf16.msra.mxu0 %v11294_v35  ;;  %v1065_v35 = vld [vmem:[%s15642_s10 + $0x60] sm:$0xff] }
 0x2af   :  { %v9718_v40 = vcombine.high %v1061_v34, %v1065_v35 }
 0x351   :  { %v440_v41 = vpop.f32.mrf.mxu0 }
 0x352   :  { %v441_v48 = vadd.f32 %v440_v41, %v399_v43  ;;  %v1053_v41 = vld [vmem:[%s15642_s10] sm:$0xff] }
 0x353   :  { %v442_v44 = vpop.f32.mrf.mxu0 }
 0x354   :  { %v443_v46 = vadd.f32 %v442_v44, %v403_v42  ;;  %v449_v54 = vmax.f32 %v441_v48, 0.0 }
 0x355   :  { %v444_v45 = vpop.f32.mrf.mxu0 }
 0x356   :  { %v445_v47 = vadd.f32 %v444_v45, %v399_v43  ;;  %v450_v52 = vmax.f32 %v443_v46, 0.0  ;;  %v9717_v43 = vcombine.low %v1061_v34, %v1065_v35  ;;  %v1173_v46 = vld [vmem:[%s15642_s10 + $0x3c0] sm:$0xff]  ;;  %v9853_v34 = vcombine.low %v1197_v29, %v1201_v30 }
 0x357   :  { %v446_v49 = vpop.f32.mrf.mxu0  ;;  %v1117_v35 = vld [vmem:[%s15642_s10 + $0x200] sm:$0xff] }
 0x358   :  { %v447_v50 = vadd.f32 %v446_v49, %v403_v42  ;;  %v451_v51 = vmax.f32 %v445_v47, 0.0  ;;  %v1057_v42 = vld [vmem:[%s15642_s10 + $0x20] sm:$0xff] }
 0x359   :  { %v9710_v44 = vcombine.high %v1053_v41, %v1057_v42  ;;  %v9709_v45 = vcombine.low %v1053_v41, %v1057_v42  ;;  %v1177_v47 = vld [vmem:[%s15642_s10 + $0x3e0] sm:$0xff] }
 0x35a   :  { %v452_v53 = vmax.f32 %v447_v50, 0.0  ;;  %v453_v56 = vpack.c.bf16 %v451_v51, %v449_v54  ;;  %v9830_v48 = vcombine.high %v1173_v46, %v1177_v47  ;;  %v9829_v49 = vcombine.low %v1173_v46, %v1177_v47  ;;  %v1165_v50 = vld [vmem:[%s15642_s10 + $0x380] sm:$0xff]  ;;  %v12583_v46 = vld [vmem:[%s15642_s10 + $0x5c8] sm:$0xff] }
 0x35b   :  { %v1169_v51 = vld [vmem:[%s15642_s10 + $0x3a0] sm:$0xff]  ;;  %v12588_v47 = vld [vmem:[%s15642_s10 + $0x5e8] sm:$0xff] }
 0x35c   :  { %v454_v55 = vpack.c.bf16 %v452_v53, %v450_v52  ;;  %v9822_v52 = vcombine.high %v1165_v50, %v1169_v51  ;;  %v1237_v53 = vld [vmem:[%s15642_s10 + $0x5c0] sm:$0xff] }
 0x35d   :  { %v1241_v54 = vld [vmem:[%s15642_s10 + $0x5e0] sm:$0xff] }
 0x35e   :  { %807 = vmatprep.mubr.bf16.mxu1 %v454_v55  ;;  %850 = vmatprep.mubr.bf16.mxu0 %v454_v55  ;;  %v9821_v55 = vcombine.low %v1165_v50, %v1169_v51  ;;  %v9893_v57 = vcombine.low %v1237_v53, %v1241_v54  ;;  %v1189_v41 = vld [vmem:[%s15642_s10 + $0x440] sm:$0xff]  ;;  %v9895_v51 = vcombine.low %v12583_v46, %v12588_v47 }
 0x35f   :  { %808 = vmatmul.mubr.bf16.vlgmr.msra.gmra.mxu1 %v453_v56  ;;  %851 = vmatmul.mubr.bf16.vlgmr.msra.gmra.mxu0 %v453_v56  ;;  %v9894_v56 = vcombine.high %v1237_v53, %v1241_v54  ;;  %v1193_v42 = vld [vmem:[%s15642_s10 + $0x460] sm:$0xff]  ;;  %v12603_v54 = vld [vmem:[%s15642_s10 + $0x1c8] sm:$0xff] }
 0x360   :  { %911 = vmatprep.mubr.bf16.mxu0 %v12038_v32  ;;  %2342 = vmatprep.mubr.bf16.mxu1 %v12038_v32  ;;  %v1185_v50 = vld [vmem:[%s15642_s10 + $0x420] sm:$0xff] }
 0x361   :  { %2310 = vmatprep.subr.bf16.mxu1 %v9894_v56 }
 0x362   :  { %2311 = vmatpush1.bf16.msra.mxu1 %v9893_v57 }
 0x41f   :  { %v809_v61 = vpop.f32.mrf.mxu1  ;;  %v10667_v62 = vpop.f32.mrf.mxu0 }
 0x421   :  { %v811_v63 = vpop.f32.mrf.mxu1  ;;  %v10668_v1 = vpop.f32.mrf.mxu0 }
 0x422   :  { %v10669_v11 = vadd.f32 %v10668_v1, %v10667_v62  ;;  %v1233_v62 = vld [vmem:[%s15642_s10 + $0x5a0] sm:$0xff] }
 0x423   :  { %v813_v2 = vpop.f32.mrf.mxu1  ;;  %v10670_v3 = vpop.f32.mrf.mxu0 }
 0x424   :  { %v859_v7 = vpack.c.bf16 %v813_v2, %v809_v61  ;;  %v1229_v61 = vld [vmem:[%s15642_s10 + $0x580] sm:$0xff] }
 0x425   :  { %v815_v4 = vpop.f32.mrf.mxu1  ;;  %v10671_v5 = vpop.f32.mrf.mxu0  ;;  %v9886_v1 = vcombine.high %v1229_v61, %v1233_v62  ;;  %v9885_v2 = vcombine.low %v1229_v61, %v1233_v62 }
 0x426   :  { %v860_v6 = vpack.c.bf16 %v815_v4, %v811_v63  ;;  %v10672_v8 = vadd.f32 %v10671_v5, %v10670_v3  ;;  %v9813_v63 = vcombine.low %v1157_v58, %v1161_v59  ;;  %v1149_v3 = vld [vmem:[%s15642_s10 + $0x300] sm:$0xff]  ;;  %v986_v61 = vpop.permute.xlu1 %985 }
 0x427   :  { %2312 = vmatprep.subr.bf16.mxu1 %v9886_v1  ;;  %v1153_v4 = vld [vmem:[%s15642_s10 + $0x320] sm:$0xff] }
 0x428   :  { %893 = vmatprep.subr.bf16.mxu0 %v860_v6  ;;  %v861_v13 = vpack.c.bf16 %v10672_v8, %v10669_v11  ;;  %2313 = vmatpush1.bf16.msra.mxu1 %v9885_v2  ;;  %v9806_v5 = vcombine.high %v1149_v3, %v1153_v4  ;;  %v1221_v6 = vld [vmem:[%s15642_s10 + $0x540] sm:$0xff]  ;;  %v9805_v8 = vcombine.low %v1149_v3, %v1153_v4  ;;  %v12620_v3 = vsub.s32 2, %v12408_v37 }
 0x429   :  { %894 = vmatpush1.bf16.msra.mxu0 %v859_v7  ;;  %v1225_v7 = vld [vmem:[%s15642_s10 + $0x560] sm:$0xff] }
 0x42a   :  { %11185 = vmatprep.subr.bf16.mxu0 %v12036_v0  ;;  %v9878_v9 = vcombine.high %v1221_v6, %v1225_v7  ;;  %v9877_v10 = vcombine.low %v1221_v6, %v1225_v7  ;;  %v1141_v11 = vld [vmem:[%s15642_s10 + $0x2c0] sm:$0xff] }
 0x42b   :  { %v862_v58 = vld [vmem:[%s15643_s9] sm:$0x7] }
 0x42c   :  { %9707 = vmatmul.mubr.msk.bf16.vlgmr.msra.gmra.mxu0 %vm205_vm1, %v12236_v26  ;;  %2314 = vmatprep.subr.bf16.mxu1 %v9878_v9  ;;  %v867_v59 = vrot.slane %v862_v58, %v12414_v39 }
 0x42d   :  { %11186 = vmatpush3.bf16.msra.mxu0 %v861_v13  ;;  %11187 = vmatprep.mubr.msk.bf16.mxu0 %vm12037_vm0, %v12036_v0  ;;  %v9757_v0 = vcombine.low %v1101_v14, %v1105_v15  ;;  %v1213_v14 = vld [vmem:[%s15642_s10 + $0x500] sm:$0xff] }
 0x42e   :  { %2269 = vmatprep.subr.bf16.mxu0 %v9766_v12  ;;  %v1145_v12 = vld [vmem:[%s15642_s10 + $0x2e0] sm:$0xff]  ;;  %2315 = vmatpush1.bf16.msra.mxu1 %v9877_v10 }
 0x42f   :  { %v9798_v13 = vcombine.high %v1141_v11, %v1145_v12  ;;  %v1217_v15 = vld [vmem:[%s15642_s10 + $0x520] sm:$0xff] }
 0x430   :  { %v9869_v18 = vcombine.low %v1213_v14, %v1217_v15 }
 0x434   :  { %11188 = vmatmul.mubr.msk.bf16.vlgmr.msra.gmra.mxu0 %vm205_vm1, %v12236_v26  ;;  %v1077_v26 = vld [vmem:[%s15642_s10 + $0xc0] sm:$0xff] }
 0x435   :  { %2270 = vmatpush1.bf16.msra.mxu0 %v9765_v16  ;;  %v9734_v28 = vcombine.high %v1077_v26, %v1081_v25  ;;  %v9733_v31 = vcombine.low %v1077_v26, %v1081_v25  ;;  %v9797_v16 = vcombine.low %v1141_v11, %v1145_v12  ;;  %v9861_v26 = vcombine.low %v1205_v21, %v1209_v22  ;;  %v1125_v25 = vld [vmem:[%s15642_s10 + $0x240] sm:$0xff] }
 0x436   :  { %2271 = vmatprep.subr.bf16.mxu0 %v9758_v17  ;;  %v9870_v17 = vcombine.high %v1213_v14, %v1217_v15  ;;  %v875_v12 = vrot.slane %v862_v58, %v12620_v3 }
 0x438   :  { %2316 = vmatprep.subr.bf16.mxu1 %v9870_v17 }
 0x439   :  { %2272 = vmatpush1.bf16.msra.mxu0 %v9757_v0  ;;  %v1137_v0 = vld [vmem:[%s15642_s10 + $0x2a0] sm:$0xff]  ;;  %2317 = vmatpush1.bf16.msra.mxu1 %v9869_v18 }
 0x43a   :  { %2273 = vmatprep.subr.bf16.mxu0 %v9750_v20  ;;  %v9790_v20 = vcombine.high %v1133_v19, %v1137_v0 }
 0x43d   :  { %2274 = vmatpush1.bf16.msra.mxu0 %v9749_v23  ;;  %v9789_v23 = vcombine.low %v1133_v19, %v1137_v0 }
 0x43e   :  { %2275 = vmatprep.subr.bf16.mxu0 %v9742_v24  ;;  %v9862_v24 = vcombine.high %v1205_v21, %v1209_v22 }
 0x440   :  { %2318 = vmatprep.subr.bf16.mxu1 %v9862_v24 }
 0x441   :  { %2276 = vmatpush1.bf16.msra.mxu0 %v9741_v27  ;;  %v1129_v27 = vld [vmem:[%s15642_s10 + $0x260] sm:$0xff]  ;;  %2319 = vmatpush1.bf16.msra.mxu1 %v9861_v26 }
 0x442   :  { %2277 = vmatprep.subr.bf16.mxu0 %v9734_v28  ;;  %v9782_v28 = vcombine.high %v1125_v25, %v1129_v27 }
 0x445   :  { %2278 = vmatpush1.bf16.msra.mxu0 %v9733_v31  ;;  %v9781_v31 = vcombine.low %v1125_v25, %v1129_v27 }
 0x446   :  { %2279 = vmatprep.subr.bf16.mxu0 %v9726_v33  ;;  %v9854_v33 = vcombine.high %v1197_v29, %v1201_v30 }
 0x448   :  { %2320 = vmatprep.subr.bf16.mxu1 %v9854_v33 }
 0x449   :  { %2280 = vmatpush1.bf16.msra.mxu0 %v9725_v36  ;;  %v1121_v36 = vld [vmem:[%s15642_s10 + $0x220] sm:$0xff]  ;;  %2321 = vmatpush1.bf16.msra.mxu1 %v9853_v34 }
 0x44a   :  { %2281 = vmatprep.subr.bf16.mxu0 %v9718_v40  ;;  %v9774_v40 = vcombine.high %v1117_v35, %v1121_v36 }
 0x44d   :  { %2282 = vmatpush1.bf16.msra.mxu0 %v9717_v43  ;;  %v9773_v43 = vcombine.low %v1117_v35, %v1121_v36 }
 0x44e   :  { %2283 = vmatprep.subr.bf16.mxu0 %v9710_v44  ;;  %v9846_v44 = vcombine.high %v1189_v41, %v1193_v42 }
 0x450   :  { %2322 = vmatprep.subr.bf16.mxu1 %v9846_v44 }
 0x451   :  { %2284 = vmatpush1.bf16.msra.mxu0 %v9709_v45  ;;  %v9845_v45 = vcombine.low %v1189_v41, %v1193_v42 }
 0x452   :  { %2285 = vmatprep.subr.bf16.mxu0 %v9830_v48  ;;  %v9896_v48 = vcombine.high %v12583_v46, %v12588_v47  ;;  %v1214_v46 = vld [vmem:[%s15642_s10 + $0x508] sm:$0xff] }
 0x453   :  { %2323 = vmatpush1.bf16.msra.mxu1 %v9845_v45  ;;  %v1218_v47 = vld [vmem:[%s15642_s10 + $0x528] sm:$0xff] }
 0x455   :  { %2286 = vmatpush2.bf16.msra.mxu0 %v9829_v49  ;;  %v1181_v49 = vld [vmem:[%s15642_s10 + $0x400] sm:$0xff] }
 0x456   :  { %2287 = vmatprep.subr.bf16.mxu0 %v9822_v52  ;;  %v9838_v52 = vcombine.high %v1181_v49, %v1185_v50  ;;  %v9837_v53 = vcombine.low %v1181_v49, %v1185_v50 }
 0x458   :  { %2324 = vmatprep.subr.bf16.mxu1 %v9838_v52 }
 0x459   :  { %2288 = vmatpush2.bf16.msra.mxu0 %v9821_v55  ;;  %2325 = vmatpush1.bf16.msra.mxu1 %v9837_v53  ;;  %v12608_v55 = vld [vmem:[%s15642_s10 + $0x1e8] sm:$0xff] }
 0x45a   :  { %2289 = vmatprep.subr.bf16.mxu0 %v9814_v60  ;;  %v9767_v56 = vcombine.low %v12603_v54, %v12608_v55  ;;  %v9768_v57 = vcombine.high %v12603_v54, %v12608_v55  ;;  %v871_v60 = vrot.slane %v862_v58, %v12411_v38  ;;  %v1086_v54 = vld [vmem:[%s15642_s10 + $0x108] sm:$0xff] }
 0x45b   :  { %v1090_v55 = vld [vmem:[%s15642_s10 + $0x128] sm:$0xff] }
 0x45c   :  { %2351 = vmatprep.subr.bf16.mxu1 %v9768_v57 }
 0x45d   :  { %2290 = vmatpush2.bf16.msra.mxu0 %v9813_v63  ;;  %v976_v63 = vpop.permute.xlu0 %975 }
 0x45e   :  { %2291 = vmatprep.subr.bf16.mxu0 %v9806_v5 }
 0x461   :  { %2292 = vmatpush2.bf16.msra.mxu0 %v9805_v8  ;;  %v991_v8 = vpop.permute.xlu1 %990  ;;  %v981_v11 = vpop.permute.xlu0 %980 }
 0x462   :  { %2293 = vmatprep.subr.bf16.mxu0 %v9798_v13 }
 0x465   :  { %2294 = vmatpush2.bf16.msra.mxu0 %v9797_v16 }
 0x466   :  { %2295 = vmatprep.subr.bf16.mxu0 %v9790_v20 }
 0x469   :  { %2296 = vmatpush2.bf16.msra.mxu0 %v9789_v23 }
 0x46a   :  { %2297 = vmatprep.subr.bf16.mxu0 %v9782_v28 }
 0x46d   :  { %2298 = vmatpush2.bf16.msra.mxu0 %v9781_v31 }
 0x46e   :  { %2299 = vmatprep.subr.bf16.mxu0 %v9774_v40 }
 0x471   :  { %2300 = vmatpush2.bf16.msra.mxu0 %v9773_v43 }
 0x472   :  { %2392 = vmatprep.subr.bf16.mxu0 %v9896_v48 }
 0x4ec   :  { %v913_v62 = vpop.f32.mrf.mxu0 }
 0x4ed   :  { %v914_v1 = vadd.f32 %v913_v62, %v867_v59 }
 0x4ee   :  { %v915_v2 = vpop.f32.mrf.mxu0 }
 0x4ef   :  { %v916_v4 = vadd.f32 %v915_v2, %v871_v60  ;;  %v963_v5 = vmax.f32 %v914_v1, 0.0 }
 0x4f0   :  { %v917_v6 = vpop.f32.mrf.mxu0 }
 0x4f1   :  { %v918_v7 = vadd.f32 %v917_v6, %v867_v59  ;;  %v964_v9 = vmax.f32 %v916_v4, 0.0  ;;  %v999_v15 = vadd.f32 %v986_v61, %v963_v5  ;;  %v993_v17 = vadd.f32 %v976_v63, %v963_v5 }
 0x4f2   :  { %v919_v10 = vpop.f32.mrf.mxu0 }
 0x4f3   :  { %v966_v13 = vmax.f32 %v918_v7, 0.0  ;;  %v920_v14 = vadd.f32 %v919_v10, %v871_v60  ;;  %v1000_v20 = vadd.f32 %v986_v61, %v964_v9  ;;  %v994_v21 = vadd.f32 %v976_v63, %v964_v9 }
 0x4f4   :  { %v956_v16 = vpop.f32.mrf.mxu0 }
 0x4f5   :  { %v967_v18 = vmax.f32 %v920_v14, 0.0  ;;  %v1002_v19 = vadd.f32 %v991_v8, %v966_v13  ;;  %v996_v0 = vadd.f32 %v981_v11, %v966_v13  ;;  %v957_v22 = vadd.f32 %v956_v16, %v875_v12 }
 0x4f6   :  { %v11189_v23 = vpop.f32.mrf.mxu0 }
 0x4f7   :  { %v1003_v24 = vadd.f32 %v991_v8, %v967_v18  ;;  %v1026_v26 = vmax.f32 %v999_v15, %v1002_v19  ;;  %v997_v25 = vadd.f32 %v981_v11, %v967_v18  ;;  %v1005_v27 = vmax.f32 %v993_v17, %v996_v0 }
 0x4f8   :  { %v959_v28 = vpop.f32.mrf.mxu0  ;;  %v965_v34 = vmax.f32 %v957_v22, 0.0 }
 0x4f9   :  { %v1027_v29 = vrot.slane %v1026_v26, 4  ;;  %v1033_v30 = vmax.f32 %v1000_v20, %v1003_v24  ;;  %v1006_v31 = vrot.slane %v1005_v27, 4  ;;  %v1012_v33 = vmax.f32 %v994_v21, %v997_v25 }
 0x4fa   :  { %v960_v35 = vadd.f32 %v959_v28, %v875_v12  ;;  %v11190_v36 = vpop.f32.mrf.mxu0  ;;  %v995_v52 = vadd.f32 %v976_v63, %v965_v34  ;;  %v1001_v53 = vadd.f32 %v986_v61, %v965_v34 }
 0x4fb   :  { %v1028_v40 = vmax.f32 %v1026_v26, %v1027_v29  ;;  %v1034_v41 = vrot.slane %v1033_v30, 4  ;;  %v1007_v42 = vmax.f32 %v1005_v27, %v1006_v31  ;;  %v1013_v43 = vrot.slane %v1012_v33, 4  ;;  %v1230_v31 = vld [vmem:[%s15642_s10 + $0x588] sm:$0xff] }
 0x4fc   :  { %v968_v44 = vmax.f32 %v960_v35, 0.0 }
 0x4fd   :  { %v1029_v45 = vrot.slane %v1028_v40, 2  ;;  %v1035_v48 = vmax.f32 %v1033_v30, %v1034_v41  ;;  %v1008_v49 = vrot.slane %v1007_v42, 2  ;;  %v1014_v50 = vmax.f32 %v1012_v33, %v1013_v43  ;;  %v1234_v33 = vld [vmem:[%s15642_s10 + $0x5a8] sm:$0xff] }
 0x4fe   :  { %v998_v57 = vadd.f32 %v981_v11, %v968_v44  ;;  %v1004_v58 = vadd.f32 %v991_v8, %v968_v44 }
 0x4ff   :  { %v1030_v59 = vmax.f32 %v1028_v40, %v1029_v45  ;;  %v1036_v60 = vrot.slane %v1035_v48, 2  ;;  %v1009_v62 = vmax.f32 %v1007_v42, %v1008_v49  ;;  %v1015_v1 = vrot.slane %v1014_v50, 2  ;;  %v1222_v45 = vld [vmem:[%s15642_s10 + $0x548] sm:$0xff] }
 0x500   :  { %v1019_v2 = vmax.f32 %v995_v52, %v998_v57  ;;  %v1040_v4 = vmax.f32 %v1001_v53, %v1004_v58  ;;  %v9888_v42 = vcombine.high %v1230_v31, %v1234_v33  ;;  %v9887_v52 = vcombine.low %v1230_v31, %v1234_v33  ;;  %v1102_v53 = vld [vmem:[%s15642_s10 + $0x188] sm:$0xff]  ;;  %v1111_v33 = vld [vmem:[%s15642_s10 + $0x1d0] sm:$0xff] }
 0x501   :  { %v1031_v5 = vrot.slane %v1030_v59, 1  ;;  %v1037_v6 = vmax.f32 %v1035_v48, %v1036_v60  ;;  %v1010_v7 = vrot.slane %v1009_v62, 1  ;;  %v1016_v9 = vmax.f32 %v1014_v50, %v1015_v1  ;;  %v1226_v48 = vld [vmem:[%s15642_s10 + $0x568] sm:$0xff] }
 0x502   :  { %v1020_v10 = vrot.slane %v1019_v2, 4  ;;  %v1041_v12 = vrot.slane %v1040_v4, 4  ;;  %v1106_v57 = vld [vmem:[%s15642_s10 + $0x1a8] sm:$0xff]  ;;  %v9880_v58 = vcombine.high %v1222_v45, %v1226_v48 }
 0x503   :  { %v1032_v13 = vmax.f32 %v1030_v59, %v1031_v5  ;;  %v1038_v14 = vrot.slane %v1037_v6, 1  ;;  %v1011_v15 = vmax.f32 %v1009_v62, %v1010_v7  ;;  %v1017_v16 = vrot.slane %v1016_v9, 1  ;;  %v1094_v1 = vld [vmem:[%s15642_s10 + $0x148] sm:$0xff] }
 0x504   :  { %v1021_v63 = vmax.f32 %v1019_v2, %v1020_v10  ;;  %v1042_v61 = vmax.f32 %v1040_v4, %v1041_v12  ;;  %v9760_v60 = vcombine.high %v1102_v53, %v1106_v57  ;;  %v9879_v62 = vcombine.low %v1222_v45, %v1226_v48  ;;  %v1098_v2 = vld [vmem:[%s15642_s10 + $0x168] sm:$0xff]  ;;  %v1103_v48 = vld [vmem:[%s15642_s10 + $0x190] sm:$0xff] }
 0x505   :  { %v1039_v11 = vmax.f32 %v1037_v6, %v1038_v14  ;;  %v1050_v8 = vpack.c.bf16 %v1032_v13, %v1032_v13  ;;  %v1018_v17 = vmax.f32 %v1016_v9, %v1017_v16  ;;  %v1047_v18 = vpack.c.bf16 %v1011_v15, %v1011_v15  ;;  %v1206_v6 = vld [vmem:[%s15642_s10 + $0x4c8] sm:$0xff] }
 0x506   :  { %v1022_v19 = vrot.slane %v1021_v63, 2  ;;  %v1043_v0 = vrot.slane %v1042_v61, 2  ;;  %v9872_v4 = vcombine.high %v1214_v46, %v1218_v47  ;;  %v9759_v5 = vcombine.low %v1102_v53, %v1106_v57  ;;  %v1210_v7 = vld [vmem:[%s15642_s10 + $0x4e8] sm:$0xff] }
 0x507   :  { %v1051_v20 = vpack.c.bf16 %v1039_v11, %v1039_v11  ;;  %v1296_v21 = vunpack.c.l.b16 %v1050_v8  ;;  %v1048_v22 = vpack.c.bf16 %v1018_v17, %v1018_v17  ;;  %v1293_v23 = vunpack.c.l.b16 %v1047_v18  ;;  %v1198_v13 = vld [vmem:[%s15642_s10 + $0x488] sm:$0xff] }
 0x508   :  { %v1023_v24 = vmax.f32 %v1021_v63, %v1022_v19  ;;  %v1044_v26 = vmax.f32 %v1042_v61, %v1043_v0  ;;  %v9752_v9 = vcombine.high %v1094_v1, %v1098_v2  ;;  %v9871_v10 = vcombine.low %v1214_v46, %v1218_v47  ;;  %v1202_v14 = vld [vmem:[%s15642_s10 + $0x4a8] sm:$0xff]  ;;  %v1095_v46 = vld [vmem:[%s15642_s10 + $0x150] sm:$0xff] }
 0x509   :  { %v1297_v25 = vunpack.c.l.b16 %v1051_v20  ;;  %v1294_v27 = vunpack.c.l.b16 %v1048_v22  ;;  %v1300_v30 = vsel %vm1299_vm2, %v1296_v21, %v1293_v23  ;;  %v9751_v12 = vcombine.low %v1094_v1, %v1098_v2  ;;  %v1078_v63 = vld [vmem:[%s15642_s10 + $0xc8] sm:$0xff]  ;;  %v1099_v47 = vld [vmem:[%s15642_s10 + $0x170] sm:$0xff] }
 0x50a   :  { %v1024_v28 = vrot.slane %v1023_v24, 1  ;;  %v1045_v29 = vrot.slane %v1044_v26, 1  ;;  %v12633_v41 = vpack.c.b16 %v1300_v30, %v1300_v30  ;;  %v9744_v15 = vcombine.high %v1086_v54, %v1090_v55  ;;  %v1082_v61 = vld [vmem:[%s15642_s10 + $0xe8] sm:$0xff] }
 0x50b   :  { %v1301_v34 = vsel %vm1299_vm2, %v1297_v25, %v1294_v27  ;;  %v9863_v16 = vcombine.low %v1206_v6, %v1210_v7  ;;  %v9856_v11 = vcombine.high %v1198_v13, %v1202_v14  ;;  %v9743_v8 = vcombine.low %v1086_v54, %v1090_v55  ;;  %v1190_v17 = vld [vmem:[%s15642_s10 + $0x448] sm:$0xff] }
 0x50c   :  { %v1025_v35 = vmax.f32 %v1023_v24, %v1024_v28  ;;  %v1046_v36 = vmax.f32 %v1044_v26, %v1045_v29  ;;  %v12631_v40 = vpack.c.b16 %v1301_v34, %v1301_v34  ;;  %v1194_v18 = vld [vmem:[%s15642_s10 + $0x468] sm:$0xff]  ;;  %v9736_v19 = vcombine.high %v1078_v63, %v1082_v61  ;;  %v1115_v34 = vld [vmem:[%s15642_s10 + $0x1f0] sm:$0xff] }
 0x50d   :  { %v9855_v0 = vcombine.low %v1198_v13, %v1202_v14  ;;  %v1070_v20 = vld [vmem:[%s15642_s10 + $0x88] sm:$0xff]  ;;  %v9848_v22 = vcombine.high %v1190_v17, %v1194_v18  ;;  %v9735_v23 = vcombine.low %v1078_v63, %v1082_v61  ;;  %v9847_v27 = vcombine.low %v1190_v17, %v1194_v18  ;;  %v1083_v13 = vld [vmem:[%s15642_s10 + $0xf0] sm:$0xff] }
 0x50e   :  { %v1049_v43 = vpack.c.bf16 %v1025_v35, %v1025_v35  ;;  %v1052_v44 = vpack.c.bf16 %v1046_v36, %v1046_v36  ;;  %2301 = vmatprep.mubr.bf16.mxu0 %v12631_v40  ;;  %v1074_v21 = vld [vmem:[%s15642_s10 + $0xa8] sm:$0xff]  ;;  %v1075_v17 = vld [vmem:[%s15642_s10 + $0xb0] sm:$0xff] }
 0x50f   :  { %2302 = vmatmul.mubr.bf16.vlgmr.msra.gmra.mxu0 %v12633_v41  ;;  %v1182_v24 = vld [vmem:[%s15642_s10 + $0x408] sm:$0xff]  ;;  %v9728_v25 = vcombine.high %v1070_v20, %v1074_v21  ;;  %v9727_v31 = vcombine.low %v1070_v20, %v1074_v21 }
 0x510   :  { %v1295_v49 = vunpack.c.l.b16 %v1049_v43  ;;  %v1298_v50 = vunpack.c.l.b16 %v1052_v44  ;;  %2393 = vmatpush1.bf16.msra.mxu0 %v9895_v51  ;;  %2424 = vmatprep.mubr.bf16.mxu0 %v12038_v32  ;;  %v1186_v26 = vld [vmem:[%s15642_s10 + $0x428] sm:$0xff]  ;;  %v9770_v44 = vcombine.high %v1111_v33, %v1115_v34 }
 0x511   :  { %2394 = vmatprep.subr.bf16.mxu0 %v9888_v42  ;;  %v1062_v28 = vld [vmem:[%s15642_s10 + $0x48] sm:$0xff]  ;;  %v9840_v30 = vcombine.high %v1182_v24, %v1186_v26  ;;  %v9839_v36 = vcombine.low %v1182_v24, %v1186_v26  ;;  %v1067_v24 = vld [vmem:[%s15642_s10 + $0x70] sm:$0xff] }
 0x512   :  { %v1302_v59 = vsel %vm1299_vm2, %v1298_v50, %v1295_v49  ;;  %v1066_v29 = vld [vmem:[%s15642_s10 + $0x68] sm:$0xff]  ;;  %v1107_v49 = vld [vmem:[%s15642_s10 + $0x1b0] sm:$0xff] }
 0x513   :  { %v12660_v51 = vpack.c.b16 %v1302_v59, %v1302_v59  ;;  %v9720_v35 = vcombine.high %v1062_v28, %v1066_v29  ;;  %v1054_v42 = vld [vmem:[%s15642_s10 + $0x8] sm:$0xff]  ;;  %v9719_v45 = vcombine.low %v1062_v28, %v1066_v29 }
 0x514   :  { %2395 = vmatpush1.bf16.msra.mxu0 %v9887_v52  ;;  %v1058_v43 = vld [vmem:[%s15642_s10 + $0x28] sm:$0xff]  ;;  %v9769_v52 = vcombine.low %v1111_v33, %v1115_v34 }
 0x515   :  { %2343 = vmatmul.mubr.bf16.vlgmr.msra.gmra.mxu1 %v12660_v51  ;;  %2396 = vmatprep.subr.bf16.mxu0 %v9880_v58  ;;  %v9712_v50 = vcombine.high %v1054_v42, %v1058_v43  ;;  %v1174_v53 = vld [vmem:[%s15642_s10 + $0x3c8] sm:$0xff]  ;;  %v9762_v58 = vcombine.high %v1103_v48, %v1107_v49  ;;  %v9711_v59 = vcombine.low %v1054_v42, %v1058_v43 }
 0x516   :  { %2352 = vmatpush1.bf16.msra.mxu1 %v9767_v56  ;;  %2383 = vmatprep.mubr.bf16.mxu1 %v12631_v40  ;;  %v9864_v56 = vcombine.high %v1206_v6, %v1210_v7  ;;  %v1178_v57 = vld [vmem:[%s15642_s10 + $0x3e8] sm:$0xff]  ;;  %v1087_v6 = vld [vmem:[%s15642_s10 + $0x110] sm:$0xff] }
 0x517   :  { %2353 = vmatprep.subr.bf16.mxu1 %v9760_v60  ;;  %v9832_v60 = vcombine.high %v1174_v53, %v1178_v57  ;;  %v1166_v1 = vld [vmem:[%s15642_s10 + $0x388] sm:$0xff]  ;;  %v1091_v7 = vld [vmem:[%s15642_s10 + $0x130] sm:$0xff] }
 0x518   :  { %2397 = vmatpush1.bf16.msra.mxu0 %v9879_v62  ;;  %v9761_v62 = vcombine.low %v1103_v48, %v1107_v49  ;;  %v1170_v2 = vld [vmem:[%s15642_s10 + $0x3a8] sm:$0xff]  ;;  %v9745_v61 = vcombine.low %v1087_v6, %v1091_v7 }
 0x519   :  { %2398 = vmatprep.subr.bf16.mxu0 %v9872_v4  ;;  %v9754_v4 = vcombine.high %v1095_v46, %v1099_v47  ;;  %v1158_v54 = vld [vmem:[%s15642_s10 + $0x348] sm:$0xff]  ;;  %v9823_v14 = vcombine.low %v1166_v1, %v1170_v2 }
 0x51a   :  { %2354 = vmatpush1.bf16.msra.mxu1 %v9759_v5  ;;  %v9831_v5 = vcombine.low %v1174_v53, %v1178_v57  ;;  %v1162_v55 = vld [vmem:[%s15642_s10 + $0x368] sm:$0xff] }
 0x51b   :  { %2355 = vmatprep.subr.bf16.mxu1 %v9752_v9  ;;  %v9824_v9 = vcombine.high %v1166_v1, %v1170_v2  ;;  %v1154_v63 = vld [vmem:[%s15642_s10 + $0x328] sm:$0xff]  ;;  %v9815_v18 = vcombine.low %v1158_v54, %v1162_v55 }
 0x51c   :  { %2399 = vmatpush1.bf16.msra.mxu0 %v9871_v10  ;;  %v9753_v10 = vcombine.low %v1095_v46, %v1099_v47  ;;  %v1146_v20 = vld [vmem:[%s15642_s10 + $0x2e8] sm:$0xff] }
 0x51d   :  { %2400 = vmatprep.subr.bf16.mxu0 %v9864_v56  ;;  %v9746_v56 = vcombine.high %v1087_v6, %v1091_v7  ;;  %v1138_v28 = vld [vmem:[%s15642_s10 + $0x2a8] sm:$0xff] }
 0x51e   :  { %2356 = vmatpush1.bf16.msra.mxu1 %v9751_v12  ;;  %v1079_v12 = vld [vmem:[%s15642_s10 + $0xd0] sm:$0xff] }
 0x51f   :  { %2357 = vmatprep.subr.bf16.mxu1 %v9744_v15  ;;  %v1150_v15 = vld [vmem:[%s15642_s10 + $0x308] sm:$0xff]  ;;  %v9737_v21 = vcombine.low %v1079_v12, %v1083_v13 }
 0x520   :  { %2401 = vmatpush1.bf16.msra.mxu0 %v9863_v16  ;;  %v9816_v16 = vcombine.high %v1158_v54, %v1162_v55  ;;  %v9807_v26 = vcombine.low %v1150_v15, %v1154_v63  ;;  %v1235_v54 = vld [vmem:[%s15642_s10 + $0x5b0] sm:$0xff] }
 0x521   :  { %2402 = vmatprep.subr.bf16.mxu0 %v9856_v11  ;;  %v1071_v11 = vld [vmem:[%s15642_s10 + $0x90] sm:$0xff] }
 0x522   :  { %2358 = vmatpush1.bf16.msra.mxu1 %v9743_v8  ;;  %v9738_v8 = vcombine.high %v1079_v12, %v1083_v13  ;;  %v9729_v29 = vcombine.low %v1071_v11, %v1075_v17  ;;  %v1155_v12 = vld [vmem:[%s15642_s10 + $0x330] sm:$0xff] }
 0x523   :  { %2359 = vmatprep.subr.bf16.mxu1 %v9736_v19  ;;  %v1142_v19 = vld [vmem:[%s15642_s10 + $0x2c8] sm:$0xff] }
 0x524   :  { %2403 = vmatpush1.bf16.msra.mxu0 %v9855_v0  ;;  %v9808_v0 = vcombine.high %v1150_v15, %v1154_v63  ;;  %v9799_v34 = vcombine.low %v1142_v19, %v1146_v20  ;;  %v1223_v15 = vld [vmem:[%s15642_s10 + $0x550] sm:$0xff] }
 0x525   :  { %2404 = vmatprep.subr.bf16.mxu0 %v9848_v22  ;;  %v1063_v22 = vld [vmem:[%s15642_s10 + $0x50] sm:$0xff] }
 0x526   :  { %2360 = vmatpush1.bf16.msra.mxu1 %v9735_v23  ;;  %v9730_v23 = vcombine.high %v1071_v11, %v1075_v17  ;;  %v9722_v33 = vcombine.high %v1063_v22, %v1067_v24  ;;  %v9721_v43 = vcombine.low %v1063_v22, %v1067_v24  ;;  %v1227_v63 = vld [vmem:[%s15642_s10 + $0x570] sm:$0xff] }
 0x527   :  { %2361 = vmatprep.subr.bf16.mxu1 %v9728_v25  ;;  %v1134_v25 = vld [vmem:[%s15642_s10 + $0x288] sm:$0xff]  ;;  %v1143_v11 = vld [vmem:[%s15642_s10 + $0x2d0] sm:$0xff] }
 0x528   :  { %2405 = vmatpush1.bf16.msra.mxu0 %v9847_v27  ;;  %v9800_v27 = vcombine.high %v1142_v19, %v1146_v20  ;;  %v9792_v42 = vcombine.high %v1134_v25, %v1138_v28  ;;  %v9791_v49 = vcombine.low %v1134_v25, %v1138_v28  ;;  %v1215_v19 = vld [vmem:[%s15642_s10 + $0x510] sm:$0xff] }
 0x529   :  { %2406 = vmatprep.subr.bf16.mxu0 %v9840_v30  ;;  %v1055_v30 = vld [vmem:[%s15642_s10 + $0x10] sm:$0xff] }
 0x52a   :  { %2362 = vmatpush1.bf16.msra.mxu1 %v9727_v31  ;;  %v1059_v31 = vld [vmem:[%s15642_s10 + $0x30] sm:$0xff] }
 0x52b   :  { %2363 = vmatprep.subr.bf16.mxu1 %v9720_v35  ;;  %v1126_v35 = vld [vmem:[%s15642_s10 + $0x248] sm:$0xff]  ;;  %v9714_v48 = vcombine.high %v1055_v30, %v1059_v31  ;;  %v9713_v57 = vcombine.low %v1055_v30, %v1059_v31  ;;  %v1219_v20 = vld [vmem:[%s15642_s10 + $0x530] sm:$0xff] }
 0x52c   :  { %2407 = vmatpush1.bf16.msra.mxu0 %v9839_v36  ;;  %v1130_v36 = vld [vmem:[%s15642_s10 + $0x268] sm:$0xff]  ;;  %v1135_v22 = vld [vmem:[%s15642_s10 + $0x290] sm:$0xff] }
 0x52d   :  { %2433 = vmatprep.subr.bf16.mxu0 %v9770_v44  ;;  %v1175_v44 = vld [vmem:[%s15642_s10 + $0x3d0] sm:$0xff]  ;;  %v9784_v53 = vcombine.high %v1126_v35, %v1130_v36  ;;  %v9783_v47 = vcombine.low %v1126_v35, %v1130_v36 }
 0x52e   :  { %2364 = vmatpush1.bf16.msra.mxu1 %v9719_v45  ;;  %v1179_v45 = vld [vmem:[%s15642_s10 + $0x3f0] sm:$0xff] }
 0x52f   :  { %2425 = vmatmul.mubr.bf16.vlgmr.msra.gmra.mxu0 %v12660_v51  ;;  %2365 = vmatprep.subr.bf16.mxu1 %v9712_v50  ;;  %v1118_v50 = vld [vmem:[%s15642_s10 + $0x208] sm:$0xff]  ;;  %v9834_v46 = vcombine.high %v1175_v44, %v1179_v45  ;;  %v9833_v2 = vcombine.low %v1175_v44, %v1179_v45  ;;  %v1207_v25 = vld [vmem:[%s15642_s10 + $0x4d0] sm:$0xff] }
 0x530   :  { %2434 = vmatpush1.bf16.msra.mxu0 %v9769_v52  ;;  %2465 = vmatprep.mubr.bf16.mxu0 %v12631_v40  ;;  %v1122_v52 = vld [vmem:[%s15642_s10 + $0x228] sm:$0xff]  ;;  %v1211_v28 = vld [vmem:[%s15642_s10 + $0x4f0] sm:$0xff] }
 0x531   :  { %2435 = vmatprep.subr.bf16.mxu0 %v9762_v58  ;;  %v1167_v58 = vld [vmem:[%s15642_s10 + $0x390] sm:$0xff]  ;;  %v9776_v1 = vcombine.high %v1118_v50, %v1122_v52  ;;  %v9775_v7 = vcombine.low %v1118_v50, %v1122_v52 }
 0x532   :  { %2366 = vmatpush1.bf16.msra.mxu1 %v9711_v59  ;;  %v1171_v59 = vld [vmem:[%s15642_s10 + $0x3b0] sm:$0xff] }
 0x533   :  { %2367 = vmatprep.subr.bf16.mxu1 %v9832_v60  ;;  %v1239_v60 = vld [vmem:[%s15642_s10 + $0x5d0] sm:$0xff]  ;;  %v9826_v6 = vcombine.high %v1167_v58, %v1171_v59  ;;  %v9825_v55 = vcombine.low %v1167_v58, %v1171_v59 }
 0x534   :  { %2436 = vmatpush1.bf16.msra.mxu0 %v9761_v62  ;;  %v1243_v62 = vld [vmem:[%s15642_s10 + $0x5f0] sm:$0xff] }
 0x535   :  { %2437 = vmatprep.subr.bf16.mxu0 %v9754_v4  ;;  %v1159_v4 = vld [vmem:[%s15642_s10 + $0x350] sm:$0xff] }
 0x536   :  { %2368 = vmatpush2.bf16.msra.mxu1 %v9831_v5  ;;  %v1163_v5 = vld [vmem:[%s15642_s10 + $0x370] sm:$0xff] }
 0x537   :  { %2369 = vmatprep.subr.bf16.mxu1 %v9824_v9  ;;  %v1231_v9 = vld [vmem:[%s15642_s10 + $0x590] sm:$0xff]  ;;  %v9818_v13 = vcombine.high %v1159_v4, %v1163_v5 }
 0x538   :  { %2438 = vmatpush1.bf16.msra.mxu0 %v9753_v10  ;;  %v9898_v10 = vcombine.high %v1239_v60, %v1243_v62  ;;  %v1127_v30 = vld [vmem:[%s15642_s10 + $0x250] sm:$0xff] }
 0x539   :  { %2439 = vmatprep.subr.bf16.mxu0 %v9746_v56  ;;  %v1151_v56 = vld [vmem:[%s15642_s10 + $0x310] sm:$0xff] }
 0x53a   :  { %2370 = vmatpush2.bf16.msra.mxu1 %v9823_v14  ;;  %v9897_v14 = vcombine.low %v1239_v60, %v1243_v62  ;;  %v9810_v17 = vcombine.high %v1151_v56, %v1155_v12  ;;  %v1131_v31 = vld [vmem:[%s15642_s10 + $0x270] sm:$0xff] }
 0x53b   :  { %2371 = vmatprep.subr.bf16.mxu1 %v9816_v16  ;;  %v9890_v16 = vcombine.high %v1231_v9, %v1235_v54  ;;  %v1199_v35 = vld [vmem:[%s15642_s10 + $0x490] sm:$0xff] }
 0x53c   :  { %2440 = vmatpush1.bf16.msra.mxu0 %v9745_v61  ;;  %v9817_v61 = vcombine.low %v1159_v4, %v1163_v5  ;;  %v1203_v36 = vld [vmem:[%s15642_s10 + $0x4b0] sm:$0xff] }
 0x53d   :  { %2441 = vmatprep.subr.bf16.mxu0 %v9738_v8  ;;  %v1147_v8 = vld [vmem:[%s15642_s10 + $0x2f0] sm:$0xff]  ;;  %v9857_v59 = vcombine.low %v1199_v35, %v1203_v36 }
 0x53e   :  { %2372 = vmatpush2.bf16.msra.mxu1 %v9815_v18  ;;  %v9889_v18 = vcombine.low %v1231_v9, %v1235_v54  ;;  %v9802_v24 = vcombine.high %v1143_v11, %v1147_v8  ;;  %v1119_v44 = vld [vmem:[%s15642_s10 + $0x210] sm:$0xff]  ;;  %v1112_v54 = vld [vmem:[%s15642_s10 + $0x1d8] sm:$0xff] }
 0x53f   :  { %2373 = vmatprep.subr.bf16.mxu1 %v9808_v0  ;;  %v9882_v0 = vcombine.high %v1223_v15, %v1227_v63  ;;  %v1123_v45 = vld [vmem:[%s15642_s10 + $0x230] sm:$0xff] }
 0x540   :  { %2442 = vmatpush1.bf16.msra.mxu0 %v9737_v21  ;;  %v9809_v21 = vcombine.low %v1151_v56, %v1155_v12  ;;  %v1191_v50 = vld [vmem:[%s15642_s10 + $0x450] sm:$0xff]  ;;  %v9778_v58 = vcombine.high %v1119_v44, %v1123_v45  ;;  %v9777_v62 = vcombine.low %v1119_v44, %v1123_v45  ;;  %v1192_v45 = vld [vmem:[%s15642_s10 + $0x458] sm:$0xff] }
 0x541   :  { %2443 = vmatprep.subr.bf16.mxu0 %v9730_v23  ;;  %v1139_v23 = vld [vmem:[%s15642_s10 + $0x2b0] sm:$0xff] }
 0x542   :  { %2374 = vmatpush2.bf16.msra.mxu1 %v9807_v26  ;;  %v9881_v26 = vcombine.low %v1223_v15, %v1227_v63  ;;  %v1195_v52 = vld [vmem:[%s15642_s10 + $0x470] sm:$0xff]  ;;  %v1104_v63 = vld [vmem:[%s15642_s10 + $0x198] sm:$0xff] }
 0x543   :  { %2375 = vmatprep.subr.bf16.mxu1 %v9800_v27  ;;  %v9874_v27 = vcombine.high %v1215_v19, %v1219_v20  ;;  %v9850_v60 = vcombine.high %v1191_v50, %v1195_v52  ;;  %v9849_v5 = vcombine.low %v1191_v50, %v1195_v52  ;;  %v1072_v52 = vld [vmem:[%s15642_s10 + $0x98] sm:$0xff] }
 0x544   :  { %2444 = vmatpush1.bf16.msra.mxu0 %v9729_v29  ;;  %v9801_v29 = vcombine.low %v1143_v11, %v1147_v8 }
 0x545   :  { %2445 = vmatprep.subr.bf16.mxu0 %v9722_v33  ;;  %v9794_v33 = vcombine.high %v1135_v22, %v1139_v23 }
 0x546   :  { %2376 = vmatpush2.bf16.msra.mxu1 %v9799_v34  ;;  %v9873_v34 = vcombine.low %v1215_v19, %v1219_v20  ;;  %v1096_v20 = vld [vmem:[%s15642_s10 + $0x158] sm:$0xff] }
 0x547   :  { %2377 = vmatprep.subr.bf16.mxu1 %v9792_v42  ;;  %v9866_v42 = vcombine.high %v1207_v25, %v1211_v28 }
 0x548   :  { %2446 = vmatpush1.bf16.msra.mxu0 %v9721_v43  ;;  %v9793_v43 = vcombine.low %v1135_v22, %v1139_v23 }
 0x549   :  { %2447 = vmatprep.subr.bf16.mxu0 %v9714_v48  ;;  %v9786_v48 = vcombine.high %v1127_v30, %v1131_v31 }
 0x54a   :  { %2378 = vmatpush2.bf16.msra.mxu1 %v9791_v49  ;;  %v9865_v49 = vcombine.low %v1207_v25, %v1211_v28  ;;  %v1088_v28 = vld [vmem:[%s15642_s10 + $0x118] sm:$0xff] }
 0x54b   :  { %2379 = vmatprep.subr.bf16.mxu1 %v9784_v53  ;;  %v9858_v53 = vcombine.high %v1199_v35, %v1203_v36  ;;  %v1080_v36 = vld [vmem:[%s15642_s10 + $0xd8] sm:$0xff] }
 0x54c   :  { %2448 = vmatpush1.bf16.msra.mxu0 %v9713_v57  ;;  %v9785_v57 = vcombine.low %v1127_v30, %v1131_v31  ;;  %v1200_v31 = vld [vmem:[%s15642_s10 + $0x498] sm:$0xff] }
 0x54d   :  { %2449 = vmatprep.subr.bf16.mxu0 %v9834_v46  ;;  %v1240_v46 = vld [vmem:[%s15642_s10 + $0x5d8] sm:$0xff] }
 0x54e   :  { %2380 = vmatpush2.bf16.msra.mxu1 %v9783_v47  ;;  %v1244_v47 = vld [vmem:[%s15642_s10 + $0x5f8] sm:$0xff] }
 0x54f   :  { %2381 = vmatprep.subr.bf16.mxu1 %v9776_v1  ;;  %v1183_v1 = vld [vmem:[%s15642_s10 + $0x410] sm:$0xff]  ;;  %v9900_v4 = vcombine.high %v1240_v46, %v1244_v47 }
 0x550   :  { %2450 = vmatpush2.bf16.msra.mxu0 %v9833_v2  ;;  %v1187_v2 = vld [vmem:[%s15642_s10 + $0x430] sm:$0xff] }
 0x551   :  { %2451 = vmatprep.subr.bf16.mxu0 %v9826_v6  ;;  %v1232_v6 = vld [vmem:[%s15642_s10 + $0x598] sm:$0xff]  ;;  %v9842_v9 = vcombine.high %v1183_v1, %v1187_v2  ;;  %v9841_v12 = vcombine.low %v1183_v1, %v1187_v2 }
 0x552   :  { %2382 = vmatpush2.bf16.msra.mxu1 %v9775_v7  ;;  %v1236_v7 = vld [vmem:[%s15642_s10 + $0x5b8] sm:$0xff] }
 0x553   :  { %2474 = vmatprep.subr.bf16.mxu1 %v9898_v10  ;;  %v9899_v10 = vcombine.low %v1240_v46, %v1244_v47  ;;  %v9892_v56 = vcombine.high %v1232_v6, %v1236_v7  ;;  %v1188_v46 = vld [vmem:[%s15642_s10 + $0x438] sm:$0xff] }
 0x554   :  { %2452 = vmatpush2.bf16.msra.mxu0 %v9825_v55  ;;  %v1116_v55 = vld [vmem:[%s15642_s10 + $0x1f8] sm:$0xff] }
 0x555   :  { %2384 = vmatmul.mubr.bf16.vlgmr.msra.gmra.mxu1 %v12633_v41  ;;  %2453 = vmatprep.subr.bf16.mxu0 %v9818_v13  ;;  %v1224_v13 = vld [vmem:[%s15642_s10 + $0x558] sm:$0xff]  ;;  %v9772_v15 = vcombine.high %v1112_v54, %v1116_v55  ;;  %v9771_v8 = vcombine.low %v1112_v54, %v1116_v55 }
 0x556   :  { %2475 = vmatpush1.bf16.msra.mxu1 %v9897_v14  ;;  %2506 = vmatprep.mubr.bf16.mxu1 %v12038_v32  ;;  %v1228_v14 = vld [vmem:[%s15642_s10 + $0x578] sm:$0xff] }
 0x557   :  { %2476 = vmatprep.subr.bf16.mxu1 %v9890_v16  ;;  %v9891_v16 = vcombine.low %v1232_v6, %v1236_v7  ;;  %v9884_v11 = vcombine.high %v1224_v13, %v1228_v14  ;;  %v1068_v1 = vld [vmem:[%s15642_s10 + $0x78] sm:$0xff] }
 0x558   :  { %2454 = vmatpush2.bf16.msra.mxu0 %v9817_v61  ;;  %v1108_v61 = vld [vmem:[%s15642_s10 + $0x1b8] sm:$0xff] }
 0x559   :  { %2455 = vmatprep.subr.bf16.mxu0 %v9810_v17  ;;  %v1216_v17 = vld [vmem:[%s15642_s10 + $0x518] sm:$0xff]  ;;  %v9764_v19 = vcombine.high %v1104_v63, %v1108_v61  ;;  %v9763_v23 = vcombine.low %v1104_v63, %v1108_v61 }
 0x55a   :  { %2477 = vmatpush1.bf16.msra.mxu1 %v9889_v18  ;;  %v1220_v18 = vld [vmem:[%s15642_s10 + $0x538] sm:$0xff] }
 0x55b   :  { %2478 = vmatprep.subr.bf16.mxu1 %v9882_v0  ;;  %v9883_v0 = vcombine.low %v1224_v13, %v1228_v14  ;;  %v9876_v22 = vcombine.high %v1216_v17, %v1220_v18  ;;  %v1056_v7 = vld [vmem:[%s15642_s10 + $0x18] sm:$0xff]  ;;  %v11297_v14 = vld [vmem:[%s15644_s12 + $0x70] sm:$0xff]  }
 0x55c   :  { %2456 = vmatpush2.bf16.msra.mxu0 %v9809_v21  ;;  %v1100_v21 = vld [vmem:[%s15642_s10 + $0x178] sm:$0xff] }
 0x55d   :  { %2457 = vmatprep.subr.bf16.mxu0 %v9802_v24  ;;  %v1208_v24 = vld [vmem:[%s15642_s10 + $0x4d8] sm:$0xff]  ;;  %v9756_v25 = vcombine.high %v1096_v20, %v1100_v21  ;;  %v9755_v30 = vcombine.low %v1096_v20, %v1100_v21  ;;  %v11301_v20 = vld [vmem:[%s15644_s12 + $0x60] sm:$0xff]  }
 0x55e   :  { %2479 = vmatpush1.bf16.msra.mxu1 %v9881_v26  ;;  %v1212_v26 = vld [vmem:[%s15642_s10 + $0x4f8] sm:$0xff] }
 0x55f   :  { %2480 = vmatprep.subr.bf16.mxu1 %v9874_v27  ;;  %v9875_v27 = vcombine.low %v1216_v17, %v1220_v18  ;;  %v9867_v35 = vcombine.low %v1208_v24, %v1212_v26  ;;  %v11296_v13 = vld [vmem:[%s15644_s12 + $0x38] sm:$0xff]  }
 0x560   :  { %2458 = vmatpush2.bf16.msra.mxu0 %v9801_v29  ;;  %v9868_v29 = vcombine.high %v1208_v24, %v1212_v26  ;;  %v1168_v63 = vld [vmem:[%s15642_s10 + $0x398] sm:$0xff]  ;;  %v11302_v26 = vld [vmem:[%s15644_s12 + $0x20] sm:$0xff]  }
 0x561   :  { %2459 = vmatprep.subr.bf16.mxu0 %v9794_v33  ;;  %v1204_v33 = vld [vmem:[%s15642_s10 + $0x4b8] sm:$0xff] }
 0x562   :  { %2481 = vmatpush1.bf16.msra.mxu1 %v9873_v34  ;;  %v9859_v50 = vcombine.low %v1200_v31, %v1204_v33  ;;  %v1172_v61 = vld [vmem:[%s15642_s10 + $0x3b8] sm:$0xff] }
 0x563   :  { %2482 = vmatprep.subr.bf16.mxu1 %v9866_v42  ;;  %v1084_v42 = vld [vmem:[%s15642_s10 + $0xf8] sm:$0xff]  ;;  %v9828_v17 = vcombine.high %v1168_v63, %v1172_v61  ;;  %v9827_v21 = vcombine.low %v1168_v63, %v1172_v61  ;;  %v11326_v63 = vld [vmem:[%s15644_s12 + $0x80] sm:$0xff]  }
 0x564   :  { %2460 = vmatpush2.bf16.msra.mxu0 %v9793_v43  ;;  %v9860_v43 = vcombine.high %v1200_v31, %v1204_v33  ;;  %v1160_v18 = vld [vmem:[%s15642_s10 + $0x358] sm:$0xff]  ;;  %v11305_v31 = vld [vmem:[%s15644_s12 + $0x50] sm:$0xff]  }
 0x565   :  { %2461 = vmatprep.subr.bf16.mxu0 %v9786_v48  ;;  %v1196_v48 = vld [vmem:[%s15642_s10 + $0x478] sm:$0xff] }
 0x566   :  { %2483 = vmatpush1.bf16.msra.mxu1 %v9865_v49  ;;  %v9740_v49 = vcombine.high %v1080_v36, %v1084_v42  ;;  %v1156_v24 = vld [vmem:[%s15642_s10 + $0x338] sm:$0xff] }
 0x567   :  { %2484 = vmatprep.subr.bf16.mxu1 %v9858_v53  ;;  %v1076_v53 = vld [vmem:[%s15642_s10 + $0xb8] sm:$0xff] }
 0x568   :  { %2462 = vmatpush2.bf16.msra.mxu0 %v9785_v57  ;;  %v9852_v57 = vcombine.high %v1192_v45, %v1196_v48  ;;  %v9732_v47 = vcombine.high %v1072_v52, %v1076_v53 }
 0x569   :  { %2463 = vmatprep.subr.bf16.mxu0 %v9778_v58  ;;  %v9739_v58 = vcombine.low %v1080_v36, %v1084_v42  ;;  %v1140_v36 = vld [vmem:[%s15642_s10 + $0x2b8] sm:$0xff]  ;;  %v11306_v42 = vld [vmem:[%s15644_s12 + $0x10] sm:$0xff]  }
 0x56a   :  { %2485 = vmatpush1.bf16.msra.mxu1 %v9857_v59  ;;  %v1184_v59 = vld [vmem:[%s15642_s10 + $0x418] sm:$0xff] }
 0x56b   :  { %2486 = vmatprep.subr.bf16.mxu1 %v9850_v60  ;;  %v9851_v60 = vcombine.low %v1192_v45, %v1196_v48  ;;  %v9844_v2 = vcombine.high %v1184_v59, %v1188_v46  ;;  %v9843_v6 = vcombine.low %v1184_v59, %v1188_v46  ;;  %v1128_v48 = vld [vmem:[%s15642_s10 + $0x258] sm:$0xff]  ;;  %v11310_v46 = vld [vmem:[%s15644_s12] sm:$0xff]  }
 0x56c   :  { %2464 = vmatpush2.bf16.msra.mxu0 %v9777_v62  ;;  %v1064_v62 = vld [vmem:[%s15642_s10 + $0x58] sm:$0xff] }
 0x56d   :  { %2556 = vmatprep.subr.bf16.mxu0 %v9900_v4  ;;  %v9731_v4 = vcombine.low %v1072_v52, %v1076_v53  ;;  %v9723_v54 = vcombine.low %v1064_v62, %v1068_v1  ;;  %v11309_v52 = vld [vmem:[%s15644_s12 + $0x40] sm:$0xff]   ;;  %v1124_v59 = vld [vmem:[%s15642_s10 + $0x238] sm:$0xff] }
 0x56e   :  { %2487 = vmatpush1.bf16.msra.mxu1 %v9849_v5  ;;  %v9724_v5 = vcombine.high %v1064_v62, %v1068_v1 }
 0x56f   :  { %2466 = vmatmul.mubr.bf16.vlgmr.msra.gmra.mxu0 %v12633_v41  ;;  %2488 = vmatprep.subr.bf16.mxu1 %v9842_v9  ;;  %v1060_v9 = vld [vmem:[%s15642_s10 + $0x38] sm:$0xff] }
 0x570   :  { %2557 = vmatpush1.bf16.msra.mxu0 %v9899_v10  ;;  %2588 = vmatprep.mubr.bf16.mxu0 %v12038_v32  ;;  %v11295_v10 = vld [vmem:[%s15644_s12 + $0x78] sm:$0xff]   ;;  %v9716_v55 = vcombine.high %v1056_v7, %v1060_v9 }
 0x571   :  { %2558 = vmatprep.subr.bf16.mxu0 %v9892_v56  ;;  %v1176_v56 = vld [vmem:[%s15642_s10 + $0x3d8] sm:$0xff] }
 0x572   :  { %2489 = vmatpush1.bf16.msra.mxu1 %v9841_v12  ;;  %v1180_v12 = vld [vmem:[%s15642_s10 + $0x3f8] sm:$0xff] }
 0x573   :  { %2515 = vmatprep.subr.bf16.mxu1 %v9772_v15  ;;  %v9715_v15 = vcombine.low %v1056_v7, %v1060_v9  ;;  %v11315_v7 = vld [vmem:[%s15644_s12 + $0xe8] sm:$0xff]  }
 0x574   :  { %2559 = vmatpush1.bf16.msra.mxu0 %v9891_v16  ;;  %v9836_v16 = vcombine.high %v1176_v56, %v1180_v12  ;;  %v11316_v9 = vld [vmem:[%s15644_s12 + $0xa8] sm:$0xff]  }
 0x575   :  { %2507 = vmatmul.mubr.bf16.vlgmr.msra.gmra.mxu1 %v12660_v51  ;;  %2560 = vmatprep.subr.bf16.mxu0 %v9884_v11  ;;  %v11298_v11 = vld [vmem:[%s15644_s12 + $0x30] sm:$0xff]  }
 0x576   :  { %2516 = vmatpush1.bf16.msra.mxu1 %v9771_v8  ;;  %2547 = vmatprep.mubr.bf16.mxu1 %v12631_v40  ;;  %v1092_v40 = vld [vmem:[%s15642_s10 + $0x138] sm:$0xff]  ;;  %v9835_v8 = vcombine.low %v1176_v56, %v1180_v12  ;;  %v11321_v56 = vld [vmem:[%s15644_s12 + $0xd0] sm:$0xff]  }
 0x577   :  { %2517 = vmatprep.subr.bf16.mxu1 %v9764_v19  ;;  %v9748_v34 = vcombine.high %v1088_v28, %v1092_v40  ;;  %v9747_v44 = vcombine.low %v1088_v28, %v1092_v40  ;;  %v1164_v19 = vld [vmem:[%s15642_s10 + $0x378] sm:$0xff]  ;;  %v11322_v12 = vld [vmem:[%s15644_s12 + $0x90] sm:$0xff]  }
 0x578   :  { %2561 = vmatpush1.bf16.msra.mxu0 %v9883_v0  ;;  %v11300_v0 = vld [vmem:[%s15644_s12 + $0x28] sm:$0xff]   ;;  %v1144_v40 = vld [vmem:[%s15642_s10 + $0x2d8] sm:$0xff] }
 0x579   :  { %2562 = vmatprep.subr.bf16.mxu0 %v9876_v22  ;;  %v9820_v22 = vcombine.high %v1160_v18, %v1164_v19 }
 0x57a   :  { %2518 = vmatpush1.bf16.msra.mxu1 %v9763_v23  ;;  %v1152_v23 = vld [vmem:[%s15642_s10 + $0x318] sm:$0xff] }
 0x57b   :  { %2519 = vmatprep.subr.bf16.mxu1 %v9756_v25  ;;  %v11303_v25 = vld [vmem:[%s15644_s12 + $0x58] sm:$0xff]   ;;  %v9812_v28 = vcombine.high %v1152_v23, %v1156_v24  ;;  %v9811_v33 = vcombine.low %v1152_v23, %v1156_v24 }
 0x57c   :  { %2563 = vmatpush1.bf16.msra.mxu0 %v9875_v27  ;;  %v9819_v27 = vcombine.low %v1160_v18, %v1164_v19 }
 0x57d   :  { %2564 = vmatprep.subr.bf16.mxu0 %v9868_v29  ;;  %v1148_v29 = vld [vmem:[%s15642_s10 + $0x2f8] sm:$0xff] }
 0x57e   :  { %2520 = vmatpush1.bf16.msra.mxu1 %v9755_v30  ;;  %v11304_v30 = vld [vmem:[%s15644_s12 + $0x18] sm:$0xff]  }
 0x57f   :  { %2521 = vmatprep.subr.bf16.mxu1 %v9748_v34  ;;  %v9804_v34 = vcombine.high %v1144_v40, %v1148_v29 }
 0x580   :  { %2565 = vmatpush1.bf16.msra.mxu0 %v9867_v35  ;;  %v1136_v35 = vld [vmem:[%s15642_s10 + $0x298] sm:$0xff] }
 0x581   :  { %2566 = vmatprep.subr.bf16.mxu0 %v9860_v43  ;;  %v11307_v43 = vld [vmem:[%s15644_s12 + $0x48] sm:$0xff]   ;;  %v9796_v45 = vcombine.high %v1136_v35, %v1140_v36  ;;  %v9795_v53 = vcombine.low %v1136_v35, %v1140_v36  ;;  %v11333_v36 = vld [vmem:[%s15644_s12 + $0x160] sm:$0xff]  }
 0x582   :  { %2522 = vmatpush1.bf16.msra.mxu1 %v9747_v44  ;;  %v9803_v44 = vcombine.low %v1144_v40, %v1148_v29  ;;  %v11328_v29 = vld [vmem:[%s15644_s12 + $0x138] sm:$0xff]   ;;  %v11332_v35 = vld [vmem:[%s15644_s12 + $0x128] sm:$0xff]  }
 0x583   :  { %2523 = vmatprep.subr.bf16.mxu1 %v9740_v49  ;;  %v1132_v49 = vld [vmem:[%s15642_s10 + $0x278] sm:$0xff] }
 0x584   :  { %2567 = vmatpush1.bf16.msra.mxu0 %v9859_v50  ;;  %v11308_v50 = vld [vmem:[%s15644_s12 + $0x8] sm:$0xff]  }
 0x585   :  { %2568 = vmatprep.subr.bf16.mxu0 %v9852_v57  ;;  %v9788_v57 = vcombine.high %v1128_v48, %v1132_v49 }
 0x586   :  { %2524 = vmatpush1.bf16.msra.mxu1 %v9739_v58  ;;  %v1120_v58 = vld [vmem:[%s15642_s10 + $0x218] sm:$0xff] }
 0x587   :  { %2525 = vmatprep.subr.bf16.mxu1 %v9732_v47  ;;  %v11327_v47 = vld [vmem:[%s15644_s12 + $0x178] sm:$0xff]   ;;  %v9780_v62 = vcombine.high %v1120_v58, %v1124_v59  ;;  %v9779_v1 = vcombine.low %v1120_v58, %v1124_v59  ;;  %v11341_v59 = vld [vmem:[%s15644_s12 + $0x140] sm:$0xff]  }
 0x588   :  { %2569 = vmatpush1.bf16.msra.mxu0 %v9851_v60  ;;  %v9787_v60 = vcombine.low %v1128_v48, %v1132_v49  ;;  %v11338_v48 = vld [vmem:[%s15644_s12 + $0x110] sm:$0xff]  }
 0x589   :  { %2570 = vmatprep.subr.bf16.mxu0 %v9844_v2  ;;  %v11311_v2 = vld [vmem:[%s15644_s12 + $0xf8] sm:$0xff]  }
 0x58a   :  { %2526 = vmatpush1.bf16.msra.mxu1 %v9731_v4  ;;  %v11312_v4 = vld [vmem:[%s15644_s12 + $0xb8] sm:$0xff]  }
 0x58b   :  { %2527 = vmatprep.subr.bf16.mxu1 %v9724_v5  ;;  %v11313_v5 = vld [vmem:[%s15644_s12 + $0xf0] sm:$0xff]  }
 0x58c   :  { %2571 = vmatpush1.bf16.msra.mxu0 %v9843_v6  ;;  %v11314_v6 = vld [vmem:[%s15644_s12 + $0xb0] sm:$0xff]  }
 0x58d   :  { %10675 = vmatprep.subr.bf16.mxu0 %v11295_v10  ;;  %v11318_v10 = vld [vmem:[%s15644_s12 + $0xa0] sm:$0xff]  }
 0x58e   :  { %2528 = vmatpush1.bf16.msra.mxu1 %v9723_v54  ;;  %v11319_v54 = vld [vmem:[%s15644_s12 + $0xd8] sm:$0xff]  }
 0x58f   :  { %2589 = vmatmul.mubr.bf16.vlgmr.msra.gmra.mxu0 %v12660_v51  ;;  %2529 = vmatprep.subr.bf16.mxu1 %v9716_v55  ;;  %v11299_v51 = vld [vmem:[%s15644_s12 + $0x68] sm:$0xff]   ;;  %v11320_v55 = vld [vmem:[%s15644_s12 + $0x98] sm:$0xff]  }
 0x590   :  { %10676 = vmatpush3.bf16.msra.mxu0 %v11296_v13  ;;  %v11323_v13 = vld [vmem:[%s15644_s12 + $0xc8] sm:$0xff]  }
 0x591   :  { %10677 = vmatprep.subr.bf16.mxu0 %v11297_v14  ;;  %v11324_v14 = vld [vmem:[%s15644_s12 + $0x88] sm:$0xff]  }
 0x592   :  { %2530 = vmatpush1.bf16.msra.mxu1 %v9715_v15  ;;  %v11325_v15 = vld [vmem:[%s15644_s12 + $0xc0] sm:$0xff]  }
 0x593   :  { %2531 = vmatprep.subr.bf16.mxu1 %v9836_v16  ;;  %v13172_v16 = vld [vmem:[%s15645_s11] sm:$0xff] }
 0x594   :  { %10678 = vmatpush3.bf16.msra.mxu0 %v11298_v11  ;;  %v1250_v11 = vrot.slane %v13172_v16, %v12414_v39 }
 0x595   :  { %10679 = vmatprep.subr.bf16.mxu0 %v11299_v51 }
 0x596   :  { %2532 = vmatpush2.bf16.msra.mxu1 %v9835_v8  ;;  %v1254_v8 = vrot.slane %v13172_v16, %v12411_v38 }
 0x597   :  { %2533 = vmatprep.subr.bf16.mxu1 %v9828_v17 }
 0x598   :  { %10680 = vmatpush3.bf16.msra.mxu0 %v11300_v0 }
 0x599   :  { %10681 = vmatprep.subr.bf16.mxu0 %v11301_v20  ;;  %v11343_v20 = vld [vmem:[%s15644_s12 + $0x1f8] sm:$0xff]  }
 0x59a   :  { %2534 = vmatpush2.bf16.msra.mxu1 %v9827_v21 }
 0x59b   :  { %2535 = vmatprep.subr.bf16.mxu1 %v9820_v22 }
 0x59c   :  { %10682 = vmatpush3.bf16.msra.mxu0 %v11302_v26 }
 0x59d   :  { %10683 = vmatprep.subr.bf16.mxu0 %v11303_v25 }
 0x59e   :  { %2536 = vmatpush2.bf16.msra.mxu1 %v9819_v27 }
 0x59f   :  { %2537 = vmatprep.subr.bf16.mxu1 %v9812_v28 }
 0x5a0   :  { %10684 = vmatpush3.bf16.msra.mxu0 %v11304_v30 }
 0x5a1   :  { %10685 = vmatprep.subr.bf16.mxu0 %v11305_v31  ;;  %v11329_v31 = vld [vmem:[%s15644_s12 + $0x170] sm:$0xff]  }
 0x5a2   :  { %2538 = vmatpush2.bf16.msra.mxu1 %v9811_v33  ;;  %v11330_v33 = vld [vmem:[%s15644_s12 + $0x130] sm:$0xff]  }
 0x5a3   :  { %2539 = vmatprep.subr.bf16.mxu1 %v9804_v34  ;;  %v11331_v34 = vld [vmem:[%s15644_s12 + $0x168] sm:$0xff]  }
 0x5a4   :  { %10686 = vmatpush3.bf16.msra.mxu0 %v11306_v42  ;;  %v11334_v42 = vld [vmem:[%s15644_s12 + $0x120] sm:$0xff]  }
 0x5a5   :  { %10687 = vmatprep.subr.bf16.mxu0 %v11307_v43  ;;  %v11335_v43 = vld [vmem:[%s15644_s12 + $0x158] sm:$0xff]  }
 0x5a6   :  { %2540 = vmatpush2.bf16.msra.mxu1 %v9803_v44  ;;  %v11336_v44 = vld [vmem:[%s15644_s12 + $0x118] sm:$0xff]  }
 0x5a7   :  { %2541 = vmatprep.subr.bf16.mxu1 %v9796_v45  ;;  %v11337_v45 = vld [vmem:[%s15644_s12 + $0x150] sm:$0xff]  }
 0x5a8   :  { %10688 = vmatpush3.bf16.msra.mxu0 %v11308_v50  ;;  %v11339_v50 = vld [vmem:[%s15644_s12 + $0x148] sm:$0xff]  }
 0x5a9   :  { %10689 = vmatprep.subr.bf16.mxu0 %v11309_v52 }
 0x5aa   :  { %2542 = vmatpush2.bf16.msra.mxu1 %v9795_v53 }
 0x5ab   :  { %2543 = vmatprep.subr.bf16.mxu1 %v9788_v57  ;;  %v11340_v57 = vld [vmem:[%s15644_s12 + $0x108] sm:$0xff]  }
 0x5ac   :  { %10690 = vmatpush3.bf16.msra.mxu0 %v11310_v46  ;;  %v11342_v46 = vld [vmem:[%s15644_s12 + $0x100] sm:$0xff]  }
 0x5ad   :  { %10719 = vmatprep.subr.bf16.mxu0 %v11327_v47  ;;  %v11345_v47 = vld [vmem:[%s15646_s14 + $0x78] sm:$0xff]  }
 0x5ae   :  { %2544 = vmatpush2.bf16.msra.mxu1 %v9787_v60  ;;  %v13233_v60 = vsub.s32 3, %v12408_v37 }
 0x5af   :  { %2545 = vmatprep.subr.bf16.mxu1 %v9780_v62  ;;  %v1258_v62 = vrot.slane %v13172_v16, %v12620_v3 }
 0x5b2   :  { %2546 = vmatpush2.bf16.msra.mxu1 %v9779_v1  ;;  %v1262_v1 = vrot.slane %v13172_v16, %v13233_v60 }
 0x5b3   :  { %10697 = vmatprep.subr.bf16.mxu1 %v11311_v2 }
 0x5b5   :  { %2548 = vmatmul.mubr.bf16.vlgmr.msra.gmra.mxu1 %v12633_v41  ;;  %v11317_v41 = vld [vmem:[%s15644_s12 + $0xe0] sm:$0xff]  }
 0x5b6   :  { %10698 = vmatpush3.bf16.msra.mxu1 %v11312_v4 }
 0x5b7   :  { %10699 = vmatprep.subr.bf16.mxu1 %v11313_v5 }
 0x5ba   :  { %10700 = vmatpush3.bf16.msra.mxu1 %v11314_v6 }
 0x5bb   :  { %10701 = vmatprep.subr.bf16.mxu1 %v11315_v7 }
 0x5be   :  { %10702 = vmatpush3.bf16.msra.mxu1 %v11316_v9 }
 0x5bf   :  { %10703 = vmatprep.subr.bf16.mxu1 %v11317_v41 }
 0x5c2   :  { %10704 = vmatpush3.bf16.msra.mxu1 %v11318_v10 }
 0x5c3   :  { %10705 = vmatprep.subr.bf16.mxu1 %v11319_v54 }
 0x5c6   :  { %10706 = vmatpush3.bf16.msra.mxu1 %v11320_v55 }
 0x5c7   :  { %10707 = vmatprep.subr.bf16.mxu1 %v11321_v56 }
 0x5ca   :  { %10708 = vmatpush3.bf16.msra.mxu1 %v11322_v12  ;;  %v11344_v12 = vld [vmem:[%s15644_s12 + $0x1b8] sm:$0xff]  }
 0x5cb   :  { %10709 = vmatprep.subr.bf16.mxu1 %v11323_v13 }
 0x5ce   :  { %10710 = vmatpush3.bf16.msra.mxu1 %v11324_v14  ;;  %v11347_v14 = vld [vmem:[%s15644_s12 + $0x1f0] sm:$0xff]  }
 0x5cf   :  { %v2303_v61 = vpop.f32.mrf.mxu0  ;;  %10711 = vmatprep.subr.bf16.mxu1 %v11325_v15  ;;  %v11348_v15 = vld [vmem:[%s15644_s12 + $0x1b0] sm:$0xff]  }
 0x5d0   :  { %v2304_v18 = vadd.f32 %v2303_v61, %v1250_v11  ;;  %v11352_v61 = vld [vmem:[%s15644_s12 + $0x1a8] sm:$0xff]   ;;  %v11355_v11 = vld [vmem:[%s15644_s12 + $0x1e0] sm:$0xff]  }
 0x5d1   :  { %v2305_v51 = vpop.f32.mrf.mxu0 }
 0x5d2   :  { %10712 = vmatpush3.bf16.msra.mxu1 %v11326_v63  ;;  %v2306_v21 = vadd.f32 %v2305_v51, %v1254_v8  ;;  %v11351_v63 = vld [vmem:[%s15644_s12 + $0x1e8] sm:$0xff]   ;;  %v12039_v51 = vmov 1966171168  }
 0x5d3   :  { %v2307_v17 = vpop.f32.mrf.mxu0  ;;  %10741 = vmatprep.subr.bf16.mxu1 %v11343_v20  ;;  %v3821_v8 = vunpack.c.l.s4 %v12039_v51  ;;  %v1269_v20 = vsub.s32 5, %v12408_v37  ;;  %v11374_v51 = vld [vmem:[%s15646_s14] sm:$0xff]  }
 0x5d4   :  { %v11356_v17 = vld [vmem:[%s15644_s12 + $0x1a0] sm:$0xff]  }
 0x5d5   :  { %v2344_v19 = vpop.f32.mrf.mxu1  ;;  %v2308_v0 = vpop.f32.mrf.mxu0 }
 0x5d6   :  { %v2345_v22 = vadd.f32 %v2344_v19, %v2304_v18  ;;  %v1265_v18 = vsub.s32 4, %v12408_v37  ;;  %v11359_v19 = vld [vmem:[%s15644_s12 + $0x1d8] sm:$0xff]   ;;  %v3822_v0 = vunpack.c.0.s8 %v3821_v8 }
 0x5d7   :  { %v2346_v23 = vpop.f32.mrf.mxu1 }
 0x5d8   :  { %v2347_v24 = vadd.f32 %v2346_v23, %v2306_v21  ;;  %v2597_v26 = vmax.f32 %v2345_v22, 0.0  ;;  %v11360_v21 = vld [vmem:[%s15644_s12 + $0x198] sm:$0xff]   ;;  %v11363_v23 = vld [vmem:[%s15644_s12 + $0x1d0] sm:$0xff]  }
 0x5d9   :  { %v2348_v25 = vpop.f32.mrf.mxu1 }
 0x5da   :  { %v2598_v27 = vmax.f32 %v2347_v24, 0.0  ;;  %v2605_v30 = vpack.c.bf16 %v2597_v26, %v2597_v26  ;;  %v13272_v24 = vsub.s32 %v3822_v0, %v12408_v37  ;;  %v1266_v26 = vrot.slane %v13172_v16, %v1265_v18  ;;  %v11378_v0 = vld [vmem:[%s15646_s14 + $0x138] sm:$0xff]  }
 0x5db   :  { %v2349_v28 = vpop.f32.mrf.mxu1 }
 0x5dc   :  { %v2606_v40 = vpack.c.bf16 %v2598_v27, %v2598_v27  ;;  %v13280_v27 = vld [vmem:[%s15647_s3] sm:$0xff]  ;;  %v1270_v28 = vrot.slane %v13172_v16, %v1269_v20 }
 0x5de   :  { %3164 = vmatprep.mubr.bf16.mxu0 %v2606_v40  ;;  %v11364_v40 = vld [vmem:[%s15644_s12 + $0x190] sm:$0xff]  }
 0x5df   :  { %3165 = vmatmul.mubr.bf16.vlgmr.msra.gmra.mxu0 %v2605_v30  ;;  %v11367_v30 = vld [vmem:[%s15644_s12 + $0x1c8] sm:$0xff]  }
 0x5e0   :  { %10720 = vmatpush3.bf16.msra.mxu0 %v11328_v29 }
 0x5e1   :  { %10721 = vmatprep.subr.bf16.mxu0 %v11329_v31 }
 0x5e4   :  { %10722 = vmatpush3.bf16.msra.mxu0 %v11330_v33  ;;  %v13293_v33 = vrot.slane %v13280_v27, %v13272_v24 }
 0x5e5   :  { %10723 = vmatprep.subr.bf16.mxu0 %v11331_v34 }
 0x5e8   :  { %10724 = vmatpush3.bf16.msra.mxu0 %v11332_v35 }
 0x5e9   :  { %10725 = vmatprep.subr.bf16.mxu0 %v11333_v36 }
 0x5ec   :  { %10726 = vmatpush3.bf16.msra.mxu0 %v11334_v42  ;;  %v11368_v42 = vld [vmem:[%s15644_s12 + $0x188] sm:$0xff]  }
 0x5ed   :  { %10727 = vmatprep.subr.bf16.mxu0 %v11335_v43 }
 0x5ef   :  { %v2426_v49 = vpop.f32.mrf.mxu0 }
 0x5f0   :  { %10728 = vmatpush3.bf16.msra.mxu0 %v11336_v44  ;;  %v11371_v44 = vld [vmem:[%s15644_s12 + $0x1c0] sm:$0xff]  }
 0x5f1   :  { %v2428_v52 = vpop.f32.mrf.mxu0  ;;  %10729 = vmatprep.subr.bf16.mxu0 %v11337_v45 }
 0x5f3   :  { %v2430_v53 = vpop.f32.mrf.mxu0 }
 0x5f4   :  { %10730 = vmatpush3.bf16.msra.mxu0 %v11338_v48  ;;  %v3834_v48 = vcombine.high %v13293_v33, %v13293_v33  ;;  %v11372_v53 = vld [vmem:[%s15644_s12 + $0x180] sm:$0xff]  }
 0x5f5   :  { %v2431_v58 = vpop.f32.mrf.mxu0  ;;  %10731 = vmatprep.subr.bf16.mxu0 %v11339_v50 }
 0x5f6   :  { %v11346_v58 = vld [vmem:[%s15646_s14 + $0x38] sm:$0xff]  }
 0x5f8   :  { %10732 = vmatpush3.bf16.msra.mxu0 %v11340_v57 }
 0x5f9   :  { %10733 = vmatprep.subr.bf16.mxu0 %v11341_v59  ;;  %v11375_v59 = vld [vmem:[%s15646_s14 + $0xf8] sm:$0xff]  }
 0x5fc   :  { %10734 = vmatpush3.bf16.msra.mxu0 %v11342_v46 }
 0x5fd   :  { %10763 = vmatprep.subr.bf16.mxu0 %v11345_v47  ;;  %v13313_v47 = vrot.slane %v3834_v48, %v13272_v24  ;;  %v11405_v48 = vld [vmem:[%s15646_s14 + $0x140] sm:$0xff]  }
 0x615   :  { %v2385_v2 = vpop.f32.mrf.mxu1 }
 0x616   :  { %v2386_v4 = vadd.f32 %v2385_v2, %v1258_v62  ;;  %v11350_v2 = vld [vmem:[%s15646_s14 + $0x30] sm:$0xff]  }
 0x617   :  { %v2387_v5 = vpop.f32.mrf.mxu1 }
 0x618   :  { %v2427_v6 = vadd.f32 %v2426_v49, %v2386_v4  ;;  %v2388_v7 = vadd.f32 %v2387_v5, %v1262_v1  ;;  %v11349_v1 = vld [vmem:[%s15646_s14 + $0x70] sm:$0xff]   ;;  %v11353_v4 = vld [vmem:[%s15646_s14 + $0x68] sm:$0xff]  }
 0x619   :  { %v2389_v9 = vpop.f32.mrf.mxu1  ;;  %v11354_v5 = vld [vmem:[%s15646_s14 + $0x28] sm:$0xff]  }
 0x61a   :  { %v2429_v41 = vadd.f32 %v2428_v52, %v2388_v7  ;;  %v2599_v10 = vmax.f32 %v2427_v6, 0.0  ;;  %v11357_v6 = vld [vmem:[%s15646_s14 + $0x60] sm:$0xff]   ;;  %v11361_v9 = vld [vmem:[%s15646_s14 + $0x58] sm:$0xff]  }
 0x61b   :  { %v2390_v54 = vpop.f32.mrf.mxu1  ;;  %v11358_v7 = vld [vmem:[%s15646_s14 + $0x20] sm:$0xff]  }
 0x61c   :  { %v2600_v55 = vmax.f32 %v2429_v41, 0.0  ;;  %v2607_v13 = vpack.c.bf16 %v2599_v10, %v2599_v10  ;;  %v11362_v41 = vld [vmem:[%s15646_s14 + $0x18] sm:$0xff]   ;;  %v11365_v10 = vld [vmem:[%s15646_s14 + $0x50] sm:$0xff]  }
 0x61e   :  { %v2608_v56 = vpack.c.bf16 %v2600_v55, %v2600_v55  ;;  %v11366_v55 = vld [vmem:[%s15646_s14 + $0x10] sm:$0xff]  }
 0x620   :  { %3204 = vmatprep.mubr.bf16.mxu1 %v2608_v56  ;;  %v3819_v56 = vcombine.high %v13280_v27, %v13280_v27  ;;  %v11389_v27 = vld [vmem:[%s15646_s14 + $0x160] sm:$0xff]  }
 0x621   :  { %3205 = vmatmul.mubr.bf16.vlgmr.msra.gmra.mxu1 %v2607_v13  ;;  %v11369_v13 = vld [vmem:[%s15646_s14 + $0x48] sm:$0xff]  }
 0x622   :  { %10742 = vmatpush3.bf16.msra.mxu1 %v11344_v12 }
 0x623   :  { %10743 = vmatprep.subr.bf16.mxu1 %v11347_v14 }
 0x626   :  { %10744 = vmatpush3.bf16.msra.mxu1 %v11348_v15  ;;  %v11370_v15 = vld [vmem:[%s15646_s14 + $0x8] sm:$0xff]  }
 0x627   :  { %10745 = vmatprep.subr.bf16.mxu1 %v11351_v63  ;;  %v3833_v63 = vrot.slane %v3819_v56, %v13272_v24  ;;  %v11379_v56 = vld [vmem:[%s15646_s14 + $0xf0] sm:$0xff]  }
 0x629   :  { %v3835_v8 = vcombine.high %v3833_v63, %v3833_v63 }
 0x62a   :  { %10746 = vmatpush3.bf16.msra.mxu1 %v11352_v61 }
 0x62b   :  { %10747 = vmatprep.subr.bf16.mxu1 %v11355_v11  ;;  %v11373_v11 = vld [vmem:[%s15646_s14 + $0x40] sm:$0xff]  }
 0x62e   :  { %10748 = vmatpush3.bf16.msra.mxu1 %v11356_v17  ;;  %v11377_v17 = vld [vmem:[%s15646_s14 + $0x178] sm:$0xff]  }
 0x62f   :  { %v2467_v22 = vpop.f32.mrf.mxu0  ;;  %10749 = vmatprep.subr.bf16.mxu1 %v11359_v19  ;;  %v13368_v19 = vrot.slane %v13293_v33, %v13272_v24  ;;  %v1277_v33 = vsub.s32 7, %v12408_v37 }
 0x630   :  { %v2468_v31 = vadd.f32 %v2467_v22, %v1266_v26  ;;  %v11381_v22 = vld [vmem:[%s15646_s14 + $0x170] sm:$0xff]   ;;  %v11385_v26 = vld [vmem:[%s15646_s14 + $0x168] sm:$0xff]  }
 0x631   :  { %v2469_v25 = vpop.f32.mrf.mxu0 }
 0x632   :  { %10750 = vmatpush3.bf16.msra.mxu1 %v11360_v21  ;;  %v2470_v36 = vadd.f32 %v2469_v25, %v1270_v28  ;;  %v13374_v21 = vrot.slane %v3835_v8, %v13272_v24  ;;  %v11386_v25 = vld [vmem:[%s15646_s14 + $0x128] sm:$0xff]   ;;  %v11390_v28 = vld [vmem:[%s15646_s14 + $0x120] sm:$0xff]  }
 0x633   :  { %v2471_v29 = vpop.f32.mrf.mxu0  ;;  %10751 = vmatprep.subr.bf16.mxu1 %v11363_v23  ;;  %v11382_v23 = vld [vmem:[%s15646_s14 + $0x130] sm:$0xff]   ;;  %v11423_v8 = vld [vmem:[%s15646_s14 + $0x220] sm:$0xff]  }
 0x634   :  { %v11394_v29 = vld [vmem:[%s15646_s14 + $0x118] sm:$0xff]  }
 0x635   :  { %v2508_v34 = vpop.f32.mrf.mxu1  ;;  %v2472_v35 = vpop.f32.mrf.mxu0 }
 0x636   :  { %v2509_v16 = vadd.f32 %v2508_v34, %v2468_v31  ;;  %10752 = vmatpush3.bf16.msra.mxu1 %v11364_v40  ;;  %v11393_v40 = vld [vmem:[%s15646_s14 + $0x158] sm:$0xff]   ;;  %v1273_v31 = vsub.s32 6, %v12408_v37  ;;  %v11398_v34 = vld [vmem:[%s15646_s14 + $0x110] sm:$0xff]   ;;  %v11401_v35 = vld [vmem:[%s15646_s14 + $0x148] sm:$0xff]  }
 0x637   :  { %v2510_v43 = vpop.f32.mrf.mxu1  ;;  %10753 = vmatprep.subr.bf16.mxu1 %v11367_v30  ;;  %v11397_v30 = vld [vmem:[%s15646_s14 + $0x150] sm:$0xff]  }
 0x638   :  { %v2511_v45 = vadd.f32 %v2510_v43, %v2470_v36  ;;  %v2601_v49 = vmax.f32 %v2509_v16, 0.0  ;;  %v12035_v36 = vld [vmem:[%s15645_s11] sm:$0xff]  ;;  %v13424_v43 = vld [vmem:[%s15647_s3 + $0x8] sm:$0xff] }
 0x639   :  { %v2512_v50 = vpop.f32.mrf.mxu1  ;;  %v1274_v16 = vrot.slane %v12035_v36, %v1273_v31  ;;  %v11762_v37 = vld [vmem:[%s15652_s19 + $0x604] ss:$16 sps:$4 sm:$0xff]  }
 0x63a   :  { %v2602_v52 = vmax.f32 %v2511_v45, 0.0  ;;  %10754 = vmatpush3.bf16.msra.mxu1 %v11368_v42  ;;  %v2609_v62 = vpack.c.bf16 %v2601_v49, %v2601_v49  ;;  %v11402_v42 = vld [vmem:[%s15646_s14 + $0x108] sm:$0xff]  }
 0x63b   :  { %v2513_v57 = vpop.f32.mrf.mxu1  ;;  %10755 = vmatprep.subr.bf16.mxu1 %v11371_v44  ;;  %v1278_v44 = vrot.slane %v12035_v36, %v1277_v33 }
 0x63c   :  { %v2610_v46 = vpack.c.bf16 %v2602_v52, %v2602_v52  ;;  %v11406_v52 = vld [vmem:[%s15646_s14 + $0x100] sm:$0xff]  }
 0x63e   :  { %3244 = vmatprep.mubr.bf16.mxu0 %v2610_v46  ;;  %10756 = vmatpush3.bf16.msra.mxu1 %v11372_v53  ;;  %v13436_v53 = vrot.slane %v13424_v43, %v13272_v24  ;;  %v11410_v46 = vld [vmem:[%s15646_s14 + $0x278] sm:$0xff]  }
 0x63f   :  { %3245 = vmatmul.mubr.bf16.vlgmr.msra.gmra.mxu0 %v2609_v62  ;;  %10785 = vmatprep.subr.bf16.mxu1 %v11375_v59 }
 0x640   :  { %10764 = vmatpush3.bf16.msra.mxu0 %v11346_v58  ;;  %5615 = vmatprep.mubr.bf16.mxu0 %v13313_v47 }
 0x641   :  { %10765 = vmatprep.subr.bf16.mxu0 %v11349_v1 }
 0x644   :  { %10766 = vmatpush3.bf16.msra.mxu0 %v11350_v2 }
 0x645   :  { %10767 = vmatprep.subr.bf16.mxu0 %v11353_v4  ;;  %v13443_v4 = vrot.slane %v3833_v63, %v13272_v24  ;;  %v11419_v63 = vld [vmem:[%s15646_s14 + $0x228] sm:$0xff]  }
 0x648   :  { %10768 = vmatpush3.bf16.msra.mxu0 %v11354_v5  ;;  %v3883_v5 = vcombine.high %v13436_v53, %v13436_v53 }
 0x649   :  { %10769 = vmatprep.subr.bf16.mxu0 %v11357_v6 }
 0x64c   :  { %10770 = vmatpush3.bf16.msra.mxu0 %v11358_v7  ;;  %v11411_v7 = vld [vmem:[%s15646_s14 + $0x238] sm:$0xff]  }
 0x64d   :  { %10771 = vmatprep.subr.bf16.mxu0 %v11361_v9  ;;  %v11414_v9 = vld [vmem:[%s15646_s14 + $0x270] sm:$0xff]  }
 0x64f   :  { %v2590_v54 = vpop.f32.mrf.mxu0 }
 0x650   :  { %10772 = vmatpush3.bf16.msra.mxu0 %v11362_v41 }
 0x651   :  { %v13348_v12 = vpop.f32.mrf.mxu0  ;;  %10773 = vmatprep.subr.bf16.mxu0 %v11365_v10  ;;  %v11376_v10 = vld [vmem:[%s15646_s14 + $0xb8] sm:$0xff]  }
 0x653   :  { %v2594_v14 = vpop.f32.mrf.mxu0 }
 0x654   :  { %10774 = vmatpush3.bf16.msra.mxu0 %v11366_v55  ;;  %v11380_v14 = vld [vmem:[%s15646_s14 + $0xb0] sm:$0xff]  }
 0x655   :  { %v2595_v61 = vpop.f32.mrf.mxu0  ;;  %10775 = vmatprep.subr.bf16.mxu0 %v11369_v13  ;;  %v11415_v13 = vld [vmem:[%s15646_s14 + $0x230] sm:$0xff]  }
 0x656   :  { %v11422_v61 = vld [vmem:[%s15646_s14 + $0x260] sm:$0xff]  }
 0x658   :  { %10776 = vmatpush3.bf16.msra.mxu0 %v11370_v15  ;;  %v11383_v15 = vld [vmem:[%s15646_s14 + $0xe8] sm:$0xff]  }
 0x659   :  { %10777 = vmatprep.subr.bf16.mxu0 %v11373_v11  ;;  %v11384_v11 = vld [vmem:[%s15646_s14 + $0xa8] sm:$0xff]  }
 0x65c   :  { %10778 = vmatpush3.bf16.msra.mxu0 %v11374_v51  ;;  %v11387_v51 = vld [vmem:[%s15646_s14 + $0xe0] sm:$0xff]  }
 0x65d   :  { %10807 = vmatprep.subr.bf16.mxu0 %v11377_v17  ;;  %v11426_v17 = vld [vmem:[%s15646_s14 + $0x258] sm:$0xff]  }
 0x65f   :  { %5616 = vmatmul.mubr.bf16.vlgmr.msra.gmra.mxu0 %v13368_v19 }
 0x660   :  { %10808 = vmatpush3.bf16.msra.mxu0 %v11378_v0  ;;  %5695 = vmatprep.mubr.bf16.mxu0 %v13374_v21  ;;  %v11388_v0 = vld [vmem:[%s15646_s14 + $0xa0] sm:$0xff]  }
 0x661   :  { %10809 = vmatprep.subr.bf16.mxu0 %v11381_v22  ;;  %v11391_v22 = vld [vmem:[%s15646_s14 + $0xd8] sm:$0xff]  }
 0x664   :  { %10810 = vmatpush3.bf16.msra.mxu0 %v11382_v23  ;;  %v11427_v23 = vld [vmem:[%s15646_s14 + $0x218] sm:$0xff]  }
 0x665   :  { %10811 = vmatprep.subr.bf16.mxu0 %v11385_v26  ;;  %v11430_v26 = vld [vmem:[%s15646_s14 + $0x250] sm:$0xff]  }
 0x668   :  { %10812 = vmatpush3.bf16.msra.mxu0 %v11386_v25  ;;  %v11392_v25 = vld [vmem:[%s15646_s14 + $0x98] sm:$0xff]  }
 0x669   :  { %10813 = vmatprep.subr.bf16.mxu0 %v11389_v27  ;;  %v11395_v27 = vld [vmem:[%s15646_s14 + $0xd0] sm:$0xff]  }
 0x66c   :  { %10814 = vmatpush3.bf16.msra.mxu0 %v11390_v28  ;;  %v11431_v28 = vld [vmem:[%s15646_s14 + $0x210] sm:$0xff]  }
 0x66d   :  { %10815 = vmatprep.subr.bf16.mxu0 %v11393_v40  ;;  %v3868_v40 = vcombine.high %v13424_v43, %v13424_v43  ;;  %v11403_v43 = vld [vmem:[%s15646_s14 + $0xc0] sm:$0xff]  }
 0x66f   :  { %v13532_v36 = vrot.slane %v3868_v40, %v13272_v24  ;;  %v11433_v40 = vld [vmem:[%s15646_s14 + $0x188] sm:$0xff]  }
 0x670   :  { %10816 = vmatpush3.bf16.msra.mxu0 %v11394_v29  ;;  %v11434_v29 = vld [vmem:[%s15646_s14 + $0x248] sm:$0xff]  }
 0x671   :  { %10817 = vmatprep.subr.bf16.mxu0 %v11397_v30  ;;  %v11396_v30 = vld [vmem:[%s15646_s14 + $0x90] sm:$0xff]  }
 0x674   :  { %10818 = vmatpush3.bf16.msra.mxu0 %v11398_v34  ;;  %v11399_v34 = vld [vmem:[%s15646_s14 + $0xc8] sm:$0xff]  }
 0x675   :  { %v2549_v45 = vpop.f32.mrf.mxu1  ;;  %10819 = vmatprep.subr.bf16.mxu0 %v11401_v35  ;;  %v11435_v35 = vld [vmem:[%s15646_s14 + $0x208] sm:$0xff]  }
 0x676   :  { %v2550_v49 = vadd.f32 %v2549_v45, %v1274_v16  ;;  %v11438_v16 = vld [vmem:[%s15646_s14 + $0x240] sm:$0xff]   ;;  %v3884_v45 = vcombine.high %v13532_v36, %v13532_v36 }
 0x677   :  { %v2551_v50 = vpop.f32.mrf.mxu1 }
 0x678   :  { %v2591_v57 = vadd.f32 %v2590_v54, %v2550_v49  ;;  %v2552_v58 = vadd.f32 %v2551_v50, %v1278_v44  ;;  %10820 = vmatpush3.bf16.msra.mxu0 %v11402_v42  ;;  %v3866_v54 = vcombine.high %v13313_v47, %v13313_v47  ;;  %v11418_v47 = vld [vmem:[%s15646_s14 + $0x268] sm:$0xff]   ;;  %v11439_v44 = vld [vmem:[%s15646_s14 + $0x200] sm:$0xff]   ;;  %v11407_v50 = vld [vmem:[%s15646_s14 + $0x1f8] sm:$0xff]  }
 0x679   :  { %v2553_v59 = vpop.f32.mrf.mxu1  ;;  %10821 = vmatprep.subr.bf16.mxu0 %v11405_v48  ;;  %v11400_v42 = vld [vmem:[%s15646_s14 + $0x88] sm:$0xff]   ;;  %v11442_v48 = vld [vmem:[%s15646_s14 + $0x378] sm:$0xff]   ;;  %v11404_v49 = vld [vmem:[%s15646_s14 + $0x80] sm:$0xff]  }
 0x67a   :  { %v2593_v62 = vadd.f32 %v13348_v12, %v2552_v58  ;;  %v2603_v1 = vmax.f32 %v2591_v57, 0.0  ;;  %v13463_v12 = vrot.slane %v3883_v5, %v13272_v24  ;;  %v11443_v57 = vld [vmem:[%s15646_s14 + $0x338] sm:$0xff]   ;;  %v13565_v58 = vrot.slane %v3884_v45, %v13272_v24 }
 0x67b   :  { %v2554_v2 = vpop.f32.mrf.mxu1  ;;  %v3864_v59 = vcombine.high %v13368_v19, %v13368_v19  ;;  %v11447_v19 = vld [vmem:[%s15646_s14 + $0x330] sm:$0xff]  }
 0x67c   :  { %v2604_v6 = vmax.f32 %v2593_v62, 0.0  ;;  %10822 = vmatpush3.bf16.msra.mxu0 %v11406_v52  ;;  %v2611_v55 = vpack.c.bf16 %v2603_v1, %v2603_v1  ;;  %v13559_v52 = vrot.slane %v13436_v53, %v13272_v24  ;;  %v11408_v53 = vld [vmem:[%s15646_s14 + $0x1b8] sm:$0xff]   ;;  %v3867_v62 = vcombine.high %v13374_v21, %v13374_v21  ;;  %v11412_v2 = vld [vmem:[%s15646_s14 + $0x1f0] sm:$0xff]   ;;  %v11450_v21 = vld [vmem:[%s15646_s14 + $0x368] sm:$0xff]  }
 0x67d   :  { %10851 = vmatprep.subr.bf16.mxu0 %v11410_v46  ;;  %v11446_v46 = vld [vmem:[%s15646_s14 + $0x370] sm:$0xff]  }
 0x67e   :  { %v2612_v41 = vpack.c.bf16 %v2604_v6, %v2604_v6 }
 0x67f   :  { %5696 = vmatmul.mubr.bf16.vlgmr.msra.gmra.mxu0 %v13443_v4 }
 0x680   :  { %3284 = vmatprep.mubr.bf16.mxu1 %v2612_v41  ;;  %10852 = vmatpush3.bf16.msra.mxu0 %v11411_v7  ;;  %v11413_v7 = vld [vmem:[%s15646_s14 + $0x1b0] sm:$0xff]  }
 0x681   :  { %3285 = vmatmul.mubr.bf16.vlgmr.msra.gmra.mxu1 %v2611_v55  ;;  %10853 = vmatprep.subr.bf16.mxu0 %v11414_v9  ;;  %v11416_v9 = vld [vmem:[%s15646_s14 + $0x1e8] sm:$0xff]   ;;  %v11454_v55 = vld [vmem:[%s15646_s14 + $0x360] sm:$0xff]  }
 0x682   :  { %10786 = vmatpush3.bf16.msra.mxu1 %v11376_v10  ;;  %5655 = vmatprep.mubr.bf16.mxu1 %v3866_v54  ;;  %v11451_v10 = vld [vmem:[%s15646_s14 + $0x328] sm:$0xff]  }
 0x683   :  { %10787 = vmatprep.subr.bf16.mxu1 %v11379_v56  ;;  %5775 = vmatprep.mubr.bf16.mxu0 %v13463_v12  ;;  %v11417_v56 = vld [vmem:[%s15646_s14 + $0x1a8] sm:$0xff]  }
 0x684   :  { %10854 = vmatpush3.bf16.msra.mxu0 %v11415_v13  ;;  %v11420_v13 = vld [vmem:[%s15646_s14 + $0x1e0] sm:$0xff]  }
 0x685   :  { %10855 = vmatprep.subr.bf16.mxu0 %v11418_v47  ;;  %v11455_v47 = vld [vmem:[%s15646_s14 + $0x320] sm:$0xff]  }
 0x686   :  { %10788 = vmatpush3.bf16.msra.mxu1 %v11380_v14  ;;  %v11458_v14 = vld [vmem:[%s15646_s14 + $0x358] sm:$0xff]  }
 0x687   :  { %10789 = vmatprep.subr.bf16.mxu1 %v11383_v15  ;;  %v11421_v15 = vld [vmem:[%s15646_s14 + $0x1a0] sm:$0xff]  }
 0x688   :  { %10856 = vmatpush3.bf16.msra.mxu0 %v11419_v63  ;;  %v11424_v63 = vld [vmem:[%s15646_s14 + $0x1d8] sm:$0xff]  }
 0x689   :  { %10857 = vmatprep.subr.bf16.mxu0 %v11422_v61  ;;  %v11459_v61 = vld [vmem:[%s15646_s14 + $0x318] sm:$0xff]  }
 0x68a   :  { %10790 = vmatpush3.bf16.msra.mxu1 %v11384_v11  ;;  %v11425_v11 = vld [vmem:[%s15646_s14 + $0x198] sm:$0xff]  }
 0x68b   :  { %10791 = vmatprep.subr.bf16.mxu1 %v11387_v51  ;;  %v11462_v51 = vld [vmem:[%s15646_s14 + $0x350] sm:$0xff]  }
 0x68c   :  { %10858 = vmatpush3.bf16.msra.mxu0 %v11423_v8  ;;  %v11428_v8 = vld [vmem:[%s15646_s14 + $0x1d0] sm:$0xff]  }
 0x68d   :  { %10859 = vmatprep.subr.bf16.mxu0 %v11426_v17  ;;  %v11463_v17 = vld [vmem:[%s15646_s14 + $0x310] sm:$0xff]  }
 0x68e   :  { %10792 = vmatpush3.bf16.msra.mxu1 %v11388_v0  ;;  %v11466_v0 = vld [vmem:[%s15646_s14 + $0x348] sm:$0xff]  }
 0x68f   :  { %10793 = vmatprep.subr.bf16.mxu1 %v11391_v22  ;;  %v13641_v22 = vld [vmem:[%s15647_s3 + $0x10] sm:$0xff] }
 0x690   :  { %10860 = vmatpush3.bf16.msra.mxu0 %v11427_v23  ;;  %v11429_v23 = vld [vmem:[%s15646_s14 + $0x190] sm:$0xff]  }
 0x691   :  { %10861 = vmatprep.subr.bf16.mxu0 %v11430_v26  ;;  %v11432_v26 = vld [vmem:[%s15646_s14 + $0x1c8] sm:$0xff]  }
 0x692   :  { %10794 = vmatpush3.bf16.msra.mxu1 %v11392_v25  ;;  %v11467_v25 = vld [vmem:[%s15646_s14 + $0x308] sm:$0xff]  }
 0x693   :  { %10795 = vmatprep.subr.bf16.mxu1 %v11395_v27  ;;  %v13654_v27 = vrot.slane %v13641_v22, %v13272_v24 }
 0x694   :  { %10862 = vmatpush3.bf16.msra.mxu0 %v11431_v28  ;;  %v11470_v28 = vld [vmem:[%s15646_s14 + $0x340] sm:$0xff]  }
 0x695   :  { %10863 = vmatprep.subr.bf16.mxu0 %v11434_v29  ;;  %v11436_v29 = vld [vmem:[%s15646_s14 + $0x1c0] sm:$0xff]  }
 0x696   :  { %10796 = vmatpush3.bf16.msra.mxu1 %v11396_v30  ;;  %v11471_v30 = vld [vmem:[%s15646_s14 + $0x300] sm:$0xff]  }
 0x697   :  { %10797 = vmatprep.subr.bf16.mxu1 %v11399_v34  ;;  %v3932_v34 = vcombine.high %v13654_v27, %v13654_v27 }
 0x698   :  { %10864 = vmatpush3.bf16.msra.mxu0 %v11435_v35  ;;  %v11475_v35 = vld [vmem:[%s15646_s14 + $0x478] sm:$0xff]  }
 0x699   :  { %10865 = vmatprep.subr.bf16.mxu0 %v11438_v16  ;;  %v11437_v16 = vld [vmem:[%s15646_s14 + $0x180] sm:$0xff]   ;;  %v13687_v45 = vrot.slane %v3932_v34, %v13272_v24  ;;  %v11477_v34 = vld [vmem:[%s15646_s14 + $0x3f0] sm:$0xff]  }
 0x69a   :  { %10798 = vmatpush3.bf16.msra.mxu1 %v11400_v42  ;;  %v11440_v42 = vld [vmem:[%s15646_s14 + $0x2f8] sm:$0xff]  }
 0x69b   :  { %10799 = vmatprep.subr.bf16.mxu1 %v11403_v43  ;;  %v13681_v43 = vrot.slane %v13532_v36, %v13272_v24  ;;  %v11441_v36 = vld [vmem:[%s15646_s14 + $0x2b8] sm:$0xff]  }
 0x69c   :  { %10866 = vmatpush3.bf16.msra.mxu0 %v11439_v44  ;;  %v11476_v44 = vld [vmem:[%s15646_s14 + $0x438] sm:$0xff]  }
 0x69d   :  { %10895 = vmatprep.subr.bf16.mxu0 %v11442_v48  ;;  %v3865_v48 = vcombine.high %v13443_v4, %v13443_v4  ;;  %v11480_v4 = vld [vmem:[%s15646_s14 + $0x430] sm:$0xff]  }
 0x69e   :  { %10800 = vmatpush3.bf16.msra.mxu1 %v11404_v49  ;;  %v11479_v49 = vld [vmem:[%s15646_s14 + $0x470] sm:$0xff]  }
 0x69f   :  { %v10691_v1 = vpop.f32.mrf.mxu0  ;;  %10829 = vmatprep.subr.bf16.mxu1 %v11407_v50  ;;  %5776 = vmatmul.mubr.bf16.vlgmr.msra.gmra.mxu0 %v13559_v52  ;;  %v3915_v50 = vcombine.high %v13463_v12, %v13463_v12  ;;  %v11483_v12 = vld [vmem:[%s15646_s14 + $0x468] sm:$0xff]  }
 0x6a0   :  { %10896 = vmatpush3.bf16.msra.mxu0 %v11443_v57  ;;  %5855 = vmatprep.mubr.bf16.mxu0 %v13565_v58  ;;  %v11444_v57 = vld [vmem:[%s15646_s14 + $0x2f0] sm:$0xff]  }
 0x6a1   :  { %5656 = vmatmul.mubr.bf16.vlgmr.msra.gmra.mxu1 %v3864_v59  ;;  %v10692_v5 = vpop.f32.mrf.mxu0  ;;  %10897 = vmatprep.subr.bf16.mxu0 %v11446_v46  ;;  %v11445_v59 = vld [vmem:[%s15646_s14 + $0x2b0] sm:$0xff]   ;;  %v11448_v46 = vld [vmem:[%s15646_s14 + $0x2e8] sm:$0xff]  }
 0x6a2   :  { %10830 = vmatpush3.bf16.msra.mxu1 %v11408_v53  ;;  %v13588_v6 = vadd.f32 %v10692_v5, %v10691_v1  ;;  %5735 = vmatprep.mubr.bf16.mxu1 %v3867_v62  ;;  %v11484_v53 = vld [vmem:[%s15646_s14 + $0x428] sm:$0xff]   ;;  %v11487_v62 = vld [vmem:[%s15646_s14 + $0x460] sm:$0xff]   ;;  %v11491_v5 = vld [vmem:[%s15646_s14 + $0x458] sm:$0xff]  }
 0x6a3   :  { %v10694_v41 = vpop.f32.mrf.mxu0  ;;  %10831 = vmatprep.subr.bf16.mxu1 %v11412_v2  ;;  %v11449_v1 = vld [vmem:[%s15646_s14 + $0x2a8] sm:$0xff]   ;;  %v11452_v2 = vld [vmem:[%s15646_s14 + $0x2e0] sm:$0xff]  }
 0x6a4   :  { %10898 = vmatpush3.bf16.msra.mxu0 %v11447_v19  ;;  %v11488_v19 = vld [vmem:[%s15646_s14 + $0x420] sm:$0xff]   ;;  %v11495_v41 = vld [vmem:[%s15646_s14 + $0x450] sm:$0xff]  }
 0x6a5   :  { %v10695_v54 = vpop.f32.mrf.mxu0  ;;  %10899 = vmatprep.subr.bf16.mxu0 %v11450_v21  ;;  %v11453_v21 = vld [vmem:[%s15646_s14 + $0x2a0] sm:$0xff]  }
 0x6a6   :  { %10832 = vmatpush3.bf16.msra.mxu1 %v11413_v7  ;;  %v11456_v7 = vld [vmem:[%s15646_s14 + $0x2d8] sm:$0xff]   ;;  %v11460_v54 = vld [vmem:[%s15646_s14 + $0x2d0] sm:$0xff]  }
 0x6a7   :  { %10833 = vmatprep.subr.bf16.mxu1 %v11416_v9  ;;  %v11492_v9 = vld [vmem:[%s15646_s14 + $0x418] sm:$0xff]  }
 0x6a8   :  { %10900 = vmatpush3.bf16.msra.mxu0 %v11451_v10  ;;  %v11457_v10 = vld [vmem:[%s15646_s14 + $0x298] sm:$0xff]  }
 0x6a9   :  { %10901 = vmatprep.subr.bf16.mxu0 %v11454_v55  ;;  %v11496_v55 = vld [vmem:[%s15646_s14 + $0x410] sm:$0xff]  }
 0x6aa   :  { %10834 = vmatpush3.bf16.msra.mxu1 %v11417_v56  ;;  %v3917_v56 = vcombine.high %v13641_v22, %v13641_v22  ;;  %v11469_v22 = vld [vmem:[%s15646_s14 + $0x280] sm:$0xff]  }
 0x6ab   :  { %10835 = vmatprep.subr.bf16.mxu1 %v11420_v13  ;;  %v11499_v13 = vld [vmem:[%s15646_s14 + $0x448] sm:$0xff]  }
 0x6ac   :  { %10902 = vmatpush3.bf16.msra.mxu0 %v11455_v47  ;;  %v11461_v47 = vld [vmem:[%s15646_s14 + $0x290] sm:$0xff]  }
 0x6ad   :  { %10903 = vmatprep.subr.bf16.mxu0 %v11458_v14  ;;  %v11464_v14 = vld [vmem:[%s15646_s14 + $0x2c8] sm:$0xff]  }
 0x6ae   :  { %10836 = vmatpush3.bf16.msra.mxu1 %v11421_v15  ;;  %v11500_v15 = vld [vmem:[%s15646_s14 + $0x408] sm:$0xff]  }
 0x6af   :  { %10837 = vmatprep.subr.bf16.mxu1 %v11424_v63  ;;  %v13770_v63 = vrot.slane %v3917_v56, %v13272_v24  ;;  %v11532_v56 = vld [vmem:[%s15646_s14 + $0x508] sm:$0xff]  }
 0x6b0   :  { %10904 = vmatpush3.bf16.msra.mxu0 %v11459_v61  ;;  %v11503_v61 = vld [vmem:[%s15646_s14 + $0x440] sm:$0xff]  }
 0x6b1   :  { %10905 = vmatprep.subr.bf16.mxu0 %v11462_v51  ;;  %v11468_v51 = vld [vmem:[%s15646_s14 + $0x2c0] sm:$0xff]  }
 0x6b2   :  { %10838 = vmatpush3.bf16.msra.mxu1 %v11425_v11  ;;  %v11465_v11 = vld [vmem:[%s15646_s14 + $0x288] sm:$0xff]  }
 0x6b3   :  { %10839 = vmatprep.subr.bf16.mxu1 %v11428_v8  ;;  %v11504_v8 = vld [vmem:[%s15646_s14 + $0x400] sm:$0xff]  }
 0x6b4   :  { %10906 = vmatpush3.bf16.msra.mxu0 %v11463_v17  ;;  %v3933_v17 = vcombine.high %v13770_v63, %v13770_v63 }
 0x6b5   :  { %10907 = vmatprep.subr.bf16.mxu0 %v11466_v0  ;;  %v11507_v0 = vld [vmem:[%s15646_s14 + $0x578] sm:$0xff]  }
 0x6b6   :  { %10840 = vmatpush3.bf16.msra.mxu1 %v11429_v23  ;;  %v11472_v23 = vld [vmem:[%s15646_s14 + $0x3f8] sm:$0xff]  }
 0x6b7   :  { %10841 = vmatprep.subr.bf16.mxu1 %v11432_v26  ;;  %v13797_v26 = vrot.slane %v13654_v27, %v13272_v24  ;;  %v11474_v27 = vld [vmem:[%s15646_s14 + $0x3b8] sm:$0xff]  }
 0x6b8   :  { %10908 = vmatpush3.bf16.msra.mxu0 %v11467_v25  ;;  %v11508_v25 = vld [vmem:[%s15646_s14 + $0x538] sm:$0xff]  }
 0x6b9   :  { %10909 = vmatprep.subr.bf16.mxu0 %v11470_v28  ;;  %v13803_v28 = vrot.slane %v3933_v17, %v13272_v24  ;;  %v11505_v17 = vld [vmem:[%s15646_s14 + $0x4f8] sm:$0xff]  }
 0x6ba   :  { %10842 = vmatpush3.bf16.msra.mxu1 %v11433_v40  ;;  %v3913_v40 = vcombine.high %v13559_v52, %v13559_v52  ;;  %v11512_v52 = vld [vmem:[%s15646_s14 + $0x530] sm:$0xff]  }
 0x6bb   :  { %10843 = vmatprep.subr.bf16.mxu1 %v11436_v29  ;;  %v11511_v29 = vld [vmem:[%s15646_s14 + $0x570] sm:$0xff]  }
 0x6bc   :  { %10910 = vmatpush3.bf16.msra.mxu0 %v11471_v30  ;;  %v3916_v30 = vcombine.high %v13565_v58, %v13565_v58 }
 0x6bd   :  { %10939 = vmatprep.subr.bf16.mxu0 %v11475_v35  ;;  %v9901_v35 = vld [vmem:[%s15648_s13] ss:$0 sm:$0xff] }
 0x6be   :  { %10844 = vmatpush3.bf16.msra.mxu1 %v11437_v16  ;;  %v11515_v16 = vld [vmem:[%s15646_s14 + $0x568] sm:$0xff]  }
 0x6bf   :  { %10873 = vmatprep.subr.bf16.mxu1 %v11440_v42  ;;  %5856 = vmatmul.mubr.bf16.vlgmr.msra.gmra.mxu0 %v13681_v43  ;;  %v11478_v42 = vld [vmem:[%s15646_s14 + $0x3b0] sm:$0xff]  }
 0x6c0   :  { %10940 = vmatpush3.bf16.msra.mxu0 %v11476_v44  ;;  %5935 = vmatprep.mubr.bf16.mxu0 %v13687_v45 }
 0x6c1   :  { %5736 = vmatmul.mubr.bf16.vlgmr.msra.gmra.mxu1 %v3865_v48  ;;  %10941 = vmatprep.subr.bf16.mxu0 %v11479_v49  ;;  %v11481_v48 = vld [vmem:[%s15646_s14 + $0x3e8] sm:$0xff]   ;;  %v3167_v49 = vadd.f32 %v13588_v6, %v9901_v35  ;;  %v11510_v35 = vld [vmem:[%s15646_s14 + $0x4b0] sm:$0xff]  }
 0x6c2   :  { %10874 = vmatpush3.bf16.msra.mxu1 %v11441_v36  ;;  %5815 = vmatprep.mubr.bf16.mxu1 %v3915_v50  ;;  %v11516_v50 = vld [vmem:[%s15646_s14 + $0x528] sm:$0xff]  }
 0x6c3   :  { %10875 = vmatprep.subr.bf16.mxu1 %v11444_v57 }
 0x6c4   :  { %10942 = vmatpush3.bf16.msra.mxu0 %v11480_v4  ;;  %v11519_v4 = vld [vmem:[%s15646_s14 + $0x560] sm:$0xff]  }
 0x6c5   :  { %10943 = vmatprep.subr.bf16.mxu0 %v11483_v12 }
 0x6c6   :  { %10876 = vmatpush3.bf16.msra.mxu1 %v11445_v59  ;;  %v11482_v59 = vld [vmem:[%s15646_s14 + $0x3a8] sm:$0xff]  }
 0x6c7   :  { %10877 = vmatprep.subr.bf16.mxu1 %v11448_v46  ;;  %v11485_v46 = vld [vmem:[%s15646_s14 + $0x3e0] sm:$0xff]  }
 0x6c8   :  { %10944 = vmatpush3.bf16.msra.mxu0 %v11484_v53  ;;  %v11520_v53 = vld [vmem:[%s15646_s14 + $0x520] sm:$0xff]  }
 0x6c9   :  { %10945 = vmatprep.subr.bf16.mxu0 %v11487_v62  ;;  %v11523_v62 = vld [vmem:[%s15646_s14 + $0x558] sm:$0xff]  }
 0x6ca   :  { %10878 = vmatpush3.bf16.msra.mxu1 %v11449_v1  ;;  %v11486_v1 = vld [vmem:[%s15646_s14 + $0x3a0] sm:$0xff]  }
 0x6cb   :  { %10879 = vmatprep.subr.bf16.mxu1 %v11452_v2  ;;  %v11489_v2 = vld [vmem:[%s15646_s14 + $0x3d8] sm:$0xff]  }
 0x6cc   :  { %10946 = vmatpush3.bf16.msra.mxu0 %v11488_v19  ;;  %v11524_v19 = vld [vmem:[%s15646_s14 + $0x518] sm:$0xff]  }
 0x6cd   :  { %10947 = vmatprep.subr.bf16.mxu0 %v11491_v5  ;;  %v11527_v5 = vld [vmem:[%s15646_s14 + $0x550] sm:$0xff]  }
 0x6ce   :  { %10880 = vmatpush3.bf16.msra.mxu1 %v11453_v21  ;;  %v11490_v21 = vld [vmem:[%s15646_s14 + $0x398] sm:$0xff]  }
 0x6cf   :  { %10881 = vmatprep.subr.bf16.mxu1 %v11456_v7  ;;  %v11493_v7 = vld [vmem:[%s15646_s14 + $0x3d0] sm:$0xff]  }
 0x6d0   :  { %10948 = vmatpush3.bf16.msra.mxu0 %v11492_v9  ;;  %v11528_v9 = vld [vmem:[%s15646_s14 + $0x510] sm:$0xff]  }
 0x6d1   :  { %10949 = vmatprep.subr.bf16.mxu0 %v11495_v41  ;;  %v11531_v41 = vld [vmem:[%s15646_s14 + $0x548] sm:$0xff]  }
 0x6d2   :  { %10882 = vmatpush3.bf16.msra.mxu1 %v11457_v10  ;;  %v13883_v10 = vld [vmem:[%s15647_s3 + $0x18] sm:$0xff] }
 0x6d3   :  { %10883 = vmatprep.subr.bf16.mxu1 %v11460_v54  ;;  %v11494_v54 = vld [vmem:[%s15646_s14 + $0x390] sm:$0xff]  }
 0x6d4   :  { %10950 = vmatpush3.bf16.msra.mxu0 %v11496_v55  ;;  %v11497_v55 = vld [vmem:[%s15646_s14 + $0x3c8] sm:$0xff]  }
 0x6d5   :  { %10951 = vmatprep.subr.bf16.mxu0 %v11499_v13  ;;  %v13896_v13 = vrot.slane %v13883_v10, %v13272_v24 }
 0x6d6   :  { %10884 = vmatpush3.bf16.msra.mxu1 %v11461_v47  ;;  %v11535_v47 = vld [vmem:[%s15646_s14 + $0x540] sm:$0xff]  }
 0x6d7   :  { %10885 = vmatprep.subr.bf16.mxu1 %v11464_v14  ;;  %v11498_v14 = vld [vmem:[%s15646_s14 + $0x388] sm:$0xff]  }
 0x6d8   :  { %10952 = vmatpush3.bf16.msra.mxu0 %v11500_v15  ;;  %v11501_v15 = vld [vmem:[%s15646_s14 + $0x3c0] sm:$0xff]  }
 0x6d9   :  { %10953 = vmatprep.subr.bf16.mxu0 %v11503_v61  ;;  %v11536_v61 = vld [vmem:[%s15646_s14 + $0x500] sm:$0xff]  }
 0x6da   :  { %10886 = vmatpush3.bf16.msra.mxu1 %v11465_v11  ;;  %v3981_v11 = vcombine.high %v13896_v13, %v13896_v13 }
 0x6db   :  { %10887 = vmatprep.subr.bf16.mxu1 %v11468_v51  ;;  %v11540_v51 = vld [vmem:[%s15646_s14 + $0x678] sm:$0xff]  }
 0x6dc   :  { %10954 = vmatpush3.bf16.msra.mxu0 %v11504_v8  ;;  %v11502_v8 = vld [vmem:[%s15646_s14 + $0x380] sm:$0xff]  }
 0x6dd   :  { %10983 = vmatprep.subr.bf16.mxu0 %v11507_v0  ;;  %v13923_v0 = vrot.slane %v13770_v63, %v13272_v24  ;;  %v11506_v63 = vld [vmem:[%s15646_s14 + $0x4b8] sm:$0xff]  }
 0x6de   :  { %10888 = vmatpush3.bf16.msra.mxu1 %v11469_v22  ;;  %v11541_v22 = vld [vmem:[%s15646_s14 + $0x638] sm:$0xff]  }
 0x6df   :  { %10917 = vmatprep.subr.bf16.mxu1 %v11472_v23  ;;  %5936 = vmatmul.mubr.bf16.vlgmr.msra.gmra.mxu0 %v13797_v26  ;;  %v13929_v23 = vrot.slane %v3981_v11, %v13272_v24  ;;  %v11573_v11 = vld [vmem:[%s15646_s14 + $0x738] sm:$0xff]  }
 0x6e0   :  { %10984 = vmatpush3.bf16.msra.mxu0 %v11508_v25  ;;  %6015 = vmatprep.mubr.bf16.mxu0 %v13803_v28  ;;  %v3914_v25 = vcombine.high %v13681_v43, %v13681_v43  ;;  %v11545_v43 = vld [vmem:[%s15646_s14 + $0x630] sm:$0xff]  }
 0x6e1   :  { %5816 = vmatmul.mubr.bf16.vlgmr.msra.gmra.mxu1 %v3913_v40  ;;  %v10713_v58 = vpop.f32.mrf.mxu1  ;;  %10985 = vmatprep.subr.bf16.mxu0 %v11511_v29  ;;  %v11544_v40 = vld [vmem:[%s15646_s14 + $0x670] sm:$0xff]   ;;  %v3964_v29 = vcombine.high %v13687_v45, %v13687_v45  ;;  %v11548_v45 = vld [vmem:[%s15646_s14 + $0x668] sm:$0xff]  }
 0x6e2   :  { %10918 = vmatpush3.bf16.msra.mxu1 %v11474_v27  ;;  %5895 = vmatprep.mubr.bf16.mxu1 %v3916_v30  ;;  %v11509_v30 = vld [vmem:[%s15646_s14 + $0x4f0] sm:$0xff]  }
 0x6e3   :  { %v10714_v44 = vpop.f32.mrf.mxu1  ;;  %10919 = vmatprep.subr.bf16.mxu1 %v11477_v34 }
 0x6e4   :  { %v10715_v36 = vadd.f32 %v10714_v44, %v10713_v58  ;;  %10986 = vmatpush3.bf16.msra.mxu0 %v11512_v52  ;;  %v11549_v44 = vld [vmem:[%s15646_s14 + $0x628] sm:$0xff]  }
 0x6e5   :  { %v10716_v57 = vpop.f32.mrf.mxu1  ;;  %10987 = vmatprep.subr.bf16.mxu0 %v11515_v16  ;;  %v11513_v16 = vld [vmem:[%s15646_s14 + $0x4e8] sm:$0xff]  }
 0x6e6   :  { %v13842_v12 = vadd.f32 %v10715_v36, %v3167_v49  ;;  %10920 = vmatpush3.bf16.msra.mxu1 %v11478_v42  ;;  %v11552_v49 = vld [vmem:[%s15646_s14 + $0x660] sm:$0xff]   ;;  %v11514_v36 = vld [vmem:[%s15646_s14 + $0x4a8] sm:$0xff]  }
 0x6e7   :  { %v10717_v6 = vpop.f32.mrf.mxu1  ;;  %10921 = vmatprep.subr.bf16.mxu1 %v11481_v48  ;;  %v11553_v57 = vld [vmem:[%s15646_s14 + $0x620] sm:$0xff]  }
 0x6e8   :  { %10988 = vmatpush3.bf16.msra.mxu0 %v11516_v50  ;;  %v11517_v50 = vld [vmem:[%s15646_s14 + $0x4e0] sm:$0xff]   ;;  %v11557_v6 = vld [vmem:[%s15646_s14 + $0x618] sm:$0xff]  }
 0x6e9   :  { %10989 = vmatprep.subr.bf16.mxu0 %v11519_v4  ;;  %v11556_v4 = vld [vmem:[%s15646_s14 + $0x658] sm:$0xff]  }
 0x6ea   :  { %10922 = vmatpush3.bf16.msra.mxu1 %v11482_v59  ;;  %v11521_v59 = vld [vmem:[%s15646_s14 + $0x4d8] sm:$0xff]  }
 0x6eb   :  { %10923 = vmatprep.subr.bf16.mxu1 %v11485_v46  ;;  %v11560_v46 = vld [vmem:[%s15646_s14 + $0x650] sm:$0xff]  }
 0x6ec   :  { %10990 = vmatpush3.bf16.msra.mxu0 %v11520_v53  ;;  %v11522_v53 = vld [vmem:[%s15646_s14 + $0x498] sm:$0xff]  }
 0x6ed   :  { %10991 = vmatprep.subr.bf16.mxu0 %v11523_v62  ;;  %v11525_v62 = vld [vmem:[%s15646_s14 + $0x4d0] sm:$0xff]  }
 0x6ee   :  { %10924 = vmatpush3.bf16.msra.mxu1 %v11486_v1  ;;  %v11561_v1 = vld [vmem:[%s15646_s14 + $0x610] sm:$0xff]  }
 0x6ef   :  { %10925 = vmatprep.subr.bf16.mxu1 %v11489_v2  ;;  %v3966_v2 = vcombine.high %v13883_v10, %v13883_v10  ;;  %v11530_v10 = vld [vmem:[%s15646_s14 + $0x488] sm:$0xff]  }
 0x6f0   :  { %10992 = vmatpush3.bf16.msra.mxu0 %v11524_v19  ;;  %v11564_v19 = vld [vmem:[%s15646_s14 + $0x648] sm:$0xff]  }
 0x6f1   :  { %10993 = vmatprep.subr.bf16.mxu0 %v11527_v5  ;;  %v11526_v5 = vld [vmem:[%s15646_s14 + $0x490] sm:$0xff]  }
 0x6f2   :  { %10926 = vmatpush3.bf16.msra.mxu1 %v11490_v21  ;;  %v11529_v21 = vld [vmem:[%s15646_s14 + $0x4c8] sm:$0xff]  }
 0x6f3   :  { %10927 = vmatprep.subr.bf16.mxu1 %v11493_v7  ;;  %v11565_v7 = vld [vmem:[%s15646_s14 + $0x608] sm:$0xff]  }
 0x6f4   :  { %10994 = vmatpush3.bf16.msra.mxu0 %v11528_v9  ;;  %v14015_v9 = vrot.slane %v3966_v2, %v13272_v24  ;;  %v11566_v2 = vld [vmem:[%s15646_s14 + $0x5c0] sm:$0xff]  }
 0x6f5   :  { %10995 = vmatprep.subr.bf16.mxu0 %v11531_v41  ;;  %v11568_v41 = vld [vmem:[%s15646_s14 + $0x640] sm:$0xff]  }
 0x6f6   :  { %10928 = vmatpush3.bf16.msra.mxu1 %v11494_v54  ;;  %v11533_v54 = vld [vmem:[%s15646_s14 + $0x4c0] sm:$0xff]  }
 0x6f7   :  { %10929 = vmatprep.subr.bf16.mxu1 %v11497_v55  ;;  %v11569_v55 = vld [vmem:[%s15646_s14 + $0x600] sm:$0xff]  }
 0x6f8   :  { %10996 = vmatpush3.bf16.msra.mxu0 %v11532_v56  ;;  %v3982_v56 = vcombine.high %v14015_v9, %v14015_v9 }
 0x6f9   :  { %10997 = vmatprep.subr.bf16.mxu0 %v11535_v47  ;;  %v11572_v47 = vld [vmem:[%s15646_s14 + $0x778] sm:$0xff]  }
 0x6fa   :  { %10930 = vmatpush3.bf16.msra.mxu1 %v11498_v14  ;;  %v11534_v14 = vld [vmem:[%s15646_s14 + $0x480] sm:$0xff]  }
 0x6fb   :  { %10931 = vmatprep.subr.bf16.mxu1 %v11501_v15  ;;  %v11537_v15 = vld [vmem:[%s15646_s14 + $0x5f8] sm:$0xff]  }
 0x6fc   :  { %10998 = vmatpush3.bf16.msra.mxu0 %v11536_v61  ;;  %v14042_v61 = vrot.slane %v13896_v13, %v13272_v24  ;;  %v11539_v13 = vld [vmem:[%s15646_s14 + $0x5b8] sm:$0xff]  }
 0x6fd   :  { %11027 = vmatprep.subr.bf16.mxu0 %v11540_v51  ;;  %v14048_v51 = vrot.slane %v3982_v56, %v13272_v24  ;;  %v11575_v56 = vld [vmem:[%s15646_s14 + $0x6b0] sm:$0xff]  }
 0x6fe   :  { %10932 = vmatpush3.bf16.msra.mxu1 %v11502_v8  ;;  %v3962_v8 = vcombine.high %v13797_v26, %v13797_v26 }
 0x6ff   :  { %v10735_v27 = vpop.f32.mrf.mxu0  ;;  %10961 = vmatprep.subr.bf16.mxu1 %v11505_v17  ;;  %6016 = vmatmul.mubr.bf16.vlgmr.msra.gmra.mxu0 %v13923_v0  ;;  %v11576_v17 = vld [vmem:[%s15646_s14 + $0x770] sm:$0xff]  }
 0x700   :  { %11028 = vmatpush3.bf16.msra.mxu0 %v11541_v22  ;;  %6095 = vmatprep.mubr.bf16.mxu0 %v13929_v23  ;;  %v3965_v22 = vcombine.high %v13803_v28, %v13803_v28  ;;  %v11580_v28 = vld [vmem:[%s15646_s14 + $0x768] sm:$0xff]  }
 0x701   :  { %5896 = vmatmul.mubr.bf16.vlgmr.msra.gmra.mxu1 %v3914_v25  ;;  %v10736_v34 = vpop.f32.mrf.mxu0  ;;  %11029 = vmatprep.subr.bf16.mxu0 %v11544_v40  ;;  %v11542_v25 = vld [vmem:[%s15646_s14 + $0x5f0] sm:$0xff]  }
 0x702   :  { %v10737_v52 = vadd.f32 %v10736_v34, %v10735_v27  ;;  %10962 = vmatpush3.bf16.msra.mxu1 %v11506_v63  ;;  %5975 = vmatprep.mubr.bf16.mxu1 %v3964_v29  ;;  %v11577_v40 = vld [vmem:[%s15646_s14 + $0x730] sm:$0xff]   ;;  %v11581_v34 = vld [vmem:[%s15646_s14 + $0x728] sm:$0xff]  }
 0x703   :  { %v10738_v58 = vpop.f32.mrf.mxu0  ;;  %10963 = vmatprep.subr.bf16.mxu1 %v11509_v30  ;;  %v11543_v29 = vld [vmem:[%s15646_s14 + $0x5b0] sm:$0xff]   ;;  %v11546_v30 = vld [vmem:[%s15646_s14 + $0x5e8] sm:$0xff]  }
 0x704   :  { %v13959_v42 = vadd.f32 %v10737_v52, %v13842_v12  ;;  %11030 = vmatpush3.bf16.msra.mxu0 %v11545_v43  ;;  %v11518_v12 = vld [vmem:[%s15646_s14 + $0x4a0] sm:$0xff]  }
 0x705   :  { %v10739_v48 = vpop.f32.mrf.mxu0  ;;  %11031 = vmatprep.subr.bf16.mxu0 %v11548_v45  ;;  %v11584_v45 = vld [vmem:[%s15646_s14 + $0x760] sm:$0xff]  }
 0x706   :  { %10964 = vmatpush3.bf16.msra.mxu1 %v11510_v35  ;;  %v11547_v35 = vld [vmem:[%s15646_s14 + $0x5a8] sm:$0xff]   ;;  %v11550_v58 = vld [vmem:[%s15646_s14 + $0x5e0] sm:$0xff]  }
 0x707   :  { %10965 = vmatprep.subr.bf16.mxu1 %v11513_v16  ;;  %v11585_v16 = vld [vmem:[%s15646_s14 + $0x720] sm:$0xff]  }
 0x708   :  { %11032 = vmatpush3.bf16.msra.mxu0 %v11549_v44  ;;  %v11588_v44 = vld [vmem:[%s15646_s14 + $0x758] sm:$0xff]   ;;  %v11551_v48 = vld [vmem:[%s15646_s14 + $0x5a0] sm:$0xff]  }
 0x709   :  { %11033 = vmatprep.subr.bf16.mxu0 %v11552_v49  ;;  %v11554_v49 = vld [vmem:[%s15646_s14 + $0x5d8] sm:$0xff]  }
 0x70a   :  { %10966 = vmatpush3.bf16.msra.mxu1 %v11514_v36  ;;  %v11589_v36 = vld [vmem:[%s15646_s14 + $0x718] sm:$0xff]  }
 0x70b   :  { %10967 = vmatprep.subr.bf16.mxu1 %v11517_v50  ;;  %v11592_v50 = vld [vmem:[%s15646_s14 + $0x750] sm:$0xff]  }
 0x70c   :  { %11034 = vmatpush3.bf16.msra.mxu0 %v11553_v57  ;;  %v11555_v57 = vld [vmem:[%s15646_s14 + $0x598] sm:$0xff]  }
 0x70d   :  { %11035 = vmatprep.subr.bf16.mxu0 %v11556_v4  ;;  %v11558_v4 = vld [vmem:[%s15646_s14 + $0x5d0] sm:$0xff]  }
 0x70e   :  { %10968 = vmatpush3.bf16.msra.mxu1 %v11518_v12  ;;  %v11593_v12 = vld [vmem:[%s15646_s14 + $0x710] sm:$0xff]  }
 0x70f   :  { %10969 = vmatprep.subr.bf16.mxu1 %v11521_v59  ;;  %v11596_v59 = vld [vmem:[%s15646_s14 + $0x748] sm:$0xff]  }
 0x710   :  { %11036 = vmatpush3.bf16.msra.mxu0 %v11557_v6  ;;  %v11559_v6 = vld [vmem:[%s15646_s14 + $0x590] sm:$0xff]  }
 0x711   :  { %11037 = vmatprep.subr.bf16.mxu0 %v11560_v46  ;;  %v11562_v46 = vld [vmem:[%s15646_s14 + $0x5c8] sm:$0xff]  }
 0x712   :  { %10970 = vmatpush3.bf16.msra.mxu1 %v11522_v53  ;;  %v11597_v53 = vld [vmem:[%s15646_s14 + $0x708] sm:$0xff]  }
 0x713   :  { %10971 = vmatprep.subr.bf16.mxu1 %v11525_v62  ;;  %v11600_v62 = vld [vmem:[%s15646_s14 + $0x740] sm:$0xff]  }
 0x714   :  { %11038 = vmatpush3.bf16.msra.mxu0 %v11561_v1  ;;  %v11563_v1 = vld [vmem:[%s15646_s14 + $0x588] sm:$0xff]  }
 0x715   :  { %11039 = vmatprep.subr.bf16.mxu0 %v11564_v19  ;;  %v11601_v19 = vld [vmem:[%s15646_s14 + $0x700] sm:$0xff]  }
 0x716   :  { %10972 = vmatpush3.bf16.msra.mxu1 %v11526_v5  ;;  %v11567_v5 = vld [vmem:[%s15646_s14 + $0x580] sm:$0xff]  }
 0x717   :  { %10973 = vmatprep.subr.bf16.mxu1 %v11529_v21  ;;  %v11570_v21 = vld [vmem:[%s15646_s14 + $0x6f8] sm:$0xff]  }
 0x718   :  { %11040 = vmatpush3.bf16.msra.mxu0 %v11565_v7  ;;  %v14150_v7 = vrot.slane %v14015_v9, %v13272_v24 }
 0x719   :  { %11041 = vmatprep.subr.bf16.mxu0 %v11568_v41  ;;  %v3963_v41 = vcombine.high %v13923_v0, %v13923_v0 }
 0x71a   :  { %10974 = vmatpush3.bf16.msra.mxu1 %v11530_v10  ;;  %v11571_v10 = vld [vmem:[%s15646_s14 + $0x6b8] sm:$0xff]  }
 0x71b   :  { %10975 = vmatprep.subr.bf16.mxu1 %v11533_v54  ;;  %v4013_v54 = vcombine.high %v13929_v23, %v13929_v23 }
 0x71c   :  { %11042 = vmatpush3.bf16.msra.mxu0 %v11569_v55  ;;  %v11574_v55 = vld [vmem:[%s15646_s14 + $0x6f0] sm:$0xff]  }
 0x71d   :  { %11071 = vmatprep.subr.bf16.mxu0 %v11572_v47 }
 0x71e   :  { %10976 = vmatpush3.bf16.msra.mxu1 %v11534_v14  ;;  %v11578_v14 = vld [vmem:[%s15646_s14 + $0x6e8] sm:$0xff]  }
 0x71f   :  { %11005 = vmatprep.subr.bf16.mxu1 %v11537_v15  ;;  %6096 = vmatmul.mubr.bf16.vlgmr.msra.gmra.mxu0 %v14042_v61  ;;  %v10779_v26 = vpop.f32.mrf.mxu0 }
 0x720   :  { %11072 = vmatpush3.bf16.msra.mxu0 %v11573_v11  ;;  %6175 = vmatprep.mubr.bf16.mxu0 %v14048_v51 }
 0x721   :  { %5976 = vmatmul.mubr.bf16.vlgmr.msra.gmra.mxu1 %v3962_v8  ;;  %11073 = vmatprep.subr.bf16.mxu0 %v11576_v17  ;;  %v10780_v63 = vpop.f32.mrf.mxu0 }
 0x722   :  { %11006 = vmatpush3.bf16.msra.mxu1 %v11539_v13  ;;  %6055 = vmatprep.mubr.bf16.mxu1 %v3965_v22  ;;  %v14074_v27 = vadd.f32 %v10780_v63, %v10779_v26  ;;  %v11579_v22 = vld [vmem:[%s15646_s14 + $0x6a8] sm:$0xff]   ;;  %v11582_v26 = vld [vmem:[%s15646_s14 + $0x6e0] sm:$0xff]   ;;  %v11590_v63 = vld [vmem:[%s15646_s14 + $0x6d0] sm:$0xff]  }
 0x723   :  { %11007 = vmatprep.subr.bf16.mxu1 %v11542_v25  ;;  %v10782_v43 = vpop.f32.mrf.mxu0 }
 0x724   :  { %11074 = vmatpush3.bf16.msra.mxu0 %v11577_v40  ;;  %v11583_v40 = vld [vmem:[%s15646_s14 + $0x6a0] sm:$0xff]   ;;  %v11595_v43 = vld [vmem:[%s15646_s14 + $0x688] sm:$0xff]  }
 0x725   :  { %11075 = vmatprep.subr.bf16.mxu0 %v11580_v28  ;;  %v10783_v52 = vpop.f32.mrf.mxu0  ;;  %v11587_v28 = vld [vmem:[%s15646_s14 + $0x698] sm:$0xff]  }
 0x726   :  { %11008 = vmatpush3.bf16.msra.mxu1 %v11543_v29  ;;  %v11591_v29 = vld [vmem:[%s15646_s14 + $0x690] sm:$0xff]   ;;  %v11602_v52 = vld [vmem:[%s15646_s14 + $0x7f8] sm:$0xff]  }
 0x727   :  { %11009 = vmatprep.subr.bf16.mxu1 %v11546_v30  ;;  %v11594_v30 = vld [vmem:[%s15646_s14 + $0x6c8] sm:$0xff]  }
 0x728   :  { %11076 = vmatpush3.bf16.msra.mxu0 %v11581_v34  ;;  %v11598_v34 = vld [vmem:[%s15646_s14 + $0x6c0] sm:$0xff]  }
 0x729   :  { %11077 = vmatprep.subr.bf16.mxu0 %v11584_v45  ;;  %v11599_v45 = vld [vmem:[%s15646_s14 + $0x680] sm:$0xff]  }
 0x72a   :  { %11010 = vmatpush3.bf16.msra.mxu1 %v11547_v35  ;;  %v4011_v35 = vcombine.high %v14042_v61, %v14042_v61 }
 0x72b   :  { %11011 = vmatprep.subr.bf16.mxu1 %v11550_v58  ;;  %v11604_v58 = vld [vmem:[%s15646_s14 + $0x7b8] sm:$0xff]  }
 0x72c   :  { %11078 = vmatpush3.bf16.msra.mxu0 %v11585_v16  ;;  %v4014_v16 = vcombine.high %v14048_v51, %v14048_v51  ;;  %v11606_v51 = vld [vmem:[%s15646_s14 + $0x7b0] sm:$0xff]  }
 0x72d   :  { %11079 = vmatprep.subr.bf16.mxu0 %v11588_v44  ;;  %v9966_v44 = vld [vmem:[%s15649_s15] ss:$0 sm:$0xff] }
 0x72e   :  { %11012 = vmatpush3.bf16.msra.mxu1 %v11551_v48  ;;  %v11605_v48 = vld [vmem:[%s15646_s14 + $0x7f0] sm:$0xff]  }
 0x72f   :  { %11013 = vmatprep.subr.bf16.mxu1 %v11554_v49 }
 0x730   :  { %11080 = vmatpush3.bf16.msra.mxu0 %v11589_v36 }
 0x731   :  { %11081 = vmatprep.subr.bf16.mxu0 %v11592_v50  ;;  %v5618_v50 = vadd.f32 %v14074_v27, %v9966_v44  ;;  %v11608_v27 = vld [vmem:[%s15646_s14 + $0x7a8] sm:$0xff]  }
 0x732   :  { %11014 = vmatpush3.bf16.msra.mxu1 %v11555_v57  ;;  %v6346_v44 = vld [vmem:[%s15650_s17 + $0x1c8] sm:$0xff] }
 0x733   :  { %11015 = vmatprep.subr.bf16.mxu1 %v11558_v4 }
 0x734   :  { %11082 = vmatpush3.bf16.msra.mxu0 %v11593_v12  ;;  %v11607_v12 = vld [vmem:[%s15646_s14 + $0x7e8] sm:$0xff]  }
 0x735   :  { %11083 = vmatprep.subr.bf16.mxu0 %v11596_v59 }
 0x736   :  { %11016 = vmatpush3.bf16.msra.mxu1 %v11559_v6 }
 0x737   :  { %11017 = vmatprep.subr.bf16.mxu1 %v11562_v46 }
 0x738   :  { %11084 = vmatpush3.bf16.msra.mxu0 %v11597_v53 }
 0x739   :  { %11085 = vmatprep.subr.bf16.mxu0 %v11600_v62 }
 0x73a   :  { %11018 = vmatpush3.bf16.msra.mxu1 %v11563_v1 }
 0x73b   :  { %11019 = vmatprep.subr.bf16.mxu1 %v11566_v2  ;;  %v11609_v2 = vld [vmem:[%s15646_s14 + $0x7e0] sm:$0xff]  }
 0x73c   :  { %11086 = vmatpush3.bf16.msra.mxu0 %v11601_v19 }
 0x73e   :  { %11020 = vmatpush3.bf16.msra.mxu1 %v11567_v5  ;;  %v11610_v5 = vld [vmem:[%s15646_s14 + $0x7a0] sm:$0xff]  }
 0x73f   :  { %11049 = vmatprep.subr.bf16.mxu1 %v11570_v21  ;;  %6176 = vmatmul.mubr.bf16.vlgmr.msra.gmra.mxu0 %v14150_v7  ;;  %v10823_v24 = vpop.f32.mrf.mxu0  ;;  %v11611_v21 = vld [vmem:[%s15646_s14 + $0x7d8] sm:$0xff]  }
 0x740   :  { %6705 = vmatprep.mubr.bf16.mxu0 %v12038_v32 }
 0x741   :  { %6056 = vmatmul.mubr.bf16.vlgmr.msra.gmra.mxu1 %v3963_v41  ;;  %v10757_v0 = vpop.f32.mrf.mxu1  ;;  %v10824_v9 = vpop.f32.mrf.mxu0  ;;  %v11612_v41 = vld [vmem:[%s15646_s14 + $0x798] sm:$0xff]  }
 0x742   :  { %11050 = vmatpush3.bf16.msra.mxu1 %v11571_v10  ;;  %6135 = vmatprep.mubr.bf16.mxu1 %v4013_v54  ;;  %v14167_v23 = vadd.f32 %v10824_v9, %v10823_v24  ;;  %v11613_v10 = vld [vmem:[%s15646_s14 + $0x7d0] sm:$0xff]   ;;  %v11616_v24 = vld [vmem:[%s15646_s14 + $0x788] sm:$0xff]   ;;  %v11618_v9 = vld [vmem:[%s15646_s14 + $0x780] sm:$0xff]  }
 0x743   :  { %v10758_v47 = vpop.f32.mrf.mxu1  ;;  %11051 = vmatprep.subr.bf16.mxu1 %v11574_v55  ;;  %v10826_v15 = vpop.f32.mrf.mxu0  ;;  %v11614_v54 = vld [vmem:[%s15646_s14 + $0x790] sm:$0xff]   ;;  %v11615_v55 = vld [vmem:[%s15646_s14 + $0x7c8] sm:$0xff]  }
 0x744   :  { %v10759_v11 = vadd.f32 %v10758_v47, %v10757_v0  ;;  %v11617_v0 = vld [vmem:[%s15646_s14 + $0x7c0] sm:$0xff]  }
 0x745   :  { %v10760_v8 = vpop.f32.mrf.mxu1  ;;  %v10827_v17 = vpop.f32.mrf.mxu0 }
 0x746   :  { %v14173_v13 = vadd.f32 %v10759_v11, %v13959_v42  ;;  %11052 = vmatpush3.bf16.msra.mxu1 %v11575_v56  ;;  %v11586_v42 = vld [vmem:[%s15646_s14 + $0x6d8] sm:$0xff]   ;;  %v4012_v56 = vcombine.high %v14150_v7, %v14150_v7 }
 0x747   :  { %v10761_v25 = vpop.f32.mrf.mxu1  ;;  %11053 = vmatprep.subr.bf16.mxu1 %v11578_v14 }
 0x74a   :  { %11054 = vmatpush3.bf16.msra.mxu1 %v11579_v22 }
 0x74b   :  { %11055 = vmatprep.subr.bf16.mxu1 %v11582_v26 }
 0x74e   :  { %11056 = vmatpush3.bf16.msra.mxu1 %v11583_v40 }
 0x74f   :  { %11057 = vmatprep.subr.bf16.mxu1 %v11586_v42 }
 0x752   :  { %11058 = vmatpush3.bf16.msra.mxu1 %v11587_v28 }
 0x753   :  { %11059 = vmatprep.subr.bf16.mxu1 %v11590_v63 }
 0x756   :  { %11060 = vmatpush3.bf16.msra.mxu1 %v11591_v29 }
 0x757   :  { %11061 = vmatprep.subr.bf16.mxu1 %v11594_v30 }
 0x75a   :  { %11062 = vmatpush3.bf16.msra.mxu1 %v11595_v43 }
 0x75b   :  { %11063 = vmatprep.subr.bf16.mxu1 %v11598_v34 }
 0x75e   :  { %11064 = vmatpush3.bf16.msra.mxu1 %v11599_v45 }
 0x75f   :  { %11093 = vmatprep.subr.bf16.mxu1 %v11602_v52  ;;  %v10867_v49 = vpop.f32.mrf.mxu0 }
 0x761   :  { %v10801_v36 = vpop.f32.mrf.mxu1  ;;  %6136 = vmatmul.mubr.bf16.vlgmr.msra.gmra.mxu1 %v4011_v35  ;;  %v10868_v61 = vpop.f32.mrf.mxu0 }
 0x762   :  { %11094 = vmatpush3.bf16.msra.mxu1 %v11604_v58  ;;  %6215 = vmatprep.mubr.bf16.mxu1 %v4014_v16  ;;  %v10869_v57 = vadd.f32 %v10868_v61, %v10867_v49  ;;  %v6345_v58 = vld [vmem:[%s15650_s17 + $0x1c0] sm:$0xff] }
 0x763   :  { %v10802_v4 = vpop.f32.mrf.mxu1  ;;  %11095 = vmatprep.subr.bf16.mxu1 %v11605_v48  ;;  %v10870_v59 = vpop.f32.mrf.mxu0  ;;  %v6349_v16 = vld [vmem:[%s15650_s17 + $0x1e0] sm:$0xff] }
 0x764   :  { %v10803_v6 = vadd.f32 %v10802_v4, %v10801_v36  ;;  %v10280_v49 = vcombine.high %v6345_v58, %v6349_v16  ;;  %v6350_v36 = vld [vmem:[%s15650_s17 + $0x1e8] sm:$0xff]  ;;  %v6337_v4 = vld [vmem:[%s15650_s17 + $0x180] sm:$0xff] }
 0x765   :  { %v10804_v46 = vpop.f32.mrf.mxu1  ;;  %v10871_v53 = vpop.f32.mrf.mxu0  ;;  %v6338_v59 = vld [vmem:[%s15650_s17 + $0x188] sm:$0xff] }
 0x766   :  { %v5658_v62 = vadd.f32 %v10803_v6, %v5618_v50  ;;  %11096 = vmatpush3.bf16.msra.mxu1 %v11606_v51  ;;  %v10279_v50 = vcombine.low %v6345_v58, %v6349_v16  ;;  %v10281_v51 = vcombine.low %v6346_v44, %v6350_v36  ;;  %6673 = vmatprep.subr.bf16.mxu0 %v10280_v49  ;;  %v6342_v46 = vld [vmem:[%s15650_s17 + $0x1a8] sm:$0xff]  ;;  %v6329_v53 = vld [vmem:[%s15650_s17 + $0x140] sm:$0xff] }
 0x767   :  { %v10805_v1 = vpop.f32.mrf.mxu1  ;;  %11097 = vmatprep.subr.bf16.mxu1 %v11607_v12  ;;  %v6341_v12 = vld [vmem:[%s15650_s17 + $0x1a0] sm:$0xff]  ;;  %v6298_v58 = vld [vmem:[%s15650_s17 + $0x48] sm:$0xff] }
 0x768   :  { %v5698_v19 = vadd.f32 %v14167_v23, %v5658_v62  ;;  %v10272_v6 = vcombine.high %v6337_v4, %v6341_v12  ;;  %v6333_v62 = vld [vmem:[%s15650_s17 + $0x160] sm:$0xff]  ;;  %6674 = vmatpush1.bf16.msra.mxu0 %v10279_v50  ;;  %v10274_v1 = vcombine.high %v6338_v59, %v6342_v46 }
 0x76a   :  { %11098 = vmatpush3.bf16.msra.mxu1 %v11608_v27  ;;  %v10271_v27 = vcombine.low %v6337_v4, %v6341_v12  ;;  %6675 = vmatprep.subr.bf16.mxu0 %v10272_v6  ;;  %v6289_v12 = vld [vmem:[%s15650_s17] sm:$0xff]  ;;  %v6290_v6 = vld [vmem:[%s15650_s17 + $0x8] sm:$0xff] }
 0x76b   :  { %11099 = vmatprep.subr.bf16.mxu1 %v11609_v2  ;;  %v6330_v2 = vld [vmem:[%s15650_s17 + $0x148] sm:$0xff] }
 0x76c   :  { %6676 = vmatpush1.bf16.msra.mxu0 %v10271_v27  ;;  %v6294_v27 = vld [vmem:[%s15650_s17 + $0x28] sm:$0xff] }
 0x76e   :  { %11100 = vmatpush3.bf16.msra.mxu1 %v11610_v5  ;;  %v10273_v5 = vcombine.low %v6338_v59, %v6342_v46  ;;  %v6293_v59 = vld [vmem:[%s15650_s17 + $0x20] sm:$0xff] }
 0x76f   :  { %11101 = vmatprep.subr.bf16.mxu1 %v11611_v21  ;;  %v10264_v21 = vcombine.high %v6329_v53, %v6333_v62 }
 0x771   :  { %6677 = vmatprep.subr.bf16.mxu0 %v10264_v21 }
 0x772   :  { %11102 = vmatpush3.bf16.msra.mxu1 %v11612_v41 }
 0x773   :  { %11103 = vmatprep.subr.bf16.mxu1 %v11613_v10  ;;  %v6321_v10 = vld [vmem:[%s15650_s17 + $0x100] sm:$0xff] }
 0x776   :  { %11104 = vmatpush3.bf16.msra.mxu1 %v11614_v54  ;;  %v6325_v54 = vld [vmem:[%s15650_s17 + $0x120] sm:$0xff] }
 0x777   :  { %11105 = vmatprep.subr.bf16.mxu1 %v11615_v55  ;;  %v6322_v55 = vld [vmem:[%s15650_s17 + $0x108] sm:$0xff] }
 0x77a   :  { %11106 = vmatpush3.bf16.msra.mxu1 %v11616_v24  ;;  %v6326_v24 = vld [vmem:[%s15650_s17 + $0x128] sm:$0xff] }
 0x77b   :  { %11107 = vmatprep.subr.bf16.mxu1 %v11617_v0  ;;  %v10263_v0 = vcombine.low %v6329_v53, %v6333_v62  ;;  %v10224_v62 = vcombine.high %v6289_v12, %v6293_v59 }
 0x77d   :  { %6678 = vmatpush1.bf16.msra.mxu0 %v10263_v0 }
 0x77e   :  { %11108 = vmatpush3.bf16.msra.mxu1 %v11618_v9 }
 0x77f   :  { %v10911_v23 = vpop.f32.mrf.mxu0 }
 0x781   :  { %v10845_v47 = vpop.f32.mrf.mxu1  ;;  %6216 = vmatmul.mubr.bf16.vlgmr.msra.gmra.mxu1 %v4012_v56  ;;  %v10912_v14 = vpop.f32.mrf.mxu0  ;;  %v10256_v56 = vcombine.high %v6321_v10, %v6325_v54 }
 0x782   :  { %v10913_v15 = vadd.f32 %v10912_v14, %v10911_v23  ;;  %6746 = vmatprep.mubr.bf16.mxu1 %v12038_v32  ;;  %v10258_v23 = vcombine.high %v6322_v55, %v6326_v24  ;;  %v6317_v14 = vld [vmem:[%s15650_s17 + $0xe0] sm:$0xff] }
 0x783   :  { %v10846_v11 = vpop.f32.mrf.mxu1  ;;  %v10914_v8 = vpop.f32.mrf.mxu0  ;;  %6679 = vmatprep.subr.bf16.mxu0 %v10256_v56 }
 0x784   :  { %v10847_v17 = vadd.f32 %v10846_v11, %v10845_v47  ;;  %v6313_v47 = vld [vmem:[%s15650_s17 + $0xc0] sm:$0xff]  ;;  %v6318_v11 = vld [vmem:[%s15650_s17 + $0xe8] sm:$0xff]  ;;  %v10255_v8 = vcombine.low %v6321_v10, %v6325_v54  ;;  %v14372_v54 = vld [vmem:[%s15650_s17 + $0x1d0] sm:$0xff] }
 0x785   :  { %v10848_v22 = vpop.f32.mrf.mxu1  ;;  %v10915_v25 = vpop.f32.mrf.mxu0 }
 0x786   :  { %v5738_v26 = vadd.f32 %v10847_v17, %v5698_v19  ;;  %v6334_v19 = vld [vmem:[%s15650_s17 + $0x168] sm:$0xff]  ;;  %v10257_v17 = vcombine.low %v6322_v55, %v6326_v24  ;;  %v10248_v22 = vcombine.high %v6313_v47, %v6317_v14  ;;  %6680 = vmatpush1.bf16.msra.mxu0 %v10255_v8  ;;  %v6351_v55 = vld [vmem:[%s15650_s17 + $0x1f0] sm:$0xff]  ;;  %v6348_v24 = vld [vmem:[%s15650_s17 + $0x1d8] sm:$0xff] }
 0x787   :  { %v10849_v40 = vpop.f32.mrf.mxu1  ;;  %v10266_v41 = vcombine.high %v6330_v2, %v6334_v19  ;;  %v10265_v9 = vcombine.low %v6330_v2, %v6334_v19  ;;  %v10223_v2 = vcombine.low %v6289_v12, %v6293_v59  ;;  %v10225_v19 = vcombine.low %v6290_v6, %v6294_v27 }
 0x788   :  { %v5778_v42 = vadd.f32 %v10869_v57, %v5738_v26  ;;  %v10282_v57 = vcombine.high %v6346_v44, %v6350_v36  ;;  %v6305_v26 = vld [vmem:[%s15650_s17 + $0x80] sm:$0xff]  ;;  %6681 = vmatprep.subr.bf16.mxu0 %v10248_v22 }
 0x789   :  { %v6309_v40 = vld [vmem:[%s15650_s17 + $0xa0] sm:$0xff] }
 0x78a   :  { %6714 = vmatprep.subr.bf16.mxu1 %v10282_v57 }
 0x78b   :  { %6715 = vmatpush1.bf16.msra.mxu1 %v10281_v51 }
 0x78c   :  { %6716 = vmatprep.subr.bf16.mxu1 %v10274_v1 }
 0x78f   :  { %6717 = vmatpush1.bf16.msra.mxu1 %v10273_v5  ;;  %v10226_v5 = vcombine.high %v6290_v6, %v6294_v27 }
 0x790   :  { %6718 = vmatprep.subr.bf16.mxu1 %v10266_v41 }
 0x793   :  { %6719 = vmatpush1.bf16.msra.mxu1 %v10265_v9  ;;  %v10284_v9 = vcombine.high %v14372_v54, %v6351_v55 }
 0x794   :  { %6720 = vmatprep.subr.bf16.mxu1 %v10258_v23  ;;  %v10283_v23 = vcombine.low %v14372_v54, %v6351_v55  ;;  %v6331_v55 = vld [vmem:[%s15650_s17 + $0x150] sm:$0xff] }
 0x797   :  { %6721 = vmatpush1.bf16.msra.mxu1 %v10257_v17 }
 0x79f   :  { %v10955_v28 = vpop.f32.mrf.mxu0 }
 0x7a1   :  { %v10889_v63 = vpop.f32.mrf.mxu1  ;;  %v10956_v29 = vpop.f32.mrf.mxu0 }
 0x7a2   :  { %v14268_v7 = vadd.f32 %v10956_v29, %v10955_v28  ;;  %v6310_v28 = vld [vmem:[%s15650_s17 + $0xa8] sm:$0xff] }
 0x7a3   :  { %v10890_v30 = vpop.f32.mrf.mxu1  ;;  %v10958_v43 = vpop.f32.mrf.mxu0 }
 0x7a4   :  { %v10891_v34 = vadd.f32 %v10890_v30, %v10889_v63  ;;  %v10247_v63 = vcombine.low %v6313_v47, %v6317_v14  ;;  %v10240_v30 = vcombine.high %v6305_v26, %v6309_v40 }
 0x7a5   :  { %v10892_v45 = vpop.f32.mrf.mxu1  ;;  %v10959_v52 = vpop.f32.mrf.mxu0 }
 0x7a6   :  { %v5818_v35 = vadd.f32 %v10891_v34, %v5778_v42  ;;  %v6306_v42 = vld [vmem:[%s15650_s17 + $0x88] sm:$0xff]  ;;  %6682 = vmatpush1.bf16.msra.mxu0 %v10247_v63  ;;  %v10239_v34 = vcombine.low %v6305_v26, %v6309_v40  ;;  %v6297_v52 = vld [vmem:[%s15650_s17 + $0x40] sm:$0xff] }
 0x7a7   :  { %v10893_v48 = vpop.f32.mrf.mxu1  ;;  %v10242_v43 = vcombine.high %v6306_v42, %v6310_v28  ;;  %6683 = vmatprep.subr.bf16.mxu0 %v10240_v30  ;;  %v10241_v45 = vcombine.low %v6306_v42, %v6310_v28 }
 0x7a8   :  { %v14282_v61 = vadd.f32 %v10913_v15, %v5818_v35  ;;  %v6314_v15 = vld [vmem:[%s15650_s17 + $0xc8] sm:$0xff]  ;;  %v6301_v35 = vld [vmem:[%s15650_s17 + $0x60] sm:$0xff] }
 0x7a9   :  { %v10250_v25 = vcombine.high %v6314_v15, %v6318_v11  ;;  %v10249_v29 = vcombine.low %v6314_v15, %v6318_v11  ;;  %v10232_v44 = vcombine.high %v6297_v52, %v6301_v35  ;;  %v6302_v48 = vld [vmem:[%s15650_s17 + $0x68] sm:$0xff]  ;;  %v10231_v49 = vcombine.low %v6297_v52, %v6301_v35 }
 0x7aa   :  { %6684 = vmatpush1.bf16.msra.mxu0 %v10239_v34  ;;  %v10233_v36 = vcombine.low %v6298_v58, %v6302_v48  ;;  %v10234_v50 = vcombine.high %v6298_v58, %v6302_v48 }
 0x7ab   :  { %6722 = vmatprep.subr.bf16.mxu1 %v10250_v25  ;;  %6685 = vmatprep.subr.bf16.mxu0 %v10232_v44 }
 0x7ac   :  { %6723 = vmatpush1.bf16.msra.mxu1 %v10249_v29 }
 0x7ad   :  { %6724 = vmatprep.subr.bf16.mxu1 %v10242_v43 }
 0x7ae   :  { %6686 = vmatpush1.bf16.msra.mxu0 %v10231_v49 }
 0x7af   :  { %6687 = vmatprep.subr.bf16.mxu0 %v10224_v62  ;;  %v6339_v62 = vld [vmem:[%s15650_s17 + $0x190] sm:$0xff] }
 0x7b0   :  { %6725 = vmatpush1.bf16.msra.mxu1 %v10241_v45 }
 0x7b1   :  { %6726 = vmatprep.subr.bf16.mxu1 %v10234_v50 }
 0x7b2   :  { %6688 = vmatpush1.bf16.msra.mxu0 %v10223_v2  ;;  %v6340_v2 = vld [vmem:[%s15650_s17 + $0x198] sm:$0xff] }
 0x7b3   :  { %6755 = vmatprep.subr.bf16.mxu0 %v10284_v9  ;;  %v6336_v9 = vld [vmem:[%s15650_s17 + $0x178] sm:$0xff] }
 0x7b4   :  { %6727 = vmatpush1.bf16.msra.mxu1 %v10233_v36 }
 0x7b5   :  { %6728 = vmatprep.subr.bf16.mxu1 %v10226_v5 }
 0x7b8   :  { %6729 = vmatpush1.bf16.msra.mxu1 %v10225_v19  ;;  %v6344_v19 = vld [vmem:[%s15650_s17 + $0x1b8] sm:$0xff] }
 0x7b9   :  { %v10278_v54 = vcombine.high %v6340_v2, %v6344_v19 }
 0x7bf   :  { %v10999_v16 = vpop.f32.mrf.mxu0 }
 0x7c1   :  { %v10933_v51 = vpop.f32.mrf.mxu1  ;;  %v11000_v57 = vpop.f32.mrf.mxu0 }
 0x7c2   :  { %v11001_v4 = vadd.f32 %v11000_v57, %v10999_v16 }
 0x7c3   :  { %v10934_v46 = vpop.f32.mrf.mxu1  ;;  %v11002_v53 = vpop.f32.mrf.mxu0 }
 0x7c4   :  { %v10935_v1 = vadd.f32 %v10934_v46, %v10933_v51 }
 0x7c5   :  { %v10936_v21 = vpop.f32.mrf.mxu1  ;;  %v11003_v41 = vpop.f32.mrf.mxu0 }
 0x7c6   :  { %v5898_v10 = vadd.f32 %v10935_v1, %v14282_v61  ;;  %v6352_v61 = vld [vmem:[%s15650_s17 + $0x1f8] sm:$0xff]  ;;  %v6343_v1 = vld [vmem:[%s15650_s17 + $0x1b0] sm:$0xff] }
 0x7c7   :  { %v10937_v0 = vpop.f32.mrf.mxu1  ;;  %v10285_v47 = vcombine.low %v6348_v24, %v6352_v61  ;;  %v10286_v14 = vcombine.high %v6348_v24, %v6352_v61  ;;  %v6335_v24 = vld [vmem:[%s15650_s17 + $0x170] sm:$0xff]  ;;  %v10275_v61 = vcombine.low %v6339_v62, %v6343_v1 }
 0x7c8   :  { %v5938_v56 = vadd.f32 %v14268_v7, %v5898_v10  ;;  %v10276_v10 = vcombine.high %v6339_v62, %v6343_v1  ;;  %v6332_v0 = vld [vmem:[%s15650_s17 + $0x158] sm:$0xff] }
 0x7c9   :  { %6796 = vmatprep.subr.bf16.mxu1 %v10286_v14  ;;  %v10268_v14 = vcombine.high %v6331_v55, %v6335_v24  ;;  %v6296_v62 = vld [vmem:[%s15650_s17 + $0x38] sm:$0xff] }
 0x7df   :  { %v11043_v15 = vpop.f32.mrf.mxu0 }
 0x7e1   :  { %v10977_v11 = vpop.f32.mrf.mxu1  ;;  %v11044_v8 = vpop.f32.mrf.mxu0 }
 0x7e2   :  { %v11045_v17 = vadd.f32 %v11044_v8, %v11043_v15  ;;  %v10270_v15 = vcombine.high %v6332_v0, %v6336_v9  ;;  %v6327_v8 = vld [vmem:[%s15650_s17 + $0x130] sm:$0xff] }
 0x7e3   :  { %v10978_v22 = vpop.f32.mrf.mxu1  ;;  %v11046_v25 = vpop.f32.mrf.mxu0 }
 0x7e4   :  { %v10979_v26 = vadd.f32 %v10978_v22, %v10977_v11  ;;  %v6323_v11 = vld [vmem:[%s15650_s17 + $0x110] sm:$0xff]  ;;  %v10269_v22 = vcombine.low %v6332_v0, %v6336_v9 }
 0x7e5   :  { %v10980_v40 = vpop.f32.mrf.mxu1  ;;  %v11047_v42 = vpop.f32.mrf.mxu0  ;;  %v10260_v25 = vcombine.high %v6323_v11, %v6327_v8 }
 0x7e6   :  { %v5978_v28 = vadd.f32 %v10979_v26, %v5938_v56  ;;  %v10277_v56 = vcombine.low %v6340_v2, %v6344_v19  ;;  %v6315_v40 = vld [vmem:[%s15650_s17 + $0xd0] sm:$0xff] }
 0x7e7   :  { %v10981_v63 = vpop.f32.mrf.mxu1  ;;  %v6319_v42 = vld [vmem:[%s15650_s17 + $0xf0] sm:$0xff] }
 0x7e8   :  { %v6018_v29 = vadd.f32 %v11001_v4, %v5978_v28  ;;  %v6316_v28 = vld [vmem:[%s15650_s17 + $0xd8] sm:$0xff] }
 0x7e9   :  { %v6320_v63 = vld [vmem:[%s15650_s17 + $0xf8] sm:$0xff] }
 0x7ff   :  { %v11087_v30 = vpop.f32.mrf.mxu0 }
 0x801   :  { %v11021_v7 = vpop.f32.mrf.mxu1  ;;  %v11088_v43 = vpop.f32.mrf.mxu0 }
 0x802   :  { %v11089_v34 = vadd.f32 %v11088_v43, %v11087_v30  ;;  %v10254_v43 = vcombine.high %v6316_v28, %v6320_v63 }
 0x803   :  { %v11022_v45 = vpop.f32.mrf.mxu1  ;;  %v11090_v52 = vpop.f32.mrf.mxu0 }
 0x804   :  { %v11023_v35 = vadd.f32 %v11022_v45, %v11021_v7  ;;  %v10252_v7 = vcombine.high %v6315_v40, %v6319_v42  ;;  %v6311_v45 = vld [vmem:[%s15650_s17 + $0xb0] sm:$0xff]  ;;  %v6308_v52 = vld [vmem:[%s15650_s17 + $0x98] sm:$0xff] }
 0x805   :  { %v11024_v58 = vpop.f32.mrf.mxu1  ;;  %v11091_v16 = vpop.f32.mrf.mxu0 }
 0x806   :  { %v6058_v44 = vadd.f32 %v11023_v35, %v6018_v29  ;;  %v10259_v29 = vcombine.low %v6323_v11, %v6327_v8  ;;  %v6312_v35 = vld [vmem:[%s15650_s17 + $0xb8] sm:$0xff]  ;;  %v10251_v58 = vcombine.low %v6315_v40, %v6319_v42  ;;  %v10253_v16 = vcombine.low %v6316_v28, %v6320_v63 }
 0x807   :  { %v11025_v48 = vpop.f32.mrf.mxu1 }
 0x808   :  { %v6098_v49 = vadd.f32 %v11045_v17, %v6058_v44  ;;  %v6324_v17 = vld [vmem:[%s15650_s17 + $0x118] sm:$0xff]  ;;  %v10246_v48 = vcombine.high %v6308_v52, %v6312_v35 }
 0x821   :  { %v11065_v36 = vpop.f32.mrf.mxu1 }
 0x823   :  { %v11066_v50 = vpop.f32.mrf.mxu1 }
 0x824   :  { %v11067_v51 = vadd.f32 %v11066_v50, %v11065_v36  ;;  %v6303_v36 = vld [vmem:[%s15650_s17 + $0x70] sm:$0xff]  ;;  %v6300_v50 = vld [vmem:[%s15650_s17 + $0x58] sm:$0xff] }
 0x825   :  { %v11068_v57 = vpop.f32.mrf.mxu1 }
 0x826   :  { %v6138_v12 = vadd.f32 %v11067_v51, %v6098_v49  ;;  %v6299_v49 = vld [vmem:[%s15650_s17 + $0x50] sm:$0xff]  ;;  %v6304_v51 = vld [vmem:[%s15650_s17 + $0x78] sm:$0xff] }
 0x827   :  { %v11069_v59 = vpop.f32.mrf.mxu1  ;;  %v10237_v1 = vcombine.low %v6300_v50, %v6304_v51 }
 0x828   :  { %v6178_v6 = vadd.f32 %v11089_v34, %v6138_v12  ;;  %v6307_v34 = vld [vmem:[%s15650_s17 + $0x90] sm:$0xff]  ;;  %v10245_v12 = vcombine.low %v6308_v52, %v6312_v35  ;;  %v10236_v59 = vcombine.high %v6299_v49, %v6303_v36  ;;  %v6248_v35 = vld [vmem:[%s15651_s16 + $0xc0] sm:$0xff] }
 0x829   :  { %v10244_v44 = vcombine.high %v6307_v34, %v6311_v45  ;;  %v10243_v57 = vcombine.low %v6307_v34, %v6311_v45 }
 0x841   :  { %v11109_v4 = vpop.f32.mrf.mxu1 }
 0x843   :  { %v11110_v46 = vpop.f32.mrf.mxu1 }
 0x844   :  { %v11111_v53 = vadd.f32 %v11110_v46, %v11109_v4  ;;  %v6291_v4 = vld [vmem:[%s15650_s17 + $0x10] sm:$0xff] }
 0x845   :  { %v11112_v27 = vpop.f32.mrf.mxu1  ;;  %v6295_v46 = vld [vmem:[%s15650_s17 + $0x30] sm:$0xff] }
 0x846   :  { %v6218_v5 = vadd.f32 %v11111_v53, %v6178_v6  ;;  %v10238_v6 = vcombine.high %v6300_v50, %v6304_v51  ;;  %v6292_v53 = vld [vmem:[%s15650_s17 + $0x18] sm:$0xff]  ;;  %v10235_v27 = vcombine.low %v6299_v49, %v6303_v36  ;;  %v10228_v2 = vcombine.high %v6291_v4, %v6295_v46  ;;  %v6240_v51 = vld [vmem:[%s15651_s16 + $0x80] sm:$0xff] }
 0x847   :  { %v11113_v21 = vpop.f32.mrf.mxu1  ;;  %v10230_v19 = vcombine.high %v6292_v53, %v6296_v62 }
 0x848   :  { %v14398_v41 = vpack.c.bf16 %v6218_v5, %v6218_v5  ;;  %v6280_v5 = vld [vmem:[%s15651_s16 + $0x1c0] sm:$0xff] }
 0x849   :  { %v6284_v21 = vld [vmem:[%s15651_s16 + $0x1e0] sm:$0xff] }
 0x84a   :  { %6706 = vmatmul.mubr.bf16.vlgmr.msra.gmra.mxu0 %v14398_v41  ;;  %6747 = vmatmul.mubr.bf16.vlgmr.msra.gmra.mxu1 %v14398_v41  ;;  %v10344_v0 = vcombine.high %v6280_v5, %v6284_v21  ;;  %v10343_v11 = vcombine.low %v6280_v5, %v6284_v21 }
 0x84b   :  { %6756 = vmatpush1.bf16.msra.mxu0 %v10283_v23  ;;  %6797 = vmatpush1.bf16.msra.mxu1 %v10285_v47  ;;  %v6328_v23 = vld [vmem:[%s15650_s17 + $0x138] sm:$0xff]  ;;  %v10267_v47 = vcombine.low %v6331_v55, %v6335_v24  ;;  %v10227_v55 = vcombine.low %v6291_v4, %v6295_v46  ;;  %v10229_v24 = vcombine.low %v6292_v53, %v6296_v62  ;;  %v6232_v62 = vld [vmem:[%s15651_s16 + $0x40] sm:$0xff] }
 0x84c   :  { %6757 = vmatprep.subr.bf16.mxu0 %v10276_v10  ;;  %6798 = vmatprep.subr.bf16.mxu1 %v10278_v54  ;;  %v10262_v26 = vcombine.high %v6324_v17, %v6328_v23  ;;  %v10261_v30 = vcombine.low %v6324_v17, %v6328_v23  ;;  %v6281_v10 = vld [vmem:[%s15651_s16 + $0x1c8] sm:$0xff] }
 0x84d   :  { %6787 = vmatprep.mubr.bf16.mxu0 %v12038_v32  ;;  %6828 = vmatprep.mubr.bf16.mxu1 %v12038_v32  ;;  %v6285_v54 = vld [vmem:[%s15651_s16 + $0x1e8] sm:$0xff] }
 0x84e   :  { %v10346_v9 = vcombine.high %v6281_v10, %v6285_v54  ;;  %v10345_v8 = vcombine.low %v6281_v10, %v6285_v54  ;;  %v6224_v54 = vld [vmem:[%s15651_s16] sm:$0xff] }
 0x84f   :  { %6758 = vmatpush1.bf16.msra.mxu0 %v10275_v61  ;;  %6799 = vmatpush1.bf16.msra.mxu1 %v10277_v56  ;;  %v6272_v61 = vld [vmem:[%s15651_s16 + $0x180] sm:$0xff] }
 0x850   :  { %6759 = vmatprep.subr.bf16.mxu0 %v10268_v14  ;;  %6800 = vmatprep.subr.bf16.mxu1 %v10270_v15  ;;  %v6276_v56 = vld [vmem:[%s15651_s16 + $0x1a0] sm:$0xff]  ;;  %v6273_v14 = vld [vmem:[%s15651_s16 + $0x188] sm:$0xff] }
 0x851   :  { %v6277_v15 = vld [vmem:[%s15651_s16 + $0x1a8] sm:$0xff]  ;;  %v10336_v17 = vcombine.high %v6272_v61, %v6276_v56  ;;  %v10335_v40 = vcombine.low %v6272_v61, %v6276_v56 }
 0x852   :  { %v10338_v23 = vcombine.high %v6273_v14, %v6277_v15  ;;  %v10337_v42 = vcombine.low %v6273_v14, %v6277_v15  ;;  %v6282_v15 = vld [vmem:[%s15651_s16 + $0x1d0] sm:$0xff] }
 0x853   :  { %6760 = vmatpush1.bf16.msra.mxu0 %v10267_v47  ;;  %6801 = vmatpush1.bf16.msra.mxu1 %v10269_v22  ;;  %v6264_v47 = vld [vmem:[%s15651_s16 + $0x140] sm:$0xff] }
 0x854   :  { %6761 = vmatprep.subr.bf16.mxu0 %v10260_v25  ;;  %6802 = vmatprep.subr.bf16.mxu1 %v10262_v26  ;;  %v6268_v22 = vld [vmem:[%s15651_s16 + $0x160] sm:$0xff]  ;;  %v6265_v25 = vld [vmem:[%s15651_s16 + $0x148] sm:$0xff] }
 0x855   :  { %v6269_v26 = vld [vmem:[%s15651_s16 + $0x168] sm:$0xff]  ;;  %v10328_v28 = vcombine.high %v6264_v47, %v6268_v22 }
 0x856   :  { %v10330_v63 = vcombine.high %v6265_v25, %v6269_v26  ;;  %v10329_v34 = vcombine.low %v6265_v25, %v6269_v26  ;;  %v6274_v26 = vld [vmem:[%s15651_s16 + $0x190] sm:$0xff] }
 0x857   :  { %6762 = vmatpush1.bf16.msra.mxu0 %v10259_v29  ;;  %6803 = vmatpush1.bf16.msra.mxu1 %v10261_v30  ;;  %v6256_v29 = vld [vmem:[%s15651_s16 + $0x100] sm:$0xff] }
 0x858   :  { %6763 = vmatprep.subr.bf16.mxu0 %v10252_v7  ;;  %6804 = vmatprep.subr.bf16.mxu1 %v10254_v43  ;;  %v6260_v30 = vld [vmem:[%s15651_s16 + $0x120] sm:$0xff]  ;;  %v6261_v7 = vld [vmem:[%s15651_s16 + $0x128] sm:$0xff]  ;;  %v10327_v43 = vcombine.low %v6264_v47, %v6268_v22 }
 0x859   :  { %v10320_v45 = vcombine.high %v6256_v29, %v6260_v30 }
 0x85b   :  { %6764 = vmatpush1.bf16.msra.mxu0 %v10251_v58  ;;  %6805 = vmatpush1.bf16.msra.mxu1 %v10253_v16  ;;  %v6252_v58 = vld [vmem:[%s15651_s16 + $0xe0] sm:$0xff]  ;;  %v6249_v16 = vld [vmem:[%s15651_s16 + $0xc8] sm:$0xff] }
 0x85c   :  { %6765 = vmatprep.subr.bf16.mxu0 %v10244_v44  ;;  %6806 = vmatprep.subr.bf16.mxu1 %v10246_v48  ;;  %v6253_v44 = vld [vmem:[%s15651_s16 + $0xe8] sm:$0xff]  ;;  %v10319_v48 = vcombine.low %v6256_v29, %v6260_v30  ;;  %v10312_v36 = vcombine.high %v6248_v35, %v6252_v58  ;;  %v14602_v30 = vpack.c.bf16 %v14173_v13, %v14173_v13  ;;  %v6271_v13 = vld [vmem:[%s15651_s16 + $0x178] sm:$0xff] }
 0x85d   :  { %v10314_v50 = vcombine.high %v6249_v16, %v6253_v44  ;;  %v10313_v4 = vcombine.low %v6249_v16, %v6253_v44  ;;  %v6258_v44 = vld [vmem:[%s15651_s16 + $0x110] sm:$0xff] }
 0x85f   :  { %6766 = vmatpush1.bf16.msra.mxu0 %v10243_v57  ;;  %6807 = vmatpush1.bf16.msra.mxu1 %v10245_v12  ;;  %v6244_v57 = vld [vmem:[%s15651_s16 + $0xa0] sm:$0xff]  ;;  %v6241_v12 = vld [vmem:[%s15651_s16 + $0x88] sm:$0xff] }
 0x860   :  { %6767 = vmatprep.subr.bf16.mxu0 %v10236_v59  ;;  %6808 = vmatprep.subr.bf16.mxu1 %v10238_v6  ;;  %v6245_v59 = vld [vmem:[%s15651_s16 + $0xa8] sm:$0xff]  ;;  %v10311_v6 = vcombine.low %v6248_v35, %v6252_v58  ;;  %v10304_v46 = vcombine.high %v6240_v51, %v6244_v57 }
 0x861   :  { %v10306_v53 = vcombine.high %v6241_v12, %v6245_v59  ;;  %v10305_v5 = vcombine.low %v6241_v12, %v6245_v59  ;;  %v6250_v59 = vld [vmem:[%s15651_s16 + $0xd0] sm:$0xff] }
 0x863   :  { %6768 = vmatpush1.bf16.msra.mxu0 %v10235_v27  ;;  %6809 = vmatpush1.bf16.msra.mxu1 %v10237_v1  ;;  %v6236_v27 = vld [vmem:[%s15651_s16 + $0x60] sm:$0xff]  ;;  %v6233_v1 = vld [vmem:[%s15651_s16 + $0x48] sm:$0xff] }
 0x864   :  { %6769 = vmatprep.subr.bf16.mxu0 %v10228_v2  ;;  %6810 = vmatprep.subr.bf16.mxu1 %v10230_v19  ;;  %v6237_v2 = vld [vmem:[%s15651_s16 + $0x68] sm:$0xff]  ;;  %v10303_v19 = vcombine.low %v6240_v51, %v6244_v57  ;;  %v10296_v21 = vcombine.high %v6232_v62, %v6236_v27 }
 0x865   :  { %v10298_v10 = vcombine.high %v6233_v1, %v6237_v2  ;;  %v10297_v61 = vcombine.low %v6233_v1, %v6237_v2  ;;  %v6246_v2 = vld [vmem:[%s15651_s16 + $0xb0] sm:$0xff] }
 0x867   :  { %6770 = vmatpush1.bf16.msra.mxu0 %v10227_v55  ;;  %6811 = vmatpush1.bf16.msra.mxu1 %v10229_v24  ;;  %v6228_v55 = vld [vmem:[%s15651_s16 + $0x20] sm:$0xff]  ;;  %v6225_v24 = vld [vmem:[%s15651_s16 + $0x8] sm:$0xff] }
 0x868   :  { %7157 = vmatprep.subr.bf16.mxu0 %v10344_v0  ;;  %7198 = vmatprep.subr.bf16.mxu1 %v10346_v9  ;;  %v6229_v0 = vld [vmem:[%s15651_s16 + $0x28] sm:$0xff]  ;;  %v10295_v9 = vcombine.low %v6232_v62, %v6236_v27  ;;  %v10288_v56 = vcombine.high %v6224_v54, %v6228_v55  ;;  %v6242_v62 = vld [vmem:[%s15651_s16 + $0x90] sm:$0xff] }
 0x869   :  { %v10290_v14 = vcombine.high %v6225_v24, %v6229_v0  ;;  %v10289_v47 = vcombine.low %v6225_v24, %v6229_v0  ;;  %v6238_v0 = vld [vmem:[%s15651_s16 + $0x70] sm:$0xff] }
 0x86a   :  { %6788 = vmatmul.mubr.bf16.vlgmr.msra.gmra.mxu0 %v14398_v41  ;;  %6829 = vmatmul.mubr.bf16.vlgmr.msra.gmra.mxu1 %v14398_v41  ;;  %v6257_v41 = vld [vmem:[%s15651_s16 + $0x108] sm:$0xff] }
 0x86b   :  { %7158 = vmatpush1.bf16.msra.mxu0 %v10343_v11  ;;  %7199 = vmatpush1.bf16.msra.mxu1 %v10345_v8  ;;  %v10322_v52 = vcombine.high %v6257_v41, %v6261_v7  ;;  %v10321_v49 = vcombine.low %v6257_v41, %v6261_v7  ;;  %v6286_v11 = vld [vmem:[%s15651_s16 + $0x1f0] sm:$0xff]  ;;  %v6283_v8 = vld [vmem:[%s15651_s16 + $0x1d8] sm:$0xff] }
 0x86c   :  { %7159 = vmatprep.subr.bf16.mxu0 %v10336_v17  ;;  %7200 = vmatprep.subr.bf16.mxu1 %v10338_v23  ;;  %v6287_v17 = vld [vmem:[%s15651_s16 + $0x1f8] sm:$0xff]  ;;  %v10287_v23 = vcombine.low %v6224_v54, %v6228_v55  ;;  %v10348_v22 = vcombine.high %v6282_v15, %v6286_v11  ;;  %v6234_v54 = vld [vmem:[%s15651_s16 + $0x50] sm:$0xff]  ;;  %v10308_v55 = vcombine.high %v6242_v62, %v6246_v2 }
 0x86d   :  { %7189 = vmatprep.mubr.bf16.mxu0 %v12038_v32  ;;  %7230 = vmatprep.mubr.bf16.mxu1 %v12038_v32  ;;  %v10350_v25 = vcombine.high %v6283_v8, %v6287_v17  ;;  %v10349_v29 = vcombine.low %v6283_v8, %v6287_v17  ;;  %v6230_v17 = vld [vmem:[%s15651_s16 + $0x30] sm:$0xff] }
 0x86f   :  { %7160 = vmatpush1.bf16.msra.mxu0 %v10335_v40  ;;  %7201 = vmatpush1.bf16.msra.mxu1 %v10337_v42  ;;  %v6278_v40 = vld [vmem:[%s15651_s16 + $0x1b0] sm:$0xff]  ;;  %v6275_v42 = vld [vmem:[%s15651_s16 + $0x198] sm:$0xff] }
 0x870   :  { %7161 = vmatprep.subr.bf16.mxu0 %v10328_v28  ;;  %7202 = vmatprep.subr.bf16.mxu1 %v10330_v63  ;;  %v6279_v28 = vld [vmem:[%s15651_s16 + $0x1b8] sm:$0xff]  ;;  %v10347_v63 = vcombine.low %v6282_v15, %v6286_v11  ;;  %v10340_v41 = vcombine.high %v6274_v26, %v6278_v40  ;;  %v6226_v15 = vld [vmem:[%s15651_s16 + $0x10] sm:$0xff]  ;;  %v10300_v11 = vcombine.high %v6234_v54, %v6238_v0 }
 0x871   :  { %v10342_v7 = vcombine.high %v6275_v42, %v6279_v28  ;;  %v10341_v35 = vcombine.low %v6275_v42, %v6279_v28  ;;  %v11621_v42 = vld [vmem:[%s15652_s19 + $0xe4] ss:$16 sps:$4 sm:$0xff]  }
 0x872   :  { %v11624_v28 = vld [vmem:[%s15652_s19 + $0x2e4] ss:$16 sps:$4 sm:$0xff]  }
 0x873   :  { %7162 = vmatpush1.bf16.msra.mxu0 %v10327_v43  ;;  %7203 = vmatpush1.bf16.msra.mxu1 %v10329_v34  ;;  %v6266_v43 = vld [vmem:[%s15651_s16 + $0x150] sm:$0xff] }
 0x874   :  { %7163 = vmatprep.subr.bf16.mxu0 %v10320_v45  ;;  %7204 = vmatprep.subr.bf16.mxu1 %v10322_v52  ;;  %v6270_v34 = vld [vmem:[%s15651_s16 + $0x170] sm:$0xff]  ;;  %v6267_v45 = vld [vmem:[%s15651_s16 + $0x158] sm:$0xff]  ;;  %v10339_v52 = vcombine.low %v6274_v26, %v6278_v40  ;;  %v10292_v26 = vcombine.high %v6226_v15, %v6230_v17 }
 0x875   :  { %v10332_v58 = vcombine.high %v6266_v43, %v6270_v34  ;;  %v10334_v16 = vcombine.high %v6267_v45, %v6271_v13  ;;  %v10333_v51 = vcombine.low %v6267_v45, %v6271_v13  ;;  %v11625_v45 = vld [vmem:[%s15652_s19 + $0xc0] ss:$16 sps:$4 sm:$0xff]  }
 0x876   :  { %v11628_v13 = vld [vmem:[%s15652_s19 + $0x2c0] ss:$16 sps:$4 sm:$0xff]  }
 0x877   :  { %7164 = vmatpush1.bf16.msra.mxu0 %v10319_v48  ;;  %7205 = vmatpush1.bf16.msra.mxu1 %v10321_v49  ;;  %v6262_v48 = vld [vmem:[%s15651_s16 + $0x130] sm:$0xff]  ;;  %v6259_v49 = vld [vmem:[%s15651_s16 + $0x118] sm:$0xff] }
 0x878   :  { %7165 = vmatprep.subr.bf16.mxu0 %v10312_v36  ;;  %7206 = vmatprep.subr.bf16.mxu1 %v10314_v50  ;;  %v6263_v36 = vld [vmem:[%s15651_s16 + $0x138] sm:$0xff]  ;;  %v10331_v50 = vcombine.low %v6266_v43, %v6270_v34  ;;  %v10324_v57 = vcombine.high %v6258_v44, %v6262_v48  ;;  %v11627_v43 = vld [vmem:[%s15652_s19 + $0xc4] ss:$16 sps:$4 sm:$0xff]  }
 0x879   :  { %v10326_v12 = vcombine.high %v6259_v49, %v6263_v36  ;;  %v11630_v34 = vld [vmem:[%s15652_s19 + $0x2c4] ss:$16 sps:$4 sm:$0xff]  }
 0x87b   :  { %7166 = vmatpush1.bf16.msra.mxu0 %v10311_v6  ;;  %7207 = vmatpush1.bf16.msra.mxu1 %v10313_v4  ;;  %v6254_v6 = vld [vmem:[%s15651_s16 + $0xf0] sm:$0xff]  ;;  %v6255_v4 = vld [vmem:[%s15651_s16 + $0xf8] sm:$0xff] }
 0x87c   :  { %7167 = vmatprep.subr.bf16.mxu0 %v10304_v46  ;;  %7208 = vmatprep.subr.bf16.mxu1 %v10306_v53  ;;  %v10323_v46 = vcombine.low %v6258_v44, %v6262_v48  ;;  %v10325_v53 = vcombine.low %v6259_v49, %v6263_v36  ;;  %v10316_v27 = vcombine.high %v6250_v59, %v6254_v6  ;;  %v11642_v44 = vld [vmem:[%s15652_s19 + $0x284] ss:$16 sps:$4 sm:$0xff]   ;;  %v11637_v48 = vld [vmem:[%s15652_s19 + $0x80] ss:$16 sps:$4 sm:$0xff]  }
 0x87d   :  { %v11640_v49 = vld [vmem:[%s15652_s19 + $0x280] ss:$16 sps:$4 sm:$0xff]   ;;  %v11645_v36 = vld [vmem:[%s15652_s19 + $0x64] ss:$16 sps:$4 sm:$0xff]  }
 0x87f   :  { %7168 = vmatpush1.bf16.msra.mxu0 %v10303_v19  ;;  %7209 = vmatpush1.bf16.msra.mxu1 %v10305_v5  ;;  %v6243_v19 = vld [vmem:[%s15651_s16 + $0x98] sm:$0xff] }
 0x880   :  { %7169 = vmatprep.subr.bf16.mxu0 %v10296_v21  ;;  %7210 = vmatprep.subr.bf16.mxu1 %v10298_v10  ;;  %v6247_v5 = vld [vmem:[%s15651_s16 + $0xb8] sm:$0xff]  ;;  %v10315_v21 = vcombine.low %v6250_v59, %v6254_v6  ;;  %v11654_v59 = vld [vmem:[%s15652_s19 + $0x244] ss:$16 sps:$4 sm:$0xff]   ;;  %v11649_v6 = vld [vmem:[%s15652_s19 + $0x40] ss:$16 sps:$4 sm:$0xff]  }
 0x881   :  { %v10310_v24 = vcombine.high %v6243_v19, %v6247_v5 }
 0x883   :  { %7170 = vmatpush1.bf16.msra.mxu0 %v10295_v9  ;;  %7211 = vmatpush1.bf16.msra.mxu1 %v10297_v61  ;;  %v6235_v9 = vld [vmem:[%s15651_s16 + $0x58] sm:$0xff] }
 0x884   :  { %7171 = vmatprep.subr.bf16.mxu0 %v10288_v56  ;;  %7212 = vmatprep.subr.bf16.mxu1 %v10290_v14  ;;  %v6239_v61 = vld [vmem:[%s15651_s16 + $0x78] sm:$0xff]  ;;  %v10307_v56 = vcombine.low %v6242_v62, %v6246_v2  ;;  %v10309_v14 = vcombine.low %v6243_v19, %v6247_v5  ;;  %v11658_v62 = vld [vmem:[%s15652_s19 + $0x220] ss:$16 sps:$4 sm:$0xff]   ;;  %v11669_v5 = vld [vmem:[%s15652_s19 + $0x1e4] ss:$16 sps:$4 sm:$0xff]  }
 0x885   :  { %v10302_v8 = vcombine.high %v6235_v9, %v6239_v61  ;;  %v11661_v2 = vld [vmem:[%s15652_s19] ss:$16 sps:$4 sm:$0xff]  }
 0x886   :  { %v11664_v19 = vld [vmem:[%s15652_s19 + $0x200] ss:$16 sps:$4 sm:$0xff]  }
 0x887   :  { %7172 = vmatpush1.bf16.msra.mxu0 %v10287_v23  ;;  %7213 = vmatpush1.bf16.msra.mxu1 %v10289_v47  ;;  %v6227_v23 = vld [vmem:[%s15651_s16 + $0x18] sm:$0xff] }
 0x888   :  { %7239 = vmatprep.subr.bf16.mxu0 %v10348_v22  ;;  %7280 = vmatprep.subr.bf16.mxu1 %v10350_v25  ;;  %v6231_v47 = vld [vmem:[%s15651_s16 + $0x38] sm:$0xff]  ;;  %v10299_v22 = vcombine.low %v6234_v54, %v6238_v0  ;;  %v10301_v25 = vcombine.low %v6235_v9, %v6239_v61  ;;  %v11670_v54 = vld [vmem:[%s15652_s19 + $0x3e0] ss:$16 sps:$4 sm:$0xff]   ;;  %v11681_v61 = vld [vmem:[%s15652_s19 + $0x1a4] ss:$16 sps:$4 sm:$0xff]  }
 0x889   :  { %v10294_v40 = vcombine.high %v6227_v23, %v6231_v47  ;;  %v11673_v0 = vld [vmem:[%s15652_s19 + $0x1c0] ss:$16 sps:$4 sm:$0xff]  }
 0x88a   :  { %7190 = vmatmul.mubr.bf16.vlgmr.msra.gmra.mxu0 %v14602_v30  ;;  %7231 = vmatmul.mubr.bf16.vlgmr.msra.gmra.mxu1 %v14602_v30  ;;  %v11676_v9 = vld [vmem:[%s15652_s19 + $0x3c0] ss:$16 sps:$4 sm:$0xff]  }
 0x88b   :  { %7240 = vmatpush1.bf16.msra.mxu0 %v10347_v63  ;;  %7281 = vmatpush1.bf16.msra.mxu1 %v10349_v29  ;;  %v10291_v63 = vcombine.low %v6226_v15, %v6230_v17  ;;  %v10293_v29 = vcombine.low %v6227_v23, %v6231_v47  ;;  %v11682_v15 = vld [vmem:[%s15652_s19 + $0x3a0] ss:$16 sps:$4 sm:$0xff]   ;;  %v11693_v47 = vld [vmem:[%s15652_s19 + $0x164] ss:$16 sps:$4 sm:$0xff]  }
 0x88c   :  { %7241 = vmatprep.subr.bf16.mxu0 %v10340_v41  ;;  %7282 = vmatprep.subr.bf16.mxu1 %v10342_v7  ;;  %v11619_v41 = vld [vmem:[%s15652_s19 + $0xe0] ss:$16 sps:$4 sm:$0xff]  }
 0x88d   :  { %7271 = vmatprep.mubr.bf16.mxu0 %v12038_v32  ;;  %7312 = vmatprep.mubr.bf16.mxu1 %v12038_v32  ;;  %v6251_v32 = vld [vmem:[%s15651_s16 + $0xd8] sm:$0xff]  ;;  %v11622_v7 = vld [vmem:[%s15652_s19 + $0x2e0] ss:$16 sps:$4 sm:$0xff]  }
 0x88e   :  { %v10318_v1 = vcombine.high %v6251_v32, %v6255_v4  ;;  %v10317_v10 = vcombine.low %v6251_v32, %v6255_v4  ;;  %v11652_v32 = vld [vmem:[%s15652_s19 + $0x240] ss:$16 sps:$4 sm:$0xff]   ;;  %v11657_v4 = vld [vmem:[%s15652_s19 + $0x24] ss:$16 sps:$4 sm:$0xff]  }
 0x88f   :  { %7242 = vmatpush1.bf16.msra.mxu0 %v10339_v52  ;;  %7283 = vmatpush1.bf16.msra.mxu1 %v10341_v35  ;;  %v11633_v52 = vld [vmem:[%s15652_s19 + $0xa4] ss:$16 sps:$4 sm:$0xff]   ;;  %v11631_v35 = vld [vmem:[%s15652_s19 + $0xa0] ss:$16 sps:$4 sm:$0xff]  }
 0x890   :  { %7243 = vmatprep.subr.bf16.mxu0 %v10332_v58  ;;  %7284 = vmatprep.subr.bf16.mxu1 %v10334_v16  ;;  %v11634_v58 = vld [vmem:[%s15652_s19 + $0x2a0] ss:$16 sps:$4 sm:$0xff]   ;;  %v11639_v16 = vld [vmem:[%s15652_s19 + $0x84] ss:$16 sps:$4 sm:$0xff]  }
 0x891   :  { %v11685_v17 = vld [vmem:[%s15652_s19 + $0x180] ss:$16 sps:$4 sm:$0xff]  }
 0x892   :  { %v11688_v23 = vld [vmem:[%s15652_s19 + $0x380] ss:$16 sps:$4 sm:$0xff]  }
 0x893   :  { %7244 = vmatpush1.bf16.msra.mxu0 %v10331_v50  ;;  %7285 = vmatpush1.bf16.msra.mxu1 %v10333_v51  ;;  %v11648_v50 = vld [vmem:[%s15652_s19 + $0x264] ss:$16 sps:$4 sm:$0xff]   ;;  %v11643_v51 = vld [vmem:[%s15652_s19 + $0x60] ss:$16 sps:$4 sm:$0xff]  }
 0x894   :  { %7245 = vmatprep.subr.bf16.mxu0 %v10324_v57  ;;  %7286 = vmatprep.subr.bf16.mxu1 %v10326_v12  ;;  %v11646_v57 = vld [vmem:[%s15652_s19 + $0x260] ss:$16 sps:$4 sm:$0xff]   ;;  %v11651_v12 = vld [vmem:[%s15652_s19 + $0x44] ss:$16 sps:$4 sm:$0xff]  }
 0x897   :  { %7246 = vmatpush1.bf16.msra.mxu0 %v10323_v46  ;;  %7287 = vmatpush1.bf16.msra.mxu1 %v10325_v53  ;;  %v11660_v46 = vld [vmem:[%s15652_s19 + $0x224] ss:$16 sps:$4 sm:$0xff]   ;;  %v11655_v53 = vld [vmem:[%s15652_s19 + $0x20] ss:$16 sps:$4 sm:$0xff]  }
 0x898   :  { %7247 = vmatprep.subr.bf16.mxu0 %v10316_v27  ;;  %7288 = vmatprep.subr.bf16.mxu1 %v10318_v1  ;;  %v11663_v27 = vld [vmem:[%s15652_s19 + $0x4] ss:$16 sps:$4 sm:$0xff]  }
 0x899   :  { %v11666_v1 = vld [vmem:[%s15652_s19 + $0x204] ss:$16 sps:$4 sm:$0xff]  }
 0x89b   :  { %7248 = vmatpush1.bf16.msra.mxu0 %v10315_v21  ;;  %7289 = vmatpush1.bf16.msra.mxu1 %v10317_v10  ;;  %v11672_v21 = vld [vmem:[%s15652_s19 + $0x3e4] ss:$16 sps:$4 sm:$0xff]   ;;  %v11667_v10 = vld [vmem:[%s15652_s19 + $0x1e0] ss:$16 sps:$4 sm:$0xff]  }
 0x89c   :  { %7249 = vmatprep.subr.bf16.mxu0 %v10308_v55  ;;  %7290 = vmatprep.subr.bf16.mxu1 %v10310_v24  ;;  %v11675_v55 = vld [vmem:[%s15652_s19 + $0x1c4] ss:$16 sps:$4 sm:$0xff]  }
 0x89d   :  { %v11678_v24 = vld [vmem:[%s15652_s19 + $0x3c4] ss:$16 sps:$4 sm:$0xff]  }
 0x89f   :  { %7250 = vmatpush1.bf16.msra.mxu0 %v10307_v56  ;;  %7291 = vmatpush1.bf16.msra.mxu1 %v10309_v14  ;;  %v11684_v56 = vld [vmem:[%s15652_s19 + $0x3a4] ss:$16 sps:$4 sm:$0xff]   ;;  %v11679_v14 = vld [vmem:[%s15652_s19 + $0x1a0] ss:$16 sps:$4 sm:$0xff]  }
 0x8a0   :  { %7251 = vmatprep.subr.bf16.mxu0 %v10300_v11  ;;  %7292 = vmatprep.subr.bf16.mxu1 %v10302_v8  ;;  %v11687_v11 = vld [vmem:[%s15652_s19 + $0x184] ss:$16 sps:$4 sm:$0xff]  }
 0x8a1   :  { %v11690_v8 = vld [vmem:[%s15652_s19 + $0x384] ss:$16 sps:$4 sm:$0xff]  }
 0x8a3   :  { %7252 = vmatpush1.bf16.msra.mxu0 %v10299_v22  ;;  %7293 = vmatpush1.bf16.msra.mxu1 %v10301_v25  ;;  %v11696_v22 = vld [vmem:[%s15652_s19 + $0x364] ss:$16 sps:$4 sm:$0xff]   ;;  %v11691_v25 = vld [vmem:[%s15652_s19 + $0x160] ss:$16 sps:$4 sm:$0xff]  }
 0x8a4   :  { %7253 = vmatprep.subr.bf16.mxu0 %v10292_v26  ;;  %7294 = vmatprep.subr.bf16.mxu1 %v10294_v40  ;;  %v11694_v26 = vld [vmem:[%s15652_s19 + $0x360] ss:$16 sps:$4 sm:$0xff]   ;;  %v11699_v40 = vld [vmem:[%s15652_s19 + $0x144] ss:$16 sps:$4 sm:$0xff]  }
 0x8a7   :  { %7254 = vmatpush1.bf16.msra.mxu0 %v10291_v63  ;;  %7295 = vmatpush1.bf16.msra.mxu1 %v10293_v29  ;;  %v11700_v63 = vld [vmem:[%s15652_s19 + $0x340] ss:$16 sps:$4 sm:$0xff]   ;;  %v11705_v29 = vld [vmem:[%s15652_s19 + $0x124] ss:$16 sps:$4 sm:$0xff]  }
 0x8a8   :  { %8945 = vmatprep.subr.bf16.mxu0 %v11621_v42  ;;  %8986 = vmatprep.subr.bf16.mxu1 %v11624_v28  ;;  %v11702_v42 = vld [vmem:[%s15652_s19 + $0x344] ss:$16 sps:$4 sm:$0xff]   ;;  %v11697_v28 = vld [vmem:[%s15652_s19 + $0x140] ss:$16 sps:$4 sm:$0xff]  }
 0x8aa   :  { %7272 = vmatmul.mubr.bf16.vlgmr.msra.gmra.mxu0 %v14602_v30  ;;  %7313 = vmatmul.mubr.bf16.vlgmr.msra.gmra.mxu1 %v14602_v30  ;;  %v11636_v30 = vld [vmem:[%s15652_s19 + $0x2a4] ss:$16 sps:$4 sm:$0xff]  }
 0x8ab   :  { %8946 = vmatpush1.bf16.msra.mxu0 %v11619_v41  ;;  %8987 = vmatpush1.bf16.msra.mxu1 %v11622_v7  ;;  %v11708_v41 = vld [vmem:[%s15652_s19 + $0x324] ss:$16 sps:$4 sm:$0xff]   ;;  %v11703_v7 = vld [vmem:[%s15652_s19 + $0x120] ss:$16 sps:$4 sm:$0xff]  }
 0x8ac   :  { %8947 = vmatprep.subr.bf16.mxu0 %v11627_v43  ;;  %8988 = vmatprep.subr.bf16.mxu1 %v11630_v34  ;;  %v11706_v43 = vld [vmem:[%s15652_s19 + $0x320] ss:$16 sps:$4 sm:$0xff]   ;;  %v11711_v34 = vld [vmem:[%s15652_s19 + $0x104] ss:$16 sps:$4 sm:$0xff]  }
 0x8af   :  { %8948 = vmatpush1.bf16.msra.mxu0 %v11625_v45  ;;  %8989 = vmatpush1.bf16.msra.mxu1 %v11628_v13  ;;  %v11714_v45 = vld [vmem:[%s15652_s19 + $0x304] ss:$16 sps:$4 sm:$0xff]   ;;  %v11709_v13 = vld [vmem:[%s15652_s19 + $0x100] ss:$16 sps:$4 sm:$0xff]  }
 0x8b0   :  { %8949 = vmatprep.subr.bf16.mxu0 %v11633_v52  ;;  %8990 = vmatprep.subr.bf16.mxu1 %v11636_v30  ;;  %v11712_v52 = vld [vmem:[%s15652_s19 + $0x300] ss:$16 sps:$4 sm:$0xff]   ;;  %v11717_v30 = vld [vmem:[%s15652_s19 + $0x4e4] ss:$16 sps:$4 sm:$0xff]  }
 0x8b3   :  { %8950 = vmatpush1.bf16.msra.mxu0 %v11631_v35  ;;  %8991 = vmatpush1.bf16.msra.mxu1 %v11634_v58  ;;  %v11720_v35 = vld [vmem:[%s15652_s19 + $0x6e4] ss:$16 sps:$4 sm:$0xff]  }
 0x8b4   :  { %8951 = vmatprep.subr.bf16.mxu0 %v11639_v16  ;;  %8992 = vmatprep.subr.bf16.mxu1 %v11642_v44 }
 0x8b7   :  { %8952 = vmatpush1.bf16.msra.mxu0 %v11637_v48  ;;  %8993 = vmatpush1.bf16.msra.mxu1 %v11640_v49 }
 0x8b8   :  { %8953 = vmatprep.subr.bf16.mxu0 %v11645_v36  ;;  %8994 = vmatprep.subr.bf16.mxu1 %v11648_v50 }
 0x8bb   :  { %8954 = vmatpush1.bf16.msra.mxu0 %v11643_v51  ;;  %8995 = vmatpush1.bf16.msra.mxu1 %v11646_v57 }
 0x8bc   :  { %8955 = vmatprep.subr.bf16.mxu0 %v11651_v12  ;;  %8996 = vmatprep.subr.bf16.mxu1 %v11654_v59 }
 0x8bf   :  { %8956 = vmatpush1.bf16.msra.mxu0 %v11649_v6  ;;  %8997 = vmatpush1.bf16.msra.mxu1 %v11652_v32 }
 0x8c0   :  { %8957 = vmatprep.subr.bf16.mxu0 %v11657_v4  ;;  %8998 = vmatprep.subr.bf16.mxu1 %v11660_v46 }
 0x8c3   :  { %8958 = vmatpush1.bf16.msra.mxu0 %v11655_v53  ;;  %8999 = vmatpush1.bf16.msra.mxu1 %v11658_v62  ;;  %v14891_v62 = vld [vmem:[%s15653_s18] sm:$0xff] }
 0x8c4   :  { %8959 = vmatprep.subr.bf16.mxu0 %v11663_v27  ;;  %9000 = vmatprep.subr.bf16.mxu1 %v11666_v1  ;;  %v7326_v27 = vrot.slane %v14891_v62, %v12414_v39  ;;  %v7334_v1 = vrot.slane %v14891_v62, %v12620_v3 }
 0x8c7   :  { %8960 = vmatpush1.bf16.msra.mxu0 %v11661_v2  ;;  %9001 = vmatpush1.bf16.msra.mxu1 %v11664_v19 }
 0x8c8   :  { %8961 = vmatprep.subr.bf16.mxu0 %v11669_v5  ;;  %9002 = vmatprep.subr.bf16.mxu1 %v11672_v21 }
 0x8cb   :  { %8962 = vmatpush2.bf16.msra.mxu0 %v11667_v10  ;;  %9003 = vmatpush2.bf16.msra.mxu1 %v11670_v54  ;;  %v7330_v10 = vrot.slane %v14891_v62, %v12411_v38  ;;  %v7338_v54 = vrot.slane %v14891_v62, %v13233_v60 }
 0x8cc   :  { %8963 = vmatprep.subr.bf16.mxu0 %v11675_v55  ;;  %9004 = vmatprep.subr.bf16.mxu1 %v11678_v24 }
 0x8cf   :  { %8964 = vmatpush2.bf16.msra.mxu0 %v11673_v0  ;;  %9005 = vmatpush2.bf16.msra.mxu1 %v11676_v9 }
 0x8d0   :  { %8965 = vmatprep.subr.bf16.mxu0 %v11681_v61  ;;  %9006 = vmatprep.subr.bf16.mxu1 %v11684_v56 }
 0x8d3   :  { %8966 = vmatpush2.bf16.msra.mxu0 %v11679_v14  ;;  %9007 = vmatpush2.bf16.msra.mxu1 %v11682_v15 }
 0x8d4   :  { %8967 = vmatprep.subr.bf16.mxu0 %v11687_v11  ;;  %9008 = vmatprep.subr.bf16.mxu1 %v11690_v8 }
 0x8d7   :  { %8968 = vmatpush2.bf16.msra.mxu0 %v11685_v17  ;;  %9009 = vmatpush2.bf16.msra.mxu1 %v11688_v23 }
 0x8d8   :  { %8969 = vmatprep.subr.bf16.mxu0 %v11693_v47  ;;  %9010 = vmatprep.subr.bf16.mxu1 %v11696_v22 }
 0x8db   :  { %8970 = vmatpush2.bf16.msra.mxu0 %v11691_v25  ;;  %9011 = vmatpush2.bf16.msra.mxu1 %v11694_v26 }
 0x8dc   :  { %8971 = vmatprep.subr.bf16.mxu0 %v11699_v40  ;;  %9012 = vmatprep.subr.bf16.mxu1 %v11702_v42 }
 0x8df   :  { %8972 = vmatpush2.bf16.msra.mxu0 %v11697_v28  ;;  %9013 = vmatpush2.bf16.msra.mxu1 %v11700_v63  ;;  %v11715_v28 = vld [vmem:[%s15652_s19 + $0x4e0] ss:$16 sps:$4 sm:$0xff]  }
 0x8e0   :  { %8973 = vmatprep.subr.bf16.mxu0 %v11705_v29  ;;  %9014 = vmatprep.subr.bf16.mxu1 %v11708_v41  ;;  %v11718_v63 = vld [vmem:[%s15652_s19 + $0x6e0] ss:$16 sps:$4 sm:$0xff]  }
 0x8e3   :  { %8974 = vmatpush2.bf16.msra.mxu0 %v11703_v7  ;;  %9015 = vmatpush2.bf16.msra.mxu1 %v11706_v43  ;;  %v11723_v7 = vld [vmem:[%s15652_s19 + $0x4c4] ss:$16 sps:$4 sm:$0xff]  }
 0x8e4   :  { %8975 = vmatprep.subr.bf16.mxu0 %v11711_v34  ;;  %9016 = vmatprep.subr.bf16.mxu1 %v11714_v45  ;;  %v11726_v43 = vld [vmem:[%s15652_s19 + $0x6c4] ss:$16 sps:$4 sm:$0xff]   ;;  %v11721_v34 = vld [vmem:[%s15652_s19 + $0x4c0] ss:$16 sps:$4 sm:$0xff]  }
 0x8e5   :  { %v11724_v45 = vld [vmem:[%s15652_s19 + $0x6c0] ss:$16 sps:$4 sm:$0xff]  }
 0x8e7   :  { %8976 = vmatpush2.bf16.msra.mxu0 %v11709_v13  ;;  %9017 = vmatpush2.bf16.msra.mxu1 %v11712_v52  ;;  %v11729_v13 = vld [vmem:[%s15652_s19 + $0x4a4] ss:$16 sps:$4 sm:$0xff]  }
 0x8e8   :  { %9027 = vmatprep.subr.bf16.mxu0 %v11717_v30  ;;  %9068 = vmatprep.subr.bf16.mxu1 %v11720_v35  ;;  %v11732_v52 = vld [vmem:[%s15652_s19 + $0x6a4] ss:$16 sps:$4 sm:$0xff]   ;;  %v11727_v30 = vld [vmem:[%s15652_s19 + $0x4a0] ss:$16 sps:$4 sm:$0xff]  }
 0x8e9   :  { %v11730_v35 = vld [vmem:[%s15652_s19 + $0x6a0] ss:$16 sps:$4 sm:$0xff]  }
 0x90a   :  { %v6707_v58 = vpop.f32.mrf.mxu0  ;;  %v6748_v16 = vpop.f32.mrf.mxu1 }
 0x90c   :  { %v6709_v44 = vpop.f32.mrf.mxu0  ;;  %v6750_v48 = vpop.f32.mrf.mxu1 }
 0x90e   :  { %v6711_v49 = vpop.f32.mrf.mxu0  ;;  %v6752_v36 = vpop.f32.mrf.mxu1 }
 0x90f   :  { %v11741_v49 = vld [vmem:[%s15652_s19 + $0x464] ss:$16 sps:$4 sm:$0xff]  }
 0x910   :  { %v6712_v50 = vpop.f32.mrf.mxu0  ;;  %v6753_v51 = vpop.f32.mrf.mxu1  ;;  %v11744_v36 = vld [vmem:[%s15652_s19 + $0x664] ss:$16 sps:$4 sm:$0xff]  }
 0x911   :  { %v11739_v50 = vld [vmem:[%s15652_s19 + $0x460] ss:$16 sps:$4 sm:$0xff]  }
 0x912   :  { %v11742_v51 = vld [vmem:[%s15652_s19 + $0x660] ss:$16 sps:$4 sm:$0xff]  }
 0x92a   :  { %v14880_v57 = vpop.f32.mrf.mxu0  ;;  %v14882_v12 = vpop.f32.mrf.mxu1 }
 0x92c   :  { %v14884_v59 = vpop.f32.mrf.mxu0  ;;  %v14886_v6 = vpop.f32.mrf.mxu1 }
 0x92e   :  { %v6793_v32 = vpop.f32.mrf.mxu0  ;;  %v6834_v4 = vpop.f32.mrf.mxu1 }
 0x92f   :  { %v11747_v32 = vld [vmem:[%s15652_s19 + $0x444] ss:$16 sps:$4 sm:$0xff]  }
 0x930   :  { %v6794_v46 = vpop.f32.mrf.mxu0  ;;  %v6835_v53 = vpop.f32.mrf.mxu1  ;;  %v11750_v4 = vld [vmem:[%s15652_s19 + $0x644] ss:$16 sps:$4 sm:$0xff]  }
 0x931   :  { %v11745_v46 = vld [vmem:[%s15652_s19 + $0x440] ss:$16 sps:$4 sm:$0xff]  }
 0x932   :  { %v11748_v53 = vld [vmem:[%s15652_s19 + $0x640] ss:$16 sps:$4 sm:$0xff]  }
 0x94a   :  { %v7191_v2 = vpop.f32.mrf.mxu0  ;;  %v7232_v19 = vpop.f32.mrf.mxu1 }
 0x94b   :  { %v7192_v5 = vadd.f32 %v7191_v2, %v6707_v58  ;;  %v7233_v21 = vadd.f32 %v7232_v19, %v6748_v16  ;;  %v11735_v58 = vld [vmem:[%s15652_s19 + $0x484] ss:$16 sps:$4 sm:$0xff]   ;;  %v7342_v2 = vrot.slane %v14891_v62, %v1265_v18  ;;  %v7350_v19 = vrot.slane %v14891_v62, %v1273_v31  ;;  %v11751_v31 = vld [vmem:[%s15652_s19 + $0x420] ss:$16 sps:$4 sm:$0xff]  }
 0x94c   :  { %v7193_v55 = vpop.f32.mrf.mxu0  ;;  %v7234_v24 = vpop.f32.mrf.mxu1  ;;  %v11738_v16 = vld [vmem:[%s15652_s19 + $0x684] ss:$16 sps:$4 sm:$0xff]   ;;  %v7354_v18 = vrot.slane %v14891_v62, %v1277_v33 }
 0x94d   :  { %v7363_v0 = vadd.f32 %v7326_v27, %v7192_v5  ;;  %v7365_v9 = vadd.f32 %v7334_v1, %v7233_v21  ;;  %v7194_v61 = vadd.f32 %v7193_v55, %v6709_v44  ;;  %v7235_v56 = vadd.f32 %v7234_v24, %v6750_v48  ;;  %v11733_v44 = vld [vmem:[%s15652_s19 + $0x480] ss:$16 sps:$4 sm:$0xff]   ;;  %v11753_v27 = vld [vmem:[%s15652_s19 + $0x424] ss:$16 sps:$4 sm:$0xff]  }
 0x94e   :  { %v7195_v14 = vpop.f32.mrf.mxu0  ;;  %v7236_v15 = vpop.f32.mrf.mxu1  ;;  %v11736_v48 = vld [vmem:[%s15652_s19 + $0x680] ss:$16 sps:$4 sm:$0xff]   ;;  %v11756_v1 = vld [vmem:[%s15652_s19 + $0x624] ss:$16 sps:$4 sm:$0xff]  }
 0x94f   :  { %v7364_v11 = vadd.f32 %v7330_v10, %v7194_v61  ;;  %v7366_v8 = vadd.f32 %v7338_v54, %v7235_v56  ;;  %v7371_v17 = vmax.f32 %v7363_v0, 0.0  ;;  %v7373_v23 = vmax.f32 %v7365_v9, 0.0  ;;  %v11754_v24 = vld [vmem:[%s15652_s19 + $0x620] ss:$16 sps:$4 sm:$0xff]  }
 0x950   :  { %v7196_v47 = vpop.f32.mrf.mxu0  ;;  %v7237_v22 = vpop.f32.mrf.mxu1  ;;  %v7346_v10 = vrot.slane %v14891_v62, %v1269_v20 }
 0x951   :  { %v7372_v25 = vmax.f32 %v7364_v11, 0.0  ;;  %v7374_v26 = vmax.f32 %v7366_v8, 0.0  ;;  %v14911_v29 = vpack.c.bf16 %v7371_v17, %v7371_v17  ;;  %v14913_v41 = vpack.c.bf16 %v7373_v23, %v7373_v23  ;;  %v11757_v11 = vld [vmem:[%s15652_s19 + $0x400] ss:$16 sps:$4 sm:$0xff]  }
 0x952   :  { %v11760_v8 = vld [vmem:[%s15652_s19 + $0x600] ss:$16 sps:$4 sm:$0xff]  }
 0x953   :  { %v14901_v40 = vpack.c.bf16 %v7372_v25, %v7372_v25  ;;  %v14903_v42 = vpack.c.bf16 %v7374_v26, %v7374_v26 }
 0x955   :  { %8977 = vmatprep.mubr.bf16.mxu0 %v14901_v40  ;;  %9018 = vmatprep.mubr.bf16.mxu1 %v14903_v42 }
 0x956   :  { %8978 = vmatmul.mubr.bf16.vlgmr.msra.gmra.mxu0 %v14911_v29  ;;  %9019 = vmatmul.mubr.bf16.vlgmr.msra.gmra.mxu1 %v14913_v41 }
 0x957   :  { %9028 = vmatpush1.bf16.msra.mxu0 %v11715_v28  ;;  %9069 = vmatpush1.bf16.msra.mxu1 %v11718_v63  ;;  %v11763_v28 = vld [vmem:[%s15652_s19 + $0x5e0] ss:$16 sps:$4 sm:$0xff]  }
 0x958   :  { %9029 = vmatprep.subr.bf16.mxu0 %v11723_v7  ;;  %9070 = vmatprep.subr.bf16.mxu1 %v11726_v43  ;;  %v11766_v63 = vld [vmem:[%s15652_s19 + $0x7e0] ss:$16 sps:$4 sm:$0xff]   ;;  %v11771_v7 = vld [vmem:[%s15652_s19 + $0x5c4] ss:$16 sps:$4 sm:$0xff]  }
 0x959   :  { %v11774_v43 = vld [vmem:[%s15652_s19 + $0x7c4] ss:$16 sps:$4 sm:$0xff]  }
 0x95b   :  { %9030 = vmatpush1.bf16.msra.mxu0 %v11721_v34  ;;  %9071 = vmatpush1.bf16.msra.mxu1 %v11724_v45  ;;  %v11769_v34 = vld [vmem:[%s15652_s19 + $0x5c0] ss:$16 sps:$4 sm:$0xff]  }
 0x95c   :  { %9031 = vmatprep.subr.bf16.mxu0 %v11729_v13  ;;  %9072 = vmatprep.subr.bf16.mxu1 %v11732_v52  ;;  %v11772_v45 = vld [vmem:[%s15652_s19 + $0x7c0] ss:$16 sps:$4 sm:$0xff]   ;;  %v11777_v13 = vld [vmem:[%s15652_s19 + $0x5a4] ss:$16 sps:$4 sm:$0xff]  }
 0x95d   :  { %v11780_v52 = vld [vmem:[%s15652_s19 + $0x7a4] ss:$16 sps:$4 sm:$0xff]  }
 0x95f   :  { %9032 = vmatpush1.bf16.msra.mxu0 %v11727_v30  ;;  %9073 = vmatpush1.bf16.msra.mxu1 %v11730_v35  ;;  %v11775_v30 = vld [vmem:[%s15652_s19 + $0x5a0] ss:$16 sps:$4 sm:$0xff]  }
 0x960   :  { %9033 = vmatprep.subr.bf16.mxu0 %v11735_v58  ;;  %9074 = vmatprep.subr.bf16.mxu1 %v11738_v16  ;;  %v11778_v35 = vld [vmem:[%s15652_s19 + $0x7a0] ss:$16 sps:$4 sm:$0xff]   ;;  %v11783_v58 = vld [vmem:[%s15652_s19 + $0x584] ss:$16 sps:$4 sm:$0xff]  }
 0x961   :  { %v11786_v16 = vld [vmem:[%s15652_s19 + $0x784] ss:$16 sps:$4 sm:$0xff]  }
 0x963   :  { %9034 = vmatpush1.bf16.msra.mxu0 %v11733_v44  ;;  %9075 = vmatpush1.bf16.msra.mxu1 %v11736_v48  ;;  %v11781_v44 = vld [vmem:[%s15652_s19 + $0x580] ss:$16 sps:$4 sm:$0xff]  }
 0x964   :  { %9035 = vmatprep.subr.bf16.mxu0 %v11741_v49  ;;  %9076 = vmatprep.subr.bf16.mxu1 %v11744_v36  ;;  %v11784_v48 = vld [vmem:[%s15652_s19 + $0x780] ss:$16 sps:$4 sm:$0xff]   ;;  %v11789_v49 = vld [vmem:[%s15652_s19 + $0x564] ss:$16 sps:$4 sm:$0xff]  }
 0x965   :  { %v11792_v36 = vld [vmem:[%s15652_s19 + $0x764] ss:$16 sps:$4 sm:$0xff]  }
 0x967   :  { %9036 = vmatpush1.bf16.msra.mxu0 %v11739_v50  ;;  %9077 = vmatpush1.bf16.msra.mxu1 %v11742_v51  ;;  %v11787_v50 = vld [vmem:[%s15652_s19 + $0x560] ss:$16 sps:$4 sm:$0xff]  }
 0x968   :  { %9037 = vmatprep.subr.bf16.mxu0 %v11747_v32  ;;  %9078 = vmatprep.subr.bf16.mxu1 %v11750_v4  ;;  %v11790_v51 = vld [vmem:[%s15652_s19 + $0x760] ss:$16 sps:$4 sm:$0xff]   ;;  %v11795_v32 = vld [vmem:[%s15652_s19 + $0x544] ss:$16 sps:$4 sm:$0xff]  }
 0x969   :  { %v11798_v4 = vld [vmem:[%s15652_s19 + $0x744] ss:$16 sps:$4 sm:$0xff]  }
 0x96a   :  { %v7273_v5 = vpop.f32.mrf.mxu0  ;;  %v7314_v21 = vpop.f32.mrf.mxu1 }
 0x96b   :  { %v7274_v54 = vadd.f32 %v7273_v5, %v14880_v57  ;;  %v7315_v55 = vadd.f32 %v7314_v21, %v14882_v12  ;;  %9038 = vmatpush1.bf16.msra.mxu0 %v11745_v46  ;;  %9079 = vmatpush1.bf16.msra.mxu1 %v11748_v53  ;;  %v11759_v57 = vld [vmem:[%s15652_s19 + $0x404] ss:$16 sps:$4 sm:$0xff]   ;;  %v11793_v46 = vld [vmem:[%s15652_s19 + $0x540] ss:$16 sps:$4 sm:$0xff]  }
 0x96c   :  { %v7275_v0 = vpop.f32.mrf.mxu0  ;;  %v7316_v20 = vpop.f32.mrf.mxu1  ;;  %9039 = vmatprep.subr.bf16.mxu0 %v11753_v27  ;;  %9080 = vmatprep.subr.bf16.mxu1 %v11756_v1  ;;  %v11796_v53 = vld [vmem:[%s15652_s19 + $0x740] ss:$16 sps:$4 sm:$0xff]   ;;  %v11801_v27 = vld [vmem:[%s15652_s19 + $0x524] ss:$16 sps:$4 sm:$0xff]  }
 0x96d   :  { %v15011_v33 = vadd.f32 %v7342_v2, %v7274_v54  ;;  %v15013_v12 = vadd.f32 %v7350_v19, %v7315_v55  ;;  %v7276_v62 = vadd.f32 %v7275_v0, %v14884_v59  ;;  %v7317_v9 = vadd.f32 %v7316_v20, %v14886_v6  ;;  %v11765_v59 = vld [vmem:[%s15652_s19 + $0x5e4] ss:$16 sps:$4 sm:$0xff]   ;;  %v11799_v2 = vld [vmem:[%s15652_s19 + $0x520] ss:$16 sps:$4 sm:$0xff]   ;;  %v11811_v0 = vld [vmem:[%s15652_s19 + $0xe8] ss:$16 sps:$4 sm:$0xff]  }
 0x96e   :  { %v7277_v61 = vpop.f32.mrf.mxu0  ;;  %v7318_v56 = vpop.f32.mrf.mxu1  ;;  %v11768_v6 = vld [vmem:[%s15652_s19 + $0x7e4] ss:$16 sps:$4 sm:$0xff]   ;;  %v11802_v19 = vld [vmem:[%s15652_s19 + $0x720] ss:$16 sps:$4 sm:$0xff]  }
 0x96f   :  { %v7368_v14 = vadd.f32 %v7346_v10, %v7276_v62  ;;  %v7370_v15 = vadd.f32 %v7354_v18, %v7317_v9  ;;  %9040 = vmatpush1.bf16.msra.mxu0 %v11751_v31  ;;  %9081 = vmatpush1.bf16.msra.mxu1 %v11754_v24  ;;  %v11804_v1 = vld [vmem:[%s15652_s19 + $0x724] ss:$16 sps:$4 sm:$0xff]   ;;  %v11805_v10 = vld [vmem:[%s15652_s19 + $0x500] ss:$16 sps:$4 sm:$0xff]   ;;  %v7375_v55 = vmax.f32 %v15011_v33, 0.0  ;;  %v7377_v18 = vmax.f32 %v15013_v12, 0.0 }
 0x970   :  { %v7278_v17 = vpop.f32.mrf.mxu0  ;;  %v7319_v23 = vpop.f32.mrf.mxu1  ;;  %9041 = vmatprep.subr.bf16.mxu0 %v11759_v57  ;;  %9082 = vmatprep.subr.bf16.mxu1 %v11762_v37  ;;  %v11807_v5 = vld [vmem:[%s15652_s19 + $0x504] ss:$16 sps:$4 sm:$0xff]   ;;  %v11808_v54 = vld [vmem:[%s15652_s19 + $0x700] ss:$16 sps:$4 sm:$0xff]   ;;  %v11813_v31 = vld [vmem:[%s15652_s19 + $0xec] ss:$16 sps:$4 sm:$0xff]  }
 0x971   :  { %v7376_v47 = vmax.f32 %v7368_v14, 0.0  ;;  %v7378_v22 = vmax.f32 %v7370_v15, 0.0  ;;  %v11810_v21 = vld [vmem:[%s15652_s19 + $0x704] ss:$16 sps:$4 sm:$0xff]   ;;  %v11816_v24 = vld [vmem:[%s15652_s19 + $0x2ec] ss:$16 sps:$4 sm:$0xff]   ;;  %v15136_v20 = vpack.c.bf16 %v7375_v55, %v7375_v55  ;;  %v15138_v57 = vpack.c.bf16 %v7377_v18, %v7377_v18 }
 0x972   :  { %v11814_v37 = vld [vmem:[%s15652_s19 + $0x2e8] ss:$16 sps:$4 sm:$0xff]   ;;  %v11819_v33 = vld [vmem:[%s15652_s19 + $0xcc] ss:$16 sps:$4 sm:$0xff]  }
 0x973   :  { %v15029_v25 = vpack.c.bf16 %v7376_v47, %v7376_v47  ;;  %v15031_v26 = vpack.c.bf16 %v7378_v22, %v7378_v22  ;;  %9042 = vmatpush1.bf16.msra.mxu0 %v11757_v11  ;;  %9083 = vmatpush1.bf16.msra.mxu1 %v11760_v8  ;;  %v11822_v12 = vld [vmem:[%s15652_s19 + $0x2cc] ss:$16 sps:$4 sm:$0xff]   ;;  %v11817_v62 = vld [vmem:[%s15652_s19 + $0xc8] ss:$16 sps:$4 sm:$0xff]  }
 0x974   :  { %9043 = vmatprep.subr.bf16.mxu0 %v11765_v59  ;;  %9084 = vmatprep.subr.bf16.mxu1 %v11768_v6  ;;  %v11820_v9 = vld [vmem:[%s15652_s19 + $0x2c8] ss:$16 sps:$4 sm:$0xff]   ;;  %v11825_v61 = vld [vmem:[%s15652_s19 + $0xac] ss:$16 sps:$4 sm:$0xff]  }
 0x975   :  { %9059 = vmatprep.mubr.bf16.mxu0 %v15029_v25  ;;  %9100 = vmatprep.mubr.bf16.mxu1 %v15031_v26  ;;  %v11823_v56 = vld [vmem:[%s15652_s19 + $0xa8] ss:$16 sps:$4 sm:$0xff]   ;;  %v11831_v14 = vld [vmem:[%s15652_s19 + $0x8c] ss:$16 sps:$4 sm:$0xff]  }
 0x976   :  { %v11834_v15 = vld [vmem:[%s15652_s19 + $0x28c] ss:$16 sps:$4 sm:$0xff]   ;;  %v11829_v11 = vld [vmem:[%s15652_s19 + $0x88] ss:$16 sps:$4 sm:$0xff]  }
 0x977   :  { %9044 = vmatpush2.bf16.msra.mxu0 %v11763_v28  ;;  %9085 = vmatpush2.bf16.msra.mxu1 %v11766_v63  ;;  %v11832_v8 = vld [vmem:[%s15652_s19 + $0x288] ss:$16 sps:$4 sm:$0xff]   ;;  %v11837_v17 = vld [vmem:[%s15652_s19 + $0x6c] ss:$16 sps:$4 sm:$0xff]  }
 0x978   :  { %9045 = vmatprep.subr.bf16.mxu0 %v11771_v7  ;;  %9086 = vmatprep.subr.bf16.mxu1 %v11774_v43  ;;  %v11840_v23 = vld [vmem:[%s15652_s19 + $0x26c] ss:$16 sps:$4 sm:$0xff]   ;;  %v11835_v59 = vld [vmem:[%s15652_s19 + $0x68] ss:$16 sps:$4 sm:$0xff]  }
 0x979   :  { %v11838_v6 = vld [vmem:[%s15652_s19 + $0x268] ss:$16 sps:$4 sm:$0xff]   ;;  %v11843_v47 = vld [vmem:[%s15652_s19 + $0x4c] ss:$16 sps:$4 sm:$0xff]  }
 0x97a   :  { %v11841_v22 = vld [vmem:[%s15652_s19 + $0x48] ss:$16 sps:$4 sm:$0xff]   ;;  %v11846_v28 = vld [vmem:[%s15652_s19 + $0x24c] ss:$16 sps:$4 sm:$0xff]  }
 0x97b   :  { %9046 = vmatpush2.bf16.msra.mxu0 %v11769_v34  ;;  %9087 = vmatpush2.bf16.msra.mxu1 %v11772_v45  ;;  %v11844_v63 = vld [vmem:[%s15652_s19 + $0x248] ss:$16 sps:$4 sm:$0xff]   ;;  %v11849_v7 = vld [vmem:[%s15652_s19 + $0x2c] ss:$16 sps:$4 sm:$0xff]  }
 0x97c   :  { %9047 = vmatprep.subr.bf16.mxu0 %v11777_v13  ;;  %9088 = vmatprep.subr.bf16.mxu1 %v11780_v52  ;;  %v11852_v43 = vld [vmem:[%s15652_s19 + $0x22c] ss:$16 sps:$4 sm:$0xff]   ;;  %v11847_v34 = vld [vmem:[%s15652_s19 + $0x28] ss:$16 sps:$4 sm:$0xff]  }
 0x97d   :  { %v11850_v45 = vld [vmem:[%s15652_s19 + $0x228] ss:$16 sps:$4 sm:$0xff]   ;;  %v11855_v13 = vld [vmem:[%s15652_s19 + $0xc] ss:$16 sps:$4 sm:$0xff]  }
 0x97e   :  { %v11858_v52 = vld [vmem:[%s15652_s19 + $0x20c] ss:$16 sps:$4 sm:$0xff]  }
 0x97f   :  { %9048 = vmatpush2.bf16.msra.mxu0 %v11775_v30  ;;  %9089 = vmatpush2.bf16.msra.mxu1 %v11778_v35  ;;  %v11853_v30 = vld [vmem:[%s15652_s19 + $0x8] ss:$16 sps:$4 sm:$0xff]   ;;  %v11891_v55 = vld [vmem:[%s15652_s19 + $0x14c] ss:$16 sps:$4 sm:$0xff]  }
 0x980   :  { %9049 = vmatprep.subr.bf16.mxu0 %v11783_v58  ;;  %9090 = vmatprep.subr.bf16.mxu1 %v11786_v16  ;;  %v11856_v35 = vld [vmem:[%s15652_s19 + $0x208] ss:$16 sps:$4 sm:$0xff]   ;;  %v11861_v58 = vld [vmem:[%s15652_s19 + $0x1ec] ss:$16 sps:$4 sm:$0xff]  }
 0x981   :  { %v11864_v16 = vld [vmem:[%s15652_s19 + $0x3ec] ss:$16 sps:$4 sm:$0xff]  }
 0x982   :  { %v11894_v18 = vld [vmem:[%s15652_s19 + $0x34c] ss:$16 sps:$4 sm:$0xff]  }
 0x983   :  { %9050 = vmatpush2.bf16.msra.mxu0 %v11781_v44  ;;  %9091 = vmatpush2.bf16.msra.mxu1 %v11784_v48  ;;  %v11859_v44 = vld [vmem:[%s15652_s19 + $0x1e8] ss:$16 sps:$4 sm:$0xff]  }
 0x984   :  { %9051 = vmatprep.subr.bf16.mxu0 %v11789_v49  ;;  %9092 = vmatprep.subr.bf16.mxu1 %v11792_v36  ;;  %v11862_v48 = vld [vmem:[%s15652_s19 + $0x3e8] ss:$16 sps:$4 sm:$0xff]   ;;  %v11867_v49 = vld [vmem:[%s15652_s19 + $0x1cc] ss:$16 sps:$4 sm:$0xff]  }
 0x985   :  { %v11870_v36 = vld [vmem:[%s15652_s19 + $0x3cc] ss:$16 sps:$4 sm:$0xff]  }
 0x987   :  { %9052 = vmatpush2.bf16.msra.mxu0 %v11787_v50  ;;  %9093 = vmatpush2.bf16.msra.mxu1 %v11790_v51  ;;  %v11865_v50 = vld [vmem:[%s15652_s19 + $0x1c8] ss:$16 sps:$4 sm:$0xff]  }
 0x988   :  { %9053 = vmatprep.subr.bf16.mxu0 %v11795_v32  ;;  %9094 = vmatprep.subr.bf16.mxu1 %v11798_v4  ;;  %v11868_v51 = vld [vmem:[%s15652_s19 + $0x3c8] ss:$16 sps:$4 sm:$0xff]   ;;  %v11873_v32 = vld [vmem:[%s15652_s19 + $0x1ac] ss:$16 sps:$4 sm:$0xff]  }
 0x989   :  { %v11876_v4 = vld [vmem:[%s15652_s19 + $0x3ac] ss:$16 sps:$4 sm:$0xff]  }
 0x98b   :  { %9054 = vmatpush2.bf16.msra.mxu0 %v11793_v46  ;;  %9095 = vmatpush2.bf16.msra.mxu1 %v11796_v53  ;;  %v11871_v46 = vld [vmem:[%s15652_s19 + $0x1a8] ss:$16 sps:$4 sm:$0xff]  }
 0x98c   :  { %9055 = vmatprep.subr.bf16.mxu0 %v11801_v27  ;;  %9096 = vmatprep.subr.bf16.mxu1 %v11804_v1  ;;  %v11874_v53 = vld [vmem:[%s15652_s19 + $0x3a8] ss:$16 sps:$4 sm:$0xff]   ;;  %v11879_v27 = vld [vmem:[%s15652_s19 + $0x18c] ss:$16 sps:$4 sm:$0xff]  }
 0x98d   :  { %v11882_v1 = vld [vmem:[%s15652_s19 + $0x38c] ss:$16 sps:$4 sm:$0xff]  }
 0x98f   :  { %9056 = vmatpush2.bf16.msra.mxu0 %v11799_v2  ;;  %9097 = vmatpush2.bf16.msra.mxu1 %v11802_v19  ;;  %v11877_v2 = vld [vmem:[%s15652_s19 + $0x188] ss:$16 sps:$4 sm:$0xff]  }
 0x990   :  { %9057 = vmatprep.subr.bf16.mxu0 %v11807_v5  ;;  %9098 = vmatprep.subr.bf16.mxu1 %v11810_v21  ;;  %v11880_v19 = vld [vmem:[%s15652_s19 + $0x388] ss:$16 sps:$4 sm:$0xff]   ;;  %v11885_v5 = vld [vmem:[%s15652_s19 + $0x16c] ss:$16 sps:$4 sm:$0xff]  }
 0x991   :  { %v11888_v21 = vld [vmem:[%s15652_s19 + $0x36c] ss:$16 sps:$4 sm:$0xff]  }
 0x993   :  { %9058 = vmatpush2.bf16.msra.mxu0 %v11805_v10  ;;  %9099 = vmatpush2.bf16.msra.mxu1 %v11808_v54  ;;  %v11883_v10 = vld [vmem:[%s15652_s19 + $0x168] ss:$16 sps:$4 sm:$0xff]  }
 0x994   :  { %9109 = vmatprep.subr.bf16.mxu0 %v11813_v31  ;;  %9150 = vmatprep.subr.bf16.mxu1 %v11816_v24  ;;  %v11886_v54 = vld [vmem:[%s15652_s19 + $0x368] ss:$16 sps:$4 sm:$0xff]  }
 0x995   :  { %v11889_v31 = vld [vmem:[%s15652_s19 + $0x148] ss:$16 sps:$4 sm:$0xff]  }
 0x996   :  { %9060 = vmatmul.mubr.bf16.vlgmr.msra.gmra.mxu0 %v15136_v20  ;;  %9101 = vmatmul.mubr.bf16.vlgmr.msra.gmra.mxu1 %v15138_v57  ;;  %v11892_v24 = vld [vmem:[%s15652_s19 + $0x348] ss:$16 sps:$4 sm:$0xff]  }
 0x997   :  { %9110 = vmatpush1.bf16.msra.mxu0 %v11811_v0  ;;  %9141 = vmatprep.mubr.bf16.mxu0 %v14901_v40  ;;  %v11828_v40 = vld [vmem:[%s15652_s19 + $0x2ac] ss:$16 sps:$4 sm:$0xff]  }
 0x998   :  { %9151 = vmatpush1.bf16.msra.mxu1 %v11814_v37  ;;  %9182 = vmatprep.mubr.bf16.mxu1 %v14903_v42  ;;  %v11826_v42 = vld [vmem:[%s15652_s19 + $0x2a8] ss:$16 sps:$4 sm:$0xff]   ;;  %v11897_v0 = vld [vmem:[%s15652_s19 + $0x12c] ss:$16 sps:$4 sm:$0xff]  }
 0x999   :  { %9111 = vmatprep.subr.bf16.mxu0 %v11819_v33  ;;  %9152 = vmatprep.subr.bf16.mxu1 %v11822_v12  ;;  %v11900_v37 = vld [vmem:[%s15652_s19 + $0x32c] ss:$16 sps:$4 sm:$0xff]   ;;  %v11895_v33 = vld [vmem:[%s15652_s19 + $0x128] ss:$16 sps:$4 sm:$0xff]  }
 0x99a   :  { %v11898_v12 = vld [vmem:[%s15652_s19 + $0x328] ss:$16 sps:$4 sm:$0xff]  }
 0x99b   :  { %9112 = vmatpush1.bf16.msra.mxu0 %v11817_v62  ;;  %v11903_v62 = vld [vmem:[%s15652_s19 + $0x10c] ss:$16 sps:$4 sm:$0xff]  }
 0x99c   :  { %9153 = vmatpush1.bf16.msra.mxu1 %v11820_v9  ;;  %9113 = vmatprep.subr.bf16.mxu0 %v11825_v61  ;;  %v11906_v9 = vld [vmem:[%s15652_s19 + $0x30c] ss:$16 sps:$4 sm:$0xff]   ;;  %v11901_v61 = vld [vmem:[%s15652_s19 + $0x108] ss:$16 sps:$4 sm:$0xff]  }
 0x99d   :  { %9154 = vmatprep.subr.bf16.mxu1 %v11828_v40  ;;  %v11904_v40 = vld [vmem:[%s15652_s19 + $0x308] ss:$16 sps:$4 sm:$0xff]  }
 0x99f   :  { %9114 = vmatpush1.bf16.msra.mxu0 %v11823_v56  ;;  %v11909_v56 = vld [vmem:[%s15652_s19 + $0x4ec] ss:$16 sps:$4 sm:$0xff]  }
 0x9a0   :  { %9155 = vmatpush1.bf16.msra.mxu1 %v11826_v42  ;;  %9115 = vmatprep.subr.bf16.mxu0 %v11831_v14  ;;  %v11912_v42 = vld [vmem:[%s15652_s19 + $0x6ec] ss:$16 sps:$4 sm:$0xff]   ;;  %v11907_v14 = vld [vmem:[%s15652_s19 + $0x4e8] ss:$16 sps:$4 sm:$0xff]  }
 0x9a1   :  { %9156 = vmatprep.subr.bf16.mxu1 %v11834_v15  ;;  %v11910_v15 = vld [vmem:[%s15652_s19 + $0x6e8] ss:$16 sps:$4 sm:$0xff]  }
 0x9a3   :  { %9116 = vmatpush1.bf16.msra.mxu0 %v11829_v11  ;;  %v11915_v11 = vld [vmem:[%s15652_s19 + $0x4cc] ss:$16 sps:$4 sm:$0xff]  }
 0x9a4   :  { %9157 = vmatpush1.bf16.msra.mxu1 %v11832_v8  ;;  %9117 = vmatprep.subr.bf16.mxu0 %v11837_v17  ;;  %v11918_v8 = vld [vmem:[%s15652_s19 + $0x6cc] ss:$16 sps:$4 sm:$0xff]   ;;  %v11913_v17 = vld [vmem:[%s15652_s19 + $0x4c8] ss:$16 sps:$4 sm:$0xff]  }
 0x9a5   :  { %9158 = vmatprep.subr.bf16.mxu1 %v11840_v23  ;;  %v11916_v23 = vld [vmem:[%s15652_s19 + $0x6c8] ss:$16 sps:$4 sm:$0xff]  }
 0x9a7   :  { %9118 = vmatpush1.bf16.msra.mxu0 %v11835_v59  ;;  %v11922_v59 = vld [vmem:[%s15652_s19 + $0x6a8] ss:$16 sps:$4 sm:$0xff]  }
 0x9a8   :  { %9159 = vmatpush1.bf16.msra.mxu1 %v11838_v6  ;;  %9119 = vmatprep.subr.bf16.mxu0 %v11843_v47  ;;  %v11930_v6 = vld [vmem:[%s15652_s19 + $0x68c] ss:$16 sps:$4 sm:$0xff]   ;;  %v11925_v47 = vld [vmem:[%s15652_s19 + $0x488] ss:$16 sps:$4 sm:$0xff]  }
 0x9a9   :  { %9160 = vmatprep.subr.bf16.mxu1 %v11846_v28  ;;  %v11933_v28 = vld [vmem:[%s15652_s19 + $0x46c] ss:$16 sps:$4 sm:$0xff]  }
 0x9ab   :  { %9120 = vmatpush1.bf16.msra.mxu0 %v11841_v22  ;;  %v11928_v22 = vld [vmem:[%s15652_s19 + $0x688] ss:$16 sps:$4 sm:$0xff]  }
 0x9ac   :  { %9161 = vmatpush1.bf16.msra.mxu1 %v11844_v63  ;;  %9121 = vmatprep.subr.bf16.mxu0 %v11849_v7  ;;  %v11936_v63 = vld [vmem:[%s15652_s19 + $0x66c] ss:$16 sps:$4 sm:$0xff]   ;;  %v11931_v7 = vld [vmem:[%s15652_s19 + $0x468] ss:$16 sps:$4 sm:$0xff]  }
 0x9ad   :  { %9162 = vmatprep.subr.bf16.mxu1 %v11852_v43  ;;  %v11934_v43 = vld [vmem:[%s15652_s19 + $0x668] ss:$16 sps:$4 sm:$0xff]  }
 0x9af   :  { %9122 = vmatpush1.bf16.msra.mxu0 %v11847_v34  ;;  %v11939_v34 = vld [vmem:[%s15652_s19 + $0x44c] ss:$16 sps:$4 sm:$0xff]  }
 0x9b0   :  { %9163 = vmatpush1.bf16.msra.mxu1 %v11850_v45  ;;  %9123 = vmatprep.subr.bf16.mxu0 %v11855_v13  ;;  %v11942_v45 = vld [vmem:[%s15652_s19 + $0x64c] ss:$16 sps:$4 sm:$0xff]   ;;  %v11937_v13 = vld [vmem:[%s15652_s19 + $0x448] ss:$16 sps:$4 sm:$0xff]  }
 0x9b1   :  { %9164 = vmatprep.subr.bf16.mxu1 %v11858_v52  ;;  %v11940_v52 = vld [vmem:[%s15652_s19 + $0x648] ss:$16 sps:$4 sm:$0xff]  }
 0x9b3   :  { %9124 = vmatpush1.bf16.msra.mxu0 %v11853_v30  ;;  %v11945_v30 = vld [vmem:[%s15652_s19 + $0x42c] ss:$16 sps:$4 sm:$0xff]  }
 0x9b4   :  { %9165 = vmatpush1.bf16.msra.mxu1 %v11856_v35  ;;  %9125 = vmatprep.subr.bf16.mxu0 %v11861_v58  ;;  %v11948_v35 = vld [vmem:[%s15652_s19 + $0x62c] ss:$16 sps:$4 sm:$0xff]   ;;  %v11943_v58 = vld [vmem:[%s15652_s19 + $0x428] ss:$16 sps:$4 sm:$0xff]  }
 0x9b5   :  { %9166 = vmatprep.subr.bf16.mxu1 %v11864_v16  ;;  %v11946_v16 = vld [vmem:[%s15652_s19 + $0x628] ss:$16 sps:$4 sm:$0xff]  }
 0x9b7   :  { %9126 = vmatpush2.bf16.msra.mxu0 %v11859_v44  ;;  %v11951_v44 = vld [vmem:[%s15652_s19 + $0x40c] ss:$16 sps:$4 sm:$0xff]  }
 0x9b8   :  { %9167 = vmatpush2.bf16.msra.mxu1 %v11862_v48  ;;  %9127 = vmatprep.subr.bf16.mxu0 %v11867_v49  ;;  %v11954_v48 = vld [vmem:[%s15652_s19 + $0x60c] ss:$16 sps:$4 sm:$0xff]   ;;  %v11949_v49 = vld [vmem:[%s15652_s19 + $0x408] ss:$16 sps:$4 sm:$0xff]  }
 0x9b9   :  { %9168 = vmatprep.subr.bf16.mxu1 %v11870_v36  ;;  %v11952_v36 = vld [vmem:[%s15652_s19 + $0x608] ss:$16 sps:$4 sm:$0xff]  }
 0x9bb   :  { %9128 = vmatpush2.bf16.msra.mxu0 %v11865_v50  ;;  %v11957_v50 = vld [vmem:[%s15652_s19 + $0x5ec] ss:$16 sps:$4 sm:$0xff]  }
 0x9bc   :  { %9169 = vmatpush2.bf16.msra.mxu1 %v11868_v51  ;;  %9129 = vmatprep.subr.bf16.mxu0 %v11873_v32  ;;  %v11960_v51 = vld [vmem:[%s15652_s19 + $0x7ec] ss:$16 sps:$4 sm:$0xff]   ;;  %v11955_v32 = vld [vmem:[%s15652_s19 + $0x5e8] ss:$16 sps:$4 sm:$0xff]  }
 0x9bd   :  { %9170 = vmatprep.subr.bf16.mxu1 %v11876_v4  ;;  %v11958_v4 = vld [vmem:[%s15652_s19 + $0x7e8] ss:$16 sps:$4 sm:$0xff]  }
 0x9bf   :  { %9130 = vmatpush2.bf16.msra.mxu0 %v11871_v46  ;;  %v11963_v46 = vld [vmem:[%s15652_s19 + $0x5cc] ss:$16 sps:$4 sm:$0xff]  }
 0x9c0   :  { %9171 = vmatpush2.bf16.msra.mxu1 %v11874_v53  ;;  %9131 = vmatprep.subr.bf16.mxu0 %v11879_v27  ;;  %v11966_v53 = vld [vmem:[%s15652_s19 + $0x7cc] ss:$16 sps:$4 sm:$0xff]   ;;  %v11961_v27 = vld [vmem:[%s15652_s19 + $0x5c8] ss:$16 sps:$4 sm:$0xff]  }
 0x9c1   :  { %9172 = vmatprep.subr.bf16.mxu1 %v11882_v1  ;;  %v11964_v1 = vld [vmem:[%s15652_s19 + $0x7c8] ss:$16 sps:$4 sm:$0xff]  }
 0x9c3   :  { %9132 = vmatpush2.bf16.msra.mxu0 %v11877_v2  ;;  %v11969_v2 = vld [vmem:[%s15652_s19 + $0x5ac] ss:$16 sps:$4 sm:$0xff]  }
 0x9c4   :  { %9173 = vmatpush2.bf16.msra.mxu1 %v11880_v19  ;;  %9133 = vmatprep.subr.bf16.mxu0 %v11885_v5  ;;  %v11972_v19 = vld [vmem:[%s15652_s19 + $0x7ac] ss:$16 sps:$4 sm:$0xff]   ;;  %v11967_v5 = vld [vmem:[%s15652_s19 + $0x5a8] ss:$16 sps:$4 sm:$0xff]  }
 0x9c5   :  { %9174 = vmatprep.subr.bf16.mxu1 %v11888_v21  ;;  %v11970_v21 = vld [vmem:[%s15652_s19 + $0x7a8] ss:$16 sps:$4 sm:$0xff]  }
 0x9c7   :  { %9134 = vmatpush2.bf16.msra.mxu0 %v11883_v10  ;;  %v11975_v10 = vld [vmem:[%s15652_s19 + $0x58c] ss:$16 sps:$4 sm:$0xff]  }
 0x9c8   :  { %9175 = vmatpush2.bf16.msra.mxu1 %v11886_v54  ;;  %9135 = vmatprep.subr.bf16.mxu0 %v11891_v55  ;;  %v11978_v54 = vld [vmem:[%s15652_s19 + $0x78c] ss:$16 sps:$4 sm:$0xff]   ;;  %v11973_v55 = vld [vmem:[%s15652_s19 + $0x588] ss:$16 sps:$4 sm:$0xff]  }
 0x9c9   :  { %9176 = vmatprep.subr.bf16.mxu1 %v11894_v18  ;;  %v11976_v18 = vld [vmem:[%s15652_s19 + $0x788] ss:$16 sps:$4 sm:$0xff]  }
 0x9cb   :  { %9136 = vmatpush2.bf16.msra.mxu0 %v11889_v31  ;;  %v11981_v31 = vld [vmem:[%s15652_s19 + $0x56c] ss:$16 sps:$4 sm:$0xff]  }
 0x9cc   :  { %9177 = vmatpush2.bf16.msra.mxu1 %v11892_v24  ;;  %9137 = vmatprep.subr.bf16.mxu0 %v11897_v0  ;;  %v11984_v24 = vld [vmem:[%s15652_s19 + $0x76c] ss:$16 sps:$4 sm:$0xff]   ;;  %v11979_v0 = vld [vmem:[%s15652_s19 + $0x568] ss:$16 sps:$4 sm:$0xff]  }
 0x9cd   :  { %9178 = vmatprep.subr.bf16.mxu1 %v11900_v37  ;;  %v11982_v37 = vld [vmem:[%s15652_s19 + $0x768] ss:$16 sps:$4 sm:$0xff]  }
 0x9cf   :  { %9138 = vmatpush2.bf16.msra.mxu0 %v11895_v33  ;;  %v11987_v33 = vld [vmem:[%s15652_s19 + $0x54c] ss:$16 sps:$4 sm:$0xff]  }
 0x9d0   :  { %9179 = vmatpush2.bf16.msra.mxu1 %v11898_v12  ;;  %9139 = vmatprep.subr.bf16.mxu0 %v11903_v62  ;;  %v11990_v12 = vld [vmem:[%s15652_s19 + $0x74c] ss:$16 sps:$4 sm:$0xff]   ;;  %v11985_v62 = vld [vmem:[%s15652_s19 + $0x548] ss:$16 sps:$4 sm:$0xff]  }
 0x9d1   :  { %9180 = vmatprep.subr.bf16.mxu1 %v11906_v9  ;;  %v11988_v9 = vld [vmem:[%s15652_s19 + $0x748] ss:$16 sps:$4 sm:$0xff]  }
 0x9d3   :  { %9140 = vmatpush2.bf16.msra.mxu0 %v11901_v61  ;;  %v11993_v61 = vld [vmem:[%s15652_s19 + $0x52c] ss:$16 sps:$4 sm:$0xff]  }
 0x9d4   :  { %9181 = vmatpush2.bf16.msra.mxu1 %v11904_v40  ;;  %9191 = vmatprep.subr.bf16.mxu0 %v11909_v56  ;;  %v11996_v40 = vld [vmem:[%s15652_s19 + $0x72c] ss:$16 sps:$4 sm:$0xff]   ;;  %v11991_v56 = vld [vmem:[%s15652_s19 + $0x528] ss:$16 sps:$4 sm:$0xff]  }
 0x9d5   :  { %9232 = vmatprep.subr.bf16.mxu1 %v11912_v42  ;;  %v11994_v42 = vld [vmem:[%s15652_s19 + $0x728] ss:$16 sps:$4 sm:$0xff]  }
 0x9d6   :  { %9142 = vmatmul.mubr.bf16.vlgmr.msra.gmra.mxu0 %v14911_v29  ;;  %v11921_v29 = vld [vmem:[%s15652_s19 + $0x4ac] ss:$16 sps:$4 sm:$0xff]  }
 0x9d7   :  { %9183 = vmatmul.mubr.bf16.vlgmr.msra.gmra.mxu1 %v14913_v41  ;;  %9192 = vmatpush1.bf16.msra.mxu0 %v11907_v14  ;;  %v11924_v41 = vld [vmem:[%s15652_s19 + $0x6ac] ss:$16 sps:$4 sm:$0xff]  }
 0x9d8   :  { %9223 = vmatprep.mubr.bf16.mxu0 %v15029_v25  ;;  %9233 = vmatpush1.bf16.msra.mxu1 %v11910_v15  ;;  %v11919_v25 = vld [vmem:[%s15652_s19 + $0x4a8] ss:$16 sps:$4 sm:$0xff]   ;;  %v11999_v14 = vld [vmem:[%s15652_s19 + $0x50c] ss:$16 sps:$4 sm:$0xff]  }
 0x9d9   :  { %9264 = vmatprep.mubr.bf16.mxu1 %v15031_v26  ;;  %9193 = vmatprep.subr.bf16.mxu0 %v11915_v11  ;;  %v11927_v26 = vld [vmem:[%s15652_s19 + $0x48c] ss:$16 sps:$4 sm:$0xff]   ;;  %v11997_v11 = vld [vmem:[%s15652_s19 + $0x508] ss:$16 sps:$4 sm:$0xff]  }
 0x9da   :  { %9234 = vmatprep.subr.bf16.mxu1 %v11918_v8  ;;  %v12002_v15 = vld [vmem:[%s15652_s19 + $0x70c] ss:$16 sps:$4 sm:$0xff]   ;;  %v12000_v8 = vld [vmem:[%s15652_s19 + $0x708] ss:$16 sps:$4 sm:$0xff]  }
 0x9db   :  { %9194 = vmatpush1.bf16.msra.mxu0 %v11913_v17  ;;  %v12003_v17 = vld [vmem:[%s15654_s21 + $0x78] sm:$0xff]  }
 0x9dc   :  { %9235 = vmatpush1.bf16.msra.mxu1 %v11916_v23  ;;  %9195 = vmatprep.subr.bf16.mxu0 %v11921_v29  ;;  %v12004_v23 = vld [vmem:[%s15654_s21 + $0x38] sm:$0xff]   ;;  %v12005_v29 = vld [vmem:[%s15654_s21 + $0x70] sm:$0xff]  }
 0x9dd   :  { %9236 = vmatprep.subr.bf16.mxu1 %v11924_v41 }
 0x9df   :  { %9196 = vmatpush1.bf16.msra.mxu0 %v11919_v25 }
 0x9e0   :  { %9237 = vmatpush1.bf16.msra.mxu1 %v11922_v59  ;;  %9197 = vmatprep.subr.bf16.mxu0 %v11927_v26  ;;  %v12006_v59 = vld [vmem:[%s15654_s21 + $0x30] sm:$0xff]  }
 0x9e1   :  { %9238 = vmatprep.subr.bf16.mxu1 %v11930_v6 }
 0x9e3   :  { %9198 = vmatpush1.bf16.msra.mxu0 %v11925_v47  ;;  %v12007_v47 = vld [vmem:[%s15654_s21 + $0x68] sm:$0xff]  }
 0x9e4   :  { %9239 = vmatpush1.bf16.msra.mxu1 %v11928_v22  ;;  %9199 = vmatprep.subr.bf16.mxu0 %v11933_v28 }
 0x9e5   :  { %9240 = vmatprep.subr.bf16.mxu1 %v11936_v63 }
 0x9e7   :  { %9200 = vmatpush1.bf16.msra.mxu0 %v11931_v7  ;;  %v12009_v7 = vld [vmem:[%s15654_s21 + $0x60] sm:$0xff]  }
 0x9e8   :  { %9241 = vmatpush1.bf16.msra.mxu1 %v11934_v43  ;;  %9201 = vmatprep.subr.bf16.mxu0 %v11939_v34  ;;  %v12019_v43 = vld [vmem:[%s15654_s21 + $0xf8] sm:$0xff]  }
 0x9e9   :  { %9242 = vmatprep.subr.bf16.mxu1 %v11942_v45  ;;  %v12020_v34 = vld [vmem:[%s15654_s21 + $0xb8] sm:$0xff]   ;;  %v12021_v45 = vld [vmem:[%s15654_s21 + $0xf0] sm:$0xff]  }
 0x9eb   :  { %9202 = vmatpush1.bf16.msra.mxu0 %v11937_v13  ;;  %v12010_v13 = vld [vmem:[%s15654_s21 + $0x20] sm:$0xff]  }
 0x9ec   :  { %9243 = vmatpush1.bf16.msra.mxu1 %v11940_v52  ;;  %9203 = vmatprep.subr.bf16.mxu0 %v11945_v30  ;;  %v12011_v52 = vld [vmem:[%s15654_s21 + $0x58] sm:$0xff]   ;;  %v12022_v30 = vld [vmem:[%s15654_s21 + $0xb0] sm:$0xff]  }
 0x9ed   :  { %9244 = vmatprep.subr.bf16.mxu1 %v11948_v35  ;;  %v12023_v35 = vld [vmem:[%s15654_s21 + $0xe8] sm:$0xff]  }
 0x9ef   :  { %9204 = vmatpush1.bf16.msra.mxu0 %v11943_v58  ;;  %v12012_v58 = vld [vmem:[%s15654_s21 + $0x18] sm:$0xff]  }
 0x9f0   :  { %9245 = vmatpush1.bf16.msra.mxu1 %v11946_v16  ;;  %9205 = vmatprep.subr.bf16.mxu0 %v11951_v44  ;;  %v12013_v16 = vld [vmem:[%s15654_s21 + $0x50] sm:$0xff]   ;;  %v12024_v44 = vld [vmem:[%s15654_s21 + $0xa8] sm:$0xff]  }
 0x9f1   :  { %9246 = vmatprep.subr.bf16.mxu1 %v11954_v48  ;;  %v12025_v48 = vld [vmem:[%s15654_s21 + $0xe0] sm:$0xff]  }
 0x9f3   :  { %9206 = vmatpush1.bf16.msra.mxu0 %v11949_v49  ;;  %v12014_v49 = vld [vmem:[%s15654_s21 + $0x10] sm:$0xff]  }
 0x9f4   :  { %9247 = vmatpush1.bf16.msra.mxu1 %v11952_v36  ;;  %9207 = vmatprep.subr.bf16.mxu0 %v11957_v50  ;;  %v12015_v36 = vld [vmem:[%s15654_s21 + $0x48] sm:$0xff]   ;;  %v12026_v50 = vld [vmem:[%s15654_s21 + $0xa0] sm:$0xff]  }
 0x9f5   :  { %9248 = vmatprep.subr.bf16.mxu1 %v11960_v51  ;;  %v12027_v51 = vld [vmem:[%s15654_s21 + $0xd8] sm:$0xff]  }
 0x9f7   :  { %9208 = vmatpush2.bf16.msra.mxu0 %v11955_v32  ;;  %v12016_v32 = vld [vmem:[%s15654_s21 + $0x8] sm:$0xff]  }
 0x9f8   :  { %9249 = vmatpush2.bf16.msra.mxu1 %v11958_v4  ;;  %9209 = vmatprep.subr.bf16.mxu0 %v11963_v46  ;;  %v12017_v4 = vld [vmem:[%s15654_s21 + $0x40] sm:$0xff]   ;;  %v12028_v46 = vld [vmem:[%s15654_s21 + $0x98] sm:$0xff]  }
 0x9f9   :  { %9250 = vmatprep.subr.bf16.mxu1 %v11966_v53  ;;  %v12018_v53 = vld [vmem:[%s15654_s21] sm:$0xff]  }
 0x9fb   :  { %9210 = vmatpush2.bf16.msra.mxu0 %v11961_v27  ;;  %v7643_v27 = vld [vmem:[%s15655_s20] sm:$0xf] }
 0x9fc   :  { %9251 = vmatpush2.bf16.msra.mxu1 %v11964_v1  ;;  %9211 = vmatprep.subr.bf16.mxu0 %v11969_v2  ;;  %v7648_v1 = vrot.slane %v7643_v27, %v12414_v39  ;;  %v7652_v2 = vrot.slane %v7643_v27, %v12411_v38 }
 0x9fd   :  { %9252 = vmatprep.subr.bf16.mxu1 %v11972_v19 }
 0x9ff   :  { %9212 = vmatpush2.bf16.msra.mxu0 %v11967_v5 }
 0xa00   :  { %9253 = vmatpush2.bf16.msra.mxu1 %v11970_v21  ;;  %9213 = vmatprep.subr.bf16.mxu0 %v11975_v10 }
 0xa01   :  { %9254 = vmatprep.subr.bf16.mxu1 %v11978_v54 }
 0xa03   :  { %9214 = vmatpush2.bf16.msra.mxu0 %v11973_v55  ;;  %v12029_v55 = vld [vmem:[%s15654_s21 + $0xd0] sm:$0xff]  }
 0xa04   :  { %9255 = vmatpush2.bf16.msra.mxu1 %v11976_v18  ;;  %9215 = vmatprep.subr.bf16.mxu0 %v11981_v31 }
 0xa05   :  { %9256 = vmatprep.subr.bf16.mxu1 %v11984_v24  ;;  %v12030_v24 = vld [vmem:[%s15654_s21 + $0x90] sm:$0xff]  }
 0xa07   :  { %9216 = vmatpush2.bf16.msra.mxu0 %v11979_v0 }
 0xa08   :  { %9257 = vmatpush2.bf16.msra.mxu1 %v11982_v37  ;;  %9217 = vmatprep.subr.bf16.mxu0 %v11987_v33 }
 0xa09   :  { %9258 = vmatprep.subr.bf16.mxu1 %v11990_v12 }
 0xa0b   :  { %9218 = vmatpush2.bf16.msra.mxu0 %v11985_v62  ;;  %v12031_v62 = vld [vmem:[%s15654_s21 + $0xc8] sm:$0xff]  }
 0xa0c   :  { %9259 = vmatpush2.bf16.msra.mxu1 %v11988_v9  ;;  %9219 = vmatprep.subr.bf16.mxu0 %v11993_v61  ;;  %v12032_v61 = vld [vmem:[%s15654_s21 + $0x88] sm:$0xff]  }
 0xa0d   :  { %9260 = vmatprep.subr.bf16.mxu1 %v11996_v40 }
 0xa0f   :  { %9220 = vmatpush2.bf16.msra.mxu0 %v11991_v56 }
 0xa10   :  { %9261 = vmatpush2.bf16.msra.mxu1 %v11994_v42  ;;  %9221 = vmatprep.subr.bf16.mxu0 %v11999_v14 }
 0xa11   :  { %9262 = vmatprep.subr.bf16.mxu1 %v12002_v15  ;;  %v12033_v15 = vld [vmem:[%s15654_s21 + $0xc0] sm:$0xff]  }
 0xa13   :  { %9222 = vmatpush2.bf16.msra.mxu0 %v11997_v11 }
 0xa14   :  { %9263 = vmatpush2.bf16.msra.mxu1 %v12000_v8  ;;  %11115 = vmatprep.subr.bf16.mxu0 %v12003_v17  ;;  %v12034_v8 = vld [vmem:[%s15654_s21 + $0x80] sm:$0xff]  }
 0xa15   :  { %11137 = vmatprep.subr.bf16.mxu1 %v12019_v43 }
 0xa16   :  { %9224 = vmatmul.mubr.bf16.vlgmr.msra.gmra.mxu0 %v15136_v20  ;;  %v8979_v41 = vpop.f32.mrf.mxu0  ;;  %v9020_v25 = vpop.f32.mrf.mxu1  ;;  %v12008_v20 = vld [vmem:[%s15654_s21 + $0x28] sm:$0xff]  }
 0xa17   :  { %9265 = vmatmul.mubr.bf16.vlgmr.msra.gmra.mxu1 %v15138_v57  ;;  %11116 = vmatpush3.bf16.msra.mxu0 %v12004_v23  ;;  %v8980_v19 = vadd.f32 %v8979_v41, %v7648_v1 }
 0xa18   :  { %v8981_v26 = vpop.f32.mrf.mxu0  ;;  %v9022_v6 = vpop.f32.mrf.mxu1  ;;  %11117 = vmatprep.subr.bf16.mxu0 %v12005_v29  ;;  %11138 = vmatpush3.bf16.msra.mxu1 %v12020_v34 }
 0xa19   :  { %11139 = vmatprep.subr.bf16.mxu1 %v12021_v45  ;;  %v8982_v5 = vadd.f32 %v8981_v26, %v7652_v2  ;;  %v9021_v21 = vadd.f32 %v9020_v25, %v8980_v19 }
 0xa1a   :  { %v8983_v22 = vpop.f32.mrf.mxu0  ;;  %v9024_v28 = vpop.f32.mrf.mxu1 }
 0xa1b   :  { %11118 = vmatpush3.bf16.msra.mxu0 %v12006_v59  ;;  %v9023_v18 = vadd.f32 %v9022_v6, %v8982_v5  ;;  %v28_v22 = vstv %s15656_s22  ;;  %v7656_v28 = vrot.slane %v7643_v27, %v12620_v3 }
 0xa1c   :  { %v8984_v57 = vpop.f32.mrf.mxu0  ;;  %v9025_v63 = vpop.f32.mrf.mxu1  ;;  %11119 = vmatprep.subr.bf16.mxu0 %v12007_v47  ;;  %11140 = vmatpush3.bf16.msra.mxu1 %v12022_v30  ;;  %29 = vst [vmem:[#allocation2] sm:$0x1] %v28_v22 }
 0xa1d   :  { %11141 = vmatprep.subr.bf16.mxu1 %v12023_v35 }
 0xa1f   :  { %11120 = vmatpush3.bf16.msra.mxu0 %v12008_v20  ;;  %v7660_v20 = vrot.slane %v7643_v27, %v13233_v60 }
 0xa20   :  { %11121 = vmatprep.subr.bf16.mxu0 %v12009_v7  ;;  %11142 = vmatpush3.bf16.msra.mxu1 %v12024_v44 }
 0xa21   :  { %11143 = vmatprep.subr.bf16.mxu1 %v12025_v48 }
 0xa23   :  { %11122 = vmatpush3.bf16.msra.mxu0 %v12010_v13  ;;  %v10607_v1 = vld [vmem:[#allocation2] ss:$0 sm:$0xff] }
 0xa24   :  { %11123 = vmatprep.subr.bf16.mxu0 %v12011_v52  ;;  %11144 = vmatpush3.bf16.msra.mxu1 %v12026_v50 }
 0xa25   :  { %11145 = vmatprep.subr.bf16.mxu1 %v12027_v51 }
 0xa27   :  { %11124 = vmatpush3.bf16.msra.mxu0 %v12012_v58 }
 0xa28   :  { %11125 = vmatprep.subr.bf16.mxu0 %v12013_v16  ;;  %11146 = vmatpush3.bf16.msra.mxu1 %v12028_v46 }
 0xa29   :  { %11147 = vmatprep.subr.bf16.mxu1 %v12029_v55 }
 0xa2b   :  { %11126 = vmatpush3.bf16.msra.mxu0 %v12014_v49 }
 0xa2c   :  { %11127 = vmatprep.subr.bf16.mxu0 %v12015_v36  ;;  %11148 = vmatpush3.bf16.msra.mxu1 %v12030_v24 }
 0xa2d   :  { %11149 = vmatprep.subr.bf16.mxu1 %v12031_v62 }
 0xa2f   :  { %11128 = vmatpush3.bf16.msra.mxu0 %v12016_v32 }
 0xa30   :  { %11129 = vmatprep.subr.bf16.mxu0 %v12017_v4  ;;  %11150 = vmatpush3.bf16.msra.mxu1 %v12032_v61 }
 0xa31   :  { %11151 = vmatprep.subr.bf16.mxu1 %v12033_v15 }
 0xa33   :  { %11130 = vmatpush3.bf16.msra.mxu0 %v12018_v53 }
 0xa34   :  { %11152 = vmatpush3.bf16.msra.mxu1 %v12034_v8 }
 0xa56   :  { %v9061_v10 = vpop.f32.mrf.mxu0  ;;  %v9102_v54 = vpop.f32.mrf.mxu1 }
 0xa57   :  { %v9062_v31 = vadd.f32 %v9061_v10, %v9021_v21 }
 0xa58   :  { %v9063_v0 = vpop.f32.mrf.mxu0  ;;  %v9104_v37 = vpop.f32.mrf.mxu1 }
 0xa59   :  { %v9103_v39 = vadd.f32 %v9102_v54, %v9062_v31  ;;  %v9064_v38 = vadd.f32 %v9063_v0, %v9023_v18 }
 0xa5a   :  { %v9065_v33 = vpop.f32.mrf.mxu0  ;;  %v9106_v12 = vpop.f32.mrf.mxu1 }
 0xa5b   :  { %v9105_v9 = vadd.f32 %v9104_v37, %v9064_v38  ;;  %v9273_v40 = vmax.f32 %v9103_v39, 0.0 }
 0xa5c   :  { %v9066_v56 = vpop.f32.mrf.mxu0  ;;  %v9107_v42 = vpop.f32.mrf.mxu1 }
 0xa5d   :  { %v9274_v14 = vmax.f32 %v9105_v9, 0.0  ;;  %v9277_v17 = vpack.c.bf16 %v9273_v40, %v9273_v40 }
 0xa5f   :  { %v9278_v11 = vpack.c.bf16 %v9274_v14, %v9274_v14 }
 0xa61   :  { %9576 = vmatprep.mubr.bf16.mxu0 %v9278_v11 }
 0xa62   :  { %9577 = vmatmul.mubr.bf16.vlgmr.msra.gmra.mxu0 %v9277_v17 }
 0xa96   :  { %v9143_v23 = vpop.f32.mrf.mxu0 }
 0xa97   :  { %v9184_v29 = vpop.f32.mrf.mxu1  ;;  %v9144_v57 = vadd.f32 %v9143_v23, %v7656_v28 }
 0xa98   :  { %v9145_v41 = vpop.f32.mrf.mxu0 }
 0xa99   :  { %v9186_v25 = vpop.f32.mrf.mxu1  ;;  %v9146_v63 = vadd.f32 %v9145_v41, %v7660_v20  ;;  %v9185_v7 = vadd.f32 %v9184_v29, %v9144_v57 }
 0xa9a   :  { %v9147_v59 = vpop.f32.mrf.mxu0 }
 0xa9b   :  { %v9188_v26 = vpop.f32.mrf.mxu1  ;;  %v9187_v34 = vadd.f32 %v9186_v25, %v9146_v63 }
 0xa9c   :  { %v9148_v6 = vpop.f32.mrf.mxu0 }
 0xa9d   :  { %v9189_v47 = vpop.f32.mrf.mxu1 }
 0xad6   :  { %v9225_v43 = vpop.f32.mrf.mxu0 }
 0xad7   :  { %v9226_v45 = vadd.f32 %v9225_v43, %v9185_v7  ;;  %v9266_v13 = vpop.f32.mrf.mxu1 }
 0xad8   :  { %v9227_v52 = vpop.f32.mrf.mxu0 }
 0xad9   :  { %v9267_v30 = vadd.f32 %v9266_v13, %v9226_v45  ;;  %v9228_v35 = vadd.f32 %v9227_v52, %v9187_v34  ;;  %v9268_v58 = vpop.f32.mrf.mxu1 }
 0xada   :  { %v9229_v16 = vpop.f32.mrf.mxu0 }
 0xadb   :  { %v9269_v44 = vadd.f32 %v9268_v58, %v9228_v35  ;;  %v9270_v48 = vpop.f32.mrf.mxu1  ;;  %v9275_v49 = vmax.f32 %v9267_v30, 0.0 }
 0xadc   :  { %v9230_v36 = vpop.f32.mrf.mxu0 }
 0xadd   :  { %v9276_v50 = vmax.f32 %v9269_v44, 0.0  ;;  %v9271_v3 = vpop.f32.mrf.mxu1  ;;  %v9279_v60 = vpack.c.bf16 %v9275_v49, %v9275_v49 }
 0xadf   :  { %v9280_v51 = vpack.c.bf16 %v9276_v50, %v9276_v50 }
 0xae1   :  { %9616 = vmatprep.mubr.bf16.mxu1 %v9280_v51 }
 0xae2   :  { %9617 = vmatmul.mubr.bf16.vlgmr.msra.gmra.mxu1 %v9279_v60 }
 0xb22   :  { %v11131_v32 = vpop.f32.mrf.mxu0 }
 0xb24   :  { %v11132_v4 = vpop.f32.mrf.mxu0 }
 0xb25   :  { %v11133_v46 = vadd.f32 %v11132_v4, %v11131_v32 }
 0xb26   :  { %v11134_v53 = vpop.f32.mrf.mxu0 }
 0xb27   :  { %v9579_v5 = vadd.f32 %v11133_v46, %v10607_v1 }
 0xb28   :  { %v11135_v27 = vpop.f32.mrf.mxu0 }
 0xba2   :  { %v11153_v2 = vpop.f32.mrf.mxu1 }
 0xba4   :  { %v11154_v19 = vpop.f32.mrf.mxu1 }
 0xba5   :  { %v11155_v21 = vadd.f32 %v11154_v19, %v11153_v2 }
 0xba6   :  { %v11156_v10 = vpop.f32.mrf.mxu1 }
 0xba7   :  { %v9619_v54 = vadd.f32 %v11155_v21, %v9579_v5 }
 0xba8   :  { %v11157_v55 = vpop.f32.mrf.mxu1 }
 0xba9   :  { %9625 = vst.msk [vmem:[%s15657_s23] sm:$0x3] %vm9624_vm3, %v9619_v54 }

</bundles_post_ra>
